<compile_context>
chip_gen: v5e
topology: v5e:2x2
jax: 0.10.0
libtpu: 0.0.40
codegen_flags: <defaults>
</compile_context>

<pallas_src>
import jax
import jax.numpy as jnp
from jax import lax
from jax.experimental import pallas as pl
from jax.experimental.pallas import tpu as pltpu


# ---------------------------------------------------------------------------
# Kernel bodies
# ---------------------------------------------------------------------------

def _leaky_relu(x, negative_slope=0.01):
    # torch.nn.LeakyReLU() default slope.
    return jnp.where(x > 0, x, negative_slope * x)


def _linear(a, w_ref, b_ref):
    # MXU matmul (operands f32 or bf16), f32 accumulation, f32 bias add.
    y = jnp.dot(a.astype(w_ref.dtype), w_ref[...],
                preferred_element_type=jnp.float32,
                precision=lax.Precision.HIGHEST)
    return y + b_ref[...].astype(jnp.float32)


def _mlp3(x, w1_ref, b1_ref, w2_ref, b2_ref, w3_ref, b3_ref):
    h = _leaky_relu(_linear(x, w1_ref, b1_ref))
    h = _leaky_relu(_linear(h, w2_ref, b2_ref))
    return _linear(h, w3_ref, b3_ref)


def _rnd_phi_kernel(x_ref,
                    wt1, bt1, wt2, bt2, wt3, bt3,
                    wp1, bp1, wp2, bp2, wp3, bp3,
                    out_ref):
    """One batch tile of BOTH MLPs; output is (tile, 2*latent) = target||pred."""
    x = x_ref[...]
    latent = out_ref.shape[-1] // 2
    out_ref[:, :latent] = _mlp3(x, wt1, bt1, wt2, bt2, wt3, bt3).astype(out_ref.dtype)
    out_ref[:, latent:] = _mlp3(x, wp1, bp1, wp2, bp2, wp3, bp3).astype(out_ref.dtype)


def _rnd_norm_kernel(x_ref,
                     wt1, bt1, wt2, bt2, wt3, bt3,
                     wp1, bp1, wp2, bp2, wp3, bp3,
                     out_ref):
    """Fused epilogue: ||predictor(x) - target(x)||_2 per row -> (tile, 1)."""
    x = x_ref[...]
    t = _mlp3(x, wt1, bt1, wt2, bt2, wt3, bt3)
    p = _mlp3(x, wp1, bp1, wp2, bp2, wp3, bp3)
    d = p - t
    out_ref[...] = jnp.sqrt(
        jnp.sum(d * d, axis=-1, keepdims=True)).astype(out_ref.dtype)


# ---------------------------------------------------------------------------
# Wrappers
# ---------------------------------------------------------------------------

def _round_up(n, m):
    return ((n + m - 1) // m) * m


def _cast_matmul_params(params, dtype):
    w1, b1, w2, b2, w3, b3 = params
    # Only the matmul operands go to bf16; biases (elementwise path) stay f32.
    return (w1.astype(dtype), b1, w2.astype(dtype), b2, w3.astype(dtype), b3)


def _rnd_pallas_call(kernel, x, target_params, predictor_params, out_dim, *,
                     batch_tile=None, use_bf16=False):
    batch, state_dim = x.shape

    if batch_tile is None:
        # One tile for small batches; otherwise 256-row tiles (amortizes the
        # ~0.35us/step pipeline overhead, fills the MXU M dimension, and gives
        # >=2 parallel grid steps for big batches so both v7x TCs get work).
        rounded = _round_up(batch, 8)
        batch_tile = rounded if rounded <= 256 else 256

    padded = _round_up(batch, batch_tile)
    if padded != batch:
        x = jnp.pad(x, ((0, padded - batch), (0, 0)))

    if use_bf16:
        x = x.astype(jnp.bfloat16)
        target_params = _cast_matmul_params(target_params, jnp.bfloat16)
        predictor_params = _cast_matmul_params(predictor_params, jnp.bfloat16)

    flat_params = tuple(target_params) + tuple(predictor_params)
    grid = (padded // batch_tile,)

    in_specs = [pl.BlockSpec((batch_tile, state_dim), lambda i: (i, 0))]
    # Weights / biases: constant block index -> DMA'd once, resident in VMEM.
    for p in flat_params:
        in_specs.append(pl.BlockSpec(p.shape, lambda i: (0, 0)))

    out = pl.pallas_call(
        kernel,
        out_shape=jax.ShapeDtypeStruct((padded, out_dim), jnp.float32),
        grid_spec=pltpu.PrefetchScalarGridSpec(
            num_scalar_prefetch=0,
            grid=grid,
            in_specs=in_specs,
            out_specs=pl.BlockSpec((batch_tile, out_dim), lambda i: (i, 0)),
        ),
        compiler_params=pltpu.CompilerParams(
            dimension_semantics=("parallel",)),
    )(x, *flat_params)

    return out[:batch]


def rnd_forward(x, target_params, predictor_params, *, batch_tile=None,
                use_bf16=False):
    """Fused forward: returns (random_phi, predicted_phi), both (batch, latent)."""
    latent_dim = target_params[4].shape[1]
    phis = _rnd_pallas_call(_rnd_phi_kernel, x, target_params,
                            predictor_params, 2 * latent_dim,
                            batch_tile=batch_tile, use_bf16=use_bf16)
    return phis[:, :latent_dim], phis[:, latent_dim:]


def rnd_prediction_error(x, target_params, predictor_params, *,
                         batch_tile=None, use_bf16=False):
    """Fused ||predictor(x) - target(x)||_2 per row, shape (batch,)."""
    norms = _rnd_pallas_call(_rnd_norm_kernel, x, target_params,
                             predictor_params, 1,
                             batch_tile=batch_tile, use_bf16=use_bf16)
    return norms[:, 0]


# ---------------------------------------------------------------------------
# Module-equivalent wrapper
# ---------------------------------------------------------------------------

def init_mlp_params(key, state_dim, hidden_dim, latent_dim):
    """Mimics torch.nn.Linear init: U(-1/sqrt(fan_in), 1/sqrt(fan_in))."""
    ks = jax.random.split(key, 6)
    dims = [(state_dim, hidden_dim), (hidden_dim, hidden_dim),
            (hidden_dim, latent_dim)]
    params = []
    for i, (fan_in, fan_out) in enumerate(dims):
        bound = 1.0 / float(fan_in) ** 0.5
        w = jax.random.uniform(ks[2 * i], (fan_in, fan_out), jnp.float32,
                               -bound, bound)
        b = jax.random.uniform(ks[2 * i + 1], (1, fan_out), jnp.float32,
                               -bound, bound)
        params += [w, b]
    return tuple(params)


class RNDPallas:
    """JAX/Pallas equivalent of the PyTorch RND module's forward pass."""

    def __init__(self, state_dim, reward_scale=0.5, hidden_dim=256,
                 s_latent_dim=128, key=None, use_bf16=False):
        if key is None:
            key = jax.random.PRNGKey(0)
        k_tgt, k_pred = jax.random.split(key)
        self.target_params = init_mlp_params(k_tgt, state_dim, hidden_dim,
                                             s_latent_dim)
        self.predictor_params = init_mlp_params(k_pred, state_dim, hidden_dim,
                                                s_latent_dim)
        self.reward_scale = reward_scale
        self.use_bf16 = use_bf16

    def forward(self, next_state):
        return rnd_forward(next_state, self.target_params,
                           self.predictor_params, use_bf16=self.use_bf16)

    def compute_intrinsic_reward(self, next_states):
        # TODO(synk): PyTorch converts to a host numpy array (.cpu().numpy());
        # we return a device array (use jax.device_get for host data).
        err = rnd_prediction_error(next_states, self.target_params,
                                   self.predictor_params,
                                   use_bf16=self.use_bf16)
        return err * self.reward_scale

    def compute_loss(self, next_states):
        err = rnd_prediction_error(next_states, self.target_params,
                                   self.predictor_params,
                                   use_bf16=self.use_bf16)
        return jnp.mean(err)


# ---------------------------------------------------------------------------
# Reference + self-check
# ---------------------------------------------------------------------------

def _reference_mlp(x, params):
    w1, b1, w2, b2, w3, b3 = params
    h1 = _leaky_relu(x @ w1 + b1)
    h2 = _leaky_relu(h1 @ w2 + b2)
    return h2 @ w3 + b3


if __name__ == "__main__":
    key = jax.random.PRNGKey(0)
    k_model, k_x = jax.random.split(key)

    # Small shapes, module-default widths (lane-aligned: hidden=256, latent=128).
    batch, state_dim, hidden_dim, s_latent_dim = 64, 16, 256, 128
    rnd = RNDPallas(state_dim, hidden_dim=hidden_dim,
                    s_latent_dim=s_latent_dim, key=k_model)

    next_state = jax.random.normal(k_x, (batch, state_dim), jnp.float32)

    # Forward pass (fused target+predictor kernel).
    random_phi, predicted_phi = rnd.forward(next_state)
    jax.block_until_ready((random_phi, predicted_phi))

    ref_random = _reference_mlp(next_state, rnd.target_params)
    ref_pred = _reference_mlp(next_state, rnd.predictor_params)
    assert random_phi.shape == (batch, s_latent_dim)
    assert predicted_phi.shape == (batch, s_latent_dim)
    assert jnp.allclose(random_phi, ref_random, atol=1e-3, rtol=1e-3)
    assert jnp.allclose(predicted_phi, ref_pred, atol=1e-3, rtol=1e-3)

    # Fused reward / loss epilogue kernel.
    reward = rnd.compute_intrinsic_reward(next_state)
    loss = rnd.compute_loss(next_state)
    jax.block_until_ready((reward, loss))
    ref_err = jnp.linalg.norm(ref_pred - ref_random, ord=2, axis=-1)
    assert reward.shape == (batch,)
    assert jnp.allclose(reward, ref_err * rnd.reward_scale, atol=1e-2, rtol=1e-2)
    assert jnp.allclose(loss, jnp.mean(ref_err), atol=1e-2, rtol=1e-2)

    # Non-tile-multiple / tiny batches exercise the zero-pad path.
    odd_random, odd_pred = rnd.forward(next_state[:37])
    tiny_random, tiny_pred = rnd.forward(next_state[:2])
    jax.block_until_ready((odd_random, odd_pred, tiny_random, tiny_pred))
    assert odd_random.shape == (37, s_latent_dim)
    assert tiny_random.shape == (2, s_latent_dim)
    assert jnp.allclose(odd_random, ref_random[:37], atol=1e-3, rtol=1e-3)
    assert jnp.allclose(odd_pred, ref_pred[:37], atol=1e-3, rtol=1e-3)
    assert jnp.allclose(tiny_pred, ref_pred[:2], atol=1e-3, rtol=1e-3)

    # Optional bf16 MXU-operand path (v6e/v7x fast path); f32 accumulation.
    rnd_bf16 = RNDPallas(state_dim, hidden_dim=hidden_dim,
                         s_latent_dim=s_latent_dim, key=k_model,
                         use_bf16=True)
    bf_random, bf_pred = rnd_bf16.forward(next_state)
    jax.block_until_ready((bf_random, bf_pred))
    assert jnp.allclose(bf_random, ref_random, atol=0.1, rtol=0.1)
    assert jnp.allclose(bf_pred, ref_pred, atol=0.1, rtol=0.1)

    print("KERNEL_OK")
</pallas_src>

<mosaic_0001>
module attributes {stable_mosaic.version = 11 : i64} {
  func.func @_rnd_phi_kernel(%arg0: i32, %arg1: memref<64x16xf32, #tpu.memory_space<vmem>>, %arg2: memref<16x256xf32, #tpu.memory_space<vmem>>, %arg3: memref<1x256xf32, #tpu.memory_space<vmem>>, %arg4: memref<256x256xf32, #tpu.memory_space<vmem>>, %arg5: memref<1x256xf32, #tpu.memory_space<vmem>>, %arg6: memref<256x128xf32, #tpu.memory_space<vmem>>, %arg7: memref<1x128xf32, #tpu.memory_space<vmem>>, %arg8: memref<16x256xf32, #tpu.memory_space<vmem>>, %arg9: memref<1x256xf32, #tpu.memory_space<vmem>>, %arg10: memref<256x256xf32, #tpu.memory_space<vmem>>, %arg11: memref<1x256xf32, #tpu.memory_space<vmem>>, %arg12: memref<256x128xf32, #tpu.memory_space<vmem>>, %arg13: memref<1x128xf32, #tpu.memory_space<vmem>>, %arg14: memref<64x256xf32, #tpu.memory_space<vmem>>) attributes {dimension_semantics = [#tpu.dimension_semantics<parallel>], iteration_bounds = array<i64: 1>, scalar_prefetch = 0 : i64, scratch_operands = 0 : i64, tpu.core_type = #tpu.core_type<tc>, window_params = [{transform_indices = @transform_0, window_bounds = array<i64: 64, 16>}, {pipeline_mode = #tpu.pipeline_mode<synchronous>, transform_indices = @transform_1, window_bounds = array<i64: 16, 256>}, {pipeline_mode = #tpu.pipeline_mode<synchronous>, transform_indices = @transform_2, window_bounds = array<i64: 1, 256>}, {pipeline_mode = #tpu.pipeline_mode<synchronous>, transform_indices = @transform_3, window_bounds = array<i64: 256, 256>}, {pipeline_mode = #tpu.pipeline_mode<synchronous>, transform_indices = @transform_4, window_bounds = array<i64: 1, 256>}, {pipeline_mode = #tpu.pipeline_mode<synchronous>, transform_indices = @transform_5, window_bounds = array<i64: 256, 128>}, {pipeline_mode = #tpu.pipeline_mode<synchronous>, transform_indices = @transform_6, window_bounds = array<i64: 1, 128>}, {pipeline_mode = #tpu.pipeline_mode<synchronous>, transform_indices = @transform_7, window_bounds = array<i64: 16, 256>}, {pipeline_mode = #tpu.pipeline_mode<synchronous>, transform_indices = @transform_8, window_bounds = array<i64: 1, 256>}, {pipeline_mode = #tpu.pipeline_mode<synchronous>, transform_indices = @transform_9, window_bounds = array<i64: 256, 256>}, {pipeline_mode = #tpu.pipeline_mode<synchronous>, transform_indices = @transform_10, window_bounds = array<i64: 1, 256>}, {pipeline_mode = #tpu.pipeline_mode<synchronous>, transform_indices = @transform_11, window_bounds = array<i64: 256, 128>}, {pipeline_mode = #tpu.pipeline_mode<synchronous>, transform_indices = @transform_12, window_bounds = array<i64: 1, 128>}, {transform_indices = @transform_13, window_bounds = array<i64: 64, 256>}]} {
    %c0 = arith.constant 0 : index
    %c0_0 = arith.constant 0 : index
    %0 = vector.load %arg1[%c0, %c0_0] : memref<64x16xf32, #tpu.memory_space<vmem>>, vector<64x16xf32>
    %c0_1 = arith.constant 0 : index
    %c0_2 = arith.constant 0 : index
    %1 = vector.load %arg2[%c0_1, %c0_2] : memref<16x256xf32, #tpu.memory_space<vmem>>, vector<16x256xf32>
    %cst = arith.constant dense<0.000000e+00> : vector<64x256xf32>
    %2 = tpu.matmul %0, %1, %cst {dimension_numbers = #tpu.dot_dimension_numbers<[1], [0], [0], [1], [0, 0, 1, 1], [], []>, precision = #tpu.contract_precision<fp32>} : vector<64x16xf32>, vector<16x256xf32>, vector<64x256xf32> -> vector<64x256xf32>
    %c0_3 = arith.constant 0 : index
    %c0_4 = arith.constant 0 : index
    %3 = vector.load %arg3[%c0_3, %c0_4] : memref<1x256xf32, #tpu.memory_space<vmem>>, vector<1x256xf32>
    %4 = vector.broadcast %3 : vector<1x256xf32> to vector<64x256xf32>
    %5 = arith.addf %2, %4 : vector<64x256xf32>
    %cst_5 = arith.constant 0.000000e+00 : f32
    %6 = vector.broadcast %cst_5 : f32 to vector<64x256xf32>
    %7 = arith.cmpf ogt, %5, %6 : vector<64x256xf32>
    %cst_6 = arith.constant 0.00999999977 : f32
    %8 = vector.broadcast %cst_6 : f32 to vector<64x256xf32>
    %9 = arith.mulf %8, %5 : vector<64x256xf32>
    %10 = arith.select %7, %5, %9 : vector<64x256xi1>, vector<64x256xf32>
    %c0_7 = arith.constant 0 : index
    %c0_8 = arith.constant 0 : index
    %11 = vector.load %arg4[%c0_7, %c0_8] : memref<256x256xf32, #tpu.memory_space<vmem>>, vector<256x256xf32>
    %cst_9 = arith.constant dense<0.000000e+00> : vector<64x256xf32>
    %12 = tpu.matmul %10, %11, %cst_9 {dimension_numbers = #tpu.dot_dimension_numbers<[1], [0], [0], [1], [0, 0, 1, 1], [], []>, precision = #tpu.contract_precision<fp32>} : vector<64x256xf32>, vector<256x256xf32>, vector<64x256xf32> -> vector<64x256xf32>
    %c0_10 = arith.constant 0 : index
    %c0_11 = arith.constant 0 : index
    %13 = vector.load %arg5[%c0_10, %c0_11] : memref<1x256xf32, #tpu.memory_space<vmem>>, vector<1x256xf32>
    %14 = vector.broadcast %13 : vector<1x256xf32> to vector<64x256xf32>
    %15 = arith.addf %12, %14 : vector<64x256xf32>
    %cst_12 = arith.constant 0.000000e+00 : f32
    %16 = vector.broadcast %cst_12 : f32 to vector<64x256xf32>
    %17 = arith.cmpf ogt, %15, %16 : vector<64x256xf32>
    %cst_13 = arith.constant 0.00999999977 : f32
    %18 = vector.broadcast %cst_13 : f32 to vector<64x256xf32>
    %19 = arith.mulf %18, %15 : vector<64x256xf32>
    %20 = arith.select %17, %15, %19 : vector<64x256xi1>, vector<64x256xf32>
    %c0_14 = arith.constant 0 : index
    %c0_15 = arith.constant 0 : index
    %21 = vector.load %arg6[%c0_14, %c0_15] : memref<256x128xf32, #tpu.memory_space<vmem>>, vector<256x128xf32>
    %cst_16 = arith.constant dense<0.000000e+00> : vector<64x128xf32>
    %22 = tpu.matmul %20, %21, %cst_16 {dimension_numbers = #tpu.dot_dimension_numbers<[1], [0], [0], [1], [0, 0, 1, 1], [], []>, precision = #tpu.contract_precision<fp32>} : vector<64x256xf32>, vector<256x128xf32>, vector<64x128xf32> -> vector<64x128xf32>
    %c0_17 = arith.constant 0 : index
    %c0_18 = arith.constant 0 : index
    %23 = vector.load %arg7[%c0_17, %c0_18] : memref<1x128xf32, #tpu.memory_space<vmem>>, vector<1x128xf32>
    %24 = vector.broadcast %23 : vector<1x128xf32> to vector<64x128xf32>
    %25 = arith.addf %22, %24 : vector<64x128xf32>
    %c0_19 = arith.constant 0 : index
    %c0_20 = arith.constant 0 : index
    %26 = vector.load %arg14[%c0_19, %c0_20] : memref<64x256xf32, #tpu.memory_space<vmem>>, vector<64x128xf32>
    tpu.vector_store %arg14[%c0_19, %c0_20], %25 {strides = array<i32>} : memref<64x256xf32, #tpu.memory_space<vmem>>, vector<64x128xf32>,
    %c0_21 = arith.constant 0 : index
    %c0_22 = arith.constant 0 : index
    %27 = vector.load %arg8[%c0_21, %c0_22] : memref<16x256xf32, #tpu.memory_space<vmem>>, vector<16x256xf32>
    %cst_23 = arith.constant dense<0.000000e+00> : vector<64x256xf32>
    %28 = tpu.matmul %0, %27, %cst_23 {dimension_numbers = #tpu.dot_dimension_numbers<[1], [0], [0], [1], [0, 0, 1, 1], [], []>, precision = #tpu.contract_precision<fp32>} : vector<64x16xf32>, vector<16x256xf32>, vector<64x256xf32> -> vector<64x256xf32>
    %c0_24 = arith.constant 0 : index
    %c0_25 = arith.constant 0 : index
    %29 = vector.load %arg9[%c0_24, %c0_25] : memref<1x256xf32, #tpu.memory_space<vmem>>, vector<1x256xf32>
    %30 = vector.broadcast %29 : vector<1x256xf32> to vector<64x256xf32>
    %31 = arith.addf %28, %30 : vector<64x256xf32>
    %cst_26 = arith.constant 0.000000e+00 : f32
    %32 = vector.broadcast %cst_26 : f32 to vector<64x256xf32>
    %33 = arith.cmpf ogt, %31, %32 : vector<64x256xf32>
    %cst_27 = arith.constant 0.00999999977 : f32
    %34 = vector.broadcast %cst_27 : f32 to vector<64x256xf32>
    %35 = arith.mulf %34, %31 : vector<64x256xf32>
    %36 = arith.select %33, %31, %35 : vector<64x256xi1>, vector<64x256xf32>
    %c0_28 = arith.constant 0 : index
    %c0_29 = arith.constant 0 : index
    %37 = vector.load %arg10[%c0_28, %c0_29] : memref<256x256xf32, #tpu.memory_space<vmem>>, vector<256x256xf32>
    %cst_30 = arith.constant dense<0.000000e+00> : vector<64x256xf32>
    %38 = tpu.matmul %36, %37, %cst_30 {dimension_numbers = #tpu.dot_dimension_numbers<[1], [0], [0], [1], [0, 0, 1, 1], [], []>, precision = #tpu.contract_precision<fp32>} : vector<64x256xf32>, vector<256x256xf32>, vector<64x256xf32> -> vector<64x256xf32>
    %c0_31 = arith.constant 0 : index
    %c0_32 = arith.constant 0 : index
    %39 = vector.load %arg11[%c0_31, %c0_32] : memref<1x256xf32, #tpu.memory_space<vmem>>, vector<1x256xf32>
    %40 = vector.broadcast %39 : vector<1x256xf32> to vector<64x256xf32>
    %41 = arith.addf %38, %40 : vector<64x256xf32>
    %cst_33 = arith.constant 0.000000e+00 : f32
    %42 = vector.broadcast %cst_33 : f32 to vector<64x256xf32>
    %43 = arith.cmpf ogt, %41, %42 : vector<64x256xf32>
    %cst_34 = arith.constant 0.00999999977 : f32
    %44 = vector.broadcast %cst_34 : f32 to vector<64x256xf32>
    %45 = arith.mulf %44, %41 : vector<64x256xf32>
    %46 = arith.select %43, %41, %45 : vector<64x256xi1>, vector<64x256xf32>
    %c0_35 = arith.constant 0 : index
    %c0_36 = arith.constant 0 : index
    %47 = vector.load %arg12[%c0_35, %c0_36] : memref<256x128xf32, #tpu.memory_space<vmem>>, vector<256x128xf32>
    %cst_37 = arith.constant dense<0.000000e+00> : vector<64x128xf32>
    %48 = tpu.matmul %46, %47, %cst_37 {dimension_numbers = #tpu.dot_dimension_numbers<[1], [0], [0], [1], [0, 0, 1, 1], [], []>, precision = #tpu.contract_precision<fp32>} : vector<64x256xf32>, vector<256x128xf32>, vector<64x128xf32> -> vector<64x128xf32>
    %c0_38 = arith.constant 0 : index
    %c0_39 = arith.constant 0 : index
    %49 = vector.load %arg13[%c0_38, %c0_39] : memref<1x128xf32, #tpu.memory_space<vmem>>, vector<1x128xf32>
    %50 = vector.broadcast %49 : vector<1x128xf32> to vector<64x128xf32>
    %51 = arith.addf %48, %50 : vector<64x128xf32>
    %c0_40 = arith.constant 0 : index
    %c128 = arith.constant 128 : index
    %52 = vector.load %arg14[%c0_40, %c128] : memref<64x256xf32, #tpu.memory_space<vmem>>, vector<64x128xf32>
    tpu.vector_store %arg14[%c0_40, %c128], %51 {strides = array<i32>} : memref<64x256xf32, #tpu.memory_space<vmem>>, vector<64x128xf32>,
    return
  }
  func.func @transform_0(%arg0: i32) -> (i32, i32) {
    %c0_i32 = arith.constant 0 : i32
    %c0_i32_0 = arith.constant 0 : i32
    return %arg0, %c0_i32 : i32, i32
  }
  func.func @transform_1(%arg0: i32) -> (i32, i32) {
    %c0_i32 = arith.constant 0 : i32
    %c0_i32_0 = arith.constant 0 : i32
    %c0_i32_1 = arith.constant 0 : i32
    return %c0_i32, %c0_i32_0 : i32, i32
  }
  func.func @transform_2(%arg0: i32) -> (i32, i32) {
    %c0_i32 = arith.constant 0 : i32
    %c0_i32_0 = arith.constant 0 : i32
    %c0_i32_1 = arith.constant 0 : i32
    return %c0_i32, %c0_i32_0 : i32, i32
  }
  func.func @transform_3(%arg0: i32) -> (i32, i32) {
    %c0_i32 = arith.constant 0 : i32
    %c0_i32_0 = arith.constant 0 : i32
    %c0_i32_1 = arith.constant 0 : i32
    return %c0_i32, %c0_i32_0 : i32, i32
  }
  func.func @transform_4(%arg0: i32) -> (i32, i32) {
    %c0_i32 = arith.constant 0 : i32
    %c0_i32_0 = arith.constant 0 : i32
    %c0_i32_1 = arith.constant 0 : i32
    return %c0_i32, %c0_i32_0 : i32, i32
  }
  func.func @transform_5(%arg0: i32) -> (i32, i32) {
    %c0_i32 = arith.constant 0 : i32
    %c0_i32_0 = arith.constant 0 : i32
    %c0_i32_1 = arith.constant 0 : i32
    return %c0_i32, %c0_i32_0 : i32, i32
  }
  func.func @transform_6(%arg0: i32) -> (i32, i32) {
    %c0_i32 = arith.constant 0 : i32
    %c0_i32_0 = arith.constant 0 : i32
    %c0_i32_1 = arith.constant 0 : i32
    return %c0_i32, %c0_i32_0 : i32, i32
  }
  func.func @transform_7(%arg0: i32) -> (i32, i32) {
    %c0_i32 = arith.constant 0 : i32
    %c0_i32_0 = arith.constant 0 : i32
    %c0_i32_1 = arith.constant 0 : i32
    return %c0_i32, %c0_i32_0 : i32, i32
  }
  func.func @transform_8(%arg0: i32) -> (i32, i32) {
    %c0_i32 = arith.constant 0 : i32
    %c0_i32_0 = arith.constant 0 : i32
    %c0_i32_1 = arith.constant 0 : i32
    return %c0_i32, %c0_i32_0 : i32, i32
  }
  func.func @transform_9(%arg0: i32) -> (i32, i32) {
    %c0_i32 = arith.constant 0 : i32
    %c0_i32_0 = arith.constant 0 : i32
    %c0_i32_1 = arith.constant 0 : i32
    return %c0_i32, %c0_i32_0 : i32, i32
  }
  func.func @transform_10(%arg0: i32) -> (i32, i32) {
    %c0_i32 = arith.constant 0 : i32
    %c0_i32_0 = arith.constant 0 : i32
    %c0_i32_1 = arith.constant 0 : i32
    return %c0_i32, %c0_i32_0 : i32, i32
  }
  func.func @transform_11(%arg0: i32) -> (i32, i32) {
    %c0_i32 = arith.constant 0 : i32
    %c0_i32_0 = arith.constant 0 : i32
    %c0_i32_1 = arith.constant 0 : i32
    return %c0_i32, %c0_i32_0 : i32, i32
  }
  func.func @transform_12(%arg0: i32) -> (i32, i32) {
    %c0_i32 = arith.constant 0 : i32
    %c0_i32_0 = arith.constant 0 : i32
    %c0_i32_1 = arith.constant 0 : i32
    return %c0_i32, %c0_i32_0 : i32, i32
  }
  func.func @transform_13(%arg0: i32) -> (i32, i32) {
    %c0_i32 = arith.constant 0 : i32
    %c0_i32_0 = arith.constant 0 : i32
    return %arg0, %c0_i32 : i32, i32
  }
}

</mosaic_0001>

<bundles_post_ra>
// kernel: tpu_custom_call.1
= control target key start
LH: loop header
LB: loop body
LE: loop exit
PB: predicated region body
PF: predicated region fallthrough
CT: control target
= control target key end

     0   :  { %18 = vsyncpa [#allocation3], 0  ;;  %s14817_s0 = inlined_call_operand.vmem [shape: f32[64,16], index: 0, kind: input, shape index: {}]   ;;  %s14818_s1 = inlined_call_operand.vmem [shape: f32[16,256], index: 1, kind: input, shape index: {}]   ;;  %s14819_s2 = inlined_call_operand.vmem [shape: f32[1,256], index: 2, kind: input, shape index: {}]   ;;  %s14820_s3 = inlined_call_operand.hbm [shape: f32[256,256], index: 3, kind: input, shape index: {}]   ;;  %s14821_s4 = inlined_call_operand.vmem [shape: f32[1,256], index: 4, kind: input, shape index: {}]   ;;  %s14822_s5 = inlined_call_operand.hbm [shape: f32[256,128], index: 5, kind: input, shape index: {}]   ;;  %s14823_s6 = inlined_call_operand.vmem [shape: f32[1,128], index: 6, kind: input, shape index: {}]   ;;  %s14824_s7 = inlined_call_operand.vmem [shape: f32[16,256], index: 7, kind: input, shape index: {}]   ;;  %s14825_s8 = inlined_call_operand.vmem [shape: f32[1,256], index: 8, kind: input, shape index: {}]   ;;  %s14826_s9 = inlined_call_operand.hbm [shape: f32[256,256], index: 9, kind: input, shape index: {}]   ;;  %s14827_s10 = inlined_call_operand.vmem [shape: f32[1,256], index: 10, kind: input, shape index: {}]   ;;  %s14828_s11 = inlined_call_operand.hbm [shape: f32[256,128], index: 11, kind: input, shape index: {}]   ;;  %s14829_s12 = inlined_call_operand.vmem [shape: f32[1,128], index: 12, kind: input, shape index: {}]   ;;  %s14830_s13 = inlined_call_operand.hbm [shape: f32[64,256], index: 13, kind: output, shape index: {}]  }
   0x1   :  { %19 = vsyncpa [#allocation6], 0 }
   0x2   :  { %20 = vsyncpa [#allocation9], 0  ;;  %s47_s27 = sshll.u32 %s14822_s5, 4  ;;  %s48_s27 = int_to_ptr.hbm [resolvable:$true] %s47_s27 }
   0x3   :  { %21 = vsyncpa [#allocation4], 0  ;;  %s8943_s28 = smov [#allocation5]   ;;  %s32_s15 = sshll.u32 %s14820_s3, 4  ;;  %s33_s15 = int_to_ptr.hbm [resolvable:$true] %s32_s15 }
   0x4   :  { %s49_s29 = sshll.u32 %s8943_s28, 4  ;;  %s8944_s16 = smov 128   ;;  %s50_s29 = int_to_ptr.vmem [resolvable:$true] %s49_s29 }
   0x5   :  { %s8945_s17 = smov 8   ;;  %s8946_s18 = smov [#allocation2]  }
   0x6   :  { %55 = dma.hbm_to_vmem [thread:$0]  %s48_s27, 4096, %s50_s29, [#allocation6], %s8944_s16, %s8944_s16, %s8945_s17  }
   0x7   :  { %s34_s19 = sshll.u32 %s8946_s18, 4  ;;  %s8947_s20 = smov 256   ;;  %s35_s19 = int_to_ptr.vmem [resolvable:$true] %s34_s19 }
   0x8   :  { %s8948_s21 = smov 16   ;;  %s66_s23 = sshll.u32 %s14826_s9, 4  ;;  %s67_s23 = int_to_ptr.hbm [resolvable:$true] %s66_s23 }
   0x9   :  { %40 = dma.hbm_to_vmem [thread:$0]  %s33_s15, 8192, %s35_s19, [#allocation3], %s8947_s20, %s8947_s20, %s8948_s21  }
   0xa   :  { %s8949_s24 = smov [#allocation7]   ;;  %s81_s27 = sshll.u32 %s14828_s11, 4  ;;  %s82_s27 = int_to_ptr.hbm [resolvable:$true] %s81_s27 }
   0xb   :  { %s68_s3 = sshll.u32 %s8949_s24, 4  ;;  %s8950_s28 = smov [#allocation8]   ;;  %s69_s3 = int_to_ptr.vmem [resolvable:$true] %s68_s3 }
   0xc   :  { %74 = dma.hbm_to_vmem [thread:$0]  %s67_s23, 8192, %s69_s3, [#allocation6], %s8947_s20, %s8947_s20, %s8948_s21  }
   0xd   :  { %s83_s29 = sshll.u32 %s8950_s28, 4  ;;  %s84_s29 = int_to_ptr.vmem [resolvable:$true] %s83_s29 }
   0xe   :  { %89 = dma.hbm_to_vmem [thread:$0]  %s82_s27, 4096, %s84_s29, [#allocation9], %s8944_s16, %s8944_s16, %s8945_s17  }
   0xf   :  { %8935 = dma.done.wait [#allocation3], 8192  }
  0x10   :  { %8936 = vsyncadd [#allocation3], 4294959104 }
  0x11   :  { %8937 = dma.done.wait [#allocation6], 12288  }
  0x12   :  { %8938 = vsyncadd [#allocation6], 4294955008 }
  0x13   :  { %8939 = dma.done.wait [#allocation9], 4096  }
  0x14   :  { %8940 = vsyncadd [#allocation9], 4294963200  ;;  %vm126_vm0 = vcmask 130048   ;;  %v118_v0 = vld [vmem:[%s14818_s1 + $0x10] sm:$0xff]  ;;  %v116_v1 = vld [vmem:[%s14818_s1] sm:$0xff] }
  0x15   :  { %v108_v2 = vld [vmem:[%s14817_s0] sm:$0xff]  ;;  %v165_v3 = vand.u32 4294901760, %v118_v0  ;;  %v9049_v4 = vand.u32 4294901760, %v116_v1  ;;  %v119_v6 = vld [vmem:[%s14818_s1 + $0x18] sm:$0xff]  ;;  %v109_v7 = vld [vmem:[%s14817_s0 + $0x8] sm:$0xff] }
  0x16   :  { %v128_v5 = vsel %vm126_vm0, %v108_v2, 0  ;;  %v9060_v9 = vand.u32 4294901760, %v119_v6  ;;  %v131_v10 = vsel %vm126_vm0, %v109_v7, 0  ;;  %v110_v11 = vld [vmem:[%s14817_s0 + $0x10] sm:$0xff]  ;;  %v117_v29 = vld [vmem:[%s14818_s1 + $0x8] sm:$0xff]  ;;  %v111_v34 = vld [vmem:[%s14817_s0 + $0x18] sm:$0xff] }
  0x17   :  { %v9058_v8 = vand.u32 4294901760, %v128_v5  ;;  %v249_v12 = vsub.f32 %v118_v0, %v165_v3  ;;  %166 = vmatpush.msra.mxu0 %v165_v3  ;;  %v255_v13 = vsub.f32 %v116_v1, %v9049_v4  ;;  %369 = vmatpush.msra.mxu3 %v165_v3  ;;  %v9067_v14 = vand.u32 4294901760, %v131_v10  ;;  %v112_v45 = vld [vmem:[%s14817_s0 + $0x20] sm:$0xff]  ;;  %v113_v53 = vld [vmem:[%s14817_s0 + $0x28] sm:$0xff]  ;;  %v114_v60 = vld [vmem:[%s14817_s0 + $0x30] sm:$0xff] }
  0x18   :  { %v625_v16 = vsub.f32 %v119_v6, %v9060_v9  ;;  %v134_v20 = vsel %vm126_vm0, %v110_v11, 0  ;;  %v543_v35 = vand.u32 4294901760, %v117_v29  ;;  %v137_v38 = vsel %vm126_vm0, %v111_v34, 0 }
  0x19   :  { %15242 = vst [vmem:[#allocation15_spill] sm:$0xff] %v9058_v8  ;;  %v9070_v15 = vsub.f32 %v128_v5, %v9058_v8  ;;  %309 = vmatpush.msra.mxu2 %v249_v12  ;;  %168 = vmatpush.msra.mxu0 %v9049_v4  ;;  %v250_v17 = vand.u32 4294901760, %v249_v12  ;;  %v256_v18 = vand.u32 4294901760, %v255_v13  ;;  %v9075_v19 = vsub.f32 %v131_v10, %v9067_v14 }
  0x1a   :  { %15243 = vst [vmem:[#allocation16_spill] sm:$0xff] %v9067_v14  ;;  %371 = vmatpush.msra.mxu3 %v9049_v4  ;;  %v626_v22 = vand.u32 4294901760, %v625_v16  ;;  %v9089_v28 = vand.u32 4294901760, %v134_v20  ;;  %v631_v39 = vsub.f32 %v117_v29, %v543_v35  ;;  %v9115_v43 = vand.u32 4294901760, %v137_v38 }
  0x1b   :  { %15244 = vst [vmem:[#allocation17_spill] sm:$0xff] %v9070_v15  ;;  %v9080_v21 = vand.u32 4294901760, %v9070_v15  ;;  %312 = vmatpush.msra.mxu2 %v255_v13  ;;  %v251_v23 = vsub.f32 %v249_v12, %v250_v17  ;;  %438 = vmatpush.msrb.mxu0 %v250_v17  ;;  %v257_v24 = vsub.f32 %v255_v13, %v256_v18  ;;  %v9087_v27 = vand.u32 4294901760, %v9075_v19 }
  0x1c   :  { %15245 = vst [vmem:[#allocation18_spill] sm:$0xff] %v9075_v19  ;;  %315 = vmatmul.f32.vlgmr.msra.gmra.mxu2 %v9070_v15  ;;  %v627_v26 = vsub.f32 %v625_v16, %v626_v22  ;;  %v9104_v37 = vsub.f32 %v134_v20, %v9089_v28  ;;  %v632_v40 = vand.u32 4294901760, %v631_v39  ;;  %v9126_v48 = vsub.f32 %v137_v38, %v9115_v43  ;;  %v981_v20 = vld [vmem:[#allocation2 + $0xf0] sm:$0xff] }
  0x1d   :  { %15246 = vst [vmem:[#allocation19_spill] sm:$0xff] %v9080_v21  ;;  %v172_v25 = vsub.f32 %v9070_v15, %v9080_v21  ;;  %375 = vmatmul.f32.vlgmr.msra.gmra.mxu3 %v9080_v21  ;;  %542 = vmatpush.msrb.mxu2 %v9060_v9  ;;  %v252_v30 = vand.u32 4294901760, %v251_v23  ;;  %v258_v31 = vand.u32 4294901760, %v257_v24  ;;  %v180_v36 = vsub.f32 %v9075_v19, %v9087_v27  ;;  %v979_v24 = vld [vmem:[#allocation2 + $0xe0] sm:$0xff] }
  0x1e   :  { %15247 = vst [vmem:[#allocation20_spill] sm:$0xff] %v9087_v27  ;;  %442 = vmatpush.msrb.mxu0 %v256_v18  ;;  %v628_v33 = vand.u32 4294901760, %v627_v26  ;;  %v9113_v42 = vand.u32 4294901760, %v9104_v37  ;;  %v633_v44 = vsub.f32 %v631_v39, %v632_v40  ;;  %v140_v49 = vsel %vm126_vm0, %v112_v45, 0 }
  0x1f   :  { %15248 = vst [vmem:[#allocation21_spill] sm:$0xff] %v9089_v28  ;;  %v9095_v32 = vand.u32 4294901760, %v172_v25  ;;  %253 = vmatpush.msra.mxu1 %v252_v30  ;;  %544 = vmatpush.msrb.mxu2 %v543_v35  ;;  %v9109_v41 = vand.u32 4294901760, %v180_v36  ;;  %v9136_v51 = vand.u32 4294901760, %v9126_v48  ;;  %v9138_v52 = vand.u32 4294901760, %v140_v49 }
  0x20   :  { %629 = vmatpush.msrb.mxu3 %v628_v33  ;;  %15250 = vst [vmem:[#allocation23_spill] sm:$0xff] %v9104_v37  ;;  %v634_v46 = vand.u32 4294901760, %v633_v44  ;;  %v188_v47 = vsub.f32 %v9104_v37, %v9113_v42  ;;  %v143_v56 = vsel %vm126_vm0, %v113_v53, 0  ;;  %v146_v63 = vsel %vm126_vm0, %v114_v60, 0  ;;  %v973_v60 = vld [vmem:[#allocation2 + $0xb0] sm:$0xff] }
  0x21   :  { %15249 = vst [vmem:[#allocation22_spill] sm:$0xff] %v9095_v32  ;;  %174 = vmatmul.f32.vlgmr.msra.gmra.mxu0 %v9095_v32  ;;  %259 = vmatpush.msra.mxu1 %v258_v31  ;;  %v196_v54 = vsub.f32 %v9126_v48, %v9136_v51  ;;  %v9147_v55 = vsub.f32 %v140_v49, %v9138_v52  ;;  %v9158_v59 = vand.u32 4294901760, %v143_v56  ;;  %v9178_v2 = vand.u32 4294901760, %v146_v63  ;;  %v977_v31 = vld [vmem:[#allocation2 + $0xd0] sm:$0xff] }
  0x22   :  { %261 = vmatmul.f32.vlgmr.msra.gmra.mxu1 %v9058_v8  ;;  %814 = vmatpush.msra.mxu2 %v626_v22  ;;  %15251 = vst [vmem:[#allocation24_spill] sm:$0xff] %v9109_v41  ;;  %v9132_v50 = vand.u32 4294901760, %v188_v47  ;;  %v9254_v22 = vand.u32 4294901760, %v981_v20  ;;  %v9264_v26 = vand.u32 4294901760, %v979_v24  ;;  %v9281_v36 = vand.u32 4294901760, %v977_v31 }
  0x23   :  { %491 = vmatpush.msrb.mxu1 %v165_v3  ;;  %685 = vmatpush.msra.mxu0 %v625_v16  ;;  %15252 = vst [vmem:[#allocation25_spill] sm:$0xff] %v9113_v42  ;;  %v9152_v57 = vand.u32 4294901760, %v196_v54  ;;  %v9156_v58 = vand.u32 4294901760, %v9147_v55  ;;  %v9167_v62 = vsub.f32 %v143_v56, %v9158_v59  ;;  %v115_v3 = vld [vmem:[%s14817_s0 + $0x38] sm:$0xff]  ;;  %v9187_v5 = vsub.f32 %v146_v63, %v9178_v2  ;;  %s8787_s0 = sshll.u32 %s14830_s13, 4  ;;  %s8788_s0 = int_to_ptr.hbm [resolvable:$true] %s8787_s0 }
  0x24   :  { %320 = vmatmul.f32.gmra.mxu2 %v9075_v19  ;;  %15253 = vst [vmem:[#allocation26_spill] sm:$0xff] %v9115_v43  ;;  %635 = vmatpush.msrb.mxu3 %v634_v46  ;;  %v149_v6 = vsel %vm126_vm0, %v115_v3, 0  ;;  %v9257_v23 = vsub.f32 %v981_v20, %v9254_v22  ;;  %v9271_v30 = vsub.f32 %v979_v24, %v9264_v26  ;;  %v975_v46 = vld [vmem:[#allocation2 + $0xc0] sm:$0xff] }
  0x25   :  { %381 = vmatmul.f32.gmra.mxu3 %v9087_v27  ;;  %493 = vmatpush.msrb.mxu1 %v9049_v4  ;;  %15254 = vst [vmem:[#allocation27_spill] sm:$0xff] %v9126_v48  ;;  %v204_v61 = vsub.f32 %v9147_v55, %v9156_v58  ;;  %v9176_v1 = vand.u32 4294901760, %v9167_v62  ;;  %v9198_v10 = vand.u32 4294901760, %v149_v6  ;;  %v9291_v44 = vsub.f32 %v977_v31, %v9281_v36  ;;  %v971_v24 = vld [vmem:[#allocation2 + $0xa0] sm:$0xff] }
  0x26   :  { %818 = vmatpush.msra.mxu2 %v632_v40  ;;  %688 = vmatpush.msra.mxu0 %v631_v39  ;;  %15255 = vst [vmem:[#allocation28_spill] sm:$0xff] %v9132_v50  ;;  %v14835_v25 = vand.u32 4294901760, %v9257_v23  ;;  %v9300_v53 = vand.u32 4294901760, %v975_v46  ;;  %v9334_v31 = vand.u32 4294901760, %v971_v24 }
  0x27   :  { %745 = vmatpush.msra.mxu1 %v9060_v9  ;;  %867 = vmatpush.msra.mxu3 %v9060_v9  ;;  %15256 = vst [vmem:[#allocation29_spill] sm:$0xff] %v9136_v51  ;;  %v9172_v0 = vand.u32 4294901760, %v204_v61  ;;  %v212_v4 = vsub.f32 %v9167_v62, %v9176_v1  ;;  %v9196_v9 = vand.u32 4294901760, %v9187_v5  ;;  %v9204_v12 = vsub.f32 %v149_v6, %v9198_v10 }
  0x28   :  { %15257 = vst [vmem:[#allocation30_spill] sm:$0xff] %v9138_v52  ;;  %v1121_v29 = vsub.f32 %v9257_v23, %v14835_v25  ;;  %v14832_v49 = vand.u32 4294901760, %v9291_v44  ;;  %v9307_v56 = vsub.f32 %v975_v46, %v9300_v53  ;;  %v969_v46 = vld [vmem:[#allocation2 + $0x90] sm:$0xff] }
  0x29   :  { %182 = vmatmul.f32.gmra.mxu0 %v9109_v41  ;;  %747 = vmatpush.msra.mxu1 %v543_v35  ;;  %15258 = vst [vmem:[#allocation31_spill] sm:$0xff] %v9147_v55  ;;  %v9192_v7 = vand.u32 4294901760, %v212_v4  ;;  %v220_v11 = vsub.f32 %v9187_v5, %v9196_v9  ;;  %v9212_v16 = vand.u32 4294901760, %v9204_v12  ;;  %v9317_v4 = vand.u32 4294901760, %v973_v60 }
  0x2a   :  { %265 = vmatmul.f32.gmra.mxu1 %v9067_v14  ;;  %869 = vmatpush.msra.mxu3 %v543_v35  ;;  %15259 = vst [vmem:[#allocation32_spill] sm:$0xff] %v9152_v57  ;;  %v1122_v34 = vand.u32 4294901760, %v1121_v29  ;;  %v14834_v35 = vand.u32 4294901760, %v9271_v30  ;;  %v1133_v54 = vsub.f32 %v9291_v44, %v14832_v49  ;;  %v14831_v3 = vand.u32 4294901760, %v9307_v56 }
  0x2b   :  { %15260 = vst [vmem:[#allocation33_spill] sm:$0xff] %v9156_v58  ;;  %v9208_v13 = vand.u32 4294901760, %v220_v11  ;;  %v228_v17 = vsub.f32 %v9204_v12, %v9212_v16  ;;  %v9327_v20 = vsub.f32 %v973_v60, %v9317_v4 }
  0x2c   :  { %325 = vmatmul.f32.gmra.mxu2 %v9104_v37  ;;  %15261 = vst [vmem:[#allocation34_spill] sm:$0xff] %v9158_v59  ;;  %v1127_v40 = vsub.f32 %v9271_v30, %v14834_v35  ;;  %v1134_v63 = vand.u32 4294901760, %v1133_v54  ;;  %v9343_v54 = vand.u32 4294901760, %v969_v46 }
  0x2d   :  { %387 = vmatmul.f32.gmra.mxu3 %v9113_v42  ;;  %15262 = vst [vmem:[#allocation35_spill] sm:$0xff] %v9167_v62  ;;  %v9219_v18 = vand.u32 4294901760, %v228_v17  ;;  %v1139_v17 = vsub.f32 %v9307_v56, %v14831_v3 }
  0x2e   :  { %15263 = vst [vmem:[#allocation36_spill] sm:$0xff] %v9172_v0  ;;  %v1128_v47 = vand.u32 4294901760, %v1127_v40  ;;  %v14833_v40 = vand.u32 4294901760, %v9327_v20 }
  0x2f   :  { %15264 = vst [vmem:[#allocation37_spill] sm:$0xff] %v9176_v1 }
  0x30   :  { %15265 = vst [vmem:[#allocation38_spill] sm:$0xff] %v9178_v2  ;;  %v1145_v60 = vsub.f32 %v9327_v20, %v14833_v40  ;;  %v965_v40 = vld [vmem:[#allocation2 + $0x70] sm:$0xff] }
  0x31   :  { %190 = vmatmul.f32.gmra.mxu0 %v9132_v50  ;;  %15266 = vst [vmem:[#allocation39_spill] sm:$0xff] %v9187_v5 }
  0x32   :  { %269 = vmatmul.f32.gmra.mxu1 %v9089_v28  ;;  %15267 = vst [vmem:[#allocation40_spill] sm:$0xff] %v9192_v7 }
  0x33   :  { %15268 = vst [vmem:[#allocation41_spill] sm:$0xff] %v9196_v9 }
  0x34   :  { %330 = vmatmul.f32.gmra.mxu2 %v9126_v48  ;;  %15269 = vst [vmem:[#allocation42_spill] sm:$0xff] %v9198_v10 }
  0x35   :  { %393 = vmatmul.f32.gmra.mxu3 %v9136_v51  ;;  %15270 = vst [vmem:[#allocation43_spill] sm:$0xff] %v9204_v12 }
  0x36   :  { %15271 = vst [vmem:[#allocation44_spill] sm:$0xff] %v9208_v13 }
  0x37   :  { %15272 = vst [vmem:[#allocation45_spill] sm:$0xff] %v9212_v16 }
  0x38   :  { %15273 = vst [vmem:[#allocation46_spill] sm:$0xff] %v9219_v18 }
  0x39   :  { %198 = vmatmul.f32.gmra.mxu0 %v9152_v57 }
  0x3a   :  { %273 = vmatmul.f32.gmra.mxu1 %v9115_v43 }
  0x3c   :  { %335 = vmatmul.f32.gmra.mxu2 %v9147_v55 }
  0x3d   :  { %399 = vmatmul.f32.gmra.mxu3 %v9156_v58 }
  0x41   :  { %206 = vmatmul.f32.gmra.mxu0 %v9172_v0 }
  0x42   :  { %277 = vmatmul.f32.gmra.mxu1 %v9138_v52 }
  0x44   :  { %340 = vmatmul.f32.gmra.mxu2 %v9167_v62 }
  0x45   :  { %405 = vmatmul.f32.gmra.mxu3 %v9176_v1 }
  0x49   :  { %214 = vmatmul.f32.gmra.mxu0 %v9192_v7 }
  0x4a   :  { %281 = vmatmul.f32.gmra.mxu1 %v9158_v59 }
  0x4c   :  { %345 = vmatmul.f32.gmra.mxu2 %v9187_v5 }
  0x4d   :  { %411 = vmatmul.f32.gmra.mxu3 %v9196_v9 }
  0x51   :  { %222 = vmatmul.f32.gmra.mxu0 %v9208_v13 }
  0x52   :  { %285 = vmatmul.f32.gmra.mxu1 %v9178_v2 }
  0x54   :  { %350 = vmatmul.f32.gmra.mxu2 %v9204_v12 }
  0x55   :  { %417 = vmatmul.f32.gmra.mxu3 %v9212_v16 }
  0x59   :  { %230 = vmatmul.f32.gmra.mxu0 %v9219_v18 }
  0x5a   :  { %289 = vmatmul.f32.gmra.mxu1 %v9198_v10 }
  0x5c   :  { %550 = vmatmul.f32.vlgmr.msrb.gmra.mxu2 %v9095_v32  ;;  %v955_v32 = vld [vmem:[#allocation2 + $0x20] sm:$0xff] }
  0x5d   :  { %637 = vmatmul.f32.vlgmr.msrb.gmra.mxu3 %v9058_v8  ;;  %1249 = vmatpush.msrb.mxu2 %v9257_v23 }
  0x5e   :  { %1337 = vmatpush.msrb.mxu3 %v9254_v22 }
  0x5f   :  { %1252 = vmatpush.msrb.mxu2 %v9271_v30 }
  0x60   :  { %1339 = vmatpush.msrb.mxu3 %v9264_v26 }
  0x61   :  { %444 = vmatmul.f32.vlgmr.msrb.gmra.mxu0 %v9058_v8  ;;  %1255 = vmatpush.msrb.mxu2 %v9291_v44 }
  0x62   :  { %495 = vmatmul.f32.vlgmr.msrb.gmra.mxu1 %v9058_v8  ;;  %1022 = vmatpush.msrb.mxu0 %v9254_v22 }
  0x63   :  { %1123 = vmatpush.msrb.mxu1 %v1122_v34  ;;  %1341 = vmatpush.msrb.mxu3 %v9281_v36  ;;  %v1140_v34 = vand.u32 4294901760, %v1139_v17 }
  0x64   :  { %558 = vmatmul.f32.gmra.mxu2 %v9109_v41  ;;  %1024 = vmatpush.msrb.mxu0 %v9264_v26 }
  0x65   :  { %641 = vmatmul.f32.gmra.mxu3 %v9067_v14  ;;  %1129 = vmatpush.msrb.mxu1 %v1128_v47  ;;  %v9340_v47 = vsub.f32 %v971_v24, %v9334_v31  ;;  %v9353_v24 = vsub.f32 %v969_v46, %v9343_v54 }
  0x66   :  { %1026 = vmatpush.msrb.mxu0 %v9281_v36  ;;  %1258 = vmatpush.msrb.mxu2 %v9307_v56 }
  0x67   :  { %1343 = vmatpush.msrb.mxu3 %v9300_v53  ;;  %1135 = vmatpush.msrb.mxu1 %v1134_v63  ;;  %v967_v63 = vld [vmem:[#allocation2 + $0x80] sm:$0xff]  ;;  %v14842_v17 = vand.u32 4294901760, %v9340_v47  ;;  %v14851_v25 = vand.u32 4294901760, %v9353_v24 }
  0x68   :  { %1028 = vmatpush.msrb.mxu0 %v9300_v53  ;;  %1261 = vmatpush.msrb.mxu2 %v9327_v20  ;;  %v9355_v3 = vand.u32 4294901760, %v967_v63 }
  0x69   :  { %448 = vmatmul.f32.gmra.mxu0 %v9067_v14  ;;  %1345 = vmatpush.msrb.mxu3 %v9317_v4  ;;  %v1151_v35 = vsub.f32 %v9340_v47, %v14842_v17 }
  0x6a   :  { %499 = vmatmul.f32.gmra.mxu1 %v9067_v14  ;;  %1030 = vmatpush.msrb.mxu0 %v9317_v4  ;;  %v9367_v46 = vsub.f32 %v967_v63, %v9355_v3  ;;  %v1157_v63 = vsub.f32 %v9353_v24, %v14851_v25 }
  0x6b   :  { %1141 = vmatpush.msrb.mxu1 %v1140_v34  ;;  %1347 = vmatpush.msrb.mxu3 %v9334_v31  ;;  %v1146_v34 = vand.u32 4294901760, %v1145_v60  ;;  %v9374_v60 = vand.u32 4294901760, %v965_v40 }
  0x6c   :  { %566 = vmatmul.f32.gmra.mxu2 %v9132_v50  ;;  %1032 = vmatpush.msrb.mxu0 %v9334_v31 }
  0x6d   :  { %645 = vmatmul.f32.gmra.mxu3 %v9089_v28  ;;  %1264 = vmatpush.msrb.mxu2 %v9340_v47 }
  0x6e   :  { %1034 = vmatpush.msrb.mxu0 %v9343_v54  ;;  %1349 = vmatpush.msrb.mxu3 %v9343_v54 }
  0x6f   :  { %1147 = vmatpush.msrb.mxu1 %v1146_v34  ;;  %1267 = vmatpush.msrb.mxu2 %v9353_v24  ;;  %v9387_v34 = vsub.f32 %v965_v40, %v9374_v60 }
  0x70   :  { %1351 = vmatpush.msrb.mxu3 %v9355_v3  ;;  %1036 = vmatpush.msrb.mxu0 %v9355_v3 }
  0x71   :  { %452 = vmatmul.f32.gmra.mxu0 %v9089_v28  ;;  %1270 = vmatpush.msrb.mxu2 %v9367_v46  ;;  %v14869_v40 = vand.u32 4294901760, %v9387_v34 }
  0x72   :  { %503 = vmatmul.f32.gmra.mxu1 %v9089_v28  ;;  %1353 = vmatpush.msrb.mxu3 %v9374_v60 }
  0x73   :  { %1273 = vmatpush.msrb.mxu2 %v9387_v34  ;;  %1038 = vmatpush.msrb.mxu0 %v9374_v60 }
  0x74   :  { %574 = vmatmul.f32.gmra.mxu2 %v9152_v57 }
  0x75   :  { %649 = vmatmul.f32.gmra.mxu3 %v9115_v43 }
  0x79   :  { %456 = vmatmul.f32.gmra.mxu0 %v9115_v43 }
  0x7a   :  { %507 = vmatmul.f32.gmra.mxu1 %v9115_v43 }
  0x7c   :  { %582 = vmatmul.f32.gmra.mxu2 %v9172_v0  ;;  %v14858_v0 = vand.u32 4294901760, %v9367_v46 }
  0x7d   :  { %653 = vmatmul.f32.gmra.mxu3 %v9138_v52 }
  0x7e   :  { %v1163_v25 = vsub.f32 %v9367_v46, %v14858_v0 }
  0x81   :  { %460 = vmatmul.f32.gmra.mxu0 %v9138_v52 }
  0x82   :  { %511 = vmatmul.f32.gmra.mxu1 %v9138_v52 }
  0x84   :  { %590 = vmatmul.f32.gmra.mxu2 %v9192_v7  ;;  %v963_v7 = vld [vmem:[#allocation2 + $0x60] sm:$0xff] }
  0x85   :  { %657 = vmatmul.f32.gmra.mxu3 %v9158_v59 }
  0x89   :  { %464 = vmatmul.f32.gmra.mxu0 %v9158_v59 }
  0x8a   :  { %515 = vmatmul.f32.gmra.mxu1 %v9158_v59 }
  0x8c   :  { %598 = vmatmul.f32.gmra.mxu2 %v9208_v13 }
  0x8d   :  { %661 = vmatmul.f32.gmra.mxu3 %v9178_v2 }
  0x91   :  { %468 = vmatmul.f32.gmra.mxu0 %v9178_v2 }
  0x92   :  { %519 = vmatmul.f32.gmra.mxu1 %v9178_v2 }
  0x94   :  { %606 = vmatmul.f32.gmra.mxu2 %v9219_v18 }
  0x95   :  { %665 = vmatmul.f32.gmra.mxu3 %v9198_v10 }
  0x99   :  { %472 = vmatmul.f32.gmra.mxu0 %v9198_v10 }
  0x9a   :  { %523 = vmatmul.f32.gmra.mxu1 %v9198_v10 }
  0x9c   :  { %820 = vmatmul.f32.vlgmr.msra.gmra.mxu2 %v9058_v8 }
  0x9d   :  { %871 = vmatmul.f32.vlgmr.msra.gmra.mxu3 %v9058_v8 }
  0x9e   :  { %v9277_v33 = vpop.f32.mrf.mxu0 }
  0x9f   :  { %v9283_v38 = vpop.f32.mrf.mxu1  ;;  %v9285_v39 = vpop.f32.mrf.mxu2 }
  0xa0   :  { %v9295_v45 = vpop.f32.mrf.mxu3 }
  0xa1   :  { %691 = vmatmul.f32.vlgmr.msra.gmra.mxu0 %v9070_v15 }
  0xa2   :  { %751 = vmatmul.f32.vlgmr.msra.gmra.mxu1 %v9080_v21  ;;  %v959_v21 = vld [vmem:[#allocation2 + $0x40] sm:$0xff] }
  0xa4   :  { %824 = vmatmul.f32.gmra.mxu2 %v9067_v14 }
  0xa5   :  { %875 = vmatmul.f32.gmra.mxu3 %v9067_v14 }
  0xa6   :  { %v9312_v61 = vpop.f32.mrf.mxu0 }
  0xa7   :  { %v9319_v6 = vpop.f32.mrf.mxu1  ;;  %v9321_v11 = vpop.f32.mrf.mxu2 }
  0xa8   :  { %v9331_v29 = vpop.f32.mrf.mxu3 }
  0xa9   :  { %696 = vmatmul.f32.gmra.mxu0 %v9075_v19  ;;  %v1152_v19 = vand.u32 4294901760, %v1151_v35  ;;  %v1158_v35 = vand.u32 4294901760, %v1157_v63  ;;  %v1164_v63 = vand.u32 4294901760, %v1163_v25 }
  0xaa   :  { %757 = vmatmul.f32.gmra.mxu1 %v9087_v27  ;;  %v9389_v27 = vand.u32 4294901760, %v963_v7 }
  0xab   :  { %1153 = vmatpush.msrb.mxu1 %v1152_v19  ;;  %v1169_v19 = vsub.f32 %v9387_v34, %v14869_v40 }
  0xac   :  { %828 = vmatmul.f32.gmra.mxu2 %v9089_v28  ;;  %v9401_v57 = vsub.f32 %v963_v7, %v9389_v27  ;;  %1355 = vmatpush.msrb.mxu3 %v9389_v27 }
  0xad   :  { %879 = vmatmul.f32.gmra.mxu3 %v9089_v28  ;;  %1159 = vmatpush.msrb.mxu1 %v1158_v35  ;;  %v957_v28 = vld [vmem:[#allocation2 + $0x30] sm:$0xff]  ;;  %v1170_v40 = vand.u32 4294901760, %v1169_v19 }
  0xae   :  { %v9357_v49 = vpop.f32.mrf.mxu0  ;;  %v14876_v7 = vand.u32 4294901760, %v9401_v57  ;;  %1276 = vmatpush.msrb.mxu2 %v9401_v57  ;;  %1040 = vmatpush.msrb.mxu0 %v9389_v27 }
  0xaf   :  { %v9369_v18 = vpop.f32.mrf.mxu1  ;;  %v9371_v13 = vpop.f32.mrf.mxu2  ;;  %1165 = vmatpush.msrb.mxu1 %v1164_v63 }
  0xb0   :  { %15274 = vst [vmem:[#allocation47_spill] sm:$0xff] %v9371_v13  ;;  %v9377_v17 = vpop.f32.mrf.mxu3  ;;  %v1175_v14 = vsub.f32 %v9401_v57, %v14876_v7  ;;  %v9445_v7 = vand.u32 4294901760, %v955_v32 }
  0xb1   :  { %701 = vmatmul.f32.gmra.mxu0 %v9104_v37  ;;  %15275 = vst [vmem:[#allocation48_spill] sm:$0xff] %v9377_v17  ;;  %v961_v37 = vld [vmem:[#allocation2 + $0x50] sm:$0xff]  ;;  %1171 = vmatpush.msrb.mxu1 %v1170_v40  ;;  %v951_v40 = vld [vmem:[#allocation2] sm:$0xff] }
  0xb2   :  { %763 = vmatmul.f32.gmra.mxu1 %v9113_v42  ;;  %v9396_v15 = vand.u32 4294901760, %v961_v37  ;;  %v9408_v42 = vand.u32 4294901760, %v959_v21 }
  0xb4   :  { %832 = vmatmul.f32.gmra.mxu2 %v9115_v43  ;;  %v9406_v0 = vsub.f32 %v961_v37, %v9396_v15  ;;  %v9421_v25 = vsub.f32 %v959_v21, %v9408_v42  ;;  %1042 = vmatpush.msrb.mxu0 %v9396_v15 }
  0xb5   :  { %883 = vmatmul.f32.gmra.mxu3 %v9115_v43  ;;  %v9423_v43 = vand.u32 4294901760, %v957_v28 }
  0xb6   :  { %v9410_v50 = vpop.f32.mrf.mxu0  ;;  %1279 = vmatpush.msrb.mxu2 %v9406_v0  ;;  %v15279_v21 = vand.u32 4294901760, %v9406_v0  ;;  %v14879_v63 = vand.u32 4294901760, %v9421_v25  ;;  %1357 = vmatpush.msrb.mxu3 %v9396_v15 }
  0xb7   :  { %v9425_v35 = vpop.f32.mrf.mxu1  ;;  %v9427_v41 = vpop.f32.mrf.mxu2  ;;  %v9442_v19 = vsub.f32 %v957_v28, %v9423_v43  ;;  %1044 = vmatpush.msrb.mxu0 %v9408_v42 }
  0xb8   :  { %15276 = vst [vmem:[#allocation49_spill] sm:$0xff] %v9425_v35  ;;  %v9434_v37 = vpop.f32.mrf.mxu3  ;;  %v1181_v8 = vsub.f32 %v9406_v0, %v15279_v21  ;;  %v1187_v21 = vsub.f32 %v9421_v25, %v14879_v63  ;;  %1282 = vmatpush.msrb.mxu2 %v9421_v25  ;;  %1359 = vmatpush.msrb.mxu3 %v9408_v42 }
  0xb9   :  { %15277 = vst [vmem:[#allocation50_spill] sm:$0xff] %v9427_v41  ;;  %706 = vmatmul.f32.gmra.mxu0 %v9126_v48  ;;  %v1176_v41 = vand.u32 4294901760, %v1175_v14  ;;  %v953_v48 = vld [vmem:[#allocation2 + $0x10] sm:$0xff]  ;;  %v14882_v17 = vand.u32 4294901760, %v9442_v19  ;;  %v9455_v14 = vsub.f32 %v955_v32, %v9445_v7 }
  0xba   :  { %15278 = vst [vmem:[#allocation51_spill] sm:$0xff] %v9434_v37  ;;  %769 = vmatmul.f32.gmra.mxu1 %v9136_v51  ;;  %v1182_v37 = vand.u32 4294901760, %v1181_v8  ;;  %v9457_v28 = vand.u32 4294901760, %v953_v48  ;;  %v1188_v8 = vand.u32 4294901760, %v1187_v21  ;;  %v9464_v51 = vand.u32 4294901760, %v951_v40  ;;  %1285 = vmatpush.msrb.mxu2 %v9442_v19 }
  0xbb   :  { %1177 = vmatpush.msrb.mxu1 %v1176_v41  ;;  %v1193_v63 = vsub.f32 %v9442_v19, %v14882_v17  ;;  %v14885_v32 = vand.u32 4294901760, %v9455_v14  ;;  %1046 = vmatpush.msrb.mxu0 %v9423_v43 }
  0xbc   :  { %836 = vmatmul.f32.gmra.mxu2 %v9138_v52  ;;  %v9471_v35 = vsub.f32 %v953_v48, %v9457_v28  ;;  %v9476_v21 = vsub.f32 %v951_v40, %v9464_v51  ;;  %1361 = vmatpush.msrb.mxu3 %v9423_v43 }
  0xbd   :  { %887 = vmatmul.f32.gmra.mxu3 %v9138_v52  ;;  %1183 = vmatpush.msrb.mxu1 %v1182_v37  ;;  %v1194_v13 = vand.u32 4294901760, %v1193_v63  ;;  %v1199_v37 = vsub.f32 %v9455_v14, %v14885_v32 }
  0xbe   :  { %v9466_v41 = vpop.f32.mrf.mxu0  ;;  %v14889_v48 = vand.u32 4294901760, %v9471_v35  ;;  %1288 = vmatpush.msrb.mxu2 %v9455_v14  ;;  %v14888_v40 = vand.u32 4294901760, %v9476_v21  ;;  %1363 = vmatpush.msrb.mxu3 %v9445_v7 }
  0xbf   :  { %v9478_v17 = vpop.f32.mrf.mxu1  ;;  %v9480_v52 = vpop.f32.mrf.mxu2  ;;  %1189 = vmatpush.msrb.mxu1 %v1188_v8  ;;  %1048 = vmatpush.msrb.mxu0 %v9445_v7 }
  0xc0   :  { %15280 = vst [vmem:[#allocation52_spill] sm:$0xff] %v9478_v17  ;;  %v9488_v63 = vpop.f32.mrf.mxu3  ;;  %v1200_v17 = vand.u32 4294901760, %v1199_v37  ;;  %v1205_v8 = vsub.f32 %v9471_v35, %v14889_v48  ;;  %v1211_v32 = vsub.f32 %v9476_v21, %v14888_v40  ;;  %1291 = vmatpush.msrb.mxu2 %v9471_v35  ;;  %1365 = vmatpush.msrb.mxu3 %v9457_v28  ;;  %v15281_v48 = vand.u32 4294901760, %v9257_v23 }
  0xc1   :  { %711 = vmatmul.f32.gmra.mxu0 %v9147_v55  ;;  %1195 = vmatpush.msrb.mxu1 %v1194_v13  ;;  %v15283_v23 = vand.u32 4294901760, %v9291_v44  ;;  %v15285_v44 = vand.u32 4294901760, %v9327_v20 }
  0xc2   :  { %775 = vmatmul.f32.gmra.mxu1 %v9156_v58  ;;  %v1206_v55 = vand.u32 4294901760, %v1205_v8  ;;  %v1212_v13 = vand.u32 4294901760, %v1211_v32  ;;  %1294 = vmatpush.msrb.mxu2 %v9476_v21 }
  0xc3   :  { %1201 = vmatpush.msrb.mxu1 %v1200_v17  ;;  %1367 = vmatpush.msrb.mxu3 %v9464_v51 }
  0xc4   :  { %840 = vmatmul.f32.gmra.mxu2 %v9158_v59  ;;  %1050 = vmatpush.msrb.mxu0 %v9457_v28 }
  0xc5   :  { %891 = vmatmul.f32.gmra.mxu3 %v9158_v59  ;;  %1207 = vmatpush.msrb.mxu1 %v1206_v55  ;;  %v9520_v55 = vld [vmem:[%s14819_s2] sm:$0x3] }
  0xc6   :  { %v9504_v37 = vpop.f32.mrf.mxu0  ;;  %1052 = vmatpush.msrb.mxu0 %v9464_v51  ;;  %v9528_v32 = vperm.slane %v9520_v55, 0 }
  0xc7   :  { %v9509_v40 = vpop.f32.mrf.mxu1  ;;  %v9511_v17 = vpop.f32.mrf.mxu2  ;;  %1213 = vmatpush.msrb.mxu1 %v1212_v13 }
  0xc8   :  { %v9514_v8 = vpop.f32.mrf.mxu3  ;;  %1420 = vmatpush.msra.mxu0 %v15281_v48  ;;  %v15287_v48 = vand.u32 4294901760, %v9353_v24 }
  0xc9   :  { %716 = vmatmul.f32.gmra.mxu0 %v9167_v62  ;;  %1515 = vmatpush.msra.mxu1 %v9254_v22 }
  0xca   :  { %781 = vmatmul.f32.gmra.mxu1 %v9176_v1  ;;  %v176_v1 = vadd.f32 %v9277_v33, %v9528_v32 }
  0xcb   :  { %1517 = vmatpush.msra.mxu1 %v9264_v26  ;;  %v15282_v26 = vand.u32 4294901760, %v9271_v30 }
  0xcc   :  { %844 = vmatmul.f32.gmra.mxu2 %v9178_v2  ;;  %v263_v30 = vadd.f32 %v9283_v38, %v176_v1  ;;  %v184_v38 = vadd.f32 %v9312_v61, %v9528_v32  ;;  %v15288_v61 = vand.u32 4294901760, %v9367_v46 }
  0xcd   :  { %895 = vmatmul.f32.gmra.mxu3 %v9178_v2  ;;  %1519 = vmatpush.msra.mxu1 %v9281_v36  ;;  %v15284_v36 = vand.u32 4294901760, %v9307_v56  ;;  %v1013_v56 = vld [vmem:[#allocation2 + $0x1f0] sm:$0xff] }
  0xce   :  { %v9532_v13 = vpop.f32.mrf.mxu0  ;;  %1424 = vmatpush.msra.mxu0 %v15282_v26  ;;  %v317_v1 = vadd.f32 %v9285_v39, %v263_v30  ;;  %v1009_v30 = vld [vmem:[#allocation2 + $0x1d0] sm:$0xff] }
  0xcf   :  { %v9537_v22 = vpop.f32.mrf.mxu1  ;;  %v9539_v62 = vpop.f32.mrf.mxu2  ;;  %1521 = vmatpush.msra.mxu1 %v9300_v53 }
  0xd0   :  { %v9547_v58 = vpop.f32.mrf.mxu3  ;;  %1428 = vmatpush.msra.mxu0 %v15283_v23 }
  0xd1   :  { %721 = vmatmul.f32.gmra.mxu0 %v9187_v5  ;;  %1523 = vmatpush.msra.mxu1 %v9317_v4 }
  0xd2   :  { %787 = vmatmul.f32.gmra.mxu1 %v9196_v9  ;;  %1432 = vmatpush.msra.mxu0 %v15284_v36 }
  0xd3   :  { %1525 = vmatpush.msra.mxu1 %v9334_v31  ;;  %v15286_v31 = vand.u32 4294901760, %v9340_v47  ;;  %v267_v47 = vadd.f32 %v9319_v6, %v184_v38  ;;  %v1011_v6 = vld [vmem:[#allocation2 + $0x1e0] sm:$0xff]  ;;  %v9611_v38 = vand.u32 4294901760, %v1009_v30 }
  0xd4   :  { %848 = vmatmul.f32.gmra.mxu2 %v9198_v10  ;;  %1436 = vmatpush.msra.mxu0 %v15285_v44  ;;  %v15290_v44 = vand.u32 4294901760, %v9401_v57 }
  0xd5   :  { %899 = vmatmul.f32.gmra.mxu3 %v9198_v10  ;;  %1527 = vmatpush.msra.mxu1 %v9343_v54  ;;  %v9577_v54 = vand.u32 4294901760, %v1013_v56 }
  0xd6   :  { %v9559_v33 = vpop.f32.mrf.mxu0  ;;  %1440 = vmatpush.msra.mxu0 %v15286_v31 }
  0xd7   :  { %v9564_v53 = vpop.f32.mrf.mxu1  ;;  %v9566_v4 = vpop.f32.mrf.mxu2  ;;  %1529 = vmatpush.msra.mxu1 %v9355_v3  ;;  %1580 = vmatpush.msra.mxu2 %v9577_v54  ;;  %v9585_v39 = vsub.f32 %v1013_v56, %v9577_v54  ;;  %v377_v3 = vadd.f32 %v9295_v45, %v317_v1  ;;  %v9609_v1 = vand.u32 4294901760, %v1011_v6 }
  0xd8   :  { %v9575_v20 = vpop.f32.mrf.mxu3  ;;  %1444 = vmatpush.msra.mxu0 %v15287_v48  ;;  %v9622_v48 = vsub.f32 %v1009_v30, %v9611_v38  ;;  %v15296_v30 = vand.u32 4294901760, %v9455_v14 }
  0xd9   :  { %726 = vmatmul.f32.gmra.mxu0 %v9204_v12  ;;  %1531 = vmatpush.msra.mxu1 %v9374_v60  ;;  %v14899_v24 = vand.u32 4294901760, %v9585_v39  ;;  %v15289_v60 = vand.u32 4294901760, %v9387_v34 }
  0xda   :  { %793 = vmatmul.f32.gmra.mxu1 %v9212_v16  ;;  %1448 = vmatpush.msra.mxu0 %v15288_v61  ;;  %v15292_v61 = vand.u32 4294901760, %v9421_v25  ;;  %v15293_v25 = vand.u32 4294901760, %v9442_v19 }
  0xdb   :  { %1533 = vmatpush.msra.mxu1 %v9389_v27  ;;  %v1679_v46 = vsub.f32 %v9585_v39, %v14899_v24  ;;  %v192_v27 = vadd.f32 %v9357_v49, %v9528_v32  ;;  %v15291_v49 = vand.u32 4294901760, %v9406_v0  ;;  %1582 = vmatpush.msra.mxu2 %v9609_v1  ;;  %v200_v0 = vadd.f32 %v9410_v50, %v9528_v32 }
  0xdc   :  { %1452 = vmatpush.msra.mxu0 %v15289_v60  ;;  %v14897_v60 = vand.u32 4294901760, %v9622_v48 }
  0xdd   :  { %1535 = vmatpush.msra.mxu1 %v9396_v15  ;;  %v322_v15 = vadd.f32 %v9321_v11, %v267_v47  ;;  %v1680_v31 = vand.u32 4294901760, %v1679_v46  ;;  %v271_v11 = vadd.f32 %v9369_v18, %v192_v27  ;;  %1584 = vmatpush.msra.mxu2 %v9611_v38 }
  0xde   :  { %v445_v26 = vpop.f32.mrf.mxu0  ;;  %1456 = vmatpush.msra.mxu0 %v15290_v44  ;;  %v1691_v19 = vsub.f32 %v9622_v48, %v14897_v60  ;;  %v15297_v44 = vld [vmem:[#allocation49_spill] sm:$0xff] }
  0xdf   :  { %v446_v23 = vadd.f32 %v445_v26, %v377_v3  ;;  %v496_v36 = vpop.f32.mrf.mxu1  ;;  %v9601_v45 = vpop.f32.mrf.mxu2  ;;  %1537 = vmatpush.msra.mxu1 %v9408_v42  ;;  %1681 = vmatpush.msra.mxu3 %v1680_v31  ;;  %v9618_v42 = vsub.f32 %v1011_v6, %v9609_v1  ;;  %v1005_v6 = vld [vmem:[#allocation2 + $0x1b0] sm:$0xff] }
  0xe0   :  { %v9607_v56 = vpop.f32.mrf.mxu3  ;;  %1460 = vmatpush.msra.mxu0 %v15291_v49  ;;  %v1692_v14 = vand.u32 4294901760, %v1691_v19 }
  0xe1   :  { %v497_v34 = vadd.f32 %v496_v36, %v446_v23  ;;  %1539 = vmatpush.msra.mxu1 %v9423_v43  ;;  %v383_v43 = vadd.f32 %v9331_v29, %v322_v15  ;;  %v14898_v47 = vand.u32 4294901760, %v9618_v42  ;;  %v15294_v29 = vld [vmem:[#allocation47_spill] sm:$0xff]  ;;  %v275_v15 = vadd.f32 %v15297_v44, %v200_v0 }
  0xe2   :  { %1464 = vmatpush.msra.mxu0 %v15292_v61  ;;  %v327_v23 = vadd.f32 %v15294_v29, %v271_v11  ;;  %v208_v11 = vadd.f32 %v9466_v41, %v9528_v32  ;;  %v15299_v0 = vand.u32 4294901760, %v9471_v35  ;;  %v15300_v41 = vld [vmem:[#allocation48_spill] sm:$0xff]  ;;  %v1003_v35 = vld [vmem:[#allocation2 + $0x1a0] sm:$0xff]  ;;  %v15302_v29 = vld [vmem:[#allocation50_spill] sm:$0xff] }
  0xe3   :  { %vm903_vm1 = vcmp.gt.f32.partialorder %v497_v34, 0.0  ;;  %v919_v57 = vmul.f32 0.01, %v497_v34  ;;  %1541 = vmatpush.msra.mxu1 %v9445_v7  ;;  %v1685_v50 = vsub.f32 %v9618_v42, %v14898_v47 }
  0xe4   :  { %1468 = vmatpush.msra.mxu0 %v15293_v25 }
  0xe5   :  { %v935_v3 = vsel %vm903_vm1, %v497_v34, %v919_v57  ;;  %1543 = vmatpush.msra.mxu1 %v9457_v28  ;;  %v1007_v28 = vld [vmem:[#allocation2 + $0x1c0] sm:$0xff]  ;;  %v1686_v49 = vand.u32 4294901760, %v1685_v50  ;;  %v15301_v50 = vand.u32 4294901760, %v9476_v21 }
  0xe6   :  { %v9632_v26 = vand.u32 4294901760, %v935_v3  ;;  %v449_v18 = vpop.f32.mrf.mxu0  ;;  %1472 = vmatpush.msra.mxu0 %v15296_v30  ;;  %v9656_v57 = vand.u32 4294901760, %v1007_v28  ;;  %v15303_v30 = vld [vmem:[#allocation52_spill] sm:$0xff] }
  0xe7   :  { %v450_v7 = vadd.f32 %v449_v18, %v383_v43  ;;  %v500_v27 = vpop.f32.mrf.mxu1  ;;  %v9646_v36 = vpop.f32.mrf.mxu2  ;;  %1545 = vmatpush.msra.mxu1 %v9464_v51  ;;  %v9665_v43 = vand.u32 4294901760, %v1005_v6  ;;  %1687 = vmatpush.msra.mxu3 %v1686_v49  ;;  %v389_v18 = vadd.f32 %v15300_v41, %v327_v23  ;;  %v9685_v23 = vand.u32 4294901760, %v1003_v35  ;;  %v1001_v41 = vld [vmem:[#allocation2 + $0x190] sm:$0xff] }
  0xe8   :  { %v9643_v46 = vsub.f32 %v935_v3, %v9632_v26  ;;  %1215 = vmatmul.f32.vlgmr.msrb.gmra.mxu1 %v9632_v26  ;;  %v9654_v31 = vpop.f32.mrf.mxu3  ;;  %1476 = vmatpush.msra.mxu0 %v15299_v0  ;;  %v9671_v51 = vsub.f32 %v1007_v28, %v9656_v57  ;;  %v279_v44 = vadd.f32 %v15303_v30, %v208_v11  ;;  %v9701_v11 = vand.u32 4294901760, %v1001_v41  ;;  %v15307_v30 = vld [vmem:[#allocation51_spill] sm:$0xff] }
  0xe9   :  { %v501_v34 = vadd.f32 %v500_v27, %v450_v7  ;;  %1586 = vmatpush.msra.mxu2 %v9656_v57  ;;  %v9678_v7 = vsub.f32 %v1005_v6, %v9665_v43  ;;  %v332_v27 = vadd.f32 %v15302_v29, %v275_v15  ;;  %1693 = vmatpush.msra.mxu3 %v1692_v14  ;;  %v999_v29 = vld [vmem:[#allocation2 + $0x180] sm:$0xff] }
  0xea   :  { %15295 = vst [vmem:[#allocation47_spill] sm:$0xff] %v9643_v46  ;;  %1297 = vmatmul.f32.vlgmr.msrb.gmra.mxu2 %v9643_v46  ;;  %v9663_v61 = vand.u32 4294901760, %v9643_v46  ;;  %1480 = vmatpush.msra.mxu0 %v15301_v50  ;;  %v14896_v28 = vand.u32 4294901760, %v9671_v51  ;;  %v9699_v14 = vsub.f32 %v1003_v35, %v9685_v23 }
  0xeb   :  { %vm905_vm2 = vcmp.gt.f32.partialorder %v501_v34, 0.0  ;;  %v921_v3 = vmul.f32 0.01, %v501_v34  ;;  %1588 = vmatpush.msra.mxu2 %v9665_v43  ;;  %v14900_v21 = vand.u32 4294901760, %v9678_v7  ;;  %1895 = vmatpush.msrb.mxu1 %v9577_v54  ;;  %v395_v35 = vadd.f32 %v15307_v30, %v332_v27 }
  0xec   :  { %15298 = vst [vmem:[#allocation49_spill] sm:$0xff] %v9663_v61  ;;  %1371 = vmatmul.f32.vlgmr.msrb.gmra.mxu3 %v9663_v61  ;;  %v1056_v25 = vsub.f32 %v9643_v46, %v9663_v61  ;;  %v9726_v27 = vand.u32 4294901760, %v999_v29 }
  0xed   :  { %v937_v19 = vsel %vm905_vm2, %v501_v34, %v921_v3  ;;  %v1697_v34 = vsub.f32 %v9671_v51, %v14896_v28  ;;  %1590 = vmatpush.msra.mxu2 %v9685_v23  ;;  %v1703_v50 = vsub.f32 %v9678_v7, %v14900_v21  ;;  %v9724_v21 = vsub.f32 %v1001_v41, %v9701_v11 }
  0xee   :  { %v9688_v49 = vand.u32 4294901760, %v937_v19  ;;  %v453_v6 = vpop.f32.mrf.mxu0  ;;  %v9690_v0 = vand.u32 4294901760, %v1056_v25  ;;  %1897 = vmatpush.msrb.mxu1 %v9609_v1 }
  0xef   :  { %v454_v15 = vadd.f32 %v453_v6, %v389_v18  ;;  %v504_v25 = vpop.f32.mrf.mxu1  ;;  %v9708_v18 = vpop.f32.mrf.mxu2  ;;  %v1698_v60 = vand.u32 4294901760, %v1697_v34  ;;  %1592 = vmatpush.msra.mxu2 %v9701_v11  ;;  %v1704_v24 = vand.u32 4294901760, %v1703_v50  ;;  %v337_v34 = vadd.f32 %v9480_v52, %v279_v44 }
  0xf0   :  { %15304 = vst [vmem:[#allocation48_spill] sm:$0xff] %v9688_v49  ;;  %v9704_v3 = vsub.f32 %v937_v19, %v9688_v49  ;;  %1058 = vmatmul.f32.vlgmr.msrb.gmra.mxu0 %v9690_v0  ;;  %1219 = vmatmul.f32.gmra.mxu1 %v9688_v49  ;;  %v9714_v28 = vpop.f32.mrf.mxu3  ;;  %v14901_v19 = vand.u32 4294901760, %v9699_v14  ;;  %v9740_v52 = vsub.f32 %v999_v29, %v9726_v27  ;;  %v15312_v29 = vand.u32 4294901760, %v9724_v21  ;;  %v985_v49 = vld [vmem:[#allocation2 + $0x110] sm:$0xff] }
  0xf1   :  { %15305 = vst [vmem:[#allocation50_spill] sm:$0xff] %v9690_v0  ;;  %v505_v6 = vadd.f32 %v504_v25, %v454_v15  ;;  %1807 = vmatpush.msrb.mxu0 %v9585_v39  ;;  %v997_v15 = vld [vmem:[#allocation2 + $0x170] sm:$0xff]  ;;  %1699 = vmatpush.msra.mxu3 %v1698_v60  ;;  %v995_v60 = vld [vmem:[#allocation2 + $0x160] sm:$0xff] }
  0xf2   :  { %15306 = vst [vmem:[#allocation52_spill] sm:$0xff] %v9704_v3  ;;  %1302 = vmatmul.f32.gmra.mxu2 %v9704_v3  ;;  %v9721_v47 = vand.u32 4294901760, %v9704_v3  ;;  %v1709_v30 = vsub.f32 %v9699_v14, %v14901_v19  ;;  %v9742_v44 = vand.u32 4294901760, %v997_v15  ;;  %v216_v19 = vadd.f32 %v9504_v37, %v9528_v32  ;;  %v993_v37 = vld [vmem:[#allocation2 + $0x150] sm:$0xff]  ;;  %1899 = vmatpush.msrb.mxu1 %v9611_v38  ;;  %v987_v0 = vld [vmem:[#allocation2 + $0x120] sm:$0xff] }
  0xf3   :  { %15308 = vst [vmem:[#allocation51_spill] sm:$0xff] %v9714_v28  ;;  %vm907_vm3 = vcmp.gt.f32.partialorder %v505_v6, 0.0  ;;  %v923_v25 = vmul.f32 0.01, %v505_v6  ;;  %1810 = vmatpush.msrb.mxu0 %v9618_v42  ;;  %1594 = vmatpush.msra.mxu2 %v9726_v27  ;;  %v9746_v5 = vand.u32 4294901760, %v995_v60  ;;  %v1715_v2 = vsub.f32 %v9724_v21, %v15312_v29 }
  0xf4   :  { %15309 = vst [vmem:[#allocation53_spill] sm:$0xff] %v9721_v47  ;;  %1377 = vmatmul.f32.gmra.mxu3 %v9721_v47  ;;  %v1064_v41 = vsub.f32 %v9704_v3, %v9721_v47  ;;  %v1710_v16 = vand.u32 4294901760, %v1709_v30  ;;  %v9765_v30 = vand.u32 4294901760, %v993_v37  ;;  %v283_v3 = vadd.f32 %v9509_v40, %v216_v19  ;;  %1901 = vmatpush.msrb.mxu1 %v9656_v57  ;;  %v989_v19 = vld [vmem:[#allocation2 + $0x130] sm:$0xff] }
  0xf5   :  { %v939_v12 = vsel %vm907_vm3, %v505_v6, %v923_v25  ;;  %1705 = vmatpush.msra.mxu3 %v1704_v24  ;;  %1813 = vmatpush.msrb.mxu0 %v9622_v48  ;;  %v9760_v6 = vsub.f32 %v997_v15, %v9742_v44  ;;  %v9763_v25 = vsub.f32 %v995_v60, %v9746_v5  ;;  %v15315_v15 = vand.u32 4294901760, %v9740_v52  ;;  %v991_v60 = vld [vmem:[#allocation2 + $0x140] sm:$0xff] }
  0xf6   :  { %v9749_v9 = vand.u32 4294901760, %v939_v12  ;;  %v457_v50 = vpop.f32.mrf.mxu0  ;;  %v9751_v10 = vand.u32 4294901760, %v1064_v41  ;;  %1596 = vmatpush.msra.mxu2 %v9742_v44  ;;  %v401_v41 = vadd.f32 %v9488_v63, %v337_v34  ;;  %v9791_v40 = vsub.f32 %v993_v37, %v9765_v30  ;;  %1903 = vmatpush.msrb.mxu1 %v9665_v43 }
  0xf7   :  { %v458_v24 = vadd.f32 %v457_v50, %v395_v35  ;;  %1711 = vmatpush.msra.mxu3 %v1710_v16  ;;  %1816 = vmatpush.msrb.mxu0 %v9671_v51  ;;  %v508_v59 = vpop.f32.mrf.mxu1  ;;  %v9774_v16 = vpop.f32.mrf.mxu2  ;;  %v1716_v35 = vand.u32 4294901760, %v1715_v2  ;;  %v1721_v50 = vsub.f32 %v9740_v52, %v15315_v15 }
  0xf8   :  { %15310 = vst [vmem:[#allocation54_spill] sm:$0xff] %v9749_v9  ;;  %v9770_v29 = vsub.f32 %v939_v12, %v9749_v9  ;;  %1066 = vmatmul.f32.gmra.mxu0 %v9751_v10  ;;  %1223 = vmatmul.f32.gmra.mxu1 %v9749_v9  ;;  %v9780_v63 = vpop.f32.mrf.mxu3  ;;  %v14921_v12 = vand.u32 4294901760, %v9760_v6  ;;  %v9814_v9 = vand.u32 4294901760, %v989_v19 }
  0xf9   :  { %15311 = vst [vmem:[#allocation55_spill] sm:$0xff] %v9751_v10  ;;  %v509_v47 = vadd.f32 %v508_v59, %v458_v24  ;;  %1598 = vmatpush.msra.mxu2 %v9746_v5  ;;  %1717 = vmatpush.msra.mxu3 %v1716_v35  ;;  %v1722_v15 = vand.u32 4294901760, %v1721_v50  ;;  %v9793_v59 = vand.u32 4294901760, %v991_v60  ;;  %v224_v24 = vadd.f32 %v9532_v13, %v9528_v32 }
  0xfa   :  { %15313 = vst [vmem:[#allocation56_spill] sm:$0xff] %v9770_v29  ;;  %1307 = vmatmul.f32.gmra.mxu2 %v9770_v29  ;;  %v9788_v2 = vand.u32 4294901760, %v9770_v29  ;;  %v1727_v10 = vsub.f32 %v9760_v6, %v14921_v12  ;;  %1819 = vmatpush.msrb.mxu0 %v9678_v7  ;;  %v15318_v35 = vand.u32 4294901760, %v9763_v25 }
  0xfb   :  { %15314 = vst [vmem:[#allocation57_spill] sm:$0xff] %v9774_v16  ;;  %vm909_vm4 = vcmp.gt.f32.partialorder %v509_v47, 0.0  ;;  %v925_v34 = vmul.f32 0.01, %v509_v47  ;;  %1600 = vmatpush.msra.mxu2 %v9765_v30  ;;  %v9810_v46 = vsub.f32 %v991_v60, %v9793_v59  ;;  %1723 = vmatpush.msra.mxu3 %v1722_v15  ;;  %v15321_v60 = vand.u32 4294901760, %v9791_v40 }
  0xfc   :  { %15316 = vst [vmem:[#allocation58_spill] sm:$0xff] %v9780_v63  ;;  %1383 = vmatmul.f32.gmra.mxu3 %v9788_v2  ;;  %v1072_v37 = vsub.f32 %v9770_v29, %v9788_v2  ;;  %v1733_v50 = vsub.f32 %v9763_v25, %v15318_v35  ;;  %v1728_v61 = vand.u32 4294901760, %v1727_v10  ;;  %v9816_v29 = vand.u32 4294901760, %v987_v0  ;;  %1822 = vmatpush.msrb.mxu0 %v9699_v14 }
  0xfd   :  { %15317 = vst [vmem:[#allocation59_spill] sm:$0xff] %v9788_v2  ;;  %v941_v12 = vsel %vm909_vm4, %v509_v47, %v925_v34  ;;  %1602 = vmatpush.msra.mxu2 %v9793_v59  ;;  %v1739_v16 = vsub.f32 %v9791_v40, %v15321_v60  ;;  %1905 = vmatpush.msrb.mxu1 %v9685_v23  ;;  %v983_v60 = vld [vmem:[#allocation2 + $0x100] sm:$0xff] }
  0xfe   :  { %v9818_v2 = vand.u32 4294901760, %v941_v12  ;;  %v461_v35 = vpop.f32.mrf.mxu0  ;;  %v9820_v63 = vand.u32 4294901760, %v1072_v37  ;;  %v1734_v13 = vand.u32 4294901760, %v1733_v50  ;;  %1729 = vmatpush.msra.mxu3 %v1728_v61  ;;  %v9830_v34 = vsub.f32 %v989_v19, %v9814_v9  ;;  %1825 = vmatpush.msrb.mxu0 %v9724_v21 }
  0xff   :  { %v462_v10 = vadd.f32 %v461_v35, %v401_v41  ;;  %1604 = vmatpush.msra.mxu2 %v9814_v9  ;;  %v9833_v15 = vsub.f32 %v987_v0, %v9816_v29  ;;  %v512_v50 = vpop.f32.mrf.mxu1  ;;  %v9840_v41 = vpop.f32.mrf.mxu2  ;;  %v1740_v61 = vand.u32 4294901760, %v1739_v16  ;;  %v9842_v35 = vand.u32 4294901760, %v985_v49  ;;  %1907 = vmatpush.msrb.mxu1 %v9701_v11 }
 0x100   :  { %15319 = vst [vmem:[#allocation60_spill] sm:$0xff] %v9818_v2  ;;  %v9836_v37 = vsub.f32 %v941_v12, %v9818_v2  ;;  %1074 = vmatmul.f32.gmra.mxu0 %v9820_v63  ;;  %1227 = vmatmul.f32.gmra.mxu1 %v9818_v2  ;;  %v342_v19 = vadd.f32 %v9511_v17, %v283_v3  ;;  %v9845_v28 = vpop.f32.mrf.mxu3  ;;  %v15325_v0 = vand.u32 4294901760, %v9810_v46  ;;  %v9860_v3 = vand.u32 4294901760, %v983_v60 }
 0x101   :  { %15320 = vst [vmem:[#allocation61_spill] sm:$0xff] %v9820_v63  ;;  %v513_v47 = vadd.f32 %v512_v50, %v462_v10  ;;  %1735 = vmatpush.msra.mxu3 %v1734_v13  ;;  %v14933_v63 = vand.u32 4294901760, %v9830_v34  ;;  %1606 = vmatpush.msra.mxu2 %v9816_v29  ;;  %v14935_v2 = vand.u32 4294901760, %v9833_v15  ;;  %v9858_v17 = vsub.f32 %v985_v49, %v9842_v35 }
 0x102   :  { %15322 = vst [vmem:[#allocation62_spill] sm:$0xff] %v9836_v37  ;;  %v1745_v12 = vsub.f32 %v9810_v46, %v15325_v0  ;;  %1312 = vmatmul.f32.gmra.mxu2 %v9836_v37  ;;  %v9854_v16 = vand.u32 4294901760, %v9836_v37  ;;  %v287_v13 = vadd.f32 %v9537_v22, %v224_v24  ;;  %v407_v24 = vadd.f32 %v9514_v8, %v342_v19 }
 0x103   :  { %15323 = vst [vmem:[#allocation63_spill] sm:$0xff] %v9840_v41  ;;  %vm911_vm5 = vcmp.gt.f32.partialorder %v513_v47, 0.0  ;;  %v927_v10 = vmul.f32 0.01, %v513_v47  ;;  %1741 = vmatpush.msra.mxu3 %v1740_v61  ;;  %1608 = vmatpush.msra.mxu2 %v9842_v35  ;;  %v1751_v49 = vsub.f32 %v9830_v34, %v14933_v63 }
 0x104   :  { %15324 = vst [vmem:[#allocation64_spill] sm:$0xff] %v9845_v28  ;;  %v1746_v50 = vand.u32 4294901760, %v1745_v12  ;;  %1389 = vmatmul.f32.gmra.mxu3 %v9854_v16  ;;  %v1080_v0 = vsub.f32 %v9836_v37, %v9854_v16  ;;  %v1757_v28 = vsub.f32 %v9833_v15, %v14935_v2  ;;  %v9878_v12 = vsub.f32 %v983_v60, %v9860_v3 }
 0x105   :  { %15326 = vst [vmem:[#allocation65_spill] sm:$0xff] %v9854_v16  ;;  %v943_v61 = vsel %vm911_vm5, %v513_v47, %v927_v10  ;;  %1610 = vmatpush.msra.mxu2 %v9860_v3  ;;  %v1752_v41 = vand.u32 4294901760, %v1751_v49  ;;  %v15329_v2 = vand.u32 4294901760, %v9585_v39  ;;  %1828 = vmatpush.msrb.mxu0 %v9740_v52  ;;  %v15330_v47 = vand.u32 4294901760, %v9858_v17 }
 0x106   :  { %1747 = vmatpush.msra.mxu3 %v1746_v50  ;;  %v9881_v37 = vand.u32 4294901760, %v943_v61  ;;  %v465_v63 = vpop.f32.mrf.mxu0  ;;  %v9883_v16 = vand.u32 4294901760, %v1080_v0  ;;  %v1758_v8 = vand.u32 4294901760, %v1757_v28  ;;  %v1768_v19 = vand.u32 4294901760, %v9878_v12  ;;  %1909 = vmatpush.msrb.mxu1 %v9726_v27 }
 0x107   :  { %1978 = vmatpush.msrb.mxu2 %v15329_v2  ;;  %v466_v22 = vadd.f32 %v465_v63, %v407_v24  ;;  %v1763_v60 = vsub.f32 %v9858_v17, %v15330_v47  ;;  %v347_v10 = vadd.f32 %v9539_v62, %v287_v13  ;;  %v516_v0 = vpop.f32.mrf.mxu1  ;;  %v9899_v39 = vpop.f32.mrf.mxu2  ;;  %v232_v28 = vadd.f32 %v9559_v33, %v9528_v32 }
 0x108   :  { %15327 = vst [vmem:[#allocation66_spill] sm:$0xff] %v9881_v37  ;;  %v9895_v50 = vsub.f32 %v943_v61, %v9881_v37  ;;  %1082 = vmatmul.f32.gmra.mxu0 %v9883_v16  ;;  %1231 = vmatmul.f32.gmra.mxu1 %v9881_v37  ;;  %v9903_v2 = vpop.f32.mrf.mxu3  ;;  %v1769_v62 = vsub.f32 %v9878_v12, %v1768_v19  ;;  %v15332_v13 = vand.u32 4294901760, %v9618_v42 }
 0x109   :  { %15328 = vst [vmem:[#allocation67_spill] sm:$0xff] %v9883_v16  ;;  %v517_v63 = vadd.f32 %v516_v0, %v466_v22  ;;  %1753 = vmatpush.msra.mxu3 %v1752_v41  ;;  %v1764_v49 = vand.u32 4294901760, %v1763_v60  ;;  %1831 = vmatpush.msrb.mxu0 %v9760_v6  ;;  %v15334_v41 = vand.u32 4294901760, %v9622_v48  ;;  %v413_v22 = vadd.f32 %v9547_v58, %v347_v10 }
 0x10a   :  { %15331 = vst [vmem:[#allocation68_spill] sm:$0xff] %v9895_v50  ;;  %1982 = vmatpush.msrb.mxu2 %v15332_v13  ;;  %v9912_v24 = vand.u32 4294901760, %v9895_v50  ;;  %v1770_v33 = vand.u32 4294901760, %v1769_v62  ;;  %1911 = vmatpush.msrb.mxu1 %v9742_v44  ;;  %v291_v61 = vadd.f32 %v9564_v53, %v232_v28  ;;  %v15335_v60 = vand.u32 4294901760, %v9671_v51 }
 0x10b   :  { %1317 = vmatmul.f32.gmra.mxu2 %v9895_v50  ;;  %vm913_vm6 = vcmp.gt.f32.partialorder %v517_v63, 0.0  ;;  %v929_v32 = vmul.f32 0.01, %v517_v63  ;;  %1759 = vmatpush.msra.mxu3 %v1758_v8  ;;  %v15338_v58 = vand.u32 4294901760, %v9678_v7  ;;  %v15340_v7 = vand.u32 4294901760, %v9699_v14 }
 0x10c   :  { %15333 = vst [vmem:[#allocation69_spill] sm:$0xff] %v9912_v24  ;;  %1986 = vmatpush.msrb.mxu2 %v15334_v41  ;;  %1395 = vmatmul.f32.gmra.mxu3 %v9912_v24  ;;  %v1088_v42 = vsub.f32 %v9895_v50, %v9912_v24  ;;  %v352_v28 = vadd.f32 %v9566_v4, %v291_v61  ;;  %v15342_v4 = vand.u32 4294901760, %v9724_v21 }
 0x10d   :  { %v945_v47 = vsel %vm913_vm6, %v517_v63, %v929_v32  ;;  %1765 = vmatpush.msra.mxu3 %v1764_v49  ;;  %1834 = vmatpush.msrb.mxu0 %v9763_v25 }
 0x10e   :  { %1990 = vmatpush.msrb.mxu2 %v15335_v60  ;;  %v9925_v8 = vand.u32 4294901760, %v945_v47  ;;  %v469_v48 = vpop.f32.mrf.mxu0  ;;  %v9927_v0 = vand.u32 4294901760, %v1088_v42  ;;  %1913 = vmatpush.msrb.mxu1 %v9746_v5  ;;  %v419_v14 = vadd.f32 %v9575_v20, %v352_v28 }
 0x10f   :  { %v470_v62 = vadd.f32 %v469_v48, %v413_v22  ;;  %1771 = vmatpush.msra.mxu3 %v1770_v33  ;;  %v520_v10 = vpop.f32.mrf.mxu1  ;;  %v9938_v51 = vpop.f32.mrf.mxu2  ;;  %1837 = vmatpush.msrb.mxu0 %v9791_v40  ;;  %v9960_v33 = vperm.slane %v9520_v55, 1  ;;  %v15346_v55 = vand.u32 4294901760, %v9760_v6 }
 0x110   :  { %15336 = vst [vmem:[#allocation70_spill] sm:$0xff] %v9925_v8  ;;  %1994 = vmatpush.msrb.mxu2 %v15338_v58  ;;  %v9934_v53 = vsub.f32 %v945_v47, %v9925_v8  ;;  %1090 = vmatmul.f32.gmra.mxu0 %v9927_v0  ;;  %v9941_v49 = vpop.f32.mrf.mxu3 }
 0x111   :  { %15337 = vst [vmem:[#allocation71_spill] sm:$0xff] %v9927_v0  ;;  %1235 = vmatmul.f32.gmra.mxu1 %v9925_v8  ;;  %v521_v63 = vadd.f32 %v520_v10, %v470_v62  ;;  %2073 = vmatpush.msrb.mxu3 %v9577_v54  ;;  %v552_v47 = vadd.f32 %v9601_v45, %v9960_v33  ;;  %v15350_v45 = vand.u32 4294901760, %v9791_v40  ;;  %v15351_v10 = vand.u32 4294901760, %v9810_v46 }
 0x112   :  { %15339 = vst [vmem:[#allocation72_spill] sm:$0xff] %v9934_v53  ;;  %1998 = vmatpush.msrb.mxu2 %v15340_v7  ;;  %v9948_v13 = vand.u32 4294901760, %v9934_v53  ;;  %1915 = vmatpush.msrb.mxu1 %v9765_v30 }
 0x113   :  { %1322 = vmatmul.f32.gmra.mxu2 %v9934_v53  ;;  %vm915_vm7 = vcmp.gt.f32.partialorder %v521_v63, 0.0  ;;  %v931_v32 = vmul.f32 0.01, %v521_v63  ;;  %2075 = vmatpush.msrb.mxu3 %v9609_v1  ;;  %v15343_v1 = vand.u32 4294901760, %v9740_v52 }
 0x114   :  { %15341 = vst [vmem:[#allocation73_spill] sm:$0xff] %v9948_v13  ;;  %2002 = vmatpush.msrb.mxu2 %v15342_v4  ;;  %1401 = vmatmul.f32.gmra.mxu3 %v9948_v13  ;;  %v1096_v54 = vsub.f32 %v9934_v53, %v9948_v13 }
 0x115   :  { %v947_v41 = vsel %vm915_vm7, %v521_v63, %v931_v32  ;;  %2077 = vmatpush.msrb.mxu3 %v9611_v38  ;;  %1917 = vmatpush.msrb.mxu1 %v9793_v59  ;;  %v560_v32 = vadd.f32 %v9646_v36, %v9960_v33 }
 0x116   :  { %2006 = vmatpush.msrb.mxu2 %v15343_v1  ;;  %v9965_v21 = vand.u32 4294901760, %v947_v41  ;;  %v473_v42 = vpop.f32.mrf.mxu0  ;;  %v9967_v22 = vand.u32 4294901760, %v1096_v54  ;;  %1840 = vmatpush.msrb.mxu0 %v9810_v46  ;;  %v15358_v1 = vand.u32 4294901760, %v9858_v17 }
 0x117   :  { %v474_v61 = vadd.f32 %v473_v42, %v419_v14  ;;  %2079 = vmatpush.msrb.mxu3 %v9656_v57  ;;  %v524_v38 = vpop.f32.mrf.mxu1  ;;  %v9979_v52 = vpop.f32.mrf.mxu2  ;;  %v15348_v57 = vand.u32 4294901760, %v9763_v25  ;;  %1919 = vmatpush.msrb.mxu1 %v9814_v9  ;;  %v639_v25 = vadd.f32 %v9607_v56, %v552_v47  ;;  %v15354_v56 = vand.u32 4294901760, %v9830_v34 }
 0x118   :  { %15344 = vst [vmem:[#allocation74_spill] sm:$0xff] %v9965_v21  ;;  %2010 = vmatpush.msrb.mxu2 %v15346_v55  ;;  %v9975_v20 = vsub.f32 %v947_v41, %v9965_v21  ;;  %1098 = vmatmul.f32.gmra.mxu0 %v9967_v22  ;;  %v9983_v48 = vpop.f32.mrf.mxu3  ;;  %v15357_v14 = vand.u32 4294901760, %v9833_v15 }
 0x119   :  { %15345 = vst [vmem:[#allocation75_spill] sm:$0xff] %v9967_v22  ;;  %1239 = vmatmul.f32.gmra.mxu1 %v9965_v21  ;;  %v525_v60 = vadd.f32 %v524_v38, %v474_v61  ;;  %2081 = vmatpush.msrb.mxu3 %v9665_v43 }
 0x11a   :  { %15347 = vst [vmem:[#allocation76_spill] sm:$0xff] %v9975_v20  ;;  %2014 = vmatpush.msrb.mxu2 %v15348_v57  ;;  %v9990_v6 = vand.u32 4294901760, %v9975_v20  ;;  %1921 = vmatpush.msrb.mxu1 %v9816_v29 }
 0x11b   :  { %1327 = vmatmul.f32.gmra.mxu2 %v9975_v20  ;;  %vm917_vm8 = vcmp.gt.f32.partialorder %v525_v60, 0.0  ;;  %v933_v62 = vmul.f32 0.01, %v525_v60  ;;  %2083 = vmatpush.msrb.mxu3 %v9685_v23 }
 0x11c   :  { %15349 = vst [vmem:[#allocation77_spill] sm:$0xff] %v9990_v6  ;;  %2018 = vmatpush.msrb.mxu2 %v15350_v45  ;;  %1407 = vmatmul.f32.gmra.mxu3 %v9990_v6  ;;  %v1104_v43 = vsub.f32 %v9975_v20, %v9990_v6  ;;  %v968_v20 = vld [vmem:[#allocation2 + $0x88] sm:$0xff] }
 0x11d   :  { %v949_v58 = vsel %vm917_vm8, %v525_v60, %v933_v62  ;;  %2085 = vmatpush.msrb.mxu3 %v9701_v11  ;;  %1923 = vmatpush.msrb.mxu1 %v9842_v35  ;;  %v10280_v53 = vand.u32 4294901760, %v968_v20 }
 0x11e   :  { %2022 = vmatpush.msrb.mxu2 %v15351_v10  ;;  %v10004_v28 = vand.u32 4294901760, %v949_v58  ;;  %v692_v23 = vpop.f32.mrf.mxu0  ;;  %v10006_v40 = vand.u32 4294901760, %v1104_v43  ;;  %1843 = vmatpush.msrb.mxu0 %v9830_v34 }
 0x11f   :  { %v693_v63 = vadd.f32 %v692_v23, %v639_v25  ;;  %2087 = vmatpush.msrb.mxu3 %v9726_v27  ;;  %v752_v46 = vpop.f32.mrf.mxu1  ;;  %v821_v7 = vpop.f32.mrf.mxu2  ;;  %1925 = vmatpush.msrb.mxu1 %v9860_v3  ;;  %v15364_v25 = vld [vmem:[#allocation48_spill] sm:$0xff] }
 0x120   :  { %15352 = vst [vmem:[#allocation78_spill] sm:$0xff] %v10004_v28  ;;  %2026 = vmatpush.msrb.mxu2 %v15354_v56  ;;  %v10014_v11 = vsub.f32 %v949_v58, %v10004_v28  ;;  %1106 = vmatmul.f32.gmra.mxu0 %v10006_v40  ;;  %v872_v54 = vpop.f32.mrf.mxu3 }
 0x121   :  { %15353 = vst [vmem:[#allocation79_spill] sm:$0xff] %v10006_v40  ;;  %1243 = vmatmul.f32.gmra.mxu1 %v10004_v28  ;;  %v753_v4 = vadd.f32 %v752_v46, %v693_v63  ;;  %2089 = vmatpush.msrb.mxu3 %v9742_v44  ;;  %v643_v44 = vadd.f32 %v9654_v31, %v560_v32 }
 0x122   :  { %15355 = vst [vmem:[#allocation80_spill] sm:$0xff] %v10014_v11  ;;  %v10024_v27 = vand.u32 4294901760, %v10014_v11  ;;  %1846 = vmatpush.msrb.mxu0 %v9833_v15  ;;  %2030 = vmatpush.msrb.mxu2 %v15357_v14 }
 0x123   :  { %1332 = vmatmul.f32.gmra.mxu2 %v10014_v11  ;;  %v822_v34 = vadd.f32 %v821_v7, %v753_v4  ;;  %2091 = vmatpush.msrb.mxu3 %v9746_v5 }
 0x124   :  { %15356 = vst [vmem:[#allocation81_spill] sm:$0xff] %v10024_v27  ;;  %1413 = vmatmul.f32.gmra.mxu3 %v10024_v27  ;;  %v1112_v36 = vsub.f32 %v10014_v11, %v10024_v27  ;;  %1849 = vmatpush.msrb.mxu0 %v9858_v17  ;;  %v568_v17 = vadd.f32 %v9708_v18, %v9960_v33 }
 0x125   :  { %v873_v41 = vadd.f32 %v872_v54, %v822_v34  ;;  %2093 = vmatpush.msrb.mxu3 %v9765_v30  ;;  %2034 = vmatpush.msrb.mxu2 %v15358_v1  ;;  %v15369_v54 = vld [vmem:[#allocation58_spill] sm:$0xff] }
 0x126   :  { %v697_v42 = vpop.f32.mrf.mxu0  ;;  %v10038_v5 = vand.u32 4294901760, %v1112_v36  ;;  %1852 = vmatpush.msrb.mxu0 %v9878_v12 }
 0x127   :  { %vm904_vm9 = vcmp.gt.f32.partialorder %v873_v41, 0.0  ;;  %v920_v15 = vmul.f32 0.01, %v873_v41  ;;  %v698_v61 = vadd.f32 %v697_v42, %v643_v44  ;;  %2095 = vmatpush.msrb.mxu3 %v9793_v59  ;;  %2038 = vmatpush.msrb.mxu2 %v1768_v19  ;;  %v758_v31 = vpop.f32.mrf.mxu1  ;;  %v825_v30 = vpop.f32.mrf.mxu2  ;;  %v15362_v19 = vld [vmem:[#allocation51_spill] sm:$0xff] }
 0x128   :  { %15359 = vst [vmem:[#allocation82_spill] sm:$0xff] %v10038_v5  ;;  %1114 = vmatmul.f32.gmra.mxu0 %v10038_v5  ;;  %v876_v47 = vpop.f32.mrf.mxu3  ;;  %v647_v57 = vadd.f32 %v15362_v19, %v568_v17 }
 0x129   :  { %1547 = vmatmul.f32.vlgmr.msra.gmra.mxu1 %v9632_v26  ;;  %v936_v55 = vsel %vm904_vm9, %v873_v41, %v920_v15  ;;  %v759_v38 = vadd.f32 %v758_v31, %v698_v61  ;;  %2097 = vmatpush.msrb.mxu3 %v9814_v9  ;;  %v15371_v15 = vld [vmem:[#allocation54_spill] sm:$0xff] }
 0x12a   :  { %v10049_v60 = vand.u32 4294901760, %v936_v55 }
 0x12b   :  { %v826_v59 = vadd.f32 %v825_v30, %v759_v38  ;;  %2099 = vmatpush.msrb.mxu3 %v9816_v29  ;;  %v15372_v30 = vld [vmem:[#allocation63_spill] sm:$0xff] }
 0x12c   :  { %15360 = vst [vmem:[#allocation83_spill] sm:$0xff] %v10049_v60  ;;  %v10053_v12 = vsub.f32 %v936_v55, %v10049_v60  ;;  %1773 = vmatmul.f32.vlgmr.msra.gmra.mxu3 %v10049_v60  ;;  %v584_v17 = vadd.f32 %v15372_v30, %v9960_v33 }
 0x12d   :  { %v877_v62 = vadd.f32 %v876_v47, %v826_v59  ;;  %2101 = vmatpush.msrb.mxu3 %v9842_v35  ;;  %v15365_v35 = vld [vmem:[#allocation57_spill] sm:$0xff] }
 0x12e   :  { %15361 = vst [vmem:[#allocation84_spill] sm:$0xff] %v10053_v12  ;;  %v10059_v18 = vand.u32 4294901760, %v10053_v12  ;;  %v702_v45 = vpop.f32.mrf.mxu0  ;;  %v576_v23 = vadd.f32 %v15365_v35, %v9960_v33 }
 0x12f   :  { %vm906_vm10 = vcmp.gt.f32.partialorder %v877_v62, 0.0  ;;  %v922_v9 = vmul.f32 0.01, %v877_v62  ;;  %v703_v43 = vadd.f32 %v702_v45, %v647_v57  ;;  %2103 = vmatpush.msrb.mxu3 %v9860_v3  ;;  %v764_v29 = vpop.f32.mrf.mxu1  ;;  %v829_v58 = vpop.f32.mrf.mxu2  ;;  %v15375_v45 = vld [vmem:[#allocation64_spill] sm:$0xff] }
 0x130   :  { %15363 = vst [vmem:[#allocation51_spill] sm:$0xff] %v10059_v18  ;;  %1482 = vmatmul.f32.vlgmr.msra.gmra.mxu0 %v9632_v26  ;;  %v1614_v10 = vsub.f32 %v10053_v12, %v10059_v18  ;;  %v880_v46 = vpop.f32.mrf.mxu3  ;;  %v651_v34 = vadd.f32 %v15369_v54, %v576_v23 }
 0x131   :  { %1551 = vmatmul.f32.gmra.mxu1 %v15364_v25  ;;  %v938_v63 = vsel %vm906_vm10, %v877_v62, %v922_v9  ;;  %v765_v56 = vadd.f32 %v764_v29, %v703_v43  ;;  %v655_v9 = vadd.f32 %v15375_v45, %v584_v17 }
 0x132   :  { %v10068_v7 = vand.u32 4294901760, %v938_v63  ;;  %v10070_v32 = vand.u32 4294901760, %v1614_v10 }
 0x133   :  { %v830_v3 = vadd.f32 %v829_v58, %v765_v56 }
 0x134   :  { %15366 = vst [vmem:[#allocation57_spill] sm:$0xff] %v10068_v7  ;;  %v10073_v4 = vsub.f32 %v938_v63, %v10068_v7  ;;  %1616 = vmatmul.f32.vlgmr.msra.gmra.mxu2 %v10070_v32  ;;  %1777 = vmatmul.f32.gmra.mxu3 %v10068_v7  ;;  %v15377_v63 = vld [vmem:[#allocation60_spill] sm:$0xff] }
 0x135   :  { %15367 = vst [vmem:[#allocation85_spill] sm:$0xff] %v10070_v32  ;;  %v881_v14 = vadd.f32 %v880_v46, %v830_v3  ;;  %v592_v3 = vadd.f32 %v9899_v39, %v9960_v33 }
 0x136   :  { %15368 = vst [vmem:[#allocation86_spill] sm:$0xff] %v10073_v4  ;;  %v707_v36 = vpop.f32.mrf.mxu0  ;;  %v10079_v44 = vand.u32 4294901760, %v10073_v4 }
 0x137   :  { %vm908_vm11 = vcmp.gt.f32.partialorder %v881_v14, 0.0  ;;  %v924_v41 = vmul.f32 0.01, %v881_v14  ;;  %v708_v1 = vadd.f32 %v707_v36, %v651_v34  ;;  %v770_v42 = vpop.f32.mrf.mxu1  ;;  %v833_v61 = vpop.f32.mrf.mxu2 }
 0x138   :  { %15370 = vst [vmem:[#allocation58_spill] sm:$0xff] %v10079_v44  ;;  %1486 = vmatmul.f32.gmra.mxu0 %v15364_v25  ;;  %v1622_v31 = vsub.f32 %v10073_v4, %v10079_v44  ;;  %v884_v47 = vpop.f32.mrf.mxu3 }
 0x139   :  { %1555 = vmatmul.f32.gmra.mxu1 %v15371_v15  ;;  %v940_v55 = vsel %vm908_vm11, %v881_v14, %v924_v41  ;;  %v771_v38 = vadd.f32 %v770_v42, %v708_v1 }
 0x13a   :  { %v10087_v59 = vand.u32 4294901760, %v940_v55  ;;  %v10089_v19 = vand.u32 4294901760, %v1622_v31 }
 0x13b   :  { %v834_v57 = vadd.f32 %v833_v61, %v771_v38  ;;  %v659_v61 = vadd.f32 %v9903_v2, %v592_v3  ;;  %v600_v2 = vadd.f32 %v9938_v51, %v9960_v33 }
 0x13c   :  { %15373 = vst [vmem:[#allocation63_spill] sm:$0xff] %v10089_v19  ;;  %v10092_v62 = vsub.f32 %v940_v55, %v10087_v59  ;;  %1624 = vmatmul.f32.gmra.mxu2 %v10089_v19  ;;  %1781 = vmatmul.f32.gmra.mxu3 %v10087_v59 }
 0x13d   :  { %v885_v43 = vadd.f32 %v884_v47, %v834_v57 }
 0x13e   :  { %15374 = vst [vmem:[#allocation87_spill] sm:$0xff] %v10092_v62  ;;  %v712_v29 = vpop.f32.mrf.mxu0  ;;  %v10098_v58 = vand.u32 4294901760, %v10092_v62 }
 0x13f   :  { %vm910_vm12 = vcmp.gt.f32.partialorder %v885_v43, 0.0  ;;  %v926_v10 = vmul.f32 0.01, %v885_v43  ;;  %v713_v35 = vadd.f32 %v712_v29, %v655_v9  ;;  %v776_v23 = vpop.f32.mrf.mxu1  ;;  %v837_v56 = vpop.f32.mrf.mxu2 }
 0x140   :  { %15376 = vst [vmem:[#allocation64_spill] sm:$0xff] %v10098_v58  ;;  %1490 = vmatmul.f32.gmra.mxu0 %v15371_v15  ;;  %v1630_v46 = vsub.f32 %v10092_v62, %v10098_v58  ;;  %v888_v14 = vpop.f32.mrf.mxu3 }
 0x141   :  { %1559 = vmatmul.f32.gmra.mxu1 %v15377_v63  ;;  %v942_v54 = vsel %vm910_vm12, %v885_v43, %v926_v10  ;;  %v777_v34 = vadd.f32 %v776_v23, %v713_v35 }
 0x142   :  { %v10106_v36 = vand.u32 4294901760, %v942_v54  ;;  %v10108_v41 = vand.u32 4294901760, %v1630_v46 }
 0x143   :  { %v838_v1 = vadd.f32 %v837_v56, %v777_v34  ;;  %v663_v56 = vadd.f32 %v9941_v49, %v600_v2  ;;  %v608_v49 = vadd.f32 %v9979_v52, %v9960_v33  ;;  %v982_v2 = vld [vmem:[#allocation2 + $0xf8] sm:$0xff] }
 0x144   :  { %15378 = vst [vmem:[#allocation88_spill] sm:$0xff] %v10108_v41  ;;  %v10111_v42 = vsub.f32 %v942_v54, %v10106_v36  ;;  %1632 = vmatmul.f32.gmra.mxu2 %v10108_v41  ;;  %1785 = vmatmul.f32.gmra.mxu3 %v10106_v36  ;;  %v10154_v33 = vand.u32 4294901760, %v982_v2 }
 0x145   :  { %v889_v31 = vadd.f32 %v888_v14, %v838_v1 }
 0x146   :  { %15379 = vst [vmem:[#allocation89_spill] sm:$0xff] %v10111_v42  ;;  %v717_v30 = vpop.f32.mrf.mxu0  ;;  %v10117_v39 = vand.u32 4294901760, %v10111_v42  ;;  %2138 = vmatpush.msra.mxu0 %v10154_v33  ;;  %2453 = vmatpush.msra.mxu3 %v10154_v33 }
 0x147   :  { %vm912_vm13 = vcmp.gt.f32.partialorder %v889_v31, 0.0  ;;  %v928_v17 = vmul.f32 0.01, %v889_v31  ;;  %v718_v55 = vadd.f32 %v717_v30, %v659_v61  ;;  %v782_v38 = vpop.f32.mrf.mxu1  ;;  %v841_v47 = vpop.f32.mrf.mxu2 }
 0x148   :  { %15380 = vst [vmem:[#allocation90_spill] sm:$0xff] %v10117_v39  ;;  %1494 = vmatmul.f32.gmra.mxu0 %v15377_v63  ;;  %v1638_v57 = vsub.f32 %v10111_v42, %v10117_v39  ;;  %v892_v43 = vpop.f32.mrf.mxu3 }
 0x149   :  { %1563 = vmatmul.f32.gmra.mxu1 %v9881_v37  ;;  %v944_v45 = vsel %vm912_vm13, %v889_v31, %v928_v17  ;;  %v783_v9 = vadd.f32 %v782_v38, %v718_v55 }
 0x14a   :  { %v10125_v29 = vand.u32 4294901760, %v944_v45  ;;  %v10127_v10 = vand.u32 4294901760, %v1638_v57 }
 0x14b   :  { %v842_v35 = vadd.f32 %v841_v47, %v783_v9 }
 0x14c   :  { %15381 = vst [vmem:[#allocation91_spill] sm:$0xff] %v10127_v10  ;;  %v10130_v23 = vsub.f32 %v944_v45, %v10125_v29  ;;  %1640 = vmatmul.f32.gmra.mxu2 %v10127_v10  ;;  %1789 = vmatmul.f32.gmra.mxu3 %v10125_v29  ;;  %v667_v45 = vadd.f32 %v9983_v48, %v608_v49 }
 0x14d   :  { %v893_v46 = vadd.f32 %v892_v43, %v842_v35 }
 0x14e   :  { %15382 = vst [vmem:[#allocation92_spill] sm:$0xff] %v10130_v23  ;;  %v722_v3 = vpop.f32.mrf.mxu0  ;;  %v10136_v51 = vand.u32 4294901760, %v10130_v23 }
 0x14f   :  { %vm914_vm14 = vcmp.gt.f32.partialorder %v893_v46, 0.0  ;;  %v930_v54 = vmul.f32 0.01, %v893_v46  ;;  %v723_v34 = vadd.f32 %v722_v3, %v663_v56  ;;  %v788_v14 = vpop.f32.mrf.mxu1  ;;  %v845_v1 = vpop.f32.mrf.mxu2 }
 0x150   :  { %15383 = vst [vmem:[#allocation93_spill] sm:$0xff] %v10136_v51  ;;  %1498 = vmatmul.f32.gmra.mxu0 %v9881_v37  ;;  %v1646_v61 = vsub.f32 %v10130_v23, %v10136_v51  ;;  %v896_v17 = vpop.f32.mrf.mxu3 }
 0x151   :  { %1567 = vmatmul.f32.gmra.mxu1 %v9925_v8  ;;  %v946_v31 = vsel %vm914_vm14, %v893_v46, %v930_v54  ;;  %v789_v30 = vadd.f32 %v788_v14, %v723_v34  ;;  %v10160_v46 = vsub.f32 %v982_v2, %v10154_v33  ;;  %v978_v2 = vld [vmem:[#allocation2 + $0xd8] sm:$0xff] }
 0x152   :  { %v10144_v55 = vand.u32 4294901760, %v946_v31  ;;  %v10146_v38 = vand.u32 4294901760, %v1646_v61 }
 0x153   :  { %v846_v47 = vadd.f32 %v845_v1, %v789_v30  ;;  %2365 = vmatpush.msra.mxu2 %v10160_v46 }
 0x154   :  { %15384 = vst [vmem:[#allocation94_spill] sm:$0xff] %v10146_v38  ;;  %v10149_v57 = vsub.f32 %v946_v31, %v10144_v55  ;;  %1648 = vmatmul.f32.gmra.mxu2 %v10146_v38  ;;  %1793 = vmatmul.f32.gmra.mxu3 %v10144_v55 }
 0x155   :  { %v897_v9 = vadd.f32 %v896_v17, %v846_v47  ;;  %v14936_v17 = vand.u32 4294901760, %v10160_v46  ;;  %v980_v47 = vld [vmem:[#allocation2 + $0xe8] sm:$0xff] }
 0x156   :  { %15385 = vst [vmem:[#allocation95_spill] sm:$0xff] %v10149_v57  ;;  %v727_v52 = vpop.f32.mrf.mxu0  ;;  %v10157_v43 = vand.u32 4294901760, %v10149_v57 }
 0x157   :  { %vm916_vm15 = vcmp.gt.f32.partialorder %v897_v9, 0.0  ;;  %v932_v35 = vmul.f32 0.01, %v897_v9  ;;  %v728_v56 = vadd.f32 %v727_v52, %v667_v45  ;;  %v794_v3 = vpop.f32.mrf.mxu1  ;;  %v849_v48 = vpop.f32.mrf.mxu2  ;;  %v10181_v52 = vand.u32 4294901760, %v978_v2 }
 0x158   :  { %15386 = vst [vmem:[#allocation96_spill] sm:$0xff] %v10157_v43  ;;  %1502 = vmatmul.f32.gmra.mxu0 %v9925_v8  ;;  %v1654_v54 = vsub.f32 %v10149_v57, %v10157_v43  ;;  %v900_v61 = vpop.f32.mrf.mxu3 }
 0x159   :  { %1571 = vmatmul.f32.gmra.mxu1 %v9965_v21  ;;  %v948_v34 = vsel %vm916_vm15, %v897_v9, %v932_v35  ;;  %v795_v14 = vadd.f32 %v794_v3, %v728_v56  ;;  %v10179_v9 = vand.u32 4294901760, %v980_v47  ;;  %v2237_v56 = vsub.f32 %v10160_v46, %v14936_v17 }
 0x15a   :  { %v10169_v1 = vand.u32 4294901760, %v948_v34  ;;  %v10171_v49 = vand.u32 4294901760, %v1654_v54 }
 0x15b   :  { %v850_v31 = vadd.f32 %v849_v48, %v795_v14  ;;  %v10190_v48 = vsub.f32 %v980_v47, %v10179_v9  ;;  %2140 = vmatpush.msra.mxu0 %v10179_v9  ;;  %2455 = vmatpush.msra.mxu3 %v10179_v9  ;;  %v10199_v14 = vsub.f32 %v978_v2, %v10181_v52 }
 0x15c   :  { %15387 = vst [vmem:[#allocation97_spill] sm:$0xff] %v10169_v1  ;;  %v10174_v30 = vsub.f32 %v948_v34, %v10169_v1  ;;  %1656 = vmatmul.f32.gmra.mxu2 %v10171_v49  ;;  %1797 = vmatmul.f32.gmra.mxu3 %v10169_v1  ;;  %v2238_v34 = vand.u32 4294901760, %v2237_v56 }
 0x15d   :  { %15388 = vst [vmem:[#allocation98_spill] sm:$0xff] %v10171_v49  ;;  %v901_v45 = vadd.f32 %v900_v61, %v850_v31  ;;  %2368 = vmatpush.msra.mxu2 %v10190_v48  ;;  %v14940_v31 = vand.u32 4294901760, %v10190_v48  ;;  %2142 = vmatpush.msra.mxu0 %v10181_v52 }
 0x15e   :  { %15389 = vst [vmem:[#allocation99_spill] sm:$0xff] %v10174_v30  ;;  %v10184_v35 = vand.u32 4294901760, %v10174_v30  ;;  %2239 = vmatpush.msra.mxu1 %v2238_v34  ;;  %2457 = vmatpush.msra.mxu3 %v10181_v52 }
 0x15f   :  { %vm918_vm0 = vcmp.gt.f32.partialorder %v901_v45, 0.0  ;;  %v934_v3 = vmul.f32 0.01, %v901_v45  ;;  %v2243_v56 = vsub.f32 %v10190_v48, %v14940_v31  ;;  %2371 = vmatpush.msra.mxu2 %v10199_v14 }
 0x160   :  { %15390 = vst [vmem:[#allocation100_spill] sm:$0xff] %v10184_v35  ;;  %1506 = vmatmul.f32.gmra.mxu0 %v9965_v21  ;;  %v1662_v54 = vsub.f32 %v10174_v30, %v10184_v35  ;;  %v966_v21 = vld [vmem:[#allocation2 + $0x78] sm:$0xff] }
 0x161   :  { %1575 = vmatmul.f32.gmra.mxu1 %v10004_v28  ;;  %v950_v61 = vsel %vm918_vm0, %v901_v45, %v934_v3  ;;  %v14944_v45 = vand.u32 4294901760, %v10199_v14  ;;  %v976_v3 = vld [vmem:[#allocation2 + $0xc8] sm:$0xff]  ;;  %v2244_v49 = vand.u32 4294901760, %v2243_v56  ;;  %v10293_v13 = vand.u32 4294901760, %v966_v21 }
 0x162   :  { %v10204_v47 = vand.u32 4294901760, %v950_v61  ;;  %v10206_v17 = vand.u32 4294901760, %v1662_v54  ;;  %v974_v54 = vld [vmem:[#allocation2 + $0xb8] sm:$0xff]  ;;  %v10219_v38 = vand.u32 4294901760, %v976_v3 }
 0x163   :  { %v10221_v10 = vand.u32 4294901760, %v974_v54  ;;  %2245 = vmatpush.msra.mxu1 %v2244_v49 }
 0x164   :  { %15391 = vst [vmem:[#allocation101_spill] sm:$0xff] %v10204_v47  ;;  %v10214_v2 = vsub.f32 %v950_v61, %v10204_v47  ;;  %1664 = vmatmul.f32.gmra.mxu2 %v10206_v17  ;;  %1801 = vmatmul.f32.gmra.mxu3 %v10204_v47  ;;  %v2249_v61 = vsub.f32 %v10199_v14, %v14944_v45 }
 0x165   :  { %15392 = vst [vmem:[#allocation102_spill] sm:$0xff] %v10206_v17  ;;  %v1216_v34 = vpop.f32.mrf.mxu1  ;;  %v1015_v17 = vld [vmem:[%s14821_s4] sm:$0x3]  ;;  %v10233_v41 = vsub.f32 %v976_v3, %v10219_v38  ;;  %2144 = vmatpush.msra.mxu0 %v10219_v38  ;;  %v10241_v45 = vsub.f32 %v974_v54, %v10221_v10  ;;  %2459 = vmatpush.msra.mxu3 %v10219_v38  ;;  %v972_v3 = vld [vmem:[#allocation2 + $0xa8] sm:$0xff] }
 0x166   :  { %15393 = vst [vmem:[#allocation103_spill] sm:$0xff] %v10214_v2  ;;  %v10224_v31 = vand.u32 4294901760, %v10214_v2  ;;  %v2250_v19 = vand.u32 4294901760, %v2249_v61  ;;  %v10248_v11 = vperm.slane %v1015_v17, 0  ;;  %v970_v61 = vld [vmem:[#allocation2 + $0x98] sm:$0xff] }
 0x167   :  { %2374 = vmatpush.msra.mxu2 %v10233_v41  ;;  %v14950_v49 = vand.u32 4294901760, %v10233_v41  ;;  %2146 = vmatpush.msra.mxu0 %v10221_v10  ;;  %v14960_v17 = vand.u32 4294901760, %v10241_v45 }
 0x168   :  { %15394 = vst [vmem:[#allocation104_spill] sm:$0xff] %v10224_v31  ;;  %1510 = vmatmul.f32.gmra.mxu0 %v10004_v28  ;;  %v1670_v56 = vsub.f32 %v10214_v2, %v10224_v31  ;;  %2251 = vmatpush.msra.mxu1 %v2250_v19 }
 0x169   :  { %1929 = vmatmul.f32.vlgmr.msrb.gmra.mxu1 %v10059_v18  ;;  %v10251_v18 = vand.u32 4294901760, %v972_v3  ;;  %v2255_v54 = vsub.f32 %v10233_v41, %v14950_v49  ;;  %2377 = vmatpush.msra.mxu2 %v10241_v45  ;;  %v2261_v40 = vsub.f32 %v10241_v45, %v14960_v17 }
 0x16a   :  { %v10246_v32 = vand.u32 4294901760, %v1670_v56  ;;  %2461 = vmatpush.msra.mxu3 %v10221_v10  ;;  %v10264_v56 = vand.u32 4294901760, %v970_v61 }
 0x16b   :  { %v10262_v19 = vsub.f32 %v972_v3, %v10251_v18  ;;  %v2256_v49 = vand.u32 4294901760, %v2255_v54  ;;  %2148 = vmatpush.msra.mxu0 %v10251_v18  ;;  %v2262_v17 = vand.u32 4294901760, %v2261_v40 }
 0x16c   :  { %15395 = vst [vmem:[#allocation105_spill] sm:$0xff] %v10246_v32  ;;  %1672 = vmatmul.f32.gmra.mxu2 %v10246_v32  ;;  %2105 = vmatmul.f32.vlgmr.msrb.gmra.mxu3 %v10049_v60  ;;  %v10277_v6 = vsub.f32 %v970_v61, %v10264_v56 }
 0x16d   :  { %v1059_v5 = vpop.f32.mrf.mxu0  ;;  %v10266_v27 = vpop.f32.mrf.mxu1  ;;  %2463 = vmatpush.msra.mxu3 %v10251_v18  ;;  %2380 = vmatpush.msra.mxu2 %v10262_v19  ;;  %v14964_v3 = vand.u32 4294901760, %v10262_v19 }
 0x16e   :  { %v1060_v32 = vadd.f32 %v1059_v5, %v10248_v11  ;;  %v1298_v28 = vpop.f32.mrf.mxu2  ;;  %2257 = vmatpush.msra.mxu1 %v2256_v49  ;;  %2150 = vmatpush.msra.mxu0 %v10264_v56  ;;  %v14966_v61 = vand.u32 4294901760, %v10277_v6  ;;  %v10291_v49 = vsub.f32 %v968_v20, %v10280_v53 }
 0x16f   :  { %v1372_v54 = vpop.f32.mrf.mxu3  ;;  %v2267_v22 = vsub.f32 %v10262_v19, %v14964_v3  ;;  %2383 = vmatpush.msra.mxu2 %v10277_v6  ;;  %2465 = vmatpush.msra.mxu3 %v10264_v56 }
 0x170   :  { %v1217_v5 = vadd.f32 %v1216_v34, %v1060_v32  ;;  %1855 = vmatmul.f32.vlgmr.msrb.gmra.mxu0 %v10053_v12  ;;  %v964_v32 = vld [vmem:[#allocation2 + $0x68] sm:$0xff]  ;;  %2263 = vmatpush.msra.mxu1 %v2262_v17  ;;  %v2273_v40 = vsub.f32 %v10277_v6, %v14966_v61  ;;  %v14973_v20 = vand.u32 4294901760, %v10291_v49  ;;  %v10305_v12 = vsub.f32 %v966_v21, %v10293_v13 }
 0x171   :  { %1935 = vmatmul.f32.gmra.mxu1 %v10079_v44  ;;  %v2268_v44 = vand.u32 4294901760, %v2267_v22  ;;  %2152 = vmatpush.msra.mxu0 %v10280_v53  ;;  %v10299_v3 = vand.u32 4294901760, %v964_v32 }
 0x172   :  { %v1299_v34 = vadd.f32 %v1298_v28, %v1217_v5  ;;  %2386 = vmatpush.msra.mxu2 %v10291_v49  ;;  %2467 = vmatpush.msra.mxu3 %v10280_v53  ;;  %v962_v28 = vld [vmem:[#allocation2 + $0x58] sm:$0xff]  ;;  %v2274_v22 = vand.u32 4294901760, %v2273_v40  ;;  %v2279_v21 = vsub.f32 %v10291_v49, %v14973_v20 }
 0x173   :  { %v10312_v5 = vsub.f32 %v964_v32, %v10299_v3  ;;  %v10314_v61 = vand.u32 4294901760, %v962_v28  ;;  %2269 = vmatpush.msra.mxu1 %v2268_v44  ;;  %2154 = vmatpush.msra.mxu0 %v10293_v13 }
 0x174   :  { %v10307_v17 = vadd.f32 %v1372_v54, %v1299_v34  ;;  %2040 = vmatmul.f32.vlgmr.msrb.gmra.mxu2 %v10049_v60  ;;  %2109 = vmatmul.f32.gmra.mxu3 %v10068_v7  ;;  %v14978_v54 = vand.u32 4294901760, %v10305_v12  ;;  %v960_v34 = vld [vmem:[#allocation2 + $0x48] sm:$0xff]  ;;  %v2280_v24 = vand.u32 4294901760, %v2279_v21 }
 0x175   :  { %v1067_v50 = vpop.f32.mrf.mxu0  ;;  %v10316_v8 = vpop.f32.mrf.mxu1  ;;  %2389 = vmatpush.msra.mxu2 %v10305_v12  ;;  %2469 = vmatpush.msra.mxu3 %v10293_v13  ;;  %v14981_v32 = vand.u32 4294901760, %v10312_v5  ;;  %v10328_v44 = vsub.f32 %v962_v28, %v10314_v61  ;;  %v10330_v0 = vand.u32 4294901760, %v960_v34 }
 0x176   :  { %15396 = vst [vmem:[#allocation106_spill] sm:$0xff] %v10307_v17  ;;  %v1068_v40 = vadd.f32 %v1067_v50, %v10248_v11  ;;  %v1303_v60 = vpop.f32.mrf.mxu2  ;;  %2275 = vmatpush.msra.mxu1 %v2274_v22  ;;  %v2285_v37 = vsub.f32 %v10305_v12, %v14978_v54  ;;  %v958_v50 = vld [vmem:[#allocation2 + $0x38] sm:$0xff]  ;;  %2156 = vmatpush.msra.mxu0 %v10299_v3 }
 0x177   :  { %v1378_v20 = vpop.f32.mrf.mxu3  ;;  %2392 = vmatpush.msra.mxu2 %v10312_v5  ;;  %v2291_v28 = vsub.f32 %v10312_v5, %v14981_v32  ;;  %v14982_v22 = vand.u32 4294901760, %v10328_v44  ;;  %v10344_v21 = vsub.f32 %v960_v34, %v10330_v0  ;;  %v10347_v63 = vand.u32 4294901760, %v958_v50  ;;  %2471 = vmatpush.msra.mxu3 %v10299_v3 }
 0x178   :  { %v1221_v16 = vadd.f32 %v10266_v27, %v1068_v40  ;;  %1860 = vmatmul.f32.gmra.mxu0 %v10073_v4  ;;  %2281 = vmatpush.msra.mxu1 %v2280_v24  ;;  %v2286_v54 = vand.u32 4294901760, %v2285_v37  ;;  %v956_v27 = vld [vmem:[#allocation2 + $0x28] sm:$0xff] }
 0x179   :  { %1941 = vmatmul.f32.gmra.mxu1 %v10098_v58  ;;  %15397 = vst [vmem:[#allocation107_spill] sm:$0xff] %v10344_v21  ;;  %v2292_v58 = vand.u32 4294901760, %v2291_v28  ;;  %2395 = vmatpush.msra.mxu2 %v10328_v44  ;;  %v2297_v32 = vsub.f32 %v10328_v44, %v14982_v22  ;;  %v14987_v34 = vand.u32 4294901760, %v10344_v21  ;;  %v10357_v37 = vsub.f32 %v958_v50, %v10347_v63 }
 0x17a   :  { %v1304_v40 = vadd.f32 %v1303_v60, %v1221_v16  ;;  %2287 = vmatpush.msra.mxu1 %v2286_v54  ;;  %2158 = vmatpush.msra.mxu0 %v10314_v61  ;;  %v10359_v24 = vand.u32 4294901760, %v956_v27  ;;  %v954_v16 = vld [vmem:[#allocation2 + $0x18] sm:$0xff] }
 0x17b   :  { %v2298_v28 = vand.u32 4294901760, %v2297_v32  ;;  %v2303_v22 = vsub.f32 %v10344_v21, %v14987_v34  ;;  %v10368_v54 = vand.u32 4294901760, %v954_v16  ;;  %2473 = vmatpush.msra.mxu3 %v10314_v61  ;;  %v14989_v50 = vand.u32 4294901760, %v10357_v37  ;;  %2398 = vmatpush.msra.mxu2 %v10344_v21 }
 0x17c   :  { %v10361_v60 = vadd.f32 %v1378_v20, %v1304_v40  ;;  %2044 = vmatmul.f32.gmra.mxu2 %v10068_v7  ;;  %2113 = vmatmul.f32.gmra.mxu3 %v10087_v59  ;;  %v10373_v20 = vsub.f32 %v956_v27, %v10359_v24  ;;  %v952_v40 = vld [vmem:[#allocation2 + $0x8] sm:$0xff] }
 0x17d   :  { %v1075_v4 = vpop.f32.mrf.mxu0  ;;  %v1228_v15 = vpop.f32.mrf.mxu1  ;;  %2293 = vmatpush.msra.mxu1 %v2292_v58  ;;  %2160 = vmatpush.msra.mxu0 %v10330_v0  ;;  %v10379_v34 = vsub.f32 %v954_v16, %v10368_v54  ;;  %v10381_v58 = vand.u32 4294901760, %v952_v40  ;;  %v2309_v27 = vsub.f32 %v10357_v37, %v14989_v50 }
 0x17e   :  { %15398 = vst [vmem:[#allocation108_spill] sm:$0xff] %v10361_v60  ;;  %v1076_v7 = vadd.f32 %v1075_v4, %v10248_v11  ;;  %v1308_v32 = vpop.f32.mrf.mxu2  ;;  %v2304_v60 = vand.u32 4294901760, %v2303_v22  ;;  %2475 = vmatpush.msra.mxu3 %v10330_v0  ;;  %v14992_v4 = vand.u32 4294901760, %v10373_v20  ;;  %2401 = vmatpush.msra.mxu2 %v10357_v37 }
 0x17f   :  { %v1384_v25 = vpop.f32.mrf.mxu3  ;;  %2299 = vmatpush.msra.mxu1 %v2298_v28  ;;  %v14991_v16 = vand.u32 4294901760, %v10379_v34  ;;  %v10393_v17 = vsub.f32 %v952_v40, %v10381_v58  ;;  %v2310_v28 = vand.u32 4294901760, %v2309_v27  ;;  %2162 = vmatpush.msra.mxu0 %v10347_v63 }
 0x180   :  { %v1225_v22 = vadd.f32 %v10316_v8, %v1076_v7  ;;  %1865 = vmatmul.f32.gmra.mxu0 %v10092_v62  ;;  %v2315_v50 = vsub.f32 %v10373_v20, %v14992_v4  ;;  %2477 = vmatpush.msra.mxu3 %v10347_v63 }
 0x181   :  { %1947 = vmatmul.f32.gmra.mxu1 %v10117_v39  ;;  %v2321_v8 = vsub.f32 %v10379_v34, %v14991_v16  ;;  %v15000_v7 = vand.u32 4294901760, %v10393_v17  ;;  %2404 = vmatpush.msra.mxu2 %v10373_v20 }
 0x182   :  { %2305 = vmatpush.msra.mxu1 %v2304_v60  ;;  %v1309_v21 = vadd.f32 %v1308_v32, %v1225_v22  ;;  %v2316_v60 = vand.u32 4294901760, %v2315_v50  ;;  %2479 = vmatpush.msra.mxu3 %v10359_v24 }
 0x183   :  { %v2322_v32 = vand.u32 4294901760, %v2321_v8  ;;  %v2327_v27 = vsub.f32 %v10393_v17, %v15000_v7  ;;  %2164 = vmatpush.msra.mxu0 %v10359_v24  ;;  %2407 = vmatpush.msra.mxu2 %v10379_v34 }
 0x184   :  { %2311 = vmatpush.msra.mxu1 %v2310_v28  ;;  %v10406_v40 = vadd.f32 %v1384_v25, %v1309_v21  ;;  %2048 = vmatmul.f32.gmra.mxu2 %v10087_v59 }
 0x185   :  { %2117 = vmatmul.f32.gmra.mxu3 %v10106_v36  ;;  %v1083_v22 = vpop.f32.mrf.mxu0  ;;  %v1232_v16 = vpop.f32.mrf.mxu1  ;;  %v2328_v4 = vand.u32 4294901760, %v2327_v27  ;;  %2166 = vmatpush.msra.mxu0 %v10368_v54 }
 0x186   :  { %2317 = vmatpush.msra.mxu1 %v2316_v60  ;;  %v1084_v50 = vadd.f32 %v1083_v22, %v10248_v11  ;;  %v1313_v28 = vpop.f32.mrf.mxu2  ;;  %2481 = vmatpush.msra.mxu3 %v10368_v54  ;;  %v15399_v22 = vand.u32 4294901760, %v10160_v46 }
 0x187   :  { %v1390_v25 = vpop.f32.mrf.mxu3  ;;  %2410 = vmatpush.msra.mxu2 %v10393_v17  ;;  %2168 = vmatpush.msra.mxu0 %v10381_v58 }
 0x188   :  { %2323 = vmatpush.msra.mxu1 %v2322_v32  ;;  %v1229_v21 = vadd.f32 %v1228_v15, %v1084_v50  ;;  %1870 = vmatmul.f32.gmra.mxu0 %v10111_v42 }
 0x189   :  { %1953 = vmatmul.f32.gmra.mxu1 %v10136_v51  ;;  %2483 = vmatpush.msra.mxu3 %v10381_v58 }
 0x18a   :  { %2329 = vmatpush.msra.mxu1 %v2328_v4  ;;  %v1314_v8 = vadd.f32 %v1313_v28, %v1229_v21  ;;  %2536 = vmatpush.msrb.mxu0 %v15399_v22  ;;  %v15400_v28 = vand.u32 4294901760, %v10190_v48  ;;  %v15402_v48 = vand.u32 4294901760, %v10233_v41  ;;  %v1012_v41 = vld [vmem:[#allocation2 + $0x1e8] sm:$0xff] }
 0x18b   :  { %v10461_v22 = vand.u32 4294901760, %v1012_v41 }
 0x18c   :  { %2631 = vmatpush.msrb.mxu1 %v10154_v33  ;;  %v10424_v60 = vadd.f32 %v1390_v25, %v1314_v8  ;;  %2052 = vmatmul.f32.gmra.mxu2 %v10106_v36  ;;  %v15401_v25 = vand.u32 4294901760, %v10199_v14 }
 0x18d   :  { %2121 = vmatmul.f32.gmra.mxu3 %v10125_v29  ;;  %v1091_v15 = vpop.f32.mrf.mxu0  ;;  %2540 = vmatpush.msrb.mxu0 %v15400_v28  ;;  %v15405_v28 = vand.u32 4294901760, %v10277_v6 }
 0x18e   :  { %v1236_v32 = vpop.f32.mrf.mxu1  ;;  %2633 = vmatpush.msrb.mxu1 %v10179_v9  ;;  %v1092_v4 = vadd.f32 %v1091_v15, %v10248_v11  ;;  %v1318_v27 = vpop.f32.mrf.mxu2 }
 0x18f   :  { %v1396_v50 = vpop.f32.mrf.mxu3  ;;  %2544 = vmatpush.msrb.mxu0 %v15401_v25 }
 0x190   :  { %2635 = vmatpush.msrb.mxu1 %v10181_v52  ;;  %v1233_v33 = vadd.f32 %v1232_v16, %v1092_v4  ;;  %1875 = vmatmul.f32.gmra.mxu0 %v10130_v23  ;;  %v1014_v52 = vld [vmem:[#allocation2 + $0x1f8] sm:$0xff]  ;;  %v15403_v4 = vand.u32 4294901760, %v10241_v45 }
 0x191   :  { %1959 = vmatmul.f32.gmra.mxu1 %v10157_v43  ;;  %v10446_v8 = vand.u32 4294901760, %v1014_v52  ;;  %2548 = vmatpush.msrb.mxu0 %v15402_v48 }
 0x192   :  { %2637 = vmatpush.msrb.mxu1 %v10219_v38  ;;  %v1319_v9 = vadd.f32 %v1318_v27, %v1233_v33 }
 0x193   :  { %2696 = vmatpush.msrb.mxu2 %v10446_v8  ;;  %v10454_v15 = vsub.f32 %v1014_v52, %v10446_v8  ;;  %2552 = vmatpush.msrb.mxu0 %v15403_v4 }
 0x194   :  { %2639 = vmatpush.msrb.mxu1 %v10221_v10  ;;  %v10442_v46 = vadd.f32 %v1396_v50, %v1319_v9  ;;  %2056 = vmatmul.f32.gmra.mxu2 %v10125_v29  ;;  %v15404_v50 = vand.u32 4294901760, %v10262_v19  ;;  %v1010_v19 = vld [vmem:[#allocation2 + $0x1d8] sm:$0xff] }
 0x195   :  { %2125 = vmatmul.f32.gmra.mxu3 %v10144_v55  ;;  %v1099_v16 = vpop.f32.mrf.mxu0  ;;  %2698 = vmatpush.msrb.mxu2 %v10461_v22  ;;  %v10480_v48 = vand.u32 4294901760, %v1010_v19 }
 0x196   :  { %v1240_v21 = vpop.f32.mrf.mxu1  ;;  %2641 = vmatpush.msrb.mxu1 %v10251_v18  ;;  %v1100_v38 = vadd.f32 %v1099_v16, %v10248_v11  ;;  %v1323_v14 = vpop.f32.mrf.mxu2  ;;  %v14999_v18 = vand.u32 4294901760, %v10454_v15  ;;  %2556 = vmatpush.msrb.mxu0 %v15404_v50 }
 0x197   :  { %v1402_v10 = vpop.f32.mrf.mxu3  ;;  %2700 = vmatpush.msrb.mxu2 %v10480_v48 }
 0x198   :  { %v1237_v27 = vadd.f32 %v1236_v32, %v1100_v38  ;;  %1880 = vmatmul.f32.gmra.mxu0 %v10149_v57  ;;  %2643 = vmatpush.msrb.mxu1 %v10264_v56  ;;  %v2795_v45 = vsub.f32 %v10454_v15, %v14999_v18  ;;  %v10471_v32 = vsub.f32 %v1012_v41, %v10461_v22  ;;  %v15406_v38 = vand.u32 4294901760, %v10291_v49 }
 0x199   :  { %1965 = vmatmul.f32.gmra.mxu1 %v10184_v35  ;;  %2560 = vmatpush.msrb.mxu0 %v15405_v28 }
 0x19a   :  { %v1324_v33 = vadd.f32 %v1323_v14, %v1237_v27  ;;  %v2796_v52 = vand.u32 4294901760, %v2795_v45  ;;  %v14997_v16 = vand.u32 4294901760, %v10471_v32  ;;  %2645 = vmatpush.msrb.mxu1 %v10280_v53  ;;  %v10491_v27 = vsub.f32 %v1010_v19, %v10480_v48  ;;  %v1008_v53 = vld [vmem:[#allocation2 + $0x1c8] sm:$0xff] }
 0x19b   :  { %2564 = vmatpush.msrb.mxu0 %v15406_v38  ;;  %v15407_v45 = vand.u32 4294901760, %v10305_v12  ;;  %v1006_v12 = vld [vmem:[#allocation2 + $0x1b8] sm:$0xff] }
 0x19c   :  { %v10475_v9 = vadd.f32 %v1402_v10, %v1324_v33  ;;  %2060 = vmatmul.f32.gmra.mxu2 %v10144_v55  ;;  %2797 = vmatpush.msrb.mxu3 %v2796_v52  ;;  %v2801_v4 = vsub.f32 %v10471_v32, %v14997_v16  ;;  %v14995_v50 = vand.u32 4294901760, %v10491_v27  ;;  %v10496_v33 = vand.u32 4294901760, %v1008_v53  ;;  %v996_v16 = vld [vmem:[#allocation2 + $0x168] sm:$0xff] }
 0x19d   :  { %2129 = vmatmul.f32.gmra.mxu3 %v10169_v1  ;;  %v1107_v56 = vpop.f32.mrf.mxu0  ;;  %2568 = vmatpush.msrb.mxu0 %v15407_v45 }
 0x19e   :  { %v1244_v25 = vpop.f32.mrf.mxu1  ;;  %v1108_v6 = vadd.f32 %v1107_v56, %v10248_v11  ;;  %v1328_v14 = vpop.f32.mrf.mxu2  ;;  %v2802_v49 = vand.u32 4294901760, %v2801_v4  ;;  %2647 = vmatpush.msrb.mxu1 %v10293_v13  ;;  %2702 = vmatpush.msrb.mxu2 %v10496_v33  ;;  %v10506_v19 = vsub.f32 %v1008_v53, %v10496_v33  ;;  %v15408_v4 = vand.u32 4294901760, %v10312_v5  ;;  %v1004_v5 = vld [vmem:[#allocation2 + $0x1a8] sm:$0xff] }
 0x19f   :  { %v1408_v10 = vpop.f32.mrf.mxu3 }
 0x1a0   :  { %v1241_v41 = vadd.f32 %v1240_v21, %v1108_v6  ;;  %1885 = vmatmul.f32.gmra.mxu0 %v10174_v30  ;;  %2803 = vmatpush.msrb.mxu3 %v2802_v49  ;;  %v2807_v21 = vsub.f32 %v10491_v27, %v14995_v50  ;;  %v14994_v6 = vand.u32 4294901760, %v10506_v19  ;;  %v15415_v50 = vld [vmem:[#allocation48_spill] sm:$0xff] }
 0x1a1   :  { %1971 = vmatmul.f32.gmra.mxu1 %v10224_v31  ;;  %2572 = vmatpush.msrb.mxu0 %v15408_v4 }
 0x1a2   :  { %v1329_v28 = vadd.f32 %v1328_v14, %v1241_v41  ;;  %v2808_v38 = vand.u32 4294901760, %v2807_v21  ;;  %v10513_v14 = vand.u32 4294901760, %v1006_v12  ;;  %2649 = vmatpush.msrb.mxu1 %v10299_v3  ;;  %v2813_v53 = vsub.f32 %v10506_v19, %v14994_v6  ;;  %v15414_v6 = vld [vmem:[#allocation50_spill] sm:$0xff] }
 0x1a3   :  { %v10529_v21 = vand.u32 4294901760, %v1004_v5 }
 0x1a4   :  { %v10508_v56 = vadd.f32 %v1408_v10, %v1329_v28  ;;  %2064 = vmatmul.f32.gmra.mxu2 %v10169_v1  ;;  %2809 = vmatpush.msrb.mxu3 %v2808_v38  ;;  %v10524_v49 = vsub.f32 %v1006_v12, %v10513_v14  ;;  %v2814_v28 = vand.u32 4294901760, %v2813_v53  ;;  %v15432_v1 = vld [vmem:[#allocation67_spill] sm:$0xff] }
 0x1a5   :  { %2133 = vmatmul.f32.gmra.mxu3 %v10204_v47  ;;  %v1115_v52 = vpop.f32.mrf.mxu0  ;;  %2704 = vmatpush.msrb.mxu2 %v10513_v14  ;;  %v10539_v12 = vsub.f32 %v1004_v5, %v10529_v21  ;;  %v15413_v5 = vld [vmem:[#allocation106_spill] sm:$0xff] }
 0x1a6   :  { %v1548_v13 = vpop.f32.mrf.mxu1  ;;  %v1116_v10 = vadd.f32 %v1115_v52, %v10248_v11  ;;  %v1333_v3 = vpop.f32.mrf.mxu2  ;;  %v14993_v11 = vand.u32 4294901760, %v10524_v49  ;;  %2651 = vmatpush.msrb.mxu1 %v10314_v61  ;;  %v15409_v52 = vand.u32 4294901760, %v10328_v44  ;;  %2815 = vmatpush.msrb.mxu3 %v2814_v28  ;;  %v1002_v61 = vld [vmem:[#allocation2 + $0x198] sm:$0xff] }
 0x1a7   :  { %v1414_v41 = vpop.f32.mrf.mxu3  ;;  %2706 = vmatpush.msrb.mxu2 %v10529_v21  ;;  %v10546_v28 = vand.u32 4294901760, %v1002_v61 }
 0x1a8   :  { %v1245_v45 = vadd.f32 %v1244_v25, %v1116_v10  ;;  %1890 = vmatmul.f32.gmra.mxu0 %v10214_v2  ;;  %v2819_v25 = vsub.f32 %v10524_v49, %v14993_v11  ;;  %v15410_v10 = vld [vmem:[#allocation49_spill] sm:$0xff]  ;;  %2653 = vmatpush.msrb.mxu1 %v10330_v0 }
 0x1a9   :  { %2331 = vmatmul.f32.vlgmr.msra.gmra.mxu1 %v9632_v26  ;;  %2576 = vmatpush.msrb.mxu0 %v15409_v52  ;;  %v15411_v52 = vld [vmem:[#allocation107_spill] sm:$0xff] }
 0x1aa   :  { %v1334_v38 = vadd.f32 %v1333_v3, %v1245_v45  ;;  %v2820_v45 = vand.u32 4294901760, %v2819_v25  ;;  %v14996_v3 = vand.u32 4294901760, %v10539_v12  ;;  %v15412_v11 = vand.u32 4294901760, %v15411_v52  ;;  %2708 = vmatpush.msrb.mxu2 %v10546_v28  ;;  %v1000_v52 = vld [vmem:[#allocation2 + $0x188] sm:$0xff]  ;;  %2655 = vmatpush.msrb.mxu1 %v10347_v63 }
 0x1ab   :  { %v10557_v25 = vsub.f32 %v1002_v61, %v10546_v28 }
 0x1ac   :  { %v10541_v4 = vadd.f32 %v1414_v41, %v1334_v38  ;;  %2068 = vmatmul.f32.gmra.mxu2 %v10204_v47  ;;  %2580 = vmatpush.msrb.mxu0 %v15412_v11 }
 0x1ad   :  { %2487 = vmatmul.f32.vlgmr.msra.gmra.mxu3 %v15410_v10  ;;  %v1483_v44 = vpop.f32.mrf.mxu0  ;;  %v2825_v10 = vsub.f32 %v10539_v12, %v14996_v3  ;;  %2657 = vmatpush.msrb.mxu1 %v10359_v24 }
 0x1ae   :  { %v1552_v53 = vpop.f32.mrf.mxu1  ;;  %v1484_v41 = vadd.f32 %v1483_v44, %v15413_v5  ;;  %2821 = vmatpush.msrb.mxu3 %v2820_v45  ;;  %v14998_v44 = vand.u32 4294901760, %v10557_v25  ;;  %v10562_v5 = vand.u32 4294901760, %v1000_v52  ;;  %v15416_v45 = vand.u32 4294901760, %v10357_v37 }
 0x1af   :  { %v1774_v38 = vpop.f32.mrf.mxu3  ;;  %v2826_v11 = vand.u32 4294901760, %v2825_v10  ;;  %v15418_v10 = vld [vmem:[#allocation53_spill] sm:$0xff]  ;;  %2659 = vmatpush.msrb.mxu1 %v10368_v54 }
 0x1b0   :  { %2174 = vmatmul.f32.vlgmr.msra.gmra.mxu0 %v15414_v6  ;;  %v1549_v0 = vadd.f32 %v1548_v13, %v1484_v41  ;;  %v2831_v61 = vsub.f32 %v10557_v25, %v14998_v44  ;;  %2710 = vmatpush.msrb.mxu2 %v10562_v5  ;;  %v10572_v13 = vsub.f32 %v1000_v52, %v10562_v5  ;;  %v998_v6 = vld [vmem:[#allocation2 + $0x178] sm:$0xff]  ;;  %v15417_v41 = vld [vmem:[#allocation47_spill] sm:$0xff]  ;;  %v15419_v44 = vand.u32 4294901760, %v10373_v20  ;;  %v15420_v52 = vld [vmem:[#allocation108_spill] sm:$0xff] }
 0x1b1   :  { %2335 = vmatmul.f32.gmra.mxu1 %v15415_v50  ;;  %2584 = vmatpush.msrb.mxu0 %v15416_v45  ;;  %v10576_v3 = vand.u32 4294901760, %v998_v6 }
 0x1b2   :  { %2827 = vmatpush.msrb.mxu3 %v2826_v11  ;;  %v2832_v11 = vand.u32 4294901760, %v2831_v61  ;;  %v15004_v45 = vand.u32 4294901760, %v10572_v13  ;;  %v994_v61 = vld [vmem:[#allocation2 + $0x158] sm:$0xff]  ;;  %2661 = vmatpush.msrb.mxu1 %v10381_v58 }
 0x1b3   :  { %2588 = vmatpush.msrb.mxu0 %v15419_v44  ;;  %2712 = vmatpush.msrb.mxu2 %v10576_v3  ;;  %v15421_v44 = vld [vmem:[#allocation55_spill] sm:$0xff] }
 0x1b4   :  { %2413 = vmatmul.f32.vlgmr.msra.gmra.mxu2 %v15417_v41  ;;  %v10587_v41 = vsub.f32 %v998_v6, %v10576_v3  ;;  %2833 = vmatpush.msrb.mxu3 %v2832_v11  ;;  %v2837_v24 = vsub.f32 %v10572_v13, %v15004_v45  ;;  %v10604_v11 = vand.u32 4294901760, %v994_v61  ;;  %v992_v45 = vld [vmem:[#allocation2 + $0x148] sm:$0xff] }
 0x1b5   :  { %2493 = vmatmul.f32.gmra.mxu3 %v15418_v10  ;;  %v1487_v63 = vpop.f32.mrf.mxu0  ;;  %v10589_v10 = vand.u32 4294901760, %v996_v16  ;;  %3011 = vmatpush.msra.mxu1 %v10446_v8 }
 0x1b6   :  { %v10578_v37 = vpop.f32.mrf.mxu1  ;;  %v1488_v18 = vadd.f32 %v1487_v63, %v15420_v52  ;;  %v15422_v63 = vld [vmem:[#allocation54_spill] sm:$0xff]  ;;  %v15005_v52 = vand.u32 4294901760, %v10587_v41  ;;  %v2838_v30 = vand.u32 4294901760, %v2837_v24  ;;  %v10620_v58 = vsub.f32 %v994_v61, %v10604_v11  ;;  %v15424_v24 = vld [vmem:[#allocation52_spill] sm:$0xff] }
 0x1b7   :  { %v1617_v7 = vpop.f32.mrf.mxu2  ;;  %v10591_v2 = vpop.f32.mrf.mxu3  ;;  %v10601_v31 = vsub.f32 %v996_v16, %v10589_v10  ;;  %2714 = vmatpush.msrb.mxu2 %v10589_v10  ;;  %v15423_v16 = vand.u32 4294901760, %v10379_v34  ;;  %3013 = vmatpush.msra.mxu1 %v10461_v22 }
 0x1b8   :  { %v1618_v20 = vadd.f32 %v1617_v7, %v1549_v0  ;;  %2182 = vmatmul.f32.gmra.mxu0 %v15421_v44  ;;  %v1553_v6 = vadd.f32 %v1552_v53, %v1488_v18  ;;  %v2843_v54 = vsub.f32 %v10587_v41, %v15005_v52  ;;  %v10611_v18 = vand.u32 4294901760, %v992_v45  ;;  %2839 = vmatpush.msrb.mxu3 %v2838_v30  ;;  %v990_v0 = vld [vmem:[#allocation2 + $0x138] sm:$0xff]  ;;  %v15425_v44 = vld [vmem:[#allocation59_spill] sm:$0xff] }
 0x1b9   :  { %2339 = vmatmul.f32.gmra.mxu1 %v15422_v63  ;;  %v15006_v7 = vand.u32 4294901760, %v10601_v31  ;;  %2592 = vmatpush.msrb.mxu0 %v15423_v16  ;;  %v15011_v61 = vand.u32 4294901760, %v10620_v58 }
 0x1ba   :  { %v10613_v53 = vadd.f32 %v1774_v38, %v1618_v20  ;;  %2716 = vmatpush.msrb.mxu2 %v10604_v11  ;;  %v2844_v52 = vand.u32 4294901760, %v2843_v54  ;;  %v10628_v34 = vsub.f32 %v992_v45, %v10611_v18  ;;  %v10630_v20 = vand.u32 4294901760, %v990_v0  ;;  %3015 = vmatpush.msra.mxu1 %v10480_v48 }
 0x1bb   :  { %v2849_v38 = vsub.f32 %v10601_v31, %v15006_v7  ;;  %v2855_v23 = vsub.f32 %v10620_v58, %v15011_v61 }
 0x1bc   :  { %2418 = vmatmul.f32.gmra.mxu2 %v15424_v24  ;;  %v988_v24 = vld [vmem:[#allocation2 + $0x128] sm:$0xff]  ;;  %2845 = vmatpush.msrb.mxu3 %v2844_v52  ;;  %v15014_v45 = vand.u32 4294901760, %v10628_v34  ;;  %v10641_v35 = vsub.f32 %v990_v0, %v10630_v20 }
 0x1bd   :  { %2499 = vmatmul.f32.gmra.mxu3 %v15425_v44  ;;  %v1491_v30 = vpop.f32.mrf.mxu0  ;;  %2718 = vmatpush.msrb.mxu2 %v10611_v18  ;;  %v15426_v44 = vand.u32 4294901760, %v10393_v17  ;;  %v2850_v7 = vand.u32 4294901760, %v2849_v38  ;;  %v10648_v17 = vand.u32 4294901760, %v988_v24  ;;  %v15427_v38 = vld [vmem:[#allocation61_spill] sm:$0xff]  ;;  %v15428_v0 = vld [vmem:[#allocation60_spill] sm:$0xff]  ;;  %v2856_v51 = vand.u32 4294901760, %v2855_v23 }
 0x1be   :  { %v10632_v16 = vpop.f32.mrf.mxu1  ;;  %v1492_v54 = vadd.f32 %v1491_v30, %v10406_v40  ;;  %v986_v40 = vld [vmem:[#allocation2 + $0x118] sm:$0xff]  ;;  %v15015_v61 = vand.u32 4294901760, %v10641_v35  ;;  %3017 = vmatpush.msra.mxu1 %v10496_v33 }
 0x1bf   :  { %2596 = vmatpush.msrb.mxu0 %v15426_v44  ;;  %v1625_v57 = vpop.f32.mrf.mxu2  ;;  %v1782_v43 = vpop.f32.mrf.mxu3  ;;  %2720 = vmatpush.msrb.mxu2 %v10630_v20  ;;  %v2861_v44 = vsub.f32 %v10628_v34, %v15014_v45  ;;  %v10659_v42 = vsub.f32 %v988_v24, %v10648_v17  ;;  %v15429_v24 = vld [vmem:[#allocation56_spill] sm:$0xff] }
 0x1c0   :  { %v1626_v52 = vadd.f32 %v1625_v57, %v1553_v6  ;;  %2190 = vmatmul.f32.gmra.mxu0 %v15427_v38  ;;  %v1557_v30 = vadd.f32 %v10578_v37, %v1492_v54  ;;  %2851 = vmatpush.msrb.mxu3 %v2850_v7  ;;  %v10662_v57 = vand.u32 4294901760, %v986_v40  ;;  %v984_v6 = vld [vmem:[#allocation2 + $0x108] sm:$0xff]  ;;  %v2867_v37 = vsub.f32 %v10641_v35, %v15015_v61 }
 0x1c1   :  { %2923 = vmatpush.msra.mxu0 %v10454_v15  ;;  %2343 = vmatmul.f32.gmra.mxu1 %v15428_v0  ;;  %v2862_v38 = vand.u32 4294901760, %v2861_v44  ;;  %v10667_v54 = vand.u32 4294901760, %v984_v6  ;;  %v15018_v23 = vand.u32 4294901760, %v10659_v42  ;;  %v15430_v44 = vld [vmem:[#allocation65_spill] sm:$0xff] }
 0x1c2   :  { %2722 = vmatpush.msrb.mxu2 %v10648_v17  ;;  %v10670_v45 = vadd.f32 %v10591_v2, %v1626_v52  ;;  %2857 = vmatpush.msrb.mxu3 %v2856_v51  ;;  %v10676_v7 = vsub.f32 %v986_v40, %v10662_v57  ;;  %v2868_v61 = vand.u32 4294901760, %v2867_v37  ;;  %v15431_v37 = vand.u32 4294901760, %v10454_v15 }
 0x1c3   :  { %2926 = vmatpush.msra.mxu0 %v10471_v32  ;;  %v10682_v2 = vsub.f32 %v984_v6, %v10667_v54  ;;  %v2873_v51 = vsub.f32 %v10659_v42, %v15018_v23  ;;  %3019 = vmatpush.msra.mxu1 %v10513_v14 }
 0x1c4   :  { %2724 = vmatpush.msrb.mxu2 %v10662_v57  ;;  %2863 = vmatpush.msrb.mxu3 %v2862_v38  ;;  %v15023_v40 = vand.u32 4294901760, %v10676_v7 }
 0x1c5   :  { %2423 = vmatmul.f32.gmra.mxu2 %v15429_v24  ;;  %2505 = vmatmul.f32.gmra.mxu3 %v15430_v44  ;;  %v1495_v52 = vpop.f32.mrf.mxu0  ;;  %v2884_v24 = vand.u32 4294901760, %v10682_v2  ;;  %v2874_v38 = vand.u32 4294901760, %v2873_v51  ;;  %v15434_v51 = vand.u32 4294901760, %v10471_v32  ;;  %v15438_v32 = vand.u32 4294901760, %v10506_v19 }
 0x1c6   :  { %v1564_v39 = vpop.f32.mrf.mxu1  ;;  %2726 = vmatpush.msrb.mxu2 %v10667_v54  ;;  %v1496_v62 = vadd.f32 %v1495_v52, %v10424_v60  ;;  %2929 = vmatpush.msra.mxu0 %v10491_v27  ;;  %v2879_v23 = vsub.f32 %v10676_v7, %v15023_v40  ;;  %v15433_v60 = vld [vmem:[#allocation66_spill] sm:$0xff] }
 0x1c7   :  { %v1633_v6 = vpop.f32.mrf.mxu2  ;;  %v1786_v44 = vpop.f32.mrf.mxu3  ;;  %2869 = vmatpush.msrb.mxu3 %v2868_v61  ;;  %v2885_v52 = vsub.f32 %v10682_v2, %v2884_v24  ;;  %3021 = vmatpush.msra.mxu1 %v10529_v21 }
 0x1c8   :  { %3094 = vmatpush.msra.mxu2 %v15431_v37  ;;  %v1634_v47 = vadd.f32 %v1633_v6, %v1557_v30  ;;  %2198 = vmatmul.f32.gmra.mxu0 %v15432_v1  ;;  %v1561_v15 = vadd.f32 %v10632_v16, %v1496_v62  ;;  %v2880_v61 = vand.u32 4294901760, %v2879_v23  ;;  %v15435_v1 = vand.u32 4294901760, %v10491_v27  ;;  %v15436_v62 = vld [vmem:[#allocation62_spill] sm:$0xff]  ;;  %v15437_v16 = vld [vmem:[#allocation69_spill] sm:$0xff] }
 0x1c9   :  { %2347 = vmatmul.f32.gmra.mxu1 %v15433_v60  ;;  %2875 = vmatpush.msrb.mxu3 %v2874_v38  ;;  %v2886_v37 = vand.u32 4294901760, %v2885_v52  ;;  %v15439_v27 = vand.u32 4294901760, %v10524_v49  ;;  %v15440_v52 = vld [vmem:[#allocation71_spill] sm:$0xff] }
 0x1ca   :  { %3098 = vmatpush.msra.mxu2 %v15434_v51  ;;  %v10706_v40 = vadd.f32 %v1782_v43, %v1634_v47  ;;  %2932 = vmatpush.msra.mxu0 %v10506_v19  ;;  %v15445_v51 = vld [vmem:[#allocation73_spill] sm:$0xff] }
 0x1cb   :  { %2881 = vmatpush.msrb.mxu3 %v2880_v61  ;;  %v15441_v61 = vld [vmem:[#allocation70_spill] sm:$0xff]  ;;  %3023 = vmatpush.msra.mxu1 %v10546_v28 }
 0x1cc   :  { %3102 = vmatpush.msra.mxu2 %v15435_v1  ;;  %2935 = vmatpush.msra.mxu0 %v10524_v49  ;;  %v15443_v49 = vand.u32 4294901760, %v10557_v25 }
 0x1cd   :  { %2428 = vmatmul.f32.gmra.mxu2 %v15436_v62  ;;  %2511 = vmatmul.f32.gmra.mxu3 %v15437_v16  ;;  %v1499_v30 = vpop.f32.mrf.mxu0  ;;  %v15447_v62 = vld [vmem:[#allocation75_spill] sm:$0xff]  ;;  %v15448_v16 = vld [vmem:[#allocation74_spill] sm:$0xff] }
 0x1ce   :  { %v1568_v23 = vpop.f32.mrf.mxu1  ;;  %2887 = vmatpush.msrb.mxu3 %v2886_v37  ;;  %3106 = vmatpush.msra.mxu2 %v15438_v32  ;;  %v1500_v43 = vadd.f32 %v1499_v30, %v10442_v46  ;;  %v15442_v46 = vand.u32 4294901760, %v10539_v12  ;;  %v15452_v30 = vld [vmem:[#allocation77_spill] sm:$0xff] }
 0x1cf   :  { %v1641_v47 = vpop.f32.mrf.mxu2  ;;  %v1790_v6 = vpop.f32.mrf.mxu3  ;;  %2938 = vmatpush.msra.mxu0 %v10539_v12  ;;  %v15446_v12 = vand.u32 4294901760, %v10572_v13  ;;  %3025 = vmatpush.msra.mxu1 %v10562_v5 }
 0x1d0   :  { %3189 = vmatpush.msra.mxu3 %v10446_v8  ;;  %3110 = vmatpush.msra.mxu2 %v15439_v27  ;;  %v1642_v38 = vadd.f32 %v1641_v47, %v1561_v15  ;;  %v1565_v19 = vadd.f32 %v1564_v39, %v1500_v43  ;;  %v15444_v15 = vld [vmem:[#allocation68_spill] sm:$0xff]  ;;  %v15455_v27 = vld [vmem:[#allocation78_spill] sm:$0xff] }
 0x1d1   :  { %2206 = vmatmul.f32.gmra.mxu0 %v15440_v52  ;;  %2351 = vmatmul.f32.gmra.mxu1 %v15441_v61 }
 0x1d2   :  { %3191 = vmatpush.msra.mxu3 %v10461_v22  ;;  %3114 = vmatpush.msra.mxu2 %v15442_v46  ;;  %v10727_v8 = vadd.f32 %v1786_v44, %v1642_v38 }
 0x1d3   :  { %2941 = vmatpush.msra.mxu0 %v10557_v25  ;;  %3027 = vmatpush.msra.mxu1 %v10576_v3 }
 0x1d4   :  { %3193 = vmatpush.msra.mxu3 %v10480_v48  ;;  %3118 = vmatpush.msra.mxu2 %v15443_v49  ;;  %v15460_v49 = vld [vmem:[#allocation82_spill] sm:$0xff] }
 0x1d5   :  { %2433 = vmatmul.f32.gmra.mxu2 %v15444_v15  ;;  %2517 = vmatmul.f32.gmra.mxu3 %v15445_v51  ;;  %v1503_v39 = vpop.f32.mrf.mxu0 }
 0x1d6   :  { %v1572_v22 = vpop.f32.mrf.mxu1  ;;  %3195 = vmatpush.msra.mxu3 %v10496_v33  ;;  %v1504_v44 = vadd.f32 %v1503_v39, %v10475_v9  ;;  %3122 = vmatpush.msra.mxu2 %v15446_v12  ;;  %v15449_v9 = vand.u32 4294901760, %v10587_v41 }
 0x1d7   :  { %v1649_v48 = vpop.f32.mrf.mxu2  ;;  %v1794_v37 = vpop.f32.mrf.mxu3  ;;  %2944 = vmatpush.msra.mxu0 %v10572_v13  ;;  %v15451_v13 = vld [vmem:[#allocation72_spill] sm:$0xff]  ;;  %3029 = vmatpush.msra.mxu1 %v10589_v10 }
 0x1d8   :  { %3197 = vmatpush.msra.mxu3 %v10513_v14  ;;  %v1650_v1 = vadd.f32 %v1649_v48, %v1565_v19  ;;  %v1569_v33 = vadd.f32 %v1568_v23, %v1504_v44  ;;  %3126 = vmatpush.msra.mxu2 %v15449_v9  ;;  %v15450_v14 = vand.u32 4294901760, %v10601_v31  ;;  %v15459_v19 = vand.u32 4294901760, %v10641_v35  ;;  %v15465_v48 = vld [vmem:[#allocation85_spill] sm:$0xff] }
 0x1d9   :  { %2214 = vmatmul.f32.gmra.mxu0 %v15447_v62  ;;  %2355 = vmatmul.f32.gmra.mxu1 %v15448_v16 }
 0x1da   :  { %3199 = vmatpush.msra.mxu3 %v10529_v21  ;;  %v10749_v25 = vadd.f32 %v1790_v6, %v1650_v1  ;;  %2947 = vmatpush.msra.mxu0 %v10587_v41  ;;  %v15453_v41 = vand.u32 4294901760, %v10620_v58  ;;  %v15454_v6 = vld [vmem:[#allocation79_spill] sm:$0xff] }
 0x1db   :  { %3130 = vmatpush.msra.mxu2 %v15450_v14  ;;  %3031 = vmatpush.msra.mxu1 %v10604_v11 }
 0x1dc   :  { %3201 = vmatpush.msra.mxu3 %v10546_v28  ;;  %2950 = vmatpush.msra.mxu0 %v10601_v31 }
 0x1dd   :  { %2438 = vmatmul.f32.gmra.mxu2 %v15451_v13  ;;  %2523 = vmatmul.f32.gmra.mxu3 %v15452_v30  ;;  %v1507_v23 = vpop.f32.mrf.mxu0 }
 0x1de   :  { %v1576_v21 = vpop.f32.mrf.mxu1  ;;  %3203 = vmatpush.msra.mxu3 %v10562_v5  ;;  %v1508_v32 = vadd.f32 %v1507_v23, %v10508_v56  ;;  %3134 = vmatpush.msra.mxu2 %v15453_v41  ;;  %v15456_v56 = vand.u32 4294901760, %v10628_v34  ;;  %v15468_v41 = vld [vmem:[#allocation88_spill] sm:$0xff] }
 0x1df   :  { %v1657_v28 = vpop.f32.mrf.mxu2  ;;  %v1798_v43 = vpop.f32.mrf.mxu3  ;;  %2953 = vmatpush.msra.mxu0 %v10620_v58  ;;  %3033 = vmatpush.msra.mxu1 %v10611_v18  ;;  %v15458_v58 = vld [vmem:[#allocation81_spill] sm:$0xff] }
 0x1e0   :  { %3205 = vmatpush.msra.mxu3 %v10576_v3  ;;  %v1658_v47 = vadd.f32 %v1657_v28, %v1569_v33  ;;  %v1573_v5 = vadd.f32 %v1572_v22, %v1508_v32  ;;  %3138 = vmatpush.msra.mxu2 %v15456_v56  ;;  %v15457_v3 = vld [vmem:[#allocation76_spill] sm:$0xff] }
 0x1e1   :  { %2222 = vmatmul.f32.gmra.mxu0 %v15454_v6  ;;  %2359 = vmatmul.f32.gmra.mxu1 %v15455_v27 }
 0x1e2   :  { %3207 = vmatpush.msra.mxu3 %v10589_v10  ;;  %v10770_v31 = vadd.f32 %v1794_v37, %v1658_v47  ;;  %2956 = vmatpush.msra.mxu0 %v10628_v34 }
 0x1e3   :  { %3035 = vmatpush.msra.mxu1 %v10630_v20  ;;  %3142 = vmatpush.msra.mxu2 %v15459_v19 }
 0x1e4   :  { %3209 = vmatpush.msra.mxu3 %v10604_v11  ;;  %2959 = vmatpush.msra.mxu0 %v10641_v35  ;;  %v15461_v35 = vand.u32 4294901760, %v10659_v42 }
 0x1e5   :  { %2443 = vmatmul.f32.gmra.mxu2 %v15457_v3  ;;  %2529 = vmatmul.f32.gmra.mxu3 %v15458_v58  ;;  %v1511_v38 = vpop.f32.mrf.mxu0  ;;  %v15469_v3 = vld [vmem:[#allocation91_spill] sm:$0xff] }
 0x1e6   :  { %v1930_v52 = vpop.f32.mrf.mxu1  ;;  %3211 = vmatpush.msra.mxu3 %v10611_v18  ;;  %v1512_v10 = vadd.f32 %v1511_v38, %v10541_v4  ;;  %3037 = vmatpush.msra.mxu1 %v10648_v17  ;;  %v15462_v18 = vld [vmem:[#allocation80_spill] sm:$0xff] }
 0x1e7   :  { %v1665_v11 = vpop.f32.mrf.mxu2  ;;  %v1802_v34 = vpop.f32.mrf.mxu3  ;;  %3146 = vmatpush.msra.mxu2 %v15461_v35  ;;  %2962 = vmatpush.msra.mxu0 %v10659_v42 }
 0x1e8   :  { %3213 = vmatpush.msra.mxu3 %v10630_v20  ;;  %v1666_v46 = vadd.f32 %v1665_v11, %v1573_v5  ;;  %v1577_v15 = vadd.f32 %v1576_v21, %v1512_v10  ;;  %3039 = vmatpush.msra.mxu1 %v10662_v57  ;;  %v15463_v20 = vld [vmem:[#allocation83_spill] sm:$0xff] }
 0x1e9   :  { %2230 = vmatmul.f32.gmra.mxu0 %v15460_v49  ;;  %2663 = vmatmul.f32.vlgmr.msrb.gmra.mxu1 %v9632_v26 }
 0x1ea   :  { %3215 = vmatpush.msra.mxu3 %v10648_v17  ;;  %v10791_v4 = vadd.f32 %v1798_v43, %v1666_v46  ;;  %3041 = vmatpush.msra.mxu1 %v10667_v54  ;;  %v15464_v17 = vand.u32 4294901760, %v10676_v7 }
 0x1eb   :  { %2965 = vmatpush.msra.mxu0 %v10676_v7 }
 0x1ec   :  { %3217 = vmatpush.msra.mxu3 %v10662_v57  ;;  %3150 = vmatpush.msra.mxu2 %v15464_v17  ;;  %v15472_v17 = vld [vmem:[#allocation97_spill] sm:$0xff] }
 0x1ed   :  { %2448 = vmatmul.f32.gmra.mxu2 %v15462_v18  ;;  %2889 = vmatmul.f32.vlgmr.msrb.gmra.mxu3 %v15463_v20  ;;  %v1856_v51 = vpop.f32.mrf.mxu0 }
 0x1ee   :  { %v1936_v39 = vpop.f32.mrf.mxu1  ;;  %3219 = vmatpush.msra.mxu3 %v10667_v54  ;;  %v1857_v22 = vadd.f32 %v1856_v51, %v10613_v53  ;;  %3154 = vmatpush.msra.mxu2 %v2884_v24  ;;  %v15466_v53 = vld [vmem:[#allocation57_spill] sm:$0xff] }
 0x1ef   :  { %v1673_v42 = vpop.f32.mrf.mxu2  ;;  %v2106_v44 = vpop.f32.mrf.mxu3  ;;  %2968 = vmatpush.msra.mxu0 %v10682_v2  ;;  %v15467_v2 = vld [vmem:[#allocation63_spill] sm:$0xff] }
 0x1f0   :  { %v1674_v57 = vadd.f32 %v1673_v42, %v1577_v15  ;;  %v1931_v12 = vadd.f32 %v1930_v52, %v1857_v22 }
 0x1f1   :  { %2598 = vmatmul.f32.vlgmr.msrb.gmra.mxu0 %v9632_v26  ;;  %2667 = vmatmul.f32.gmra.mxu1 %v15415_v50 }
 0x1f2   :  { %v10810_v54 = vadd.f32 %v1802_v34, %v1674_v57  ;;  %v15470_v34 = vld [vmem:[#allocation94_spill] sm:$0xff] }
 0x1f5   :  { %2732 = vmatmul.f32.vlgmr.msrb.gmra.mxu2 %v15465_v48  ;;  %2893 = vmatmul.f32.gmra.mxu3 %v15466_v53  ;;  %v1861_v7 = vpop.f32.mrf.mxu0 }
 0x1f6   :  { %v1942_v37 = vpop.f32.mrf.mxu1  ;;  %v1862_v1 = vadd.f32 %v1861_v7, %v10670_v45 }
 0x1f7   :  { %v2041_v62 = vpop.f32.mrf.mxu2  ;;  %v2110_v24 = vpop.f32.mrf.mxu3 }
 0x1f8   :  { %v2042_v33 = vadd.f32 %v2041_v62, %v1931_v12  ;;  %v1937_v26 = vadd.f32 %v1936_v39, %v1862_v1  ;;  %v15471_v39 = vld [vmem:[#allocation98_spill] sm:$0xff] }
 0x1f9   :  { %2602 = vmatmul.f32.gmra.mxu0 %v15415_v50  ;;  %2671 = vmatmul.f32.gmra.mxu1 %v15422_v63  ;;  %v3316_v12 = vld [vmem:[#allocation5 + $0x78] sm:$0xff] }
 0x1fa   :  { %v10817_v9 = vadd.f32 %v2106_v44, %v2042_v33  ;;  %v10852_v7 = vand.u32 4294901760, %v3316_v12  ;;  %v15473_v33 = vld [vmem:[#allocation102_spill] sm:$0xff] }
 0x1fc   :  { %v10857_v62 = vsub.f32 %v3316_v12, %v10852_v7  ;;  %3338 = vmatpush.msrb.mxu0 %v10852_v7  ;;  %3653 = vmatpush.msrb.mxu3 %v10852_v7  ;;  %vm3253_vm1 = vcmp.gt.f32.partialorder %v10817_v9, 0.0 }
 0x1fd   :  { %2740 = vmatmul.f32.gmra.mxu2 %v15467_v2  ;;  %2897 = vmatmul.f32.gmra.mxu3 %v10087_v59  ;;  %v1866_v14 = vpop.f32.mrf.mxu0 }
 0x1fe   :  { %v1948_v13 = vpop.f32.mrf.mxu1  ;;  %v1867_v30 = vadd.f32 %v1866_v14, %v10706_v40  ;;  %3565 = vmatpush.msrb.mxu2 %v10857_v62 }
 0x1ff   :  { %v2045_v23 = vpop.f32.mrf.mxu2  ;;  %v2114_v45 = vpop.f32.mrf.mxu3 }
 0x200   :  { %v2046_v21 = vadd.f32 %v2045_v23, %v1937_v26  ;;  %v1943_v50 = vadd.f32 %v1942_v37, %v1867_v30  ;;  %v3315_v37 = vld [vmem:[#allocation5 + $0x70] sm:$0xff]  ;;  %v15035_v26 = vand.u32 4294901760, %v10857_v62  ;;  %v3313_v23 = vld [vmem:[#allocation5 + $0x60] sm:$0xff] }
 0x201   :  { %2606 = vmatmul.f32.gmra.mxu0 %v15422_v63  ;;  %2675 = vmatmul.f32.gmra.mxu1 %v15428_v0 }
 0x202   :  { %v10824_v32 = vadd.f32 %v2110_v24, %v2046_v21  ;;  %v3314_v24 = vld [vmem:[#allocation5 + $0x68] sm:$0xff]  ;;  %v3437_v21 = vsub.f32 %v10857_v62, %v15035_v26  ;;  %v15483_v26 = vld [vmem:[#allocation87_spill] sm:$0xff] }
 0x203   :  { %v10872_v30 = vand.u32 4294901760, %v3314_v24 }
 0x204   :  { %vm3255_vm2 = vcmp.gt.f32.partialorder %v10824_v32, 0.0 }
 0x205   :  { %2748 = vmatmul.f32.gmra.mxu2 %v15468_v41  ;;  %2901 = vmatmul.f32.gmra.mxu3 %v10106_v36  ;;  %v1871_v28 = vpop.f32.mrf.mxu0 }
 0x206   :  { %v1954_v43 = vpop.f32.mrf.mxu1  ;;  %v1872_v47 = vadd.f32 %v1871_v28, %v10727_v8 }
 0x207   :  { %v2049_v6 = vpop.f32.mrf.mxu2 }
 0x208   :  { %v2118_v40 = vpop.f32.mrf.mxu3  ;;  %v2050_v5 = vadd.f32 %v2049_v6, %v1943_v50  ;;  %v1949_v63 = vadd.f32 %v1948_v13, %v1872_v47  ;;  %v10887_v47 = vand.u32 4294901760, %v3313_v23  ;;  %v3312_v6 = vld [vmem:[#allocation5 + $0x58] sm:$0xff] }
 0x209   :  { %2610 = vmatmul.f32.gmra.mxu0 %v15428_v0  ;;  %2679 = vmatmul.f32.gmra.mxu1 %v15433_v60 }
 0x20a   :  { %v10831_v56 = vadd.f32 %v2114_v45, %v2050_v5 }
 0x20c   :  { %vm3257_vm3 = vcmp.gt.f32.partialorder %v10831_v56, 0.0 }
 0x20d   :  { %2756 = vmatmul.f32.gmra.mxu2 %v15469_v3  ;;  %2905 = vmatmul.f32.gmra.mxu3 %v10125_v29  ;;  %v1876_v58 = vpop.f32.mrf.mxu0 }
 0x20e   :  { %v1960_v38 = vpop.f32.mrf.mxu1  ;;  %v1877_v52 = vadd.f32 %v1876_v58, %v10749_v25 }
 0x20f   :  { %v2053_v10 = vpop.f32.mrf.mxu2 }
 0x210   :  { %v2122_v8 = vpop.f32.mrf.mxu3  ;;  %v2054_v19 = vadd.f32 %v2053_v10, %v1949_v63  ;;  %v1955_v0 = vadd.f32 %v1954_v43, %v1877_v52  ;;  %v10884_v43 = vsub.f32 %v3314_v24, %v10872_v30  ;;  %v3438_v63 = vand.u32 4294901760, %v3437_v21  ;;  %v15477_v21 = vld [vmem:[#allocation84_spill] sm:$0xff] }
 0x211   :  { %2614 = vmatmul.f32.gmra.mxu0 %v15433_v60  ;;  %2683 = vmatmul.f32.gmra.mxu1 %v15441_v61  ;;  %v10899_v52 = vand.u32 4294901760, %v3312_v6 }
 0x212   :  { %v10838_v11 = vadd.f32 %v2118_v40, %v2054_v19  ;;  %v15475_v40 = vld [vmem:[#allocation51_spill] sm:$0xff]  ;;  %v15032_v58 = vand.u32 4294901760, %v10884_v43  ;;  %3439 = vmatpush.msrb.mxu1 %v3438_v63 }
 0x214   :  { %vm3259_vm4 = vcmp.gt.f32.partialorder %v10838_v11, 0.0 }
 0x215   :  { %2764 = vmatmul.f32.gmra.mxu2 %v15470_v34  ;;  %2909 = vmatmul.f32.gmra.mxu3 %v10144_v55  ;;  %v1881_v46 = vpop.f32.mrf.mxu0 }
 0x216   :  { %v1966_v49 = vpop.f32.mrf.mxu1  ;;  %v1882_v15 = vadd.f32 %v1881_v46, %v10770_v31  ;;  %v10913_v46 = vsub.f32 %v3312_v6, %v10899_v52 }
 0x217   :  { %v2057_v35 = vpop.f32.mrf.mxu2 }
 0x218   :  { %v2126_v25 = vpop.f32.mrf.mxu3  ;;  %v2058_v18 = vadd.f32 %v2057_v35, %v1955_v0  ;;  %v1961_v60 = vadd.f32 %v1960_v38, %v1882_v15  ;;  %v10897_v38 = vsub.f32 %v3313_v23, %v10887_v47  ;;  %v3449_v0 = vsub.f32 %v10884_v43, %v15032_v58  ;;  %v15476_v15 = vld [vmem:[#allocation105_spill] sm:$0xff]  ;;  %v3308_v23 = vld [vmem:[#allocation5 + $0x38] sm:$0xff] }
 0x219   :  { %2618 = vmatmul.f32.gmra.mxu0 %v15441_v61  ;;  %2687 = vmatmul.f32.gmra.mxu1 %v15448_v16 }
 0x21a   :  { %v10845_v51 = vadd.f32 %v2122_v8, %v2058_v18  ;;  %v15031_v34 = vand.u32 4294901760, %v10897_v38  ;;  %v8813_v18 = vld [vmem:[%s14821_s4] sm:$0x3] }
 0x21c   :  { %vm3261_vm5 = vcmp.gt.f32.partialorder %v10845_v51, 0.0 }
 0x21d   :  { %2772 = vmatmul.f32.gmra.mxu2 %v15471_v39  ;;  %2913 = vmatmul.f32.gmra.mxu3 %v15472_v17  ;;  %v1886_v22 = vpop.f32.mrf.mxu0 }
 0x21e   :  { %v1972_v42 = vpop.f32.mrf.mxu1  ;;  %v1887_v44 = vadd.f32 %v1886_v22, %v10791_v4  ;;  %v10860_v4 = vand.u32 4294901760, %v3315_v37 }
 0x21f   :  { %v2061_v57 = vpop.f32.mrf.mxu2 }
 0x220   :  { %v2130_v31 = vpop.f32.mrf.mxu3  ;;  %v2062_v48 = vadd.f32 %v2061_v57, %v1961_v60  ;;  %v1967_v61 = vadd.f32 %v1966_v49, %v1887_v44  ;;  %v10867_v2 = vsub.f32 %v3315_v37, %v10860_v4  ;;  %3340 = vmatpush.msrb.mxu0 %v10860_v4  ;;  %3655 = vmatpush.msrb.mxu3 %v10860_v4  ;;  %v3310_v49 = vld [vmem:[#allocation5 + $0x48] sm:$0xff]  ;;  %v10927_v60 = vperm.slane %v8813_v18, 1 }
 0x221   :  { %2622 = vmatmul.f32.gmra.mxu0 %v15448_v16  ;;  %2691 = vmatmul.f32.gmra.mxu1 %v15455_v27  ;;  %v15474_v16 = vld [vmem:[#allocation101_spill] sm:$0xff]  ;;  %v3455_v44 = vsub.f32 %v10897_v38, %v15031_v34  ;;  %v15028_v57 = vand.u32 4294901760, %v10913_v46 }
 0x222   :  { %v10854_v1 = vadd.f32 %v2126_v25, %v2062_v48  ;;  %v15034_v50 = vand.u32 4294901760, %v10867_v2  ;;  %3568 = vmatpush.msrb.mxu2 %v10867_v2  ;;  %3342 = vmatpush.msrb.mxu0 %v10872_v30  ;;  %v10922_v25 = vand.u32 4294901760, %v3310_v49 }
 0x223   :  { %3657 = vmatpush.msrb.mxu3 %v10872_v30  ;;  %v3456_v24 = vand.u32 4294901760, %v3455_v44 }
 0x224   :  { %v3443_v3 = vsub.f32 %v10867_v2, %v15034_v50  ;;  %3571 = vmatpush.msrb.mxu2 %v10884_v43  ;;  %3344 = vmatpush.msrb.mxu0 %v10887_v47  ;;  %v10938_v48 = vsub.f32 %v3310_v49, %v10922_v25  ;;  %vm3263_vm6 = vcmp.gt.f32.partialorder %v10854_v1, 0.0 }
 0x225   :  { %2780 = vmatmul.f32.gmra.mxu2 %v15473_v33  ;;  %2917 = vmatmul.f32.gmra.mxu3 %v15474_v16  ;;  %v1891_v14 = vpop.f32.mrf.mxu0  ;;  %v3461_v33 = vsub.f32 %v10913_v46, %v15028_v57 }
 0x226   :  { %v10869_v13 = vpop.f32.mrf.mxu1  ;;  %v1892_v45 = vadd.f32 %v1891_v14, %v10810_v54  ;;  %v3444_v8 = vand.u32 4294901760, %v3443_v3  ;;  %3659 = vmatpush.msrb.mxu3 %v10887_v47  ;;  %3574 = vmatpush.msrb.mxu2 %v10897_v38 }
 0x227   :  { %v2065_v41 = vpop.f32.mrf.mxu2  ;;  %3346 = vmatpush.msrb.mxu0 %v10899_v52  ;;  %v3462_v63 = vand.u32 4294901760, %v3461_v33 }
 0x228   :  { %v10881_v28 = vpop.f32.mrf.mxu3  ;;  %v2066_v54 = vadd.f32 %v2065_v41, %v1967_v61  ;;  %v1973_v5 = vadd.f32 %v1972_v42, %v1892_v45  ;;  %3445 = vmatpush.msrb.mxu1 %v3444_v8  ;;  %v3450_v42 = vand.u32 4294901760, %v3449_v0  ;;  %3661 = vmatpush.msrb.mxu3 %v10899_v52  ;;  %v15478_v41 = vld [vmem:[#allocation58_spill] sm:$0xff] }
 0x229   :  { %2626 = vmatmul.f32.gmra.mxu0 %v15455_v27  ;;  %3045 = vmatmul.f32.vlgmr.msra.gmra.mxu1 %v15475_v40  ;;  %v3311_v27 = vld [vmem:[#allocation5 + $0x50] sm:$0xff] }
 0x22a   :  { %v10903_v10 = vadd.f32 %v2130_v31, %v2066_v54  ;;  %v10905_v19 = vand.u32 4294901760, %v3311_v27  ;;  %v3309_v31 = vld [vmem:[#allocation5 + $0x40] sm:$0xff]  ;;  %3577 = vmatpush.msrb.mxu2 %v10913_v46  ;;  %3451 = vmatpush.msrb.mxu1 %v3450_v42  ;;  %v15025_v54 = vand.u32 4294901760, %v10938_v48 }
 0x22b   :  { %v10947_v14 = vand.u32 4294901760, %v3309_v31 }
 0x22c   :  { %v10920_v35 = vsub.f32 %v3311_v27, %v10905_v19  ;;  %3663 = vmatpush.msrb.mxu3 %v10905_v19  ;;  %3457 = vmatpush.msrb.mxu1 %v3456_v24  ;;  %v10960_v27 = vand.u32 4294901760, %v3308_v23  ;;  %v3473_v49 = vsub.f32 %v10938_v48, %v15025_v54  ;;  %v15481_v54 = vld [vmem:[#allocation64_spill] sm:$0xff]  ;;  %vm3265_vm7 = vcmp.gt.f32.partialorder %v10903_v10, 0.0 }
 0x22d   :  { %2788 = vmatmul.f32.gmra.mxu2 %v15476_v15  ;;  %3221 = vmatmul.f32.vlgmr.msra.gmra.mxu3 %v15463_v20  ;;  %v2175_v39 = vpop.f32.mrf.mxu0  ;;  %v10958_v3 = vsub.f32 %v3309_v31, %v10947_v14 }
 0x22e   :  { %v10929_v22 = vpop.f32.mrf.mxu1  ;;  %v15026_v12 = vand.u32 4294901760, %v10920_v35  ;;  %v2176_v40 = vadd.f32 %v2175_v39, %v10927_v60  ;;  %3665 = vmatpush.msrb.mxu3 %v10922_v25  ;;  %3348 = vmatpush.msrb.mxu0 %v10905_v19  ;;  %v10975_v39 = vsub.f32 %v3308_v23, %v10960_v27  ;;  %v3474_v42 = vand.u32 4294901760, %v3473_v49 }
 0x22f   :  { %v2069_v61 = vpop.f32.mrf.mxu2  ;;  %3580 = vmatpush.msrb.mxu2 %v10920_v35  ;;  %3463 = vmatpush.msrb.mxu1 %v3462_v63  ;;  %v15024_v18 = vand.u32 4294901760, %v10958_v3 }
 0x230   :  { %v10942_v37 = vpop.f32.mrf.mxu3  ;;  %v2070_v45 = vadd.f32 %v2069_v61, %v1973_v5  ;;  %v3467_v6 = vsub.f32 %v10920_v35, %v15026_v12  ;;  %v3307_v5 = vld [vmem:[#allocation5 + $0x30] sm:$0xff]  ;;  %3667 = vmatpush.msrb.mxu3 %v10947_v14  ;;  %v15027_v33 = vand.u32 4294901760, %v10975_v39  ;;  %3350 = vmatpush.msrb.mxu0 %v10922_v25 }
 0x231   :  { %2971 = vmatmul.f32.vlgmr.msra.gmra.mxu0 %v15477_v21  ;;  %3051 = vmatmul.f32.gmra.mxu1 %v15478_v41  ;;  %v10970_v15 = vand.u32 4294901760, %v3307_v5  ;;  %v3479_v24 = vsub.f32 %v10958_v3, %v15024_v18  ;;  %v15480_v18 = vld [vmem:[#allocation86_spill] sm:$0xff] }
 0x232   :  { %v10964_v8 = vadd.f32 %v10881_v28, %v2070_v45  ;;  %v3468_v0 = vand.u32 4294901760, %v3467_v6  ;;  %v3306_v28 = vld [vmem:[#allocation5 + $0x28] sm:$0xff]  ;;  %v2333_v45 = vadd.f32 %v10869_v13, %v2176_v40  ;;  %3669 = vmatpush.msrb.mxu3 %v10960_v27  ;;  %3583 = vmatpush.msrb.mxu2 %v10938_v48  ;;  %v3304_v13 = vld [vmem:[#allocation5 + $0x18] sm:$0xff] }
 0x233   :  { %v10981_v44 = vsub.f32 %v3307_v5, %v10970_v15  ;;  %v10990_v23 = vand.u32 4294901760, %v3306_v28  ;;  %v3480_v5 = vand.u32 4294901760, %v3479_v24  ;;  %3352 = vmatpush.msrb.mxu0 %v10947_v14  ;;  %v11012_v24 = vand.u32 4294901760, %v3304_v13 }
 0x234   :  { %15479 = vst [vmem:[#allocation49_spill] sm:$0xff] %v10964_v8  ;;  %3469 = vmatpush.msrb.mxu1 %v3468_v0  ;;  %v3485_v0 = vsub.f32 %v10975_v39, %v15027_v33  ;;  %3671 = vmatpush.msrb.mxu3 %v10970_v15 }
 0x235   :  { %3156 = vmatmul.f32.vlgmr.msra.gmra.mxu2 %v15463_v20  ;;  %3225 = vmatmul.f32.gmra.mxu3 %v15466_v53  ;;  %v2183_v31 = vpop.f32.mrf.mxu0  ;;  %v3305_v20 = vld [vmem:[#allocation5 + $0x20] sm:$0xff]  ;;  %v15030_v21 = vand.u32 4294901760, %v10981_v44  ;;  %v11004_v49 = vsub.f32 %v3306_v28, %v10990_v23 }
 0x236   :  { %v10983_v61 = vpop.f32.mrf.mxu1  ;;  %v10995_v41 = vand.u32 4294901760, %v3305_v20  ;;  %3475 = vmatpush.msrb.mxu1 %v3474_v42  ;;  %v2184_v12 = vadd.f32 %v2183_v31, %v10927_v60  ;;  %v3486_v33 = vand.u32 4294901760, %v3485_v0  ;;  %3354 = vmatpush.msrb.mxu0 %v10960_v27  ;;  %v3302_v0 = vld [vmem:[#allocation5 + $0x8] sm:$0xff] }
 0x237   :  { %v2414_v6 = vpop.f32.mrf.mxu2  ;;  %v3491_v42 = vsub.f32 %v10981_v44, %v15030_v21  ;;  %v15029_v28 = vand.u32 4294901760, %v11004_v49  ;;  %3586 = vmatpush.msrb.mxu2 %v10958_v3  ;;  %3673 = vmatpush.msrb.mxu3 %v10990_v23 }
 0x238   :  { %v10998_v63 = vpop.f32.mrf.mxu3  ;;  %v2415_v40 = vadd.f32 %v2414_v6, %v2333_v45  ;;  %3481 = vmatpush.msrb.mxu1 %v3480_v5  ;;  %v11017_v57 = vsub.f32 %v3305_v20, %v10995_v41  ;;  %3356 = vmatpush.msrb.mxu0 %v10970_v15  ;;  %v2337_v34 = vadd.f32 %v10929_v22, %v2184_v12 }
 0x239   :  { %2976 = vmatmul.f32.gmra.mxu0 %v15480_v18  ;;  %3057 = vmatmul.f32.gmra.mxu1 %v15481_v54  ;;  %v3303_v18 = vld [vmem:[#allocation5 + $0x10] sm:$0xff]  ;;  %v3492_v45 = vand.u32 4294901760, %v3491_v42  ;;  %v11022_v54 = vsub.f32 %v3304_v13, %v11012_v24  ;;  %v3497_v20 = vsub.f32 %v11004_v49, %v15029_v28 }
 0x23a   :  { %v11024_v6 = vand.u32 4294901760, %v3303_v18  ;;  %v11028_v31 = vadd.f32 %v10942_v37, %v2415_v40  ;;  %3487 = vmatpush.msrb.mxu1 %v3486_v33  ;;  %v15033_v5 = vand.u32 4294901760, %v11017_v57  ;;  %v11041_v37 = vand.u32 4294901760, %v3302_v0  ;;  %3675 = vmatpush.msrb.mxu3 %v10995_v41 }
 0x23b   :  { %v15036_v13 = vand.u32 4294901760, %v11022_v54  ;;  %v3498_v28 = vand.u32 4294901760, %v3497_v20  ;;  %3589 = vmatpush.msrb.mxu2 %v10975_v39  ;;  %3358 = vmatpush.msrb.mxu0 %v10990_v23 }
 0x23c   :  { %15482 = vst [vmem:[#allocation107_spill] sm:$0xff] %v11028_v31  ;;  %v11039_v42 = vsub.f32 %v3303_v18, %v11024_v6  ;;  %3493 = vmatpush.msrb.mxu1 %v3492_v45  ;;  %v3503_v21 = vsub.f32 %v11017_v57, %v15033_v5  ;;  %v11056_v45 = vsub.f32 %v3302_v0, %v11041_v37 }
 0x23d   :  { %3160 = vmatmul.f32.gmra.mxu2 %v15466_v53  ;;  %3229 = vmatmul.f32.gmra.mxu3 %v10087_v59  ;;  %v2191_v33 = vpop.f32.mrf.mxu0  ;;  %v3301_v53 = vld [vmem:[#allocation5] sm:$0xff]  ;;  %v3509_v18 = vsub.f32 %v11022_v54, %v15036_v13  ;;  %v15484_v13 = vld [vmem:[#allocation90_spill] sm:$0xff] }
 0x23e   :  { %v11043_v40 = vpop.f32.mrf.mxu1  ;;  %3499 = vmatpush.msrb.mxu1 %v3498_v28  ;;  %v3504_v50 = vand.u32 4294901760, %v3503_v21  ;;  %v11060_v22 = vand.u32 4294901760, %v3301_v53  ;;  %v15485_v31 = vand.u32 4294901760, %v11039_v42  ;;  %v3520_v8 = vand.u32 4294901760, %v11056_v45  ;;  %3677 = vmatpush.msrb.mxu3 %v11012_v24 }
 0x23f   :  { %v2419_v20 = vpop.f32.mrf.mxu2  ;;  %v3510_v58 = vand.u32 4294901760, %v3509_v18  ;;  %v2192_v28 = vadd.f32 %v2191_v33, %v10927_v60  ;;  %3360 = vmatpush.msrb.mxu0 %v10995_v41  ;;  %3592 = vmatpush.msrb.mxu2 %v10981_v44 }
 0x240   :  { %v2500_v5 = vpop.f32.mrf.mxu3  ;;  %v2420_v12 = vadd.f32 %v2419_v20, %v2337_v34  ;;  %v3515_v0 = vsub.f32 %v11039_v42, %v15485_v31  ;;  %3505 = vmatpush.msrb.mxu1 %v3504_v50  ;;  %v11070_v21 = vsub.f32 %v3301_v53, %v11060_v22  ;;  %v3521_v50 = vsub.f32 %v11056_v45, %v3520_v8 }
 0x241   :  { %2981 = vmatmul.f32.gmra.mxu0 %v15483_v26  ;;  %3063 = vmatmul.f32.gmra.mxu1 %v15484_v13 }
 0x242   :  { %v3516_v34 = vand.u32 4294901760, %v3515_v0  ;;  %v11076_v26 = vadd.f32 %v10998_v63, %v2420_v12  ;;  %3511 = vmatpush.msrb.mxu1 %v3510_v58  ;;  %v3526_v31 = vand.u32 4294901760, %v11070_v21  ;;  %3679 = vmatpush.msrb.mxu3 %v11024_v6  ;;  %v3522_v53 = vand.u32 4294901760, %v3521_v50  ;;  %v15486_v0 = vld [vmem:[#allocation89_spill] sm:$0xff] }
 0x243   :  { %3362 = vmatpush.msrb.mxu0 %v11012_v24  ;;  %v2341_v63 = vadd.f32 %v10983_v61, %v2192_v28  ;;  %3595 = vmatpush.msrb.mxu2 %v11004_v49 }
 0x244   :  { %3517 = vmatpush.msrb.mxu1 %v3516_v34  ;;  %v3527_v58 = vsub.f32 %v11070_v21, %v3526_v31  ;;  %3681 = vmatpush.msrb.mxu3 %v11041_v37  ;;  %v15487_v34 = vld [vmem:[#allocation93_spill] sm:$0xff] }
 0x245   :  { %3164 = vmatmul.f32.gmra.mxu2 %v10087_v59  ;;  %3233 = vmatmul.f32.gmra.mxu3 %v10106_v36  ;;  %v2199_v13 = vpop.f32.mrf.mxu0 }
 0x246   :  { %v2348_v33 = vpop.f32.mrf.mxu1  ;;  %3523 = vmatpush.msrb.mxu1 %v3522_v53  ;;  %v3528_v20 = vand.u32 4294901760, %v3527_v58  ;;  %3364 = vmatpush.msrb.mxu0 %v11024_v6  ;;  %v2200_v61 = vadd.f32 %v2199_v13, %v10927_v60  ;;  %v15488_v58 = vand.u32 4294901760, %v10857_v62  ;;  %v15491_v62 = vand.u32 4294901760, %v10867_v2 }
 0x247   :  { %3598 = vmatpush.msrb.mxu2 %v11017_v57  ;;  %3683 = vmatpush.msrb.mxu3 %v11060_v22  ;;  %v15493_v2 = vand.u32 4294901760, %v10897_v38  ;;  %v15498_v38 = vand.u32 4294901760, %v10920_v35 }
 0x248   :  { %v2424_v18 = vpop.f32.mrf.mxu2  ;;  %v2506_v59 = vpop.f32.mrf.mxu3  ;;  %3529 = vmatpush.msrb.mxu1 %v3528_v20  ;;  %3366 = vmatpush.msrb.mxu0 %v11041_v37  ;;  %v2345_v13 = vadd.f32 %v11043_v40, %v2200_v61 }
 0x249   :  { %v2425_v12 = vadd.f32 %v2424_v18, %v2341_v63  ;;  %2986 = vmatmul.f32.gmra.mxu0 %v15486_v0  ;;  %3069 = vmatmul.f32.gmra.mxu1 %v15487_v34  ;;  %v15490_v18 = vld [vmem:[#allocation96_spill] sm:$0xff]  ;;  %v15492_v0 = vand.u32 4294901760, %v10884_v43  ;;  %v15496_v43 = vand.u32 4294901760, %v10913_v46  ;;  %v15499_v46 = vand.u32 4294901760, %v10938_v48 }
 0x24a   :  { %3601 = vmatpush.msrb.mxu2 %v11022_v54  ;;  %3831 = vmatpush.msra.mxu1 %v10852_v7  ;;  %v15489_v7 = vld [vmem:[#allocation92_spill] sm:$0xff]  ;;  %v15503_v48 = vand.u32 4294901760, %v10975_v39 }
 0x24b   :  { %v11099_v28 = vadd.f32 %v2500_v5, %v2425_v12  ;;  %3368 = vmatpush.msrb.mxu0 %v11060_v22 }
 0x24c   :  { %3604 = vmatpush.msrb.mxu2 %v11039_v42  ;;  %3833 = vmatpush.msra.mxu1 %v10860_v4 }
 0x24d   :  { %3168 = vmatmul.f32.gmra.mxu2 %v10106_v36  ;;  %3237 = vmatmul.f32.gmra.mxu3 %v10125_v29 }
 0x24e   :  { %v2207_v50 = vpop.f32.mrf.mxu0  ;;  %v2352_v53 = vpop.f32.mrf.mxu1  ;;  %3736 = vmatpush.msra.mxu0 %v15488_v58  ;;  %3607 = vmatpush.msrb.mxu2 %v11056_v45 }
 0x24f   :  { %3835 = vmatpush.msra.mxu1 %v10872_v30  ;;  %v2208_v40 = vadd.f32 %v2207_v50, %v10927_v60  ;;  %v15495_v50 = vld [vmem:[#allocation100_spill] sm:$0xff] }
 0x250   :  { %v2429_v5 = vpop.f32.mrf.mxu2  ;;  %v2512_v63 = vpop.f32.mrf.mxu3  ;;  %3610 = vmatpush.msrb.mxu2 %v11070_v21  ;;  %3740 = vmatpush.msra.mxu0 %v15491_v62 }
 0x251   :  { %v2430_v36 = vadd.f32 %v2429_v5, %v2345_v13  ;;  %2991 = vmatmul.f32.gmra.mxu0 %v15489_v7  ;;  %3075 = vmatmul.f32.gmra.mxu1 %v15490_v18  ;;  %v2349_v30 = vadd.f32 %v2348_v33, %v2208_v40  ;;  %v15505_v18 = vand.u32 4294901760, %v10981_v44  ;;  %v15506_v40 = vand.u32 4294901760, %v11004_v49  ;;  %v3332_v49 = vld [vmem:[#allocation5 + $0xf8] sm:$0xff] }
 0x252   :  { %3837 = vmatpush.msra.mxu1 %v10887_v47  ;;  %3744 = vmatpush.msra.mxu0 %v15492_v0  ;;  %v15494_v47 = vld [vmem:[#allocation95_spill] sm:$0xff]  ;;  %v3273_v44 = vmul.f32 0.01, %v10831_v56 }
 0x253   :  { %v11117_v20 = vadd.f32 %v2506_v59, %v2430_v36  ;;  %v3269_v59 = vmul.f32 0.01, %v10817_v9  ;;  %v15501_v36 = vld [vmem:[#allocation99_spill] sm:$0xff] }
 0x254   :  { %3839 = vmatpush.msra.mxu1 %v10899_v52  ;;  %3748 = vmatpush.msra.mxu0 %v15493_v2  ;;  %v3289_v2 = vsel %vm3257_vm3, %v10831_v56, %v3273_v44 }
 0x255   :  { %3172 = vmatmul.f32.gmra.mxu2 %v10125_v29  ;;  %3241 = vmatmul.f32.gmra.mxu3 %v10144_v55 }
 0x256   :  { %v2215_v4 = vpop.f32.mrf.mxu0  ;;  %v2356_v12 = vpop.f32.mrf.mxu1  ;;  %3841 = vmatpush.msra.mxu1 %v10905_v19  ;;  %3752 = vmatpush.msra.mxu0 %v15496_v43  ;;  %v3285_v19 = vsel %vm3253_vm1, %v10817_v9, %v3269_v59  ;;  %v3271_v9 = vmul.f32 0.01, %v10824_v32  ;;  %v15509_v59 = vand.u32 4294901760, %v11022_v54 }
 0x257   :  { %v2216_v52 = vadd.f32 %v2215_v4, %v10927_v60  ;;  %v11149_v58 = vand.u32 4294901760, %v3285_v19 }
 0x258   :  { %v2434_v34 = vpop.f32.mrf.mxu2  ;;  %v2518_v61 = vpop.f32.mrf.mxu3  ;;  %3843 = vmatpush.msra.mxu1 %v10922_v25  ;;  %3756 = vmatpush.msra.mxu0 %v15498_v38 }
 0x259   :  { %v2435_v29 = vadd.f32 %v2434_v34, %v2349_v30  ;;  %2996 = vmatmul.f32.gmra.mxu0 %v15494_v47  ;;  %3081 = vmatmul.f32.gmra.mxu1 %v15495_v50  ;;  %v2353_v5 = vadd.f32 %v2352_v53, %v2216_v52  ;;  %v11162_v53 = vsub.f32 %v3285_v19, %v11149_v58  ;;  %v15508_v30 = vld [vmem:[#allocation103_spill] sm:$0xff]  ;;  %v15511_v47 = vand.u32 4294901760, %v11039_v42 }
 0x25a   :  { %3845 = vmatpush.msra.mxu1 %v10947_v14  ;;  %3760 = vmatpush.msra.mxu0 %v15499_v46  ;;  %v11216_v52 = vand.u32 4294901760, %v3289_v2  ;;  %v3330_v46 = vld [vmem:[#allocation5 + $0xe8] sm:$0xff] }
 0x25b   :  { %v11138_v33 = vadd.f32 %v2512_v63, %v2435_v29 }
 0x25c   :  { %3847 = vmatpush.msra.mxu1 %v10960_v27  ;;  %v15502_v27 = vld [vmem:[#allocation104_spill] sm:$0xff]  ;;  %v11240_v45 = vsub.f32 %v3289_v2, %v11216_v52 }
 0x25d   :  { %15497 = vst [vmem:[#allocation106_spill] sm:$0xff] %v11138_v33  ;;  %3176 = vmatmul.f32.gmra.mxu2 %v10144_v55  ;;  %3245 = vmatmul.f32.gmra.mxu3 %v15472_v17  ;;  %v15500_v55 = vand.u32 4294901760, %v10958_v3  ;;  %v3287_v3 = vsel %vm3255_vm2, %v10824_v32, %v3271_v9  ;;  %v3371_v32 = vand.u32 4294901760, %v11162_v53 }
 0x25e   :  { %v2223_v13 = vpop.f32.mrf.mxu0  ;;  %v2360_v25 = vpop.f32.mrf.mxu1  ;;  %3849 = vmatpush.msra.mxu1 %v10970_v15  ;;  %v11179_v4 = vand.u32 4294901760, %v3287_v3 }
 0x25f   :  { %3764 = vmatpush.msra.mxu0 %v15500_v55  ;;  %v2224_v15 = vadd.f32 %v2223_v13, %v10927_v60 }
 0x260   :  { %v2439_v14 = vpop.f32.mrf.mxu2  ;;  %v2524_v63 = vpop.f32.mrf.mxu3  ;;  %3851 = vmatpush.msra.mxu1 %v10990_v23  ;;  %v11196_v34 = vsub.f32 %v3287_v3, %v11179_v4 }
 0x261   :  { %v2440_v35 = vadd.f32 %v2439_v14, %v2353_v5  ;;  %3001 = vmatmul.f32.gmra.mxu0 %v15501_v36  ;;  %3087 = vmatmul.f32.gmra.mxu1 %v15502_v27  ;;  %v2357_v62 = vadd.f32 %v2356_v12, %v2224_v15  ;;  %v11188_v12 = vand.u32 4294901760, %v3332_v49  ;;  %v11234_v14 = vand.u32 4294901760, %v3330_v46 }
 0x262   :  { %3768 = vmatpush.msra.mxu0 %v15503_v48  ;;  %3853 = vmatpush.msra.mxu1 %v10995_v41  ;;  %v3379_v43 = vand.u32 4294901760, %v11196_v34  ;;  %v3387_v15 = vand.u32 4294901760, %v11240_v45 }
 0x263   :  { %v11165_v7 = vadd.f32 %v2518_v61, %v2440_v35  ;;  %3896 = vmatpush.msra.mxu2 %v11188_v12  ;;  %v11203_v29 = vsub.f32 %v3332_v49, %v11188_v12  ;;  %v11250_v21 = vsub.f32 %v3330_v46, %v11234_v14 }
 0x264   :  { %3772 = vmatpush.msra.mxu0 %v15505_v18  ;;  %3855 = vmatpush.msra.mxu1 %v11012_v24  ;;  %v3277_v18 = vmul.f32 0.01, %v10845_v51 }
 0x265   :  { %15504 = vst [vmem:[#allocation50_spill] sm:$0xff] %v11165_v7  ;;  %3180 = vmatmul.f32.gmra.mxu2 %v15472_v17  ;;  %3249 = vmatmul.f32.gmra.mxu3 %v15474_v16  ;;  %v15507_v17 = vand.u32 4294901760, %v11017_v57  ;;  %v3372_v57 = vsub.f32 %v11162_v53, %v3371_v32 }
 0x266   :  { %v2231_v39 = vpop.f32.mrf.mxu0  ;;  %v11173_v23 = vpop.f32.mrf.mxu1  ;;  %3776 = vmatpush.msra.mxu0 %v15506_v40  ;;  %3857 = vmatpush.msra.mxu1 %v11024_v6 }
 0x267   :  { %v2232_v6 = vadd.f32 %v2231_v39, %v10927_v60  ;;  %v3373_v50 = vand.u32 4294901760, %v3372_v57 }
 0x268   :  { %v2444_v41 = vpop.f32.mrf.mxu2  ;;  %v2530_v0 = vpop.f32.mrf.mxu3  ;;  %3780 = vmatpush.msra.mxu0 %v15507_v17  ;;  %3859 = vmatpush.msra.mxu1 %v11041_v37  ;;  %v15044_v37 = vand.u32 4294901760, %v11203_v29 }
 0x269   :  { %v2445_v24 = vadd.f32 %v2444_v41, %v2357_v62  ;;  %3006 = vmatmul.f32.gmra.mxu0 %v15508_v30  ;;  %3531 = vmatmul.f32.vlgmr.msrb.gmra.mxu1 %v11149_v58  ;;  %v2361_v56 = vadd.f32 %v2360_v25, %v2232_v6  ;;  %v3328_v41 = vld [vmem:[#allocation5 + $0xd8] sm:$0xff]  ;;  %v3388_v30 = vsub.f32 %v11240_v45, %v3387_v15 }
 0x26a   :  { %3784 = vmatpush.msra.mxu0 %v15509_v59  ;;  %3861 = vmatpush.msra.mxu1 %v11060_v22  ;;  %v3331_v22 = vld [vmem:[#allocation5 + $0xf0] sm:$0xff]  ;;  %v3995_v13 = vsub.f32 %v11203_v29, %v15044_v37  ;;  %v3293_v59 = vsel %vm3261_vm5, %v10845_v51, %v3277_v18 }
 0x26b   :  { %v11198_v61 = vadd.f32 %v2524_v63, %v2445_v24  ;;  %v11224_v42 = vand.u32 4294901760, %v3331_v22  ;;  %v11283_v24 = vand.u32 4294901760, %v3328_v41 }
 0x26c   :  { %3788 = vmatpush.msra.mxu0 %v15511_v47  ;;  %4211 = vmatpush.msrb.mxu1 %v11188_v12  ;;  %v3996_v5 = vand.u32 4294901760, %v3995_v13 }
 0x26d   :  { %15510 = vst [vmem:[#allocation48_spill] sm:$0xff] %v11198_v61  ;;  %3184 = vmatmul.f32.gmra.mxu2 %v15474_v16  ;;  %3687 = vmatmul.f32.vlgmr.msrb.gmra.mxu3 %v3371_v32  ;;  %v3275_v16 = vmul.f32 0.01, %v10838_v11  ;;  %v11232_v9 = vsub.f32 %v3331_v22, %v11224_v42  ;;  %v11294_v57 = vsub.f32 %v3328_v41, %v11283_v24  ;;  %v11309_v22 = vand.u32 4294901760, %v3293_v59 }
 0x26e   :  { %v11207_v60 = vpop.f32.mrf.mxu0  ;;  %v11209_v54 = vpop.f32.mrf.mxu1  ;;  %3792 = vmatpush.msra.mxu0 %v3520_v8  ;;  %3898 = vmatpush.msra.mxu2 %v11224_v42  ;;  %v3380_v8 = vsub.f32 %v11196_v34, %v3379_v43 }
 0x26f   :  { %4213 = vmatpush.msrb.mxu1 %v11224_v42  ;;  %v3291_v55 = vsel %vm3259_vm4, %v10838_v11, %v3275_v16  ;;  %3997 = vmatpush.msra.mxu3 %v3996_v5  ;;  %v15043_v35 = vand.u32 4294901760, %v11232_v9  ;;  %v15042_v11 = vand.u32 4294901760, %v11250_v21  ;;  %v15039_v51 = vand.u32 4294901760, %v11294_v57  ;;  %15515 = vst [vmem:[#allocation55_spill] sm:$0xff] %v11309_v22  ;;  %v3327_v16 = vld [vmem:[#allocation5 + $0xd0] sm:$0xff] }
 0x270   :  { %v2449_v19 = vpop.f32.mrf.mxu2  ;;  %v11219_v38 = vpop.f32.mrf.mxu3  ;;  %3796 = vmatpush.msra.mxu0 %v3526_v31  ;;  %3900 = vmatpush.msra.mxu2 %v11234_v14  ;;  %v3381_v48 = vand.u32 4294901760, %v3380_v8  ;;  %v11264_v3 = vand.u32 4294901760, %v3291_v55  ;;  %v11319_v5 = vand.u32 4294901760, %v3327_v16  ;;  %v3326_v8 = vld [vmem:[#allocation5 + $0xc8] sm:$0xff]  ;;  %v11332_v18 = vsub.f32 %v3293_v59, %v11309_v22 }
 0x271   :  { %v2450_v25 = vadd.f32 %v2449_v19, %v2361_v56  ;;  %3374 = vmatmul.f32.vlgmr.msrb.gmra.mxu0 %v3373_v50  ;;  %3535 = vmatmul.f32.gmra.mxu1 %v11179_v4  ;;  %v4001_v27 = vsub.f32 %v11232_v9, %v15043_v35  ;;  %v4007_v32 = vsub.f32 %v11250_v21, %v15042_v11  ;;  %v3279_v50 = vmul.f32 0.01, %v10854_v1  ;;  %v3323_v11 = vld [vmem:[#allocation5 + $0xb0] sm:$0xff] }
 0x272   :  { %4123 = vmatpush.msrb.mxu0 %v11203_v29  ;;  %4215 = vmatpush.msrb.mxu1 %v11234_v14  ;;  %15513 = vst [vmem:[#allocation53_spill] sm:$0xff] %v11264_v3  ;;  %v11287_v49 = vsub.f32 %v3291_v55, %v11264_v3  ;;  %v4019_v46 = vsub.f32 %v11294_v57, %v15039_v51 }
 0x273   :  { %v11242_v63 = vadd.f32 %v2530_v0, %v2450_v25  ;;  %v4002_v62 = vand.u32 4294901760, %v4001_v27  ;;  %v4008_v0 = vand.u32 4294901760, %v4007_v32  ;;  %v11325_v27 = vsub.f32 %v3327_v16, %v11319_v5 }
 0x274   :  { %4126 = vmatpush.msrb.mxu0 %v11232_v9  ;;  %v4020_v55 = vand.u32 4294901760, %v4019_v46 }
 0x275   :  { %15512 = vst [vmem:[#allocation47_spill] sm:$0xff] %v11242_v63  ;;  %3613 = vmatmul.f32.vlgmr.msrb.gmra.mxu2 %v11162_v53  ;;  %3693 = vmatmul.f32.gmra.mxu3 %v3379_v43  ;;  %v3329_v53 = vld [vmem:[#allocation5 + $0xe0] sm:$0xff]  ;;  %v3389_v43 = vand.u32 4294901760, %v3388_v30 }
 0x276   :  { %v11253_v31 = vpop.f32.mrf.mxu0  ;;  %v11255_v36 = vpop.f32.mrf.mxu1  ;;  %v11274_v44 = vand.u32 4294901760, %v3329_v53  ;;  %4129 = vmatpush.msrb.mxu0 %v11250_v21  ;;  %4003 = vmatpush.msra.mxu3 %v4002_v62  ;;  %v15038_v62 = vand.u32 4294901760, %v11325_v27 }
 0x278   :  { %v11267_v39 = vpop.f32.mrf.mxu2  ;;  %v11269_v40 = vpop.f32.mrf.mxu3  ;;  %3902 = vmatpush.msra.mxu2 %v11274_v44  ;;  %v11281_v17 = vsub.f32 %v3329_v53, %v11274_v44  ;;  %4217 = vmatpush.msrb.mxu1 %v11274_v44  ;;  %v4025_v30 = vsub.f32 %v11325_v27, %v15038_v62 }
 0x279   :  { %3382 = vmatmul.f32.gmra.mxu0 %v3381_v48  ;;  %3539 = vmatmul.f32.gmra.mxu1 %v11216_v52  ;;  %v11327_v48 = vand.u32 4294901760, %v3326_v8 }
 0x27a   :  { %4009 = vmatpush.msra.mxu3 %v4008_v0  ;;  %v15041_v6 = vand.u32 4294901760, %v11281_v17  ;;  %3904 = vmatpush.msra.mxu2 %v11283_v24 }
 0x27b   :  { %4219 = vmatpush.msrb.mxu1 %v11283_v24  ;;  %4132 = vmatpush.msrb.mxu0 %v11281_v17  ;;  %v11338_v32 = vsub.f32 %v3326_v8, %v11327_v48 }
 0x27c   :  { %v4013_v56 = vsub.f32 %v11281_v17, %v15041_v6  ;;  %3906 = vmatpush.msra.mxu2 %v11319_v5 }
 0x27d   :  { %3618 = vmatmul.f32.gmra.mxu2 %v11196_v34  ;;  %3699 = vmatmul.f32.gmra.mxu3 %v3387_v15  ;;  %v3395_v34 = vand.u32 4294901760, %v11287_v49  ;;  %v3295_v15 = vsel %vm3263_vm6, %v10854_v1, %v3279_v50  ;;  %v15040_v59 = vand.u32 4294901760, %v11338_v32  ;;  %v3403_v50 = vand.u32 4294901760, %v11332_v18 }
 0x27e   :  { %v11297_v2 = vpop.f32.mrf.mxu0  ;;  %v11299_v47 = vpop.f32.mrf.mxu1  ;;  %v4014_v25 = vand.u32 4294901760, %v4013_v56  ;;  %4135 = vmatpush.msrb.mxu0 %v11294_v57  ;;  %4221 = vmatpush.msrb.mxu1 %v11319_v5  ;;  %v11345_v0 = vand.u32 4294901760, %v3295_v15  ;;  %v3281_v56 = vmul.f32 0.01, %v10903_v10 }
 0x27f   :  { %15514 = vst [vmem:[#allocation108_spill] sm:$0xff] %v11299_v47  ;;  %v3396_v53 = vsub.f32 %v11287_v49, %v3395_v34  ;;  %3908 = vmatpush.msra.mxu2 %v11327_v48  ;;  %v4031_v46 = vsub.f32 %v11338_v32, %v15040_v59 }
 0x280   :  { %v11312_v19 = vpop.f32.mrf.mxu2  ;;  %v11314_v13 = vpop.f32.mrf.mxu3  ;;  %4015 = vmatpush.msra.mxu3 %v4014_v25  ;;  %15519 = vst [vmem:[#allocation61_spill] sm:$0xff] %v11345_v0  ;;  %4223 = vmatpush.msrb.mxu1 %v11327_v48  ;;  %v4026_v25 = vand.u32 4294901760, %v4025_v30  ;;  %v3297_v59 = vsel %vm3265_vm7, %v10903_v10, %v3281_v56 }
 0x281   :  { %15516 = vst [vmem:[#allocation54_spill] sm:$0xff] %v11314_v13  ;;  %3390 = vmatmul.f32.gmra.mxu0 %v3389_v43  ;;  %3543 = vmatmul.f32.gmra.mxu1 %v11264_v3  ;;  %v3325_v43 = vld [vmem:[#allocation5 + $0xc0] sm:$0xff]  ;;  %v4032_v62 = vand.u32 4294901760, %v4031_v46  ;;  %v11392_v56 = vand.u32 4294901760, %v3297_v59 }
 0x282   :  { %4021 = vmatpush.msra.mxu3 %v4020_v55  ;;  %4138 = vmatpush.msrb.mxu0 %v11325_v27  ;;  %v11363_v8 = vand.u32 4294901760, %v3325_v43  ;;  %v3324_v55 = vld [vmem:[#allocation5 + $0xb8] sm:$0xff]  ;;  %v3317_v3 = vld [vmem:[#allocation5 + $0x80] sm:$0xff] }
 0x283   :  { %v11374_v51 = vand.u32 4294901760, %v3324_v55  ;;  %15523 = vst [vmem:[#allocation67_spill] sm:$0xff] %v11392_v56  ;;  %v11485_v13 = vand.u32 4294901760, %v3317_v3 }
 0x284   :  { %4141 = vmatpush.msrb.mxu0 %v11338_v32  ;;  %4027 = vmatpush.msra.mxu3 %v4026_v25  ;;  %v11372_v30 = vsub.f32 %v3325_v43, %v11363_v8 }
 0x285   :  { %3623 = vmatmul.f32.gmra.mxu2 %v11240_v45  ;;  %3705 = vmatmul.f32.gmra.mxu3 %v3395_v34  ;;  %v3397_v45 = vand.u32 4294901760, %v3396_v53  ;;  %v11368_v53 = vsub.f32 %v3295_v15, %v11345_v0  ;;  %v11384_v25 = vsub.f32 %v3324_v55, %v11374_v51  ;;  %v15524_v55 = vld [vmem:[#allocation49_spill] sm:$0xff] }
 0x286   :  { %v11341_v41 = vpop.f32.mrf.mxu0  ;;  %v11343_v1 = vpop.f32.mrf.mxu1  ;;  %3910 = vmatpush.msra.mxu2 %v11363_v8  ;;  %4225 = vmatpush.msrb.mxu1 %v11363_v8  ;;  %v15045_v15 = vand.u32 4294901760, %v11372_v30  ;;  %v3283_v35 = vmul.f32 0.01, %v15524_v55  ;;  %vm3267_vm8 = vcmp.gt.f32.partialorder %v15524_v55, 0.0 }
 0x287   :  { %15517 = vst [vmem:[#allocation52_spill] sm:$0xff] %v11341_v41  ;;  %4033 = vmatpush.msra.mxu3 %v4032_v62  ;;  %v3411_v10 = vand.u32 4294901760, %v11368_v53  ;;  %v15046_v6 = vand.u32 4294901760, %v11384_v25  ;;  %4144 = vmatpush.msrb.mxu0 %v11372_v30 }
 0x288   :  { %15518 = vst [vmem:[#allocation59_spill] sm:$0xff] %v11343_v1  ;;  %v11356_v34 = vpop.f32.mrf.mxu2  ;;  %v11358_v16 = vpop.f32.mrf.mxu3  ;;  %3912 = vmatpush.msra.mxu2 %v11374_v51  ;;  %v4037_v62 = vsub.f32 %v11372_v30, %v15045_v15  ;;  %4227 = vmatpush.msrb.mxu1 %v11374_v51  ;;  %v3321_v1 = vld [vmem:[#allocation5 + $0xa0] sm:$0xff] }
 0x289   :  { %15520 = vst [vmem:[#allocation60_spill] sm:$0xff] %v11358_v16  ;;  %3398 = vmatmul.f32.gmra.mxu0 %v3397_v45  ;;  %3547 = vmatmul.f32.gmra.mxu1 %v11309_v22  ;;  %v3404_v45 = vsub.f32 %v11332_v18, %v3403_v50  ;;  %v4043_v15 = vsub.f32 %v11384_v25, %v15046_v6 }
 0x28a   :  { %v4038_v61 = vand.u32 4294901760, %v4037_v62  ;;  %4147 = vmatpush.msrb.mxu0 %v11384_v25  ;;  %v11420_v62 = vsub.f32 %v3297_v59, %v11392_v56 }
 0x28b   :  { %v4044_v6 = vand.u32 4294901760, %v4043_v15 }
 0x28c   :  { %4039 = vmatpush.msra.mxu3 %v4038_v61  ;;  %v3320_v61 = vld [vmem:[#allocation5 + $0x98] sm:$0xff] }
 0x28d   :  { %3628 = vmatmul.f32.gmra.mxu2 %v11287_v49  ;;  %3711 = vmatmul.f32.gmra.mxu3 %v3403_v50  ;;  %v3405_v49 = vand.u32 4294901760, %v3404_v45  ;;  %v11400_v50 = vand.u32 4294901760, %v3323_v11  ;;  %v11443_v16 = vand.u32 4294901760, %v3320_v61 }
 0x28e   :  { %v11387_v43 = vpop.f32.mrf.mxu0  ;;  %v11389_v46 = vpop.f32.mrf.mxu1  ;;  %4045 = vmatpush.msra.mxu3 %v4044_v6 }
 0x28f   :  { %15521 = vst [vmem:[#allocation56_spill] sm:$0xff] %v11387_v43  ;;  %v11414_v45 = vsub.f32 %v3323_v11, %v11400_v50  ;;  %3914 = vmatpush.msra.mxu2 %v11400_v50  ;;  %4229 = vmatpush.msrb.mxu1 %v11400_v50  ;;  %v3299_v11 = vsel %vm3267_vm8, %v15524_v55, %v3283_v35  ;;  %v3419_v55 = vand.u32 4294901760, %v11420_v62 }
 0x290   :  { %15522 = vst [vmem:[#allocation65_spill] sm:$0xff] %v11389_v46  ;;  %v11403_v37 = vpop.f32.mrf.mxu2  ;;  %v11405_v63 = vpop.f32.mrf.mxu3  ;;  %v3322_v46 = vld [vmem:[#allocation5 + $0xa8] sm:$0xff] }
 0x291   :  { %15525 = vst [vmem:[#allocation66_spill] sm:$0xff] %v11403_v37  ;;  %3406 = vmatmul.f32.gmra.mxu0 %v3405_v49  ;;  %3551 = vmatmul.f32.gmra.mxu1 %v11345_v0  ;;  %v11416_v7 = vand.u32 4294901760, %v3322_v46  ;;  %v15051_v22 = vand.u32 4294901760, %v11414_v45  ;;  %v11427_v0 = vand.u32 4294901760, %v3321_v1 }
 0x292   :  { %15526 = vst [vmem:[#allocation62_spill] sm:$0xff] %v11405_v63  ;;  %v3412_v63 = vsub.f32 %v11368_v53, %v3411_v10  ;;  %4150 = vmatpush.msrb.mxu0 %v11414_v45 }
 0x293   :  { %v11425_v49 = vsub.f32 %v3322_v46, %v11416_v7  ;;  %3916 = vmatpush.msra.mxu2 %v11416_v7  ;;  %v4049_v59 = vsub.f32 %v11414_v45, %v15051_v22  ;;  %v11441_v46 = vsub.f32 %v3321_v1, %v11427_v0  ;;  %15527 = vst [vmem:[#allocation69_spill] sm:$0xff] %v11443_v16 }
 0x294   :  { %v3413_v6 = vand.u32 4294901760, %v3412_v63  ;;  %4231 = vmatpush.msrb.mxu1 %v11416_v7 }
 0x295   :  { %3633 = vmatmul.f32.gmra.mxu2 %v11332_v18  ;;  %3717 = vmatmul.f32.gmra.mxu3 %v3411_v10  ;;  %v15052_v15 = vand.u32 4294901760, %v11425_v49  ;;  %v3319_v18 = vld [vmem:[#allocation5 + $0x90] sm:$0xff]  ;;  %v11452_v10 = vand.u32 4294901760, %v3299_v11  ;;  %v4050_v22 = vand.u32 4294901760, %v4049_v59  ;;  %v15057_v33 = vand.u32 4294901760, %v11441_v46  ;;  %v3318_v59 = vld [vmem:[#allocation5 + $0x88] sm:$0xff] }
 0x296   :  { %v11445_v43 = vpop.f32.mrf.mxu0  ;;  %v11447_v35 = vpop.f32.mrf.mxu1  ;;  %3918 = vmatpush.msra.mxu2 %v11427_v0  ;;  %4153 = vmatpush.msrb.mxu0 %v11425_v49  ;;  %v11467_v37 = vand.u32 4294901760, %v3319_v18 }
 0x297   :  { %15528 = vst [vmem:[#allocation71_spill] sm:$0xff] %v11445_v43  ;;  %v4055_v1 = vsub.f32 %v11425_v49, %v15052_v15  ;;  %v11465_v43 = vsub.f32 %v3320_v61, %v11443_v16  ;;  %4233 = vmatpush.msrb.mxu1 %v11427_v0  ;;  %4051 = vmatpush.msra.mxu3 %v4050_v22  ;;  %v11479_v61 = vand.u32 4294901760, %v3318_v59 }
 0x298   :  { %15529 = vst [vmem:[#allocation70_spill] sm:$0xff] %v11447_v35  ;;  %v11459_v35 = vpop.f32.mrf.mxu2  ;;  %v11461_v63 = vpop.f32.mrf.mxu3  ;;  %3920 = vmatpush.msra.mxu2 %v11443_v16  ;;  %v11476_v47 = vsub.f32 %v3319_v18, %v11467_v37  ;;  %4156 = vmatpush.msrb.mxu0 %v11441_v46 }
 0x299   :  { %15530 = vst [vmem:[#allocation68_spill] sm:$0xff] %v11459_v35  ;;  %3414 = vmatmul.f32.gmra.mxu0 %v3413_v6  ;;  %3555 = vmatmul.f32.gmra.mxu1 %v11392_v56  ;;  %v4056_v15 = vand.u32 4294901760, %v4055_v1  ;;  %v4061_v35 = vsub.f32 %v11441_v46, %v15057_v33  ;;  %v3420_v6 = vsub.f32 %v11420_v62, %v3419_v55 }
 0x29a   :  { %15531 = vst [vmem:[#allocation73_spill] sm:$0xff] %v11461_v63  ;;  %v15059_v63 = vand.u32 4294901760, %v11465_v43  ;;  %3922 = vmatpush.msra.mxu2 %v11467_v37  ;;  %v11483_v56 = vsub.f32 %v3299_v11, %v11452_v10  ;;  %4235 = vmatpush.msrb.mxu1 %v11443_v16  ;;  %v15060_v18 = vand.u32 4294901760, %v11476_v47  ;;  %v11494_v33 = vsub.f32 %v3318_v59, %v11479_v61 }
 0x29b   :  { %v4062_v1 = vand.u32 4294901760, %v4061_v35  ;;  %4057 = vmatpush.msra.mxu3 %v4056_v15  ;;  %v11499_v11 = vsub.f32 %v3317_v3, %v11485_v13  ;;  %v3421_v41 = vand.u32 4294901760, %v3420_v6  ;;  %4159 = vmatpush.msrb.mxu0 %v11465_v43 }
 0x29c   :  { %v4067_v22 = vsub.f32 %v11465_v43, %v15059_v63  ;;  %3924 = vmatpush.msra.mxu2 %v11479_v61  ;;  %v4073_v63 = vsub.f32 %v11476_v47, %v15060_v18  ;;  %v4078_v59 = vand.u32 4294901760, %v11494_v33  ;;  %4237 = vmatpush.msrb.mxu1 %v11467_v37 }
 0x29d   :  { %3638 = vmatmul.f32.gmra.mxu2 %v11368_v53  ;;  %3723 = vmatmul.f32.gmra.mxu3 %v3419_v55  ;;  %v3427_v53 = vand.u32 4294901760, %v11483_v56  ;;  %v15061_v3 = vand.u32 4294901760, %v11499_v11  ;;  %v15533_v55 = vand.u32 4294901760, %v11203_v29 }
 0x29e   :  { %v11501_v35 = vpop.f32.mrf.mxu0  ;;  %v11503_v15 = vpop.f32.mrf.mxu1  ;;  %4063 = vmatpush.msra.mxu3 %v4062_v1  ;;  %v4068_v16 = vand.u32 4294901760, %v4067_v22  ;;  %3926 = vmatpush.msra.mxu2 %v11485_v13  ;;  %v4074_v18 = vand.u32 4294901760, %v4073_v63 }
 0x29f   :  { %15532 = vst [vmem:[#allocation75_spill] sm:$0xff] %v11503_v15  ;;  %v4079_v15 = vsub.f32 %v11494_v33, %v4078_v59  ;;  %v4085_v29 = vsub.f32 %v11499_v11, %v15061_v3  ;;  %4239 = vmatpush.msrb.mxu1 %v11479_v61  ;;  %4162 = vmatpush.msrb.mxu0 %v11476_v47 }
 0x2a0   :  { %4294 = vmatpush.msrb.mxu2 %v15533_v55  ;;  %v11515_v1 = vpop.f32.mrf.mxu2  ;;  %v11517_v22 = vpop.f32.mrf.mxu3  ;;  %4069 = vmatpush.msra.mxu3 %v4068_v16  ;;  %v15534_v55 = vand.u32 4294901760, %v11232_v9  ;;  %v3428_v16 = vsub.f32 %v11483_v56, %v3427_v53  ;;  %v15536_v9 = vand.u32 4294901760, %v11281_v17  ;;  %v15540_v17 = vand.u32 4294901760, %v11338_v32 }
 0x2a1   :  { %3422 = vmatmul.f32.gmra.mxu0 %v3421_v41  ;;  %3559 = vmatmul.f32.gmra.mxu1 %v11452_v10  ;;  %v4080_v6 = vand.u32 4294901760, %v4079_v15  ;;  %v4086_v63 = vand.u32 4294901760, %v4085_v29  ;;  %v15535_v41 = vand.u32 4294901760, %v11250_v21  ;;  %v15537_v15 = vld [vmem:[#allocation107_spill] sm:$0xff]  ;;  %v15542_v32 = vand.u32 4294901760, %v11384_v25 }
 0x2a2   :  { %4075 = vmatpush.msra.mxu3 %v4074_v18  ;;  %4298 = vmatpush.msrb.mxu2 %v15534_v55  ;;  %v2600_v29 = vadd.f32 %v11207_v60, %v15537_v15  ;;  %v3429_v55 = vand.u32 4294901760, %v3428_v16  ;;  %v15539_v60 = vand.u32 4294901760, %v11325_v27 }
 0x2a3   :  { %4241 = vmatpush.msrb.mxu1 %v11485_v13  ;;  %4165 = vmatpush.msrb.mxu0 %v11494_v33 }
 0x2a4   :  { %4081 = vmatpush.msra.mxu3 %v4080_v6  ;;  %4302 = vmatpush.msrb.mxu2 %v15535_v41 }
 0x2a5   :  { %3643 = vmatmul.f32.gmra.mxu2 %v11420_v62  ;;  %3729 = vmatmul.f32.gmra.mxu3 %v3427_v53  ;;  %v15538_v62 = vand.u32 4294901760, %v11294_v57 }
 0x2a6   :  { %v11535_v3 = vpop.f32.mrf.mxu0  ;;  %v3046_v18 = vpop.f32.mrf.mxu1  ;;  %4087 = vmatpush.msra.mxu3 %v4086_v63  ;;  %4306 = vmatpush.msrb.mxu2 %v15536_v9 }
 0x2a7   :  { %4168 = vmatpush.msrb.mxu0 %v11499_v11 }
 0x2a8   :  { %4389 = vmatpush.msrb.mxu3 %v11188_v12  ;;  %v11543_v21 = vpop.f32.mrf.mxu2  ;;  %v11545_v6 = vpop.f32.mrf.mxu3  ;;  %4310 = vmatpush.msrb.mxu2 %v15538_v62  ;;  %v2665_v12 = vadd.f32 %v11173_v23, %v2600_v29  ;;  %v2604_v23 = vadd.f32 %v11253_v31, %v11076_v26 }
 0x2a9   :  { %3430 = vmatmul.f32.gmra.mxu0 %v3429_v55  ;;  %3863 = vmatmul.f32.vlgmr.msra.gmra.mxu1 %v11149_v58 }
 0x2aa   :  { %4391 = vmatpush.msrb.mxu3 %v11224_v42  ;;  %4314 = vmatpush.msrb.mxu2 %v15539_v60  ;;  %v2734_v57 = vadd.f32 %v11267_v39, %v2665_v12  ;;  %v15541_v42 = vand.u32 4294901760, %v11372_v30  ;;  %v2669_v26 = vadd.f32 %v11209_v54, %v2604_v23  ;;  %v15554_v12 = vld [vmem:[#allocation66_spill] sm:$0xff]  ;;  %v15556_v23 = vld [vmem:[#allocation56_spill] sm:$0xff] }
 0x2ac   :  { %4393 = vmatpush.msrb.mxu3 %v11234_v14  ;;  %4318 = vmatpush.msrb.mxu2 %v15540_v17  ;;  %v2891_v39 = vadd.f32 %v11219_v38, %v2734_v57  ;;  %v2742_v30 = vadd.f32 %v11312_v19, %v2669_v26 }
 0x2ad   :  { %3648 = vmatmul.f32.gmra.mxu2 %v11483_v56 }
 0x2ae   :  { %v2972_v53 = vpop.f32.mrf.mxu0  ;;  %v3052_v16 = vpop.f32.mrf.mxu1  ;;  %4395 = vmatpush.msrb.mxu3 %v11274_v44  ;;  %4322 = vmatpush.msrb.mxu2 %v15541_v42  ;;  %v15543_v44 = vand.u32 4294901760, %v11414_v45  ;;  %v2895_v19 = vadd.f32 %v11269_v40, %v2742_v30  ;;  %v15555_v42 = vld [vmem:[#allocation106_spill] sm:$0xff] }
 0x2af   :  { %v2973_v31 = vadd.f32 %v2972_v53, %v2891_v39 }
 0x2b0   :  { %v11566_v27 = vpop.f32.mrf.mxu2  ;;  %v3222_v14 = vpop.f32.mrf.mxu3  ;;  %4397 = vmatpush.msrb.mxu3 %v11283_v24  ;;  %4326 = vmatpush.msrb.mxu2 %v15542_v32  ;;  %v15544_v24 = vand.u32 4294901760, %v11425_v49 }
 0x2b1   :  { %3798 = vmatmul.f32.vlgmr.msra.gmra.mxu0 %v11149_v58  ;;  %3867 = vmatmul.f32.gmra.mxu1 %v11179_v4  ;;  %v15545_v58 = vand.u32 4294901760, %v11441_v46  ;;  %v3047_v56 = vadd.f32 %v3046_v18, %v2973_v31  ;;  %v15550_v18 = vld [vmem:[#allocation69_spill] sm:$0xff] }
 0x2b2   :  { %4399 = vmatpush.msrb.mxu3 %v11319_v5  ;;  %4330 = vmatpush.msrb.mxu2 %v15543_v44  ;;  %v2608_v5 = vadd.f32 %v11297_v2, %v11099_v28 }
 0x2b4   :  { %4401 = vmatpush.msrb.mxu3 %v11327_v48  ;;  %4334 = vmatpush.msrb.mxu2 %v15544_v24  ;;  %v15546_v48 = vand.u32 4294901760, %v11465_v43  ;;  %v2673_v28 = vadd.f32 %v11255_v36, %v2608_v5  ;;  %v15549_v36 = vld [vmem:[#allocation52_spill] sm:$0xff] }
 0x2b5   :  { %v15557_v24 = vld [vmem:[#allocation60_spill] sm:$0xff] }
 0x2b6   :  { %v2977_v38 = vpop.f32.mrf.mxu0  ;;  %v3058_v25 = vpop.f32.mrf.mxu1  ;;  %4403 = vmatpush.msrb.mxu3 %v11363_v8  ;;  %4338 = vmatpush.msrb.mxu2 %v15545_v58  ;;  %v15547_v8 = vand.u32 4294901760, %v11476_v47  ;;  %v2750_v40 = vadd.f32 %v11356_v34, %v2673_v28  ;;  %v15548_v47 = vand.u32 4294901760, %v11499_v11  ;;  %v15551_v34 = vld [vmem:[#allocation54_spill] sm:$0xff] }
 0x2b7   :  { %v2978_v2 = vadd.f32 %v2977_v38, %v2895_v19  ;;  %v15558_v38 = vld [vmem:[#allocation55_spill] sm:$0xff] }
 0x2b8   :  { %v3157_v54 = vpop.f32.mrf.mxu2  ;;  %v3226_v45 = vpop.f32.mrf.mxu3  ;;  %4405 = vmatpush.msrb.mxu3 %v11374_v51  ;;  %4342 = vmatpush.msrb.mxu2 %v15546_v48  ;;  %v2899_v9 = vadd.f32 %v15551_v34, %v2750_v40 }
 0x2b9   :  { %v3158_v49 = vadd.f32 %v3157_v54, %v3047_v56  ;;  %3802 = vmatmul.f32.gmra.mxu0 %v11179_v4  ;;  %3871 = vmatmul.f32.gmra.mxu1 %v11216_v52  ;;  %v3053_v41 = vadd.f32 %v3052_v16, %v2978_v2  ;;  %v15561_v2 = vld [vmem:[#allocation50_spill] sm:$0xff] }
 0x2ba   :  { %4407 = vmatpush.msrb.mxu3 %v11400_v50  ;;  %4346 = vmatpush.msrb.mxu2 %v15547_v8  ;;  %v2612_v50 = vadd.f32 %v15549_v36, %v11117_v20  ;;  %v15553_v20 = vld [vmem:[#allocation108_spill] sm:$0xff] }
 0x2bb   :  { %v3223_v46 = vadd.f32 %v3222_v14, %v3158_v49  ;;  %v2616_v14 = vadd.f32 %v15556_v23, %v15555_v42 }
 0x2bc   :  { %4409 = vmatpush.msrb.mxu3 %v11416_v7  ;;  %4350 = vmatpush.msrb.mxu2 %v4078_v59  ;;  %v2677_v29 = vadd.f32 %v15553_v20, %v2612_v50 }
 0x2bd   :  { %vm3254_vm9 = vcmp.gt.f32.partialorder %v3223_v46, 0.0  ;;  %v3270_v4 = vmul.f32 0.01, %v3223_v46 }
 0x2be   :  { %v2982_v51 = vpop.f32.mrf.mxu0  ;;  %v3064_v43 = vpop.f32.mrf.mxu1  ;;  %4411 = vmatpush.msrb.mxu3 %v11427_v0  ;;  %4354 = vmatpush.msrb.mxu2 %v15548_v47  ;;  %v15552_v0 = vld [vmem:[#allocation53_spill] sm:$0xff]  ;;  %v2758_v17 = vadd.f32 %v15554_v12, %v2677_v29 }
 0x2bf   :  { %v3286_v63 = vsel %vm3254_vm9, %v3223_v46, %v3270_v4  ;;  %v2983_v55 = vadd.f32 %v2982_v51, %v2899_v9  ;;  %v15562_v46 = vld [vmem:[#allocation71_spill] sm:$0xff]  ;;  %v15565_v9 = vld [vmem:[#allocation65_spill] sm:$0xff] }
 0x2c0   :  { %v11606_v7 = vand.u32 4294901760, %v3286_v63  ;;  %v3161_v33 = vpop.f32.mrf.mxu2  ;;  %v3230_v59 = vpop.f32.mrf.mxu3  ;;  %4413 = vmatpush.msrb.mxu3 %v15550_v18  ;;  %v2620_v40 = vadd.f32 %v15562_v46, %v15561_v2  ;;  %v15564_v18 = vld [vmem:[#allocation61_spill] sm:$0xff] }
 0x2c1   :  { %v3162_v15 = vadd.f32 %v3161_v33, %v3053_v41  ;;  %3806 = vmatmul.f32.gmra.mxu0 %v11216_v52  ;;  %3875 = vmatmul.f32.gmra.mxu1 %v15552_v0  ;;  %v3059_v39 = vadd.f32 %v3058_v25, %v2983_v55  ;;  %v15559_v25 = vld [vmem:[#allocation59_spill] sm:$0xff]  ;;  %v15563_v41 = vld [vmem:[#allocation62_spill] sm:$0xff] }
 0x2c2   :  { %v11613_v11 = vsub.f32 %v3286_v63, %v11606_v7  ;;  %4089 = vmatmul.f32.vlgmr.msra.gmra.mxu3 %v11606_v7 }
 0x2c3   :  { %v3227_v62 = vadd.f32 %v3226_v45, %v3162_v15  ;;  %4415 = vmatpush.msrb.mxu3 %v11467_v37  ;;  %v15560_v45 = vld [vmem:[#allocation68_spill] sm:$0xff] }
 0x2c4   :  { %v3929_v60 = vand.u32 4294901760, %v11613_v11 }
 0x2c5   :  { %vm3256_vm10 = vcmp.gt.f32.partialorder %v3227_v62, 0.0  ;;  %v3272_v57 = vmul.f32 0.01, %v3227_v62  ;;  %4417 = vmatpush.msrb.mxu3 %v11479_v61  ;;  %v2903_v61 = vadd.f32 %v15557_v24, %v2758_v17 }
 0x2c6   :  { %v2987_v52 = vpop.f32.mrf.mxu0  ;;  %v3070_v53 = vpop.f32.mrf.mxu1  ;;  %v3930_v16 = vsub.f32 %v11613_v11, %v3929_v60 }
 0x2c7   :  { %v3288_v32 = vsel %vm3256_vm10, %v3227_v62, %v3272_v57  ;;  %4419 = vmatpush.msrb.mxu3 %v11485_v13  ;;  %v2681_v13 = vadd.f32 %v15559_v25, %v2616_v14  ;;  %v2988_v5 = vadd.f32 %v2987_v52, %v2903_v61  ;;  %v15566_v57 = vld [vmem:[#allocation48_spill] sm:$0xff] }
 0x2c8   :  { %v3165_v37 = vpop.f32.mrf.mxu2  ;;  %v3234_v44 = vpop.f32.mrf.mxu3  ;;  %v3931_v26 = vand.u32 4294901760, %v3930_v16  ;;  %v11627_v31 = vand.u32 4294901760, %v3288_v32  ;;  %v2624_v52 = vadd.f32 %v11501_v35, %v15566_v57  ;;  %v15569_v35 = vld [vmem:[#allocation70_spill] sm:$0xff] }
 0x2c9   :  { %v3166_v30 = vadd.f32 %v3165_v37, %v3059_v39  ;;  %3810 = vmatmul.f32.gmra.mxu0 %v15552_v0  ;;  %3879 = vmatmul.f32.gmra.mxu1 %v15558_v38  ;;  %v2766_v48 = vadd.f32 %v15560_v45, %v2681_v13  ;;  %v3065_v51 = vadd.f32 %v3064_v43, %v2988_v5  ;;  %v15567_v39 = vld [vmem:[#allocation73_spill] sm:$0xff] }
 0x2ca   :  { %3932 = vmatmul.f32.vlgmr.msra.gmra.mxu2 %v3931_v26  ;;  %4093 = vmatmul.f32.gmra.mxu3 %v11627_v31  ;;  %v11634_v58 = vsub.f32 %v3288_v32, %v11627_v31  ;;  %v2685_v43 = vadd.f32 %v15565_v9, %v2620_v40  ;;  %v15568_v26 = vld [vmem:[#allocation67_spill] sm:$0xff] }
 0x2cb   :  { %v3231_v56 = vadd.f32 %v3230_v59, %v3166_v30  ;;  %v2907_v33 = vadd.f32 %v15563_v41, %v2766_v48  ;;  %v15570_v48 = vld [vmem:[#allocation47_spill] sm:$0xff] }
 0x2cc   :  { %v3937_v54 = vand.u32 4294901760, %v11634_v58  ;;  %v2774_v29 = vadd.f32 %v11515_v1, %v2685_v43 }
 0x2cd   :  { %vm3258_vm11 = vcmp.gt.f32.partialorder %v3231_v56, 0.0  ;;  %v3274_v19 = vmul.f32 0.01, %v3231_v56 }
 0x2ce   :  { %v2992_v49 = vpop.f32.mrf.mxu0  ;;  %v3076_v8 = vpop.f32.mrf.mxu1  ;;  %v3938_v28 = vsub.f32 %v11634_v58, %v3937_v54  ;;  %v2911_v37 = vadd.f32 %v15567_v39, %v2774_v29 }
 0x2cf   :  { %v3290_v4 = vsel %vm3258_vm11, %v3231_v56, %v3274_v19  ;;  %v2993_v15 = vadd.f32 %v2992_v49, %v2907_v33  ;;  %v2628_v19 = vadd.f32 %v11535_v3, %v15570_v48  ;;  %v15571_v3 = vld [vmem:[#allocation75_spill] sm:$0xff] }
 0x2d0   :  { %v3169_v47 = vpop.f32.mrf.mxu2  ;;  %v3238_v36 = vpop.f32.mrf.mxu3  ;;  %v3939_v50 = vand.u32 4294901760, %v3938_v28  ;;  %v11644_v63 = vand.u32 4294901760, %v3290_v4 }
 0x2d1   :  { %v3170_v59 = vadd.f32 %v3169_v47, %v3065_v51  ;;  %3814 = vmatmul.f32.gmra.mxu0 %v15558_v38  ;;  %3883 = vmatmul.f32.gmra.mxu1 %v15564_v18  ;;  %v3071_v42 = vadd.f32 %v3070_v53, %v2993_v15  ;;  %v2689_v53 = vadd.f32 %v15569_v35, %v2624_v52 }
 0x2d2   :  { %3940 = vmatmul.f32.gmra.mxu2 %v3939_v50  ;;  %4097 = vmatmul.f32.gmra.mxu3 %v11644_v63  ;;  %v11651_v34 = vsub.f32 %v3290_v4, %v11644_v63  ;;  %v2693_v47 = vadd.f32 %v15571_v3, %v2628_v19 }
 0x2d3   :  { %v3235_v0 = vadd.f32 %v3234_v44, %v3170_v59  ;;  %v2782_v25 = vadd.f32 %v11543_v21, %v2689_v53 }
 0x2d4   :  { %v3945_v20 = vand.u32 4294901760, %v11651_v34 }
 0x2d5   :  { %vm3260_vm12 = vcmp.gt.f32.partialorder %v3235_v0, 0.0  ;;  %v3276_v55 = vmul.f32 0.01, %v3235_v0  ;;  %v2915_v4 = vadd.f32 %v11517_v22, %v2782_v25  ;;  %v2790_v22 = vadd.f32 %v11566_v27, %v2693_v47 }
 0x2d6   :  { %v2997_v62 = vpop.f32.mrf.mxu0  ;;  %v3082_v12 = vpop.f32.mrf.mxu1  ;;  %v3946_v17 = vsub.f32 %v11651_v34, %v3945_v20 }
 0x2d7   :  { %v3292_v16 = vsel %vm3260_vm12, %v3235_v0, %v3276_v55  ;;  %v2998_v61 = vadd.f32 %v2997_v62, %v2911_v37  ;;  %v2919_v62 = vadd.f32 %v11545_v6, %v2790_v22 }
 0x2d8   :  { %v3173_v23 = vpop.f32.mrf.mxu2  ;;  %v3947_v14 = vand.u32 4294901760, %v3946_v17  ;;  %v11661_v32 = vand.u32 4294901760, %v3292_v16  ;;  %v3242_v44 = vpop.f32.mrf.mxu3 }
 0x2d9   :  { %v3174_v1 = vadd.f32 %v3173_v23, %v3071_v42  ;;  %3818 = vmatmul.f32.gmra.mxu0 %v15564_v18  ;;  %3887 = vmatmul.f32.gmra.mxu1 %v15568_v26  ;;  %v3077_v28 = vadd.f32 %v3076_v8, %v2998_v61 }
 0x2da   :  { %3948 = vmatmul.f32.gmra.mxu2 %v3947_v14  ;;  %4101 = vmatmul.f32.gmra.mxu3 %v11661_v32  ;;  %v11668_v24 = vsub.f32 %v3292_v16, %v11661_v32 }
 0x2db   :  { %v3239_v30 = vadd.f32 %v3238_v36, %v3174_v1 }
 0x2dc   :  { %v3953_v38 = vand.u32 4294901760, %v11668_v24 }
 0x2dd   :  { %vm3262_vm13 = vcmp.gt.f32.partialorder %v3239_v30, 0.0  ;;  %v3278_v13 = vmul.f32 0.01, %v3239_v30 }
 0x2de   :  { %v3002_v5 = vpop.f32.mrf.mxu0  ;;  %v3088_v56 = vpop.f32.mrf.mxu1  ;;  %v3954_v45 = vsub.f32 %v11668_v24, %v3953_v38 }
 0x2df   :  { %v3294_v49 = vsel %vm3262_vm13, %v3239_v30, %v3278_v13  ;;  %v3003_v8 = vadd.f32 %v3002_v5, %v2915_v4 }
 0x2e0   :  { %v3177_v2 = vpop.f32.mrf.mxu2  ;;  %v3955_v46 = vand.u32 4294901760, %v3954_v45  ;;  %v11678_v40 = vand.u32 4294901760, %v3294_v49  ;;  %v3246_v50 = vpop.f32.mrf.mxu3 }
 0x2e1   :  { %v3178_v21 = vadd.f32 %v3177_v2, %v3077_v28  ;;  %3822 = vmatmul.f32.gmra.mxu0 %v15568_v26  ;;  %3891 = vmatmul.f32.gmra.mxu1 %v11452_v10  ;;  %v3083_v15 = vadd.f32 %v3082_v12, %v3003_v8  ;;  %v4463_v12 = vld [vmem:[%s14824_s7 + $0x10] sm:$0xff] }
 0x2e2   :  { %3956 = vmatmul.f32.gmra.mxu2 %v3955_v46  ;;  %4105 = vmatmul.f32.gmra.mxu3 %v11678_v40  ;;  %v11685_v51 = vsub.f32 %v3294_v49, %v11678_v40  ;;  %v11708_v16 = vand.u32 4294901760, %v4463_v12 }
 0x2e3   :  { %v3243_v36 = vadd.f32 %v3242_v44, %v3178_v21 }
 0x2e4   :  { %v3961_v41 = vand.u32 4294901760, %v11685_v51  ;;  %4486 = vmatpush.msra.mxu0 %v11708_v16  ;;  %4689 = vmatpush.msra.mxu3 %v11708_v16 }
 0x2e5   :  { %vm3264_vm14 = vcmp.gt.f32.partialorder %v3243_v36, 0.0  ;;  %v3280_v33 = vmul.f32 0.01, %v3243_v36 }
 0x2e6   :  { %v3007_v59 = vpop.f32.mrf.mxu0  ;;  %v11690_v18 = vpop.f32.mrf.mxu1  ;;  %v3962_v9 = vsub.f32 %v11685_v51, %v3961_v41 }
 0x2e7   :  { %v3296_v43 = vsel %vm3264_vm14, %v3243_v36, %v3280_v33  ;;  %v3008_v57 = vadd.f32 %v3007_v59, %v2919_v62 }
 0x2e8   :  { %v3181_v0 = vpop.f32.mrf.mxu2  ;;  %v3963_v29 = vand.u32 4294901760, %v3962_v9  ;;  %v11695_v55 = vand.u32 4294901760, %v3296_v43  ;;  %v3250_v42 = vpop.f32.mrf.mxu3 }
 0x2e9   :  { %v3182_v17 = vadd.f32 %v3181_v0, %v3083_v15  ;;  %3826 = vmatmul.f32.gmra.mxu0 %v11452_v10  ;;  %4245 = vmatmul.f32.vlgmr.msrb.gmra.mxu1 %v3929_v60  ;;  %v11712_v60 = vsub.f32 %v4463_v12, %v11708_v16  ;;  %v3089_v1 = vadd.f32 %v3088_v56, %v3008_v57  ;;  %v11810_v12 = vld [vmem:[%s14823_s6] ss:$0 sm:$0xff] }
 0x2ea   :  { %3964 = vmatmul.f32.gmra.mxu2 %v3963_v29  ;;  %4109 = vmatmul.f32.gmra.mxu3 %v11695_v55  ;;  %v11703_v27 = vsub.f32 %v3296_v43, %v11695_v55 }
 0x2eb   :  { %v3247_v52 = vadd.f32 %v3246_v50, %v3182_v17  ;;  %4629 = vmatpush.msra.mxu2 %v11712_v60  ;;  %v4570_v44 = vand.u32 4294901760, %v11712_v60 }
 0x2ec   :  { %v3969_v6 = vand.u32 4294901760, %v11703_v27 }
 0x2ed   :  { %vm3266_vm15 = vcmp.gt.f32.partialorder %v3247_v52, 0.0  ;;  %v3282_v10 = vmul.f32 0.01, %v3247_v52  ;;  %v4571_v30 = vsub.f32 %v11712_v60, %v4570_v44  ;;  %v15572_v60 = vld [vmem:[#allocation15_spill] sm:$0xff] }
 0x2ee   :  { %v11716_v23 = vpop.f32.mrf.mxu0  ;;  %v11718_v14 = vpop.f32.mrf.mxu1  ;;  %v3970_v39 = vsub.f32 %v11703_v27, %v3969_v6 }
 0x2ef   :  { %v3298_v37 = vsel %vm3266_vm15, %v3247_v52, %v3282_v10  ;;  %v4572_v5 = vand.u32 4294901760, %v4571_v30 }
 0x2f0   :  { %v3185_v26 = vpop.f32.mrf.mxu2  ;;  %v3971_v35 = vand.u32 4294901760, %v3970_v39  ;;  %v11725_v53 = vand.u32 4294901760, %v3298_v37  ;;  %v11741_v49 = vpop.f32.mrf.mxu3 }
 0x2f1   :  { %v3186_v61 = vadd.f32 %v3185_v26, %v3089_v1  ;;  %4171 = vmatmul.f32.vlgmr.msrb.gmra.mxu0 %v11613_v11  ;;  %4251 = vmatmul.f32.gmra.mxu1 %v3937_v54 }
 0x2f2   :  { %3972 = vmatmul.f32.gmra.mxu2 %v3971_v35  ;;  %4113 = vmatmul.f32.gmra.mxu3 %v11725_v53  ;;  %v11733_v25 = vsub.f32 %v3298_v37, %v11725_v53 }
 0x2f3   :  { %v3251_v13 = vadd.f32 %v3250_v42, %v3186_v61  ;;  %4573 = vmatpush.msra.mxu1 %v4572_v5 }
 0x2f4   :  { %v3977_v56 = vand.u32 4294901760, %v11733_v25 }
 0x2f5   :  { %vm3268_vm0 = vcmp.gt.f32.partialorder %v3251_v13, 0.0  ;;  %v3284_v45 = vmul.f32 0.01, %v3251_v13 }
 0x2f6   :  { %v11736_v48 = vpop.f32.mrf.mxu0  ;;  %v11738_v11 = vpop.f32.mrf.mxu1  ;;  %v3978_v54 = vsub.f32 %v11733_v25, %v3977_v56 }
 0x2f7   :  { %v3300_v19 = vsel %vm3268_vm0, %v3251_v13, %v3284_v45  ;;  %v15574_v13 = vld [vmem:[#allocation16_spill] sm:$0xff] }
 0x2f8   :  { %v3979_v28 = vand.u32 4294901760, %v3978_v54  ;;  %v11743_v2 = vand.u32 4294901760, %v3300_v19  ;;  %v3614_v8 = vpop.f32.mrf.mxu2 }
 0x2f9   :  { %4176 = vmatmul.f32.gmra.mxu0 %v11634_v58  ;;  %4257 = vmatmul.f32.gmra.mxu1 %v3945_v20  ;;  %v11758_v58 = vpop.f32.mrf.mxu3 }
 0x2fa   :  { %3980 = vmatmul.f32.gmra.mxu2 %v3979_v28  ;;  %4117 = vmatmul.f32.gmra.mxu3 %v11743_v2  ;;  %v11750_v46 = vsub.f32 %v3300_v19, %v11743_v2 }
 0x2fc   :  { %v3985_v4 = vand.u32 4294901760, %v11750_v46 }
 0x2fe   :  { %v11753_v21 = vpop.f32.mrf.mxu0  ;;  %v11755_v3 = vpop.f32.mrf.mxu1  ;;  %v3986_v47 = vsub.f32 %v11750_v46, %v3985_v4 }
 0x300   :  { %v3987_v36 = vand.u32 4294901760, %v3986_v47  ;;  %v11768_v22 = vpop.f32.mrf.mxu2  ;;  %v15576_v47 = vld [vmem:[#allocation21_spill] sm:$0xff] }
 0x301   :  { %4181 = vmatmul.f32.gmra.mxu0 %v11651_v34  ;;  %4263 = vmatmul.f32.gmra.mxu1 %v3953_v38  ;;  %v4461_v34 = vld [vmem:[%s14824_s7] sm:$0xff]  ;;  %v11778_v38 = vpop.f32.mrf.mxu3 }
 0x302   :  { %3988 = vmatmul.f32.gmra.mxu2 %v3987_v36  ;;  %4421 = vmatmul.f32.vlgmr.msrb.gmra.mxu3 %v11606_v7  ;;  %v4487_v33 = vand.u32 4294901760, %v4461_v34 }
 0x304   :  { %v4575_v59 = vsub.f32 %v4461_v34, %v4487_v33  ;;  %4488 = vmatpush.msra.mxu0 %v4487_v33  ;;  %4691 = vmatpush.msra.mxu3 %v4487_v33 }
 0x306   :  { %v11764_v20 = vpop.f32.mrf.mxu0  ;;  %v11766_v50 = vpop.f32.mrf.mxu1  ;;  %4758 = vmatpush.msrb.mxu0 %v4570_v44  ;;  %4632 = vmatpush.msra.mxu2 %v4575_v59 }
 0x308   :  { %v11789_v43 = vpop.f32.mrf.mxu2 }
 0x309   :  { %4186 = vmatmul.f32.gmra.mxu0 %v11668_v24  ;;  %4269 = vmatmul.f32.gmra.mxu1 %v3961_v41  ;;  %v4576_v41 = vand.u32 4294901760, %v4575_v59  ;;  %v11791_v0 = vpop.f32.mrf.mxu3 }
 0x30a   :  { %4356 = vmatmul.f32.vlgmr.msrb.gmra.mxu2 %v11606_v7  ;;  %4425 = vmatmul.f32.gmra.mxu3 %v11627_v31 }
 0x30b   :  { %v4577_v7 = vsub.f32 %v4575_v59, %v4576_v41  ;;  %4762 = vmatpush.msrb.mxu0 %v4576_v41 }
 0x30d   :  { %v4578_v15 = vand.u32 4294901760, %v4577_v7  ;;  %v15577_v7 = vld [vmem:[#allocation28_spill] sm:$0xff] }
 0x30e   :  { %v11780_v9 = vpop.f32.mrf.mxu0  ;;  %v11782_v24 = vpop.f32.mrf.mxu1 }
 0x30f   :  { %4579 = vmatpush.msra.mxu1 %v4578_v15 }
 0x311   :  { %4191 = vmatmul.f32.gmra.mxu0 %v11685_v51  ;;  %4275 = vmatmul.f32.gmra.mxu1 %v3969_v6  ;;  %v11812_v57 = vpop.f32.mrf.mxu3 }
 0x312   :  { %4360 = vmatmul.f32.gmra.mxu2 %v11627_v31  ;;  %4429 = vmatmul.f32.gmra.mxu3 %v11644_v63  ;;  %v11801_v31 = vpop.f32.mrf.mxu2 }
 0x313   :  { %4811 = vmatpush.msrb.mxu1 %v11708_v16 }
 0x315   :  { %4813 = vmatpush.msrb.mxu1 %v4487_v33 }
 0x316   :  { %v11793_v29 = vpop.f32.mrf.mxu0  ;;  %v11795_v62 = vpop.f32.mrf.mxu1 }
 0x319   :  { %4196 = vmatmul.f32.gmra.mxu0 %v11703_v27  ;;  %4281 = vmatmul.f32.gmra.mxu1 %v3977_v56  ;;  %v11824_v42 = vpop.f32.mrf.mxu3 }
 0x31a   :  { %4364 = vmatmul.f32.gmra.mxu2 %v11644_v63  ;;  %4433 = vmatmul.f32.gmra.mxu3 %v11661_v32  ;;  %v3376_v63 = vadd.f32 %v11810_v12, %v11716_v23  ;;  %v11822_v6 = vpop.f32.mrf.mxu2 }
 0x31c   :  { %v3533_v16 = vadd.f32 %v11690_v18, %v3376_v63  ;;  %v3384_v18 = vadd.f32 %v11810_v12, %v11736_v48 }
 0x31e   :  { %v11803_v51 = vpop.f32.mrf.mxu0  ;;  %v11805_v17 = vpop.f32.mrf.mxu1  ;;  %v3615_v10 = vadd.f32 %v3614_v8, %v3533_v16  ;;  %v3537_v44 = vadd.f32 %v11718_v14, %v3384_v18  ;;  %v3392_v14 = vadd.f32 %v11810_v12, %v11753_v21  ;;  %v3400_v8 = vadd.f32 %v11810_v12, %v11764_v20  ;;  %v15579_v20 = vld [vmem:[#allocation19_spill] sm:$0xff]  ;;  %v15580_v18 = vld [vmem:[#allocation32_spill] sm:$0xff] }
 0x320   :  { %v3689_v39 = vadd.f32 %v11741_v49, %v3615_v10  ;;  %v3620_v61 = vadd.f32 %v11768_v22, %v3537_v44  ;;  %v3541_v28 = vadd.f32 %v11738_v11, %v3392_v14  ;;  %v3545_v33 = vadd.f32 %v11755_v3, %v3400_v8  ;;  %v15587_v8 = vld [vmem:[#allocation25_spill] sm:$0xff] }
 0x321   :  { %4201 = vmatmul.f32.gmra.mxu0 %v11733_v25  ;;  %4287 = vmatmul.f32.gmra.mxu1 %v3985_v4  ;;  %v15573_v25 = vld [vmem:[#allocation22_spill] sm:$0xff]  ;;  %v11859_v45 = vpop.f32.mrf.mxu3  ;;  %v15575_v4 = vld [vmem:[#allocation24_spill] sm:$0xff] }
 0x322   :  { %4368 = vmatmul.f32.gmra.mxu2 %v11661_v32  ;;  %4437 = vmatmul.f32.gmra.mxu3 %v11678_v40  ;;  %v4464_v32 = vld [vmem:[%s14824_s7 + $0x18] sm:$0xff]  ;;  %v11846_v30 = vpop.f32.mrf.mxu2  ;;  %v3695_v54 = vadd.f32 %v11758_v58, %v3620_v61  ;;  %v3630_v41 = vadd.f32 %v11801_v31, %v3545_v33 }
 0x323   :  { %v11835_v23 = vand.u32 4294901760, %v4464_v32 }
 0x324   :  { %v3707_v3 = vadd.f32 %v11791_v0, %v3630_v41  ;;  %v4462_v0 = vld [vmem:[%s14824_s7 + $0x8] sm:$0xff] }
 0x325   :  { %4862 = vmatpush.msrb.mxu2 %v11835_v23  ;;  %v11840_v37 = vsub.f32 %v4464_v32, %v11835_v23 }
 0x326   :  { %v11819_v27 = vpop.f32.mrf.mxu0  ;;  %v3864_v52 = vpop.f32.mrf.mxu1 }
 0x327   :  { %v4946_v35 = vand.u32 4294901760, %v11840_v37 }
 0x329   :  { %4206 = vmatmul.f32.gmra.mxu0 %v11750_v46  ;;  %4581 = vmatmul.f32.vlgmr.msra.gmra.mxu1 %v15572_v60  ;;  %v4947_v5 = vsub.f32 %v11840_v37, %v4946_v35  ;;  %v11875_v58 = vpop.f32.mrf.mxu3 }
 0x32a   :  { %4372 = vmatmul.f32.gmra.mxu2 %v11678_v40  ;;  %4441 = vmatmul.f32.gmra.mxu3 %v11695_v55  ;;  %v11873_v36 = vpop.f32.mrf.mxu2 }
 0x32b   :  { %5065 = vmatpush.msra.mxu1 %v11835_v23  ;;  %v4948_v48 = vand.u32 4294901760, %v4947_v5 }
 0x32d   :  { %4949 = vmatpush.msrb.mxu3 %v4948_v48 }
 0x32e   :  { %v3799_v40 = vpop.f32.mrf.mxu0  ;;  %v3868_v1 = vpop.f32.mrf.mxu1 }
 0x32f   :  { %v3800_v26 = vadd.f32 %v3799_v40, %v3689_v39  ;;  %v15583_v40 = vld [vmem:[#allocation20_spill] sm:$0xff] }
 0x331   :  { %4494 = vmatmul.f32.vlgmr.msra.gmra.mxu0 %v15573_v25  ;;  %4585 = vmatmul.f32.gmra.mxu1 %v15574_v13  ;;  %v11853_v56 = vadd.f32 %v3864_v52, %v3800_v26 }
 0x332   :  { %4376 = vmatmul.f32.gmra.mxu2 %v11695_v55  ;;  %4445 = vmatmul.f32.gmra.mxu3 %v11725_v53  ;;  %v3625_v55 = vadd.f32 %v11789_v43, %v3541_v28  ;;  %v11888_v15 = vpop.f32.mrf.mxu2  ;;  %v15585_v28 = vld [vmem:[#allocation34_spill] sm:$0xff] }
 0x333   :  { %5005 = vmatpush.msra.mxu0 %v11840_v37  ;;  %v3424_v37 = vadd.f32 %v11810_v12, %v11803_v51  ;;  %v15588_v51 = vld [vmem:[#allocation40_spill] sm:$0xff] }
 0x334   :  { %v3701_v11 = vadd.f32 %v11778_v38, %v3625_v55  ;;  %v3408_v38 = vadd.f32 %v11810_v12, %v11780_v9  ;;  %v15582_v9 = vld [vmem:[#allocation17_spill] sm:$0xff]  ;;  %v15586_v55 = vld [vmem:[#allocation18_spill] sm:$0xff] }
 0x335   :  { %v3557_v33 = vadd.f32 %v11795_v62, %v3424_v37 }
 0x336   :  { %v3803_v19 = vpop.f32.mrf.mxu0  ;;  %v3872_v49 = vpop.f32.mrf.mxu1  ;;  %v3549_v16 = vadd.f32 %v11766_v50, %v3408_v38  ;;  %v3416_v50 = vadd.f32 %v11810_v12, %v11793_v29  ;;  %v15589_v38 = vld [vmem:[#allocation38_spill] sm:$0xff] }
 0x337   :  { %v3804_v46 = vadd.f32 %v3803_v19, %v3695_v54  ;;  %v3645_v41 = vadd.f32 %v11873_v36, %v3557_v33 }
 0x338   :  { %v3635_v32 = vadd.f32 %v11822_v6, %v3549_v16  ;;  %v3553_v48 = vadd.f32 %v11782_v24, %v3416_v50 }
 0x339   :  { %4502 = vmatmul.f32.gmra.mxu0 %v15575_v4  ;;  %4589 = vmatmul.f32.gmra.mxu1 %v15576_v47  ;;  %v11867_v21 = vadd.f32 %v3868_v1, %v3804_v46  ;;  %v4863_v1 = vand.u32 4294901760, %v4462_v0  ;;  %v3725_v16 = vadd.f32 %v11859_v45, %v3645_v41 }
 0x33a   :  { %4380 = vmatmul.f32.gmra.mxu2 %v11725_v53  ;;  %4449 = vmatmul.f32.gmra.mxu3 %v11743_v2  ;;  %v15578_v53 = vld [vmem:[#allocation26_spill] sm:$0xff]  ;;  %v3713_v26 = vadd.f32 %v11812_v57, %v3635_v32  ;;  %v3640_v29 = vadd.f32 %v11846_v30, %v3553_v48 }
 0x33b   :  { %4864 = vmatpush.msrb.mxu2 %v4863_v1  ;;  %v4951_v61 = vsub.f32 %v4462_v0, %v4863_v1  ;;  %5067 = vmatpush.msra.mxu1 %v4863_v1 }
 0x33c   :  { %v3719_v30 = vadd.f32 %v11824_v42, %v3640_v29  ;;  %v15591_v42 = vld [vmem:[#allocation29_spill] sm:$0xff]  ;;  %v15597_v29 = vld [vmem:[#allocation31_spill] sm:$0xff] }
 0x33d   :  { %v4952_v19 = vand.u32 4294901760, %v4951_v61  ;;  %5008 = vmatpush.msra.mxu0 %v4951_v61 }
 0x33e   :  { %v3807_v22 = vpop.f32.mrf.mxu0  ;;  %v3876_v34 = vpop.f32.mrf.mxu1 }
 0x33f   :  { %v3808_v59 = vadd.f32 %v3807_v22, %v3701_v11  ;;  %v4953_v57 = vsub.f32 %v4951_v61, %v4952_v19 }
 0x341   :  { %4510 = vmatmul.f32.gmra.mxu0 %v15577_v7  ;;  %4593 = vmatmul.f32.gmra.mxu1 %v15578_v53  ;;  %v11882_v43 = vadd.f32 %v3872_v49, %v3808_v59  ;;  %v15584_v49 = vld [vmem:[#allocation36_spill] sm:$0xff]  ;;  %v4954_v24 = vand.u32 4294901760, %v4953_v57  ;;  %v15598_v57 = vld [vmem:[#allocation37_spill] sm:$0xff] }
 0x342   :  { %4384 = vmatmul.f32.gmra.mxu2 %v11743_v2  ;;  %4695 = vmatmul.f32.vlgmr.msra.gmra.mxu3 %v15579_v20  ;;  %v15581_v2 = vld [vmem:[#allocation30_spill] sm:$0xff] }
 0x343   :  { %4955 = vmatpush.msrb.mxu3 %v4954_v24 }
 0x345   :  { %v11890_v63 = vpop.f32.mrf.mxu3  ;;  %5187 = vmatpush.msra.mxu3 %v11835_v23 }
 0x346   :  { %v3811_v31 = vpop.f32.mrf.mxu0  ;;  %v3880_v52 = vpop.f32.mrf.mxu1 }
 0x347   :  { %v3812_v10 = vadd.f32 %v3811_v31, %v3707_v3  ;;  %5189 = vmatpush.msra.mxu3 %v4863_v1  ;;  %v15590_v31 = vld [vmem:[#allocation23_spill] sm:$0xff]  ;;  %v15592_v1 = vld [vmem:[#allocation44_spill] sm:$0xff] }
 0x349   :  { %4518 = vmatmul.f32.gmra.mxu0 %v15580_v18  ;;  %4597 = vmatmul.f32.gmra.mxu1 %v15581_v2  ;;  %v11897_v39 = vadd.f32 %v3876_v34, %v3812_v10 }
 0x34a   :  { %4635 = vmatmul.f32.vlgmr.msra.gmra.mxu2 %v15582_v9  ;;  %4701 = vmatmul.f32.gmra.mxu3 %v15583_v40 }
 0x34b   :  { %5134 = vmatpush.msra.mxu2 %v4946_v35 }
 0x34d   :  { %v11906_v44 = vpop.f32.mrf.mxu2  ;;  %v11908_v6 = vpop.f32.mrf.mxu3  ;;  %5138 = vmatpush.msra.mxu2 %v4952_v19 }
 0x34e   :  { %v3815_v5 = vpop.f32.mrf.mxu0  ;;  %v3884_v14 = vpop.f32.mrf.mxu1 }
 0x34f   :  { %v3816_v54 = vadd.f32 %v3815_v5, %v3713_v26  ;;  %v15593_v26 = vld [vmem:[#allocation42_spill] sm:$0xff] }
 0x351   :  { %4526 = vmatmul.f32.gmra.mxu0 %v15584_v49  ;;  %4601 = vmatmul.f32.gmra.mxu1 %v15585_v28  ;;  %v11917_v46 = vadd.f32 %v3880_v52, %v3816_v54  ;;  %v3432_v52 = vadd.f32 %v11810_v12, %v11819_v27  ;;  %v15594_v12 = vld [vmem:[#allocation27_spill] sm:$0xff]  ;;  %v15595_v27 = vld [vmem:[#allocation33_spill] sm:$0xff] }
 0x352   :  { %4640 = vmatmul.f32.gmra.mxu2 %v15586_v55  ;;  %4707 = vmatmul.f32.gmra.mxu3 %v15587_v8 }
 0x353   :  { %v3561_v32 = vadd.f32 %v11805_v17, %v3432_v52 }
 0x355   :  { %v11923_v35 = vpop.f32.mrf.mxu2  ;;  %v11925_v11 = vpop.f32.mrf.mxu3  ;;  %v3650_v50 = vadd.f32 %v11888_v15, %v3561_v32  ;;  %v15596_v15 = vld [vmem:[#allocation46_spill] sm:$0xff] }
 0x356   :  { %v3819_v22 = vpop.f32.mrf.mxu0  ;;  %v3888_v34 = vpop.f32.mrf.mxu1 }
 0x357   :  { %v3820_v59 = vadd.f32 %v3819_v22, %v3719_v30 }
 0x359   :  { %4534 = vmatmul.f32.gmra.mxu0 %v15588_v51  ;;  %4605 = vmatmul.f32.gmra.mxu1 %v15589_v38  ;;  %v11933_v3 = vadd.f32 %v3884_v14, %v3820_v59  ;;  %v3731_v14 = vadd.f32 %v11875_v58, %v3650_v50  ;;  %v15599_v58 = vld [vmem:[#allocation35_spill] sm:$0xff] }
 0x35a   :  { %4645 = vmatmul.f32.gmra.mxu2 %v15590_v31  ;;  %4713 = vmatmul.f32.gmra.mxu3 %v15591_v42 }
 0x35d   :  { %v11939_v23 = vpop.f32.mrf.mxu2  ;;  %v11941_v62 = vpop.f32.mrf.mxu3 }
 0x35e   :  { %v3823_v36 = vpop.f32.mrf.mxu0  ;;  %v3892_v10 = vpop.f32.mrf.mxu1 }
 0x35f   :  { %v3824_v0 = vadd.f32 %v3823_v36, %v3725_v16  ;;  %v15601_v16 = vld [vmem:[#allocation39_spill] sm:$0xff]  ;;  %v15602_v36 = vld [vmem:[#allocation45_spill] sm:$0xff] }
 0x361   :  { %4542 = vmatmul.f32.gmra.mxu0 %v15592_v1  ;;  %4609 = vmatmul.f32.gmra.mxu1 %v15593_v26  ;;  %v11948_v61 = vadd.f32 %v3888_v34, %v3824_v0  ;;  %v15600_v34 = vld [vmem:[#allocation41_spill] sm:$0xff] }
 0x362   :  { %4650 = vmatmul.f32.gmra.mxu2 %v15594_v12  ;;  %4719 = vmatmul.f32.gmra.mxu3 %v15595_v27 }
 0x365   :  { %v11952_v5 = vpop.f32.mrf.mxu2  ;;  %v11954_v45 = vpop.f32.mrf.mxu3 }
 0x366   :  { %v3827_v17 = vpop.f32.mrf.mxu0  ;;  %v4246_v48 = vpop.f32.mrf.mxu1 }
 0x367   :  { %v3828_v54 = vadd.f32 %v3827_v17, %v3731_v14  ;;  %v3934_v14 = vadd.f32 %v11906_v44, %v11853_v56  ;;  %v15603_v17 = vld [vmem:[#allocation43_spill] sm:$0xff]  ;;  %v3942_v56 = vadd.f32 %v11923_v35, %v11867_v21 }
 0x369   :  { %4550 = vmatmul.f32.gmra.mxu0 %v15596_v15  ;;  %4815 = vmatmul.f32.vlgmr.msrb.gmra.mxu1 %v15572_v60  ;;  %v11959_v19 = vadd.f32 %v3892_v10, %v3828_v54 }
 0x36a   :  { %4655 = vmatmul.f32.gmra.mxu2 %v15597_v29  ;;  %4725 = vmatmul.f32.gmra.mxu3 %v15598_v57 }
 0x36d   :  { %v11963_v37 = vpop.f32.mrf.mxu2  ;;  %v11965_v24 = vpop.f32.mrf.mxu3 }
 0x36e   :  { %v4172_v30 = vpop.f32.mrf.mxu0  ;;  %v4252_v22 = vpop.f32.mrf.mxu1 }
 0x371   :  { %4764 = vmatmul.f32.vlgmr.msrb.gmra.mxu0 %v15572_v60  ;;  %4819 = vmatmul.f32.gmra.mxu1 %v15574_v13 }
 0x372   :  { %4660 = vmatmul.f32.gmra.mxu2 %v15599_v58  ;;  %4731 = vmatmul.f32.gmra.mxu3 %v15600_v34 }
 0x375   :  { %v11971_v33 = vpop.f32.mrf.mxu2  ;;  %v11973_v59 = vpop.f32.mrf.mxu3 }
 0x376   :  { %v4177_v41 = vpop.f32.mrf.mxu0  ;;  %v4258_v52 = vpop.f32.mrf.mxu1 }
 0x379   :  { %4768 = vmatmul.f32.gmra.mxu0 %v15574_v13  ;;  %4823 = vmatmul.f32.gmra.mxu1 %v15576_v47 }
 0x37a   :  { %4665 = vmatmul.f32.gmra.mxu2 %v15601_v16  ;;  %4737 = vmatmul.f32.gmra.mxu3 %v15602_v36  ;;  %v4091_v16 = vadd.f32 %v11890_v63, %v3934_v14  ;;  %v4095_v63 = vadd.f32 %v11908_v6, %v3942_v56 }
 0x37c   :  { %v4173_v57 = vadd.f32 %v4172_v30, %v4091_v16  ;;  %v4178_v30 = vadd.f32 %v4177_v41, %v4095_v63 }
 0x37d   :  { %v11979_v10 = vpop.f32.mrf.mxu2  ;;  %v11981_v32 = vpop.f32.mrf.mxu3 }
 0x37e   :  { %v4182_v0 = vpop.f32.mrf.mxu0  ;;  %v4264_v50 = vpop.f32.mrf.mxu1  ;;  %v4247_v44 = vadd.f32 %v4246_v48, %v4173_v57  ;;  %v4253_v21 = vadd.f32 %v4252_v22, %v4178_v30 }
 0x381   :  { %4772 = vmatmul.f32.gmra.mxu0 %v15576_v47  ;;  %4827 = vmatmul.f32.gmra.mxu1 %v15578_v53 }
 0x382   :  { %4670 = vmatmul.f32.gmra.mxu2 %v15603_v17  ;;  %4957 = vmatmul.f32.vlgmr.msrb.gmra.mxu3 %v15572_v60 }
 0x385   :  { %v11989_v54 = vpop.f32.mrf.mxu2  ;;  %v4422_v36 = vpop.f32.mrf.mxu3 }
 0x386   :  { %v4187_v34 = vpop.f32.mrf.mxu0  ;;  %v11992_v58 = vpop.f32.mrf.mxu1 }
 0x389   :  { %4776 = vmatmul.f32.gmra.mxu0 %v15578_v53  ;;  %4831 = vmatmul.f32.gmra.mxu1 %v15581_v2 }
 0x38a   :  { %4870 = vmatmul.f32.vlgmr.msrb.gmra.mxu2 %v15573_v25  ;;  %4961 = vmatmul.f32.gmra.mxu3 %v15574_v13  ;;  %v3950_v25 = vadd.f32 %v11939_v23, %v11882_v43 }
 0x38c   :  { %v4099_v48 = vadd.f32 %v11925_v11, %v3950_v25 }
 0x38d   :  { %v4357_v17 = vpop.f32.mrf.mxu2  ;;  %v4426_v29 = vpop.f32.mrf.mxu3 }
 0x38e   :  { %v4358_v14 = vadd.f32 %v4357_v17, %v4247_v44  ;;  %v4192_v27 = vpop.f32.mrf.mxu0  ;;  %v12001_v12 = vpop.f32.mrf.mxu1  ;;  %v4183_v17 = vadd.f32 %v4182_v0, %v4099_v48 }
 0x390   :  { %v4423_v16 = vadd.f32 %v4422_v36, %v4358_v14  ;;  %v4259_v43 = vadd.f32 %v4258_v52, %v4183_v17 }
 0x391   :  { %4780 = vmatmul.f32.gmra.mxu0 %v15581_v2  ;;  %4835 = vmatmul.f32.gmra.mxu1 %v15585_v28 }
 0x392   :  { %4453 = vst [vmem:[#allocation10] sm:$0xff] %v4423_v16  ;;  %4878 = vmatmul.f32.gmra.mxu2 %v15575_v4  ;;  %4965 = vmatmul.f32.gmra.mxu3 %v15576_v47  ;;  %v3958_v4 = vadd.f32 %v11952_v5, %v11897_v39 }
 0x394   :  { %v4103_v22 = vadd.f32 %v11941_v62, %v3958_v4 }
 0x395   :  { %v4361_v6 = vpop.f32.mrf.mxu2  ;;  %v4430_v35 = vpop.f32.mrf.mxu3 }
 0x396   :  { %v4362_v57 = vadd.f32 %v4361_v6, %v4253_v21  ;;  %v4197_v41 = vpop.f32.mrf.mxu0  ;;  %v12010_v36 = vpop.f32.mrf.mxu1  ;;  %v4188_v63 = vadd.f32 %v4187_v34, %v4103_v22 }
 0x398   :  { %v4427_v56 = vadd.f32 %v4426_v29, %v4362_v57  ;;  %v4265_v39 = vadd.f32 %v4264_v50, %v4188_v63 }
 0x399   :  { %4784 = vmatmul.f32.gmra.mxu0 %v15585_v28  ;;  %4839 = vmatmul.f32.gmra.mxu1 %v15589_v38 }
 0x39a   :  { %4454 = vst [vmem:[#allocation10 + $0x10] sm:$0xff] %v4427_v56  ;;  %4886 = vmatmul.f32.gmra.mxu2 %v15577_v7  ;;  %4969 = vmatmul.f32.gmra.mxu3 %v15578_v53  ;;  %v3966_v7 = vadd.f32 %v11963_v37, %v11917_v46 }
 0x39c   :  { %v4107_v52 = vadd.f32 %v11954_v45, %v3966_v7 }
 0x39d   :  { %v4365_v11 = vpop.f32.mrf.mxu2  ;;  %v4434_v23 = vpop.f32.mrf.mxu3 }
 0x39e   :  { %v4366_v44 = vadd.f32 %v4365_v11, %v4259_v43  ;;  %v4202_v0 = vpop.f32.mrf.mxu0  ;;  %v12019_v29 = vpop.f32.mrf.mxu1  ;;  %v4193_v25 = vadd.f32 %v4192_v27, %v4107_v52 }
 0x3a0   :  { %v4431_v14 = vadd.f32 %v4430_v35, %v4366_v44  ;;  %v4271_v46 = vadd.f32 %v11992_v58, %v4193_v25 }
 0x3a1   :  { %4788 = vmatmul.f32.gmra.mxu0 %v15589_v38  ;;  %4843 = vmatmul.f32.gmra.mxu1 %v15593_v26 }
 0x3a2   :  { %4455 = vst [vmem:[#allocation10 + $0x20] sm:$0xff] %v4431_v14  ;;  %4894 = vmatmul.f32.gmra.mxu2 %v15580_v18  ;;  %4973 = vmatmul.f32.gmra.mxu3 %v15581_v2  ;;  %v3974_v18 = vadd.f32 %v11971_v33, %v11933_v3  ;;  %v5301_v3 = vld [vmem:[#allocation7 + $0xf0] sm:$0xff]  ;;  %v5299_v33 = vld [vmem:[#allocation7 + $0xe0] sm:$0xff] }
 0x3a4   :  { %v4111_v50 = vadd.f32 %v11965_v24, %v3974_v18  ;;  %v12050_v24 = vand.u32 4294901760, %v5301_v3 }
 0x3a5   :  { %v4369_v62 = vpop.f32.mrf.mxu2  ;;  %v4438_v5 = vpop.f32.mrf.mxu3 }
 0x3a6   :  { %v4370_v30 = vadd.f32 %v4369_v62, %v4265_v39  ;;  %v12028_v34 = vpop.f32.mrf.mxu0  ;;  %v12030_v16 = vpop.f32.mrf.mxu1  ;;  %5342 = vmatpush.msrb.mxu0 %v12050_v24  ;;  %5657 = vmatpush.msrb.mxu3 %v12050_v24 }
 0x3a8   :  { %v4435_v21 = vadd.f32 %v4434_v23, %v4370_v30 }
 0x3a9   :  { %4792 = vmatmul.f32.gmra.mxu0 %v15593_v26  ;;  %5071 = vmatmul.f32.vlgmr.msra.gmra.mxu1 %v15579_v20  ;;  %v4198_v20 = vadd.f32 %v4197_v41, %v4111_v50 }
 0x3aa   :  { %4456 = vst [vmem:[#allocation10 + $0x30] sm:$0xff] %v4435_v21  ;;  %4902 = vmatmul.f32.gmra.mxu2 %v15584_v49  ;;  %4977 = vmatmul.f32.gmra.mxu3 %v15585_v28  ;;  %v3982_v49 = vadd.f32 %v11979_v10, %v11948_v61 }
 0x3ab   :  { %v4277_v58 = vadd.f32 %v12001_v12, %v4198_v20  ;;  %v5297_v12 = vld [vmem:[#allocation7 + $0xd0] sm:$0xff] }
 0x3ac   :  { %v12069_v43 = vand.u32 4294901760, %v5297_v12 }
 0x3ad   :  { %v4373_v45 = vpop.f32.mrf.mxu2  ;;  %v4442_v37 = vpop.f32.mrf.mxu3 }
 0x3ae   :  { %v4374_v27 = vadd.f32 %v4373_v45, %v4271_v46  ;;  %v12040_v6 = vpop.f32.mrf.mxu0  ;;  %v12042_v35 = vpop.f32.mrf.mxu1  ;;  %v12081_v63 = vsub.f32 %v5297_v12, %v12069_v43 }
 0x3b0   :  { %v4439_v48 = vadd.f32 %v4438_v5, %v4374_v27  ;;  %v15070_v39 = vand.u32 4294901760, %v12081_v63  ;;  %v5289_v27 = vld [vmem:[#allocation7 + $0x90] sm:$0xff] }
 0x3b1   :  { %5011 = vmatmul.f32.vlgmr.msra.gmra.mxu0 %v15582_v9  ;;  %5077 = vmatmul.f32.gmra.mxu1 %v15583_v40  ;;  %v12054_v9 = vsub.f32 %v5301_v3, %v12050_v24  ;;  %v12056_v40 = vand.u32 4294901760, %v5299_v33 }
 0x3b2   :  { %4457 = vst [vmem:[#allocation10 + $0x40] sm:$0xff] %v4439_v48  ;;  %4910 = vmatmul.f32.gmra.mxu2 %v15588_v51  ;;  %4981 = vmatmul.f32.gmra.mxu3 %v15589_v38  ;;  %v4115_v51 = vadd.f32 %v11973_v59, %v3982_v49  ;;  %v5295_v59 = vld [vmem:[#allocation7 + $0xc0] sm:$0xff]  ;;  %v5453_v25 = vsub.f32 %v12081_v63, %v15070_v39 }
 0x3b3   :  { %v15072_v56 = vand.u32 4294901760, %v12054_v9  ;;  %v12067_v4 = vsub.f32 %v5299_v33, %v12056_v40  ;;  %5569 = vmatpush.msrb.mxu2 %v12054_v9  ;;  %5344 = vmatpush.msrb.mxu0 %v12056_v40  ;;  %v12130_v33 = vand.u32 4294901760, %v5289_v27 }
 0x3b4   :  { %v4203_v11 = vadd.f32 %v4202_v0, %v4115_v51  ;;  %5659 = vmatpush.msrb.mxu3 %v12056_v40  ;;  %v3990_v0 = vadd.f32 %v11989_v54, %v11959_v19  ;;  %v5291_v54 = vld [vmem:[#allocation7 + $0xa0] sm:$0xff]  ;;  %v5454_v20 = vand.u32 4294901760, %v5453_v25 }
 0x3b5   :  { %v4377_v57 = vpop.f32.mrf.mxu2  ;;  %v4446_v41 = vpop.f32.mrf.mxu3  ;;  %v5441_v22 = vsub.f32 %v12054_v9, %v15072_v56  ;;  %v15071_v44 = vand.u32 4294901760, %v12067_v4  ;;  %5572 = vmatpush.msrb.mxu2 %v12067_v4  ;;  %5346 = vmatpush.msrb.mxu0 %v12069_v43  ;;  %v12110_v18 = vand.u32 4294901760, %v5291_v54  ;;  %v12145_v12 = vsub.f32 %v5289_v27, %v12130_v33 }
 0x3b6   :  { %v4378_v61 = vadd.f32 %v4377_v57, %v4277_v58  ;;  %v12061_v10 = vpop.f32.mrf.mxu0  ;;  %v12063_v17 = vpop.f32.mrf.mxu1  ;;  %5661 = vmatpush.msrb.mxu3 %v12069_v43  ;;  %v5287_v57 = vld [vmem:[#allocation7 + $0x80] sm:$0xff] }
 0x3b7   :  { %v5442_v14 = vand.u32 4294901760, %v5441_v22  ;;  %v5447_v7 = vsub.f32 %v12067_v4, %v15071_v44  ;;  %5575 = vmatpush.msrb.mxu2 %v12081_v63  ;;  %v12123_v49 = vsub.f32 %v5291_v54, %v12110_v18  ;;  %v12140_v51 = vand.u32 4294901760, %v5287_v57 }
 0x3b8   :  { %v4443_v23 = vadd.f32 %v4442_v37, %v4378_v61  ;;  %v15064_v22 = vand.u32 4294901760, %v12145_v12 }
 0x3b9   :  { %5016 = vmatmul.f32.gmra.mxu0 %v15586_v55  ;;  %5083 = vmatmul.f32.gmra.mxu1 %v15587_v8  ;;  %v12087_v55 = vand.u32 4294901760, %v5295_v59  ;;  %v5293_v8 = vld [vmem:[#allocation7 + $0xb0] sm:$0xff]  ;;  %v5448_v30 = vand.u32 4294901760, %v5447_v7 }
 0x3ba   :  { %4458 = vst [vmem:[#allocation10 + $0x50] sm:$0xff] %v4443_v23  ;;  %4918 = vmatmul.f32.gmra.mxu2 %v15592_v1  ;;  %4985 = vmatmul.f32.gmra.mxu3 %v15593_v26  ;;  %v12093_v62 = vand.u32 4294901760, %v5293_v8  ;;  %v4283_v1 = vadd.f32 %v12010_v36, %v4203_v11  ;;  %v4119_v36 = vadd.f32 %v11981_v32, %v3990_v0  ;;  %v5283_v0 = vld [vmem:[#allocation7 + $0x60] sm:$0xff] }
 0x3bb   :  { %v12099_v19 = vsub.f32 %v5295_v59, %v12087_v55  ;;  %5443 = vmatpush.msrb.mxu1 %v5442_v14  ;;  %5348 = vmatpush.msrb.mxu0 %v12087_v55  ;;  %v12151_v23 = vsub.f32 %v5287_v57, %v12140_v51  ;;  %v12166_v54 = vand.u32 4294901760, %v5283_v0  ;;  %v5477_v25 = vsub.f32 %v12145_v12, %v15064_v22  ;;  %v5279_v57 = vld [vmem:[#allocation7 + $0x40] sm:$0xff]  ;;  %v5273_v22 = vld [vmem:[#allocation7 + $0x10] sm:$0xff] }
 0x3bc   :  { %v12108_v21 = vsub.f32 %v5293_v8, %v12093_v62  ;;  %5663 = vmatpush.msrb.mxu3 %v12087_v55  ;;  %v4208_v32 = vadd.f32 %v12028_v34, %v4119_v36  ;;  %v5281_v36 = vld [vmem:[#allocation7 + $0x50] sm:$0xff] }
 0x3bd   :  { %v4381_v5 = vpop.f32.mrf.mxu2  ;;  %v12102_v52 = vpop.f32.mrf.mxu3  ;;  %v15068_v50 = vand.u32 4294901760, %v12099_v19  ;;  %5449 = vmatpush.msrb.mxu1 %v5448_v30  ;;  %5350 = vmatpush.msrb.mxu0 %v12093_v62  ;;  %v15063_v7 = vand.u32 4294901760, %v12151_v23 }
 0x3be   :  { %v4382_v46 = vadd.f32 %v4381_v5, %v4283_v1  ;;  %v12114_v45 = vpop.f32.mrf.mxu0  ;;  %v12116_v37 = vpop.f32.mrf.mxu1  ;;  %v15067_v48 = vand.u32 4294901760, %v12108_v21  ;;  %5578 = vmatpush.msrb.mxu2 %v12099_v19  ;;  %5665 = vmatpush.msrb.mxu3 %v12093_v62 }
 0x3bf   :  { %v5459_v58 = vsub.f32 %v12099_v19, %v15068_v50  ;;  %5455 = vmatpush.msrb.mxu1 %v5454_v20  ;;  %5352 = vmatpush.msrb.mxu0 %v12110_v18  ;;  %v5483_v27 = vsub.f32 %v12151_v23, %v15063_v7 }
 0x3c0   :  { %v4447_v3 = vadd.f32 %v4446_v41, %v4382_v46  ;;  %v5465_v34 = vsub.f32 %v12108_v21, %v15067_v48  ;;  %v15066_v41 = vand.u32 4294901760, %v12123_v49  ;;  %5667 = vmatpush.msrb.mxu3 %v12110_v18  ;;  %5581 = vmatpush.msrb.mxu2 %v12108_v21  ;;  %v15607_v48 = vld [vmem:[#allocation31_spill] sm:$0xff] }
 0x3c1   :  { %5021 = vmatmul.f32.gmra.mxu0 %v15590_v31  ;;  %5089 = vmatmul.f32.gmra.mxu1 %v15591_v42  ;;  %v5460_v61 = vand.u32 4294901760, %v5459_v58  ;;  %v5285_v31 = vld [vmem:[#allocation7 + $0x70] sm:$0xff]  ;;  %v12187_v58 = vand.u32 4294901760, %v5281_v36 }
 0x3c2   :  { %4459 = vst [vmem:[#allocation10 + $0x60] sm:$0xff] %v4447_v3  ;;  %4926 = vmatmul.f32.gmra.mxu2 %v15596_v15  ;;  %5191 = vmatmul.f32.vlgmr.msra.gmra.mxu3 %v15572_v60  ;;  %v5466_v42 = vand.u32 4294901760, %v5465_v34  ;;  %v5471_v11 = vsub.f32 %v12123_v49, %v15066_v41  ;;  %v12153_v59 = vand.u32 4294901760, %v5285_v31  ;;  %v4289_v15 = vadd.f32 %v12019_v29, %v4208_v32  ;;  %v15604_v34 = vld [vmem:[#allocation27_spill] sm:$0xff] }
 0x3c3   :  { %5461 = vmatpush.msrb.mxu1 %v5460_v61  ;;  %5354 = vmatpush.msrb.mxu0 %v12130_v33  ;;  %v12183_v32 = vsub.f32 %v5283_v0, %v12166_v54  ;;  %v15605_v61 = vld [vmem:[#allocation33_spill] sm:$0xff]  ;;  %v12240_v41 = vand.u32 4294901760, %v5273_v22 }
 0x3c4   :  { %v12164_v1 = vsub.f32 %v5285_v31, %v12153_v59  ;;  %5669 = vmatpush.msrb.mxu3 %v12130_v33  ;;  %5584 = vmatpush.msrb.mxu2 %v12123_v49  ;;  %v5472_v46 = vand.u32 4294901760, %v5471_v11  ;;  %v5478_v31 = vand.u32 4294901760, %v5477_v25  ;;  %v12200_v11 = vsub.f32 %v5281_v36, %v12187_v58  ;;  %v5277_v0 = vld [vmem:[#allocation7 + $0x30] sm:$0xff] }
 0x3c5   :  { %v4385_v8 = vpop.f32.mrf.mxu2  ;;  %v12160_v14 = vpop.f32.mrf.mxu3  ;;  %5467 = vmatpush.msrb.mxu1 %v5466_v42  ;;  %5356 = vmatpush.msrb.mxu0 %v12140_v51  ;;  %v15065_v42 = vand.u32 4294901760, %v12183_v32 }
 0x3c6   :  { %v4386_v29 = vadd.f32 %v4385_v8, %v4289_v15  ;;  %v12169_v5 = vpop.f32.mrf.mxu0  ;;  %v12171_v30 = vpop.f32.mrf.mxu1  ;;  %v15062_v20 = vand.u32 4294901760, %v12164_v1  ;;  %5671 = vmatpush.msrb.mxu3 %v12140_v51  ;;  %5587 = vmatpush.msrb.mxu2 %v12145_v12  ;;  %v12202_v15 = vand.u32 4294901760, %v5279_v57  ;;  %v5484_v8 = vand.u32 4294901760, %v5483_v27 }
 0x3c7   :  { %5473 = vmatpush.msrb.mxu1 %v5472_v46  ;;  %5358 = vmatpush.msrb.mxu0 %v12153_v59  ;;  %v5495_v46 = vsub.f32 %v12183_v32, %v15065_v42 }
 0x3c8   :  { %v4451_v3 = vadd.f32 %v12102_v52, %v4386_v29  ;;  %v5489_v52 = vsub.f32 %v12164_v1, %v15062_v20  ;;  %v12205_v29 = vand.u32 4294901760, %v5277_v0  ;;  %v12209_v25 = vsub.f32 %v5279_v57, %v12202_v15  ;;  %5673 = vmatpush.msrb.mxu3 %v12153_v59  ;;  %5590 = vmatpush.msrb.mxu2 %v12151_v23 }
 0x3c9   :  { %5026 = vmatmul.f32.gmra.mxu0 %v15604_v34  ;;  %5095 = vmatmul.f32.gmra.mxu1 %v15605_v61  ;;  %v5496_v50 = vand.u32 4294901760, %v5495_v46 }
 0x3ca   :  { %4460 = vst [vmem:[#allocation10 + $0x70] sm:$0xff] %v4451_v3  ;;  %5140 = vmatmul.f32.vlgmr.msra.gmra.mxu2 %v15572_v60  ;;  %5195 = vmatmul.f32.gmra.mxu3 %v15574_v13  ;;  %v15069_v60 = vand.u32 4294901760, %v12200_v11  ;;  %v5275_v3 = vld [vmem:[#allocation7 + $0x20] sm:$0xff]  ;;  %v12221_v27 = vsub.f32 %v5277_v0, %v12205_v29  ;;  %v5490_v7 = vand.u32 4294901760, %v5489_v52  ;;  %v15073_v0 = vand.u32 4294901760, %v12209_v25 }
 0x3cb   :  { %5479 = vmatpush.msrb.mxu1 %v5478_v31  ;;  %5360 = vmatpush.msrb.mxu0 %v12166_v54  ;;  %v12224_v57 = vand.u32 4294901760, %v5275_v3  ;;  %v5271_v52 = vld [vmem:[#allocation7] sm:$0xff] }
 0x3cc   :  { %5675 = vmatpush.msrb.mxu3 %v12166_v54  ;;  %5593 = vmatpush.msrb.mxu2 %v12164_v1  ;;  %v5501_v31 = vsub.f32 %v12200_v11, %v15069_v60  ;;  %v15074_v60 = vand.u32 4294901760, %v12221_v27  ;;  %v5507_v44 = vsub.f32 %v12209_v25, %v15073_v0 }
 0x3cd   :  { %v12213_v36 = vpop.f32.mrf.mxu2  ;;  %v12215_v34 = vpop.f32.mrf.mxu3  ;;  %5485 = vmatpush.msrb.mxu1 %v5484_v8  ;;  %v12237_v42 = vsub.f32 %v5275_v3, %v12224_v57  ;;  %5362 = vmatpush.msrb.mxu0 %v12187_v58  ;;  %v15608_v8 = vld [vmem:[#allocation37_spill] sm:$0xff]  ;;  %v12249_v3 = vand.u32 4294901760, %v5271_v52 }
 0x3ce   :  { %v12226_v61 = vpop.f32.mrf.mxu0  ;;  %v12228_v20 = vpop.f32.mrf.mxu1  ;;  %5677 = vmatpush.msrb.mxu3 %v12187_v58  ;;  %5596 = vmatpush.msrb.mxu2 %v12183_v32  ;;  %v5502_v39 = vand.u32 4294901760, %v5501_v31  ;;  %v5508_v0 = vand.u32 4294901760, %v5507_v44  ;;  %v12291_v44 = vld [vmem:[%s14825_s8] sm:$0x3] }
 0x3cf   :  { %15606 = vst [vmem:[#allocation74_spill] sm:$0xff] %v12228_v20  ;;  %5491 = vmatpush.msrb.mxu1 %v5490_v7  ;;  %v15075_v56 = vand.u32 4294901760, %v12237_v42  ;;  %5364 = vmatpush.msrb.mxu0 %v12202_v15  ;;  %v5513_v7 = vsub.f32 %v12221_v27, %v15074_v60  ;;  %v12269_v31 = vsub.f32 %v5271_v52, %v12249_v3  ;;  %v15611_v52 = vld [vmem:[#allocation35_spill] sm:$0xff] }
 0x3d0   :  { %5679 = vmatpush.msrb.mxu3 %v12202_v15  ;;  %5599 = vmatpush.msrb.mxu2 %v12200_v11  ;;  %15613 = vst [vmem:[#allocation79_spill] sm:$0xff] %v12291_v44 }
 0x3d1   :  { %5031 = vmatmul.f32.gmra.mxu0 %v15607_v48  ;;  %5101 = vmatmul.f32.gmra.mxu1 %v15608_v8  ;;  %v12256_v48 = vsub.f32 %v5273_v22, %v12240_v41  ;;  %v5514_v20 = vand.u32 4294901760, %v5513_v7  ;;  %v12302_v7 = vperm.slane %v12291_v44, 0 }
 0x3d2   :  { %5144 = vmatmul.f32.gmra.mxu2 %v15574_v13  ;;  %5199 = vmatmul.f32.gmra.mxu3 %v15576_v47 }
 0x3d3   :  { %5497 = vmatpush.msrb.mxu1 %v5496_v50  ;;  %5366 = vmatpush.msrb.mxu0 %v12205_v29  ;;  %v5519_v50 = vsub.f32 %v12237_v42, %v15075_v56  ;;  %v15076_v60 = vand.u32 4294901760, %v12256_v48 }
 0x3d4   :  { %5681 = vmatpush.msrb.mxu3 %v12205_v29  ;;  %5602 = vmatpush.msrb.mxu2 %v12209_v25 }
 0x3d5   :  { %v12261_v13 = vpop.f32.mrf.mxu2  ;;  %v12263_v46 = vpop.f32.mrf.mxu3  ;;  %5503 = vmatpush.msrb.mxu1 %v5502_v39  ;;  %5368 = vmatpush.msrb.mxu0 %v12224_v57  ;;  %v15078_v39 = vand.u32 4294901760, %v12269_v31  ;;  %v5520_v56 = vand.u32 4294901760, %v5519_v50 }
 0x3d6   :  { %v12272_v22 = vpop.f32.mrf.mxu0  ;;  %v12274_v8 = vpop.f32.mrf.mxu1  ;;  %5683 = vmatpush.msrb.mxu3 %v12224_v57  ;;  %5605 = vmatpush.msrb.mxu2 %v12221_v27 }
 0x3d7   :  { %15609 = vst [vmem:[#allocation72_spill] sm:$0xff] %v12272_v22  ;;  %5509 = vmatpush.msrb.mxu1 %v5508_v0  ;;  %5370 = vmatpush.msrb.mxu0 %v12240_v41  ;;  %v5531_v0 = vsub.f32 %v12269_v31, %v15078_v39  ;;  %v15616_v22 = vand.u32 4294901760, %v12054_v9  ;;  %v15617_v39 = vld [vmem:[#allocation39_spill] sm:$0xff] }
 0x3d8   :  { %15610 = vst [vmem:[#allocation77_spill] sm:$0xff] %v12274_v8  ;;  %v15612_v8 = vld [vmem:[#allocation41_spill] sm:$0xff]  ;;  %5685 = vmatpush.msrb.mxu3 %v12240_v41  ;;  %5608 = vmatpush.msrb.mxu2 %v12237_v42 }
 0x3d9   :  { %5036 = vmatmul.f32.gmra.mxu0 %v15611_v52  ;;  %5107 = vmatmul.f32.gmra.mxu1 %v15612_v8  ;;  %v5525_v52 = vsub.f32 %v12256_v48, %v15076_v60 }
 0x3da   :  { %5148 = vmatmul.f32.gmra.mxu2 %v15576_v47  ;;  %5203 = vmatmul.f32.gmra.mxu3 %v15578_v53 }
 0x3db   :  { %5515 = vmatpush.msrb.mxu1 %v5514_v20  ;;  %5372 = vmatpush.msrb.mxu0 %v12249_v3  ;;  %v5526_v44 = vand.u32 4294901760, %v5525_v52  ;;  %v4496_v20 = vadd.f32 %v12040_v6, %v12302_v7  ;;  %v15620_v6 = vand.u32 4294901760, %v12081_v63 }
 0x3dc   :  { %5687 = vmatpush.msrb.mxu3 %v12249_v3  ;;  %5611 = vmatpush.msrb.mxu2 %v12256_v48 }
 0x3dd   :  { %v12304_v8 = vpop.f32.mrf.mxu2  ;;  %v12306_v47 = vpop.f32.mrf.mxu3  ;;  %5521 = vmatpush.msrb.mxu1 %v5520_v56  ;;  %5740 = vmatpush.msra.mxu0 %v15616_v22  ;;  %v15619_v56 = vand.u32 4294901760, %v12067_v4  ;;  %v4583_v9 = vadd.f32 %v12030_v16, %v4496_v20  ;;  %v4504_v16 = vadd.f32 %v12061_v10, %v12302_v7 }
 0x3de   :  { %15614 = vst [vmem:[#allocation78_spill] sm:$0xff] %v12306_v47  ;;  %v12312_v50 = vpop.f32.mrf.mxu0  ;;  %v12314_v60 = vpop.f32.mrf.mxu1  ;;  %5614 = vmatpush.msrb.mxu2 %v12269_v31  ;;  %v15618_v47 = vld [vmem:[#allocation45_spill] sm:$0xff] }
 0x3df   :  { %15615 = vst [vmem:[#allocation76_spill] sm:$0xff] %v12312_v50  ;;  %v5532_v50 = vand.u32 4294901760, %v5531_v0  ;;  %5527 = vmatpush.msrb.mxu1 %v5526_v44  ;;  %5744 = vmatpush.msra.mxu0 %v15619_v56  ;;  %v4637_v4 = vadd.f32 %v12213_v36, %v4583_v9  ;;  %v15622_v44 = vld [vmem:[#allocation43_spill] sm:$0xff]  ;;  %v4587_v63 = vadd.f32 %v12042_v35, %v4504_v16  ;;  %v15624_v36 = vand.u32 4294901760, %v12123_v49 }
 0x3e0   :  { %v4512_v35 = vadd.f32 %v12114_v45, %v12302_v7  ;;  %v15627_v49 = vand.u32 4294901760, %v12164_v1  ;;  %v15634_v16 = vand.u32 4294901760, %v12237_v42  ;;  %v5333_v42 = vld [vmem:[#allocation7 + $0x1f0] sm:$0xff] }
 0x3e1   :  { %5041 = vmatmul.f32.gmra.mxu0 %v15617_v39  ;;  %5113 = vmatmul.f32.gmra.mxu1 %v15618_v47  ;;  %v4697_v10 = vadd.f32 %v12160_v14, %v4637_v4 }
 0x3e2   :  { %5152 = vmatmul.f32.gmra.mxu2 %v15578_v53  ;;  %5207 = vmatmul.f32.gmra.mxu3 %v15581_v2  ;;  %v15621_v53 = vand.u32 4294901760, %v12099_v19  ;;  %v4591_v45 = vadd.f32 %v12063_v17, %v4512_v35  ;;  %v15629_v17 = vand.u32 4294901760, %v12200_v11 }
 0x3e3   :  { %5533 = vmatpush.msrb.mxu1 %v5532_v50  ;;  %5748 = vmatpush.msra.mxu0 %v15620_v6  ;;  %v15631_v6 = vand.u32 4294901760, %v12209_v25 }
 0x3e5   :  { %v12330_v22 = vpop.f32.mrf.mxu2  ;;  %v12332_v52 = vpop.f32.mrf.mxu3  ;;  %5835 = vmatpush.msra.mxu1 %v12050_v24  ;;  %5752 = vmatpush.msra.mxu0 %v15621_v53  ;;  %v15623_v24 = vand.u32 4294901760, %v12108_v21  ;;  %v4642_v21 = vadd.f32 %v12261_v13, %v4587_v63 }
 0x3e6   :  { %v12336_v39 = vpop.f32.mrf.mxu0  ;;  %v4816_v47 = vpop.f32.mrf.mxu1 }
 0x3e7   :  { %5837 = vmatpush.msra.mxu1 %v12056_v40  ;;  %5756 = vmatpush.msra.mxu0 %v15623_v24 }
 0x3e9   :  { %5046 = vmatmul.f32.gmra.mxu0 %v15622_v44  ;;  %5839 = vmatpush.msra.mxu1 %v12069_v43  ;;  %v15625_v43 = vand.u32 4294901760, %v12145_v12 }
 0x3ea   :  { %5156 = vmatmul.f32.gmra.mxu2 %v15581_v2  ;;  %5211 = vmatmul.f32.gmra.mxu3 %v15585_v28 }
 0x3eb   :  { %5841 = vmatpush.msra.mxu1 %v12087_v55  ;;  %5760 = vmatpush.msra.mxu0 %v15624_v36  ;;  %v15626_v55 = vand.u32 4294901760, %v12151_v23  ;;  %v4703_v23 = vadd.f32 %v12215_v34, %v4642_v21  ;;  %v12432_v36 = vand.u32 4294901760, %v5333_v42 }
 0x3ed   :  { %v12352_v19 = vpop.f32.mrf.mxu2  ;;  %v12354_v40 = vpop.f32.mrf.mxu3  ;;  %5843 = vmatpush.msra.mxu1 %v12093_v62  ;;  %5764 = vmatpush.msra.mxu0 %v15625_v43 }
 0x3ee   :  { %v4765_v2 = vpop.f32.mrf.mxu0  ;;  %v4820_v0 = vpop.f32.mrf.mxu1  ;;  %5900 = vmatpush.msra.mxu2 %v12432_v36 }
 0x3ef   :  { %v4766_v50 = vadd.f32 %v4765_v2, %v4697_v10  ;;  %5845 = vmatpush.msra.mxu1 %v12110_v18  ;;  %5768 = vmatpush.msra.mxu0 %v15626_v55  ;;  %v15644_v55 = vld [vmem:[#allocation72_spill] sm:$0xff] }
 0x3f1   :  { %v4817_v20 = vadd.f32 %v4816_v47, %v4766_v50  ;;  %5847 = vmatpush.msra.mxu1 %v12130_v33  ;;  %5772 = vmatpush.msra.mxu0 %v15627_v49  ;;  %v15641_v50 = vld [vmem:[#allocation78_spill] sm:$0xff] }
 0x3f2   :  { %5160 = vmatmul.f32.gmra.mxu2 %v15585_v28  ;;  %5215 = vmatmul.f32.gmra.mxu3 %v15589_v38  ;;  %v15628_v28 = vand.u32 4294901760, %v12183_v32  ;;  %v4647_v32 = vadd.f32 %v12304_v8, %v4591_v45  ;;  %v5331_v45 = vld [vmem:[#allocation7 + $0x1e0] sm:$0xff] }
 0x3f3   :  { %vm5223_vm1 = vcmp.gt.f32.partialorder %v4817_v20, 0.0  ;;  %v5239_v62 = vmul.f32 0.01, %v4817_v20  ;;  %5849 = vmatpush.msra.mxu1 %v12140_v51  ;;  %v4520_v51 = vadd.f32 %v12169_v5, %v12302_v7  ;;  %v15633_v5 = vand.u32 4294901760, %v12221_v27 }
 0x3f4   :  { %5776 = vmatpush.msra.mxu0 %v15628_v28 }
 0x3f5   :  { %v5255_v12 = vsel %vm5223_vm1, %v4817_v20, %v5239_v62  ;;  %v12375_v14 = vpop.f32.mrf.mxu2  ;;  %v12377_v18 = vpop.f32.mrf.mxu3  ;;  %5851 = vmatpush.msra.mxu1 %v12153_v59  ;;  %v4595_v25 = vadd.f32 %v12116_v37, %v4520_v51  ;;  %v15637_v37 = vand.u32 4294901760, %v12256_v48  ;;  %v4536_v62 = vadd.f32 %v15644_v55, %v12302_v7 }
 0x3f6   :  { %v12383_v13 = vand.u32 4294901760, %v5255_v12  ;;  %v4769_v33 = vpop.f32.mrf.mxu0  ;;  %v4824_v56 = vpop.f32.mrf.mxu1  ;;  %5780 = vmatpush.msra.mxu0 %v15629_v17 }
 0x3f7   :  { %v4770_v1 = vadd.f32 %v4769_v33, %v4703_v23  ;;  %5853 = vmatpush.msra.mxu1 %v12166_v54  ;;  %v12471_v33 = vand.u32 4294901760, %v5331_v45 }
 0x3f8   :  { %v12389_v9 = vsub.f32 %v5255_v12, %v12383_v13  ;;  %5535 = vmatmul.f32.vlgmr.msrb.gmra.mxu1 %v12383_v13  ;;  %5784 = vmatpush.msra.mxu0 %v15631_v6  ;;  %v5329_v12 = vld [vmem:[#allocation7 + $0x1d0] sm:$0xff] }
 0x3f9   :  { %v4821_v34 = vadd.f32 %v4820_v0, %v4770_v1  ;;  %5855 = vmatpush.msra.mxu1 %v12187_v58  ;;  %5902 = vmatpush.msra.mxu2 %v12471_v33  ;;  %v12485_v51 = vand.u32 4294901760, %v5329_v12 }
 0x3fa   :  { %15630 = vst [vmem:[#allocation81_spill] sm:$0xff] %v12389_v9  ;;  %v12399_v59 = vand.u32 4294901760, %v12389_v9  ;;  %5164 = vmatmul.f32.gmra.mxu2 %v15589_v38  ;;  %5219 = vmatmul.f32.gmra.mxu3 %v15593_v26  ;;  %v4709_v38 = vadd.f32 %v12263_v46, %v4647_v32  ;;  %v4652_v46 = vadd.f32 %v12330_v22, %v4595_v25  ;;  %v15647_v32 = vld [vmem:[#allocation74_spill] sm:$0xff] }
 0x3fb   :  { %vm5225_vm2 = vcmp.gt.f32.partialorder %v4821_v34, 0.0  ;;  %v5241_v11 = vmul.f32 0.01, %v4821_v34  ;;  %5788 = vmatpush.msra.mxu0 %v15633_v5  ;;  %5857 = vmatpush.msra.mxu1 %v12202_v15  ;;  %v4528_v15 = vadd.f32 %v12226_v61, %v12302_v7  ;;  %v12444_v61 = vsub.f32 %v5333_v42, %v12432_v36 }
 0x3fc   :  { %15632 = vst [vmem:[#allocation82_spill] sm:$0xff] %v12399_v59  ;;  %v5376_v54 = vsub.f32 %v12389_v9, %v12399_v59  ;;  %v4715_v43 = vadd.f32 %v15641_v50, %v4652_v46  ;;  %5904 = vmatpush.msra.mxu2 %v12485_v51 }
 0x3fd   :  { %v5257_v8 = vsel %vm5225_vm2, %v4821_v34, %v5241_v11  ;;  %v12409_v47 = vpop.f32.mrf.mxu2  ;;  %v12411_v53 = vpop.f32.mrf.mxu3  ;;  %5792 = vmatpush.msra.mxu0 %v15634_v16  ;;  %5859 = vmatpush.msra.mxu1 %v12205_v29  ;;  %v15639_v29 = vand.u32 4294901760, %v12269_v31  ;;  %v4599_v31 = vadd.f32 %v12171_v30, %v4528_v15  ;;  %v4603_v34 = vadd.f32 %v15647_v32, %v4536_v62 }
 0x3fe   :  { %v12417_v58 = vand.u32 4294901760, %v5257_v8  ;;  %v4773_v27 = vpop.f32.mrf.mxu0  ;;  %v12419_v4 = vand.u32 4294901760, %v5376_v54  ;;  %v4828_v44 = vpop.f32.mrf.mxu1 }
 0x3ff   :  { %v4774_v24 = vadd.f32 %v4773_v27, %v4709_v38  ;;  %5796 = vmatpush.msra.mxu0 %v15637_v37  ;;  %5861 = vmatpush.msra.mxu1 %v12224_v57  ;;  %v4657_v23 = vadd.f32 %v12352_v19, %v4599_v31  ;;  %v12483_v19 = vsub.f32 %v5331_v45, %v12471_v33  ;;  %v15650_v37 = vld [vmem:[#allocation76_spill] sm:$0xff]  ;;  %v15653_v45 = vld [vmem:[#allocation77_spill] sm:$0xff] }
 0x400   :  { %15635 = vst [vmem:[#allocation80_spill] sm:$0xff] %v12417_v58  ;;  %v12425_v63 = vsub.f32 %v5257_v8, %v12417_v58  ;;  %5378 = vmatmul.f32.vlgmr.msrb.gmra.mxu0 %v12419_v4  ;;  %5539 = vmatmul.f32.gmra.mxu1 %v12417_v58  ;;  %v4544_v42 = vadd.f32 %v15650_v37, %v12302_v7 }
 0x401   :  { %15636 = vst [vmem:[#allocation83_spill] sm:$0xff] %v12419_v4  ;;  %v4825_v10 = vadd.f32 %v4824_v56, %v4774_v24  ;;  %5800 = vmatpush.msra.mxu0 %v15639_v29  ;;  %5863 = vmatpush.msra.mxu1 %v12240_v41  ;;  %v4721_v8 = vadd.f32 %v12332_v52, %v4657_v23  ;;  %v15083_v38 = vand.u32 4294901760, %v12483_v19 }
 0x402   :  { %15638 = vst [vmem:[#allocation85_spill] sm:$0xff] %v12425_v63  ;;  %5168 = vmatmul.f32.gmra.mxu2 %v15593_v26  ;;  %5691 = vmatmul.f32.vlgmr.msrb.gmra.mxu3 %v12399_v59  ;;  %v12440_v48 = vand.u32 4294901760, %v12425_v63  ;;  %v4662_v46 = vadd.f32 %v12375_v14, %v4603_v34  ;;  %v12516_v29 = vsub.f32 %v5329_v12, %v12485_v51 }
 0x403   :  { %vm5227_vm3 = vcmp.gt.f32.partialorder %v4825_v10, 0.0  ;;  %v5243_v2 = vmul.f32 0.01, %v4825_v10  ;;  %5865 = vmatpush.msra.mxu1 %v12249_v3  ;;  %6127 = vmatpush.msrb.mxu0 %v12444_v61  ;;  %v15086_v3 = vand.u32 4294901760, %v12444_v61  ;;  %v6005_v52 = vsub.f32 %v12483_v19, %v15083_v38 }
 0x404   :  { %15640 = vst [vmem:[#allocation57_spill] sm:$0xff] %v12440_v48  ;;  %v5384_v57 = vsub.f32 %v12425_v63, %v12440_v48  ;;  %v4607_v12 = vadd.f32 %v15653_v45, %v4544_v42 }
 0x405   :  { %v5259_v26 = vsel %vm5227_vm3, %v4825_v10, %v5243_v2  ;;  %v12450_v22 = vpop.f32.mrf.mxu2  ;;  %v12452_v0 = vpop.f32.mrf.mxu3  ;;  %6215 = vmatpush.msrb.mxu1 %v12432_v36  ;;  %v5999_v1 = vsub.f32 %v12444_v61, %v15086_v3  ;;  %6130 = vmatpush.msrb.mxu0 %v12483_v19  ;;  %v5327_v2 = vld [vmem:[#allocation7 + $0x1c0] sm:$0xff]  ;;  %v5313_v3 = vld [vmem:[#allocation7 + $0x150] sm:$0xff] }
 0x406   :  { %v12457_v35 = vand.u32 4294901760, %v5259_v26  ;;  %v4777_v21 = vpop.f32.mrf.mxu0  ;;  %v12459_v41 = vand.u32 4294901760, %v5384_v57  ;;  %v4832_v20 = vpop.f32.mrf.mxu1  ;;  %v5325_v57 = vld [vmem:[#allocation7 + $0x1b0] sm:$0xff]  ;;  %v12518_v50 = vand.u32 4294901760, %v5327_v2 }
 0x407   :  { %v4778_v30 = vadd.f32 %v4777_v21, %v4715_v43  ;;  %6217 = vmatpush.msrb.mxu1 %v12471_v33  ;;  %v6000_v11 = vand.u32 4294901760, %v5999_v1  ;;  %v12520_v43 = vand.u32 4294901760, %v5325_v57  ;;  %v15082_v21 = vand.u32 4294901760, %v12516_v29  ;;  %6133 = vmatpush.msrb.mxu0 %v12516_v29 }
 0x408   :  { %15642 = vst [vmem:[#allocation63_spill] sm:$0xff] %v12457_v35  ;;  %v12465_v49 = vsub.f32 %v5259_v26, %v12457_v35  ;;  %5386 = vmatmul.f32.gmra.mxu0 %v12459_v41  ;;  %5543 = vmatmul.f32.gmra.mxu1 %v12457_v35  ;;  %v6006_v26 = vand.u32 4294901760, %v6005_v52 }
 0x409   :  { %15643 = vst [vmem:[#allocation88_spill] sm:$0xff] %v12459_v41  ;;  %v4829_v28 = vadd.f32 %v4828_v44, %v4778_v30  ;;  %6219 = vmatpush.msrb.mxu1 %v12485_v51  ;;  %6001 = vmatpush.msra.mxu3 %v6000_v11  ;;  %v5323_v30 = vld [vmem:[#allocation7 + $0x1a0] sm:$0xff]  ;;  %v12533_v62 = vsub.f32 %v5325_v57, %v12520_v43  ;;  %v5321_v57 = vld [vmem:[#allocation7 + $0x190] sm:$0xff] }
 0x40a   :  { %15645 = vst [vmem:[#allocation91_spill] sm:$0xff] %v12465_v49  ;;  %5617 = vmatmul.f32.vlgmr.msrb.gmra.mxu2 %v12389_v9  ;;  %5697 = vmatmul.f32.gmra.mxu3 %v12440_v48  ;;  %v12476_v56 = vand.u32 4294901760, %v12465_v49  ;;  %v12541_v1 = vand.u32 4294901760, %v5323_v30  ;;  %v12577_v45 = vand.u32 4294901760, %v5321_v57  ;;  %v5303_v41 = vld [vmem:[#allocation7 + $0x100] sm:$0xff] }
 0x40b   :  { %vm5229_vm4 = vcmp.gt.f32.partialorder %v4829_v28, 0.0  ;;  %v5245_v17 = vmul.f32 0.01, %v4829_v28  ;;  %6007 = vmatpush.msra.mxu3 %v6006_v26  ;;  %5906 = vmatpush.msra.mxu2 %v12518_v50  ;;  %v4667_v26 = vadd.f32 %v12409_v47, %v4607_v12  ;;  %v5319_v47 = vld [vmem:[#allocation7 + $0x180] sm:$0xff] }
 0x40c   :  { %15646 = vst [vmem:[#allocation94_spill] sm:$0xff] %v12476_v56  ;;  %v5392_v6 = vsub.f32 %v12465_v49, %v12476_v56  ;;  %6221 = vmatpush.msrb.mxu1 %v12518_v50 }
 0x40d   :  { %v5261_v5 = vsel %vm5229_vm4, %v4829_v28, %v5245_v17  ;;  %v12491_v54 = vpop.f32.mrf.mxu2  ;;  %v12493_v25 = vpop.f32.mrf.mxu3  ;;  %v6011_v28 = vsub.f32 %v12516_v29, %v15082_v21  ;;  %5908 = vmatpush.msra.mxu2 %v12520_v43 }
 0x40e   :  { %v12499_v16 = vand.u32 4294901760, %v5261_v5  ;;  %v4781_v27 = vpop.f32.mrf.mxu0  ;;  %v12501_v44 = vand.u32 4294901760, %v5392_v6  ;;  %v4836_v24 = vpop.f32.mrf.mxu1  ;;  %v4727_v6 = vadd.f32 %v12354_v40, %v4662_v46  ;;  %6223 = vmatpush.msrb.mxu1 %v12520_v43 }
 0x40f   :  { %v4782_v15 = vadd.f32 %v4781_v27, %v4721_v8  ;;  %5910 = vmatpush.msra.mxu2 %v12541_v1 }
 0x410   :  { %15648 = vst [vmem:[#allocation98_spill] sm:$0xff] %v12499_v16  ;;  %v12511_v10 = vsub.f32 %v5261_v5, %v12499_v16  ;;  %5394 = vmatmul.f32.gmra.mxu0 %v12501_v44  ;;  %5547 = vmatmul.f32.gmra.mxu1 %v12499_v16  ;;  %v15080_v5 = vand.u32 4294901760, %v12533_v62 }
 0x411   :  { %15649 = vst [vmem:[#allocation97_spill] sm:$0xff] %v12501_v44  ;;  %v4833_v31 = vadd.f32 %v4832_v20, %v4782_v15  ;;  %v12530_v20 = vsub.f32 %v5327_v2, %v12518_v50  ;;  %v6012_v15 = vand.u32 4294901760, %v6011_v28  ;;  %v12567_v2 = vsub.f32 %v5323_v30, %v12541_v1  ;;  %6225 = vmatpush.msrb.mxu1 %v12541_v1 }
 0x412   :  { %15651 = vst [vmem:[#allocation102_spill] sm:$0xff] %v12511_v10  ;;  %5622 = vmatmul.f32.gmra.mxu2 %v12425_v63  ;;  %5703 = vmatmul.f32.gmra.mxu3 %v12476_v56  ;;  %v12525_v14 = vand.u32 4294901760, %v12511_v10  ;;  %v6023_v46 = vsub.f32 %v12533_v62, %v15080_v5 }
 0x413   :  { %vm5231_vm5 = vcmp.gt.f32.partialorder %v4833_v31, 0.0  ;;  %v5247_v55 = vmul.f32 0.01, %v4833_v31  ;;  %v15081_v11 = vand.u32 4294901760, %v12530_v20  ;;  %6136 = vmatpush.msrb.mxu0 %v12530_v20  ;;  %6013 = vmatpush.msra.mxu3 %v6012_v15 }
 0x414   :  { %15652 = vst [vmem:[#allocation101_spill] sm:$0xff] %v12525_v14  ;;  %v5400_v23 = vsub.f32 %v12511_v10, %v12525_v14  ;;  %v6024_v30 = vand.u32 4294901760, %v6023_v46  ;;  %5912 = vmatpush.msra.mxu2 %v12577_v45  ;;  %6227 = vmatpush.msrb.mxu1 %v12577_v45 }
 0x415   :  { %v5263_v17 = vsel %vm5231_vm5, %v4833_v31, %v5247_v55  ;;  %v12545_v32 = vpop.f32.mrf.mxu2  ;;  %v12547_v34 = vpop.f32.mrf.mxu3  ;;  %v6017_v40 = vsub.f32 %v12530_v20, %v15081_v11  ;;  %v4552_v31 = vadd.f32 %v12336_v39, %v12302_v7  ;;  %v12587_v39 = vsub.f32 %v5321_v57, %v12577_v45  ;;  %6139 = vmatpush.msrb.mxu0 %v12533_v62 }
 0x416   :  { %v12553_v8 = vand.u32 4294901760, %v5263_v17  ;;  %v4785_v27 = vpop.f32.mrf.mxu0  ;;  %v12555_v37 = vand.u32 4294901760, %v5400_v23  ;;  %v4840_v42 = vpop.f32.mrf.mxu1 }
 0x417   :  { %v4786_v52 = vadd.f32 %v4785_v27, %v4727_v6  ;;  %v6018_v28 = vand.u32 4294901760, %v6017_v40  ;;  %v15079_v6 = vand.u32 4294901760, %v12567_v2  ;;  %v15085_v15 = vand.u32 4294901760, %v12587_v39  ;;  %6142 = vmatpush.msrb.mxu0 %v12567_v2 }
 0x418   :  { %15654 = vst [vmem:[#allocation51_spill] sm:$0xff] %v12553_v8  ;;  %v12573_v55 = vsub.f32 %v5263_v17, %v12553_v8  ;;  %5402 = vmatmul.f32.gmra.mxu0 %v12555_v37  ;;  %5551 = vmatmul.f32.gmra.mxu1 %v12553_v8  ;;  %v12593_v17 = vand.u32 4294901760, %v5319_v47 }
 0x419   :  { %15655 = vst [vmem:[#allocation105_spill] sm:$0xff] %v12555_v37  ;;  %v4837_v23 = vadd.f32 %v4836_v24, %v4786_v52  ;;  %6019 = vmatpush.msra.mxu3 %v6018_v28  ;;  %v6029_v12 = vsub.f32 %v12567_v2, %v15079_v6  ;;  %v4611_v52 = vadd.f32 %v12314_v60, %v4552_v31 }
 0x41a   :  { %15656 = vst [vmem:[#allocation84_spill] sm:$0xff] %v12573_v55  ;;  %5627 = vmatmul.f32.gmra.mxu2 %v12465_v49  ;;  %5709 = vmatmul.f32.gmra.mxu3 %v12525_v14  ;;  %v12584_v7 = vand.u32 4294901760, %v12573_v55  ;;  %v4733_v28 = vadd.f32 %v12377_v18, %v4667_v26  ;;  %v6035_v60 = vsub.f32 %v12587_v39, %v15085_v15  ;;  %v5317_v26 = vld [vmem:[#allocation7 + $0x170] sm:$0xff] }
 0x41b   :  { %vm5233_vm6 = vcmp.gt.f32.partialorder %v4837_v23, 0.0  ;;  %v5249_v24 = vmul.f32 0.01, %v4837_v23  ;;  %6025 = vmatpush.msra.mxu3 %v6024_v30  ;;  %v6030_v6 = vand.u32 4294901760, %v6029_v12  ;;  %5914 = vmatpush.msra.mxu2 %v12593_v17  ;;  %v12617_v18 = vsub.f32 %v5319_v47, %v12593_v17 }
 0x41c   :  { %15657 = vst [vmem:[#allocation58_spill] sm:$0xff] %v12584_v7  ;;  %v5408_v27 = vsub.f32 %v12573_v55, %v12584_v7  ;;  %6229 = vmatpush.msrb.mxu1 %v12593_v17  ;;  %v6036_v30 = vand.u32 4294901760, %v6035_v60  ;;  %v4672_v12 = vadd.f32 %v12450_v22, %v4611_v52  ;;  %6145 = vmatpush.msrb.mxu0 %v12587_v39 }
 0x41d   :  { %v5265_v40 = vsel %vm5233_vm6, %v4837_v23, %v5249_v24  ;;  %v12601_v46 = vpop.f32.mrf.mxu2  ;;  %v12603_v57 = vpop.f32.mrf.mxu3  ;;  %6031 = vmatpush.msra.mxu3 %v6030_v6  ;;  %v12624_v24 = vand.u32 4294901760, %v5317_v26 }
 0x41e   :  { %v12607_v5 = vand.u32 4294901760, %v5265_v40  ;;  %v4789_v11 = vpop.f32.mrf.mxu0  ;;  %v12609_v21 = vand.u32 4294901760, %v5408_v27  ;;  %v4844_v38 = vpop.f32.mrf.mxu1  ;;  %6148 = vmatpush.msrb.mxu0 %v12617_v18 }
 0x41f   :  { %v4790_v31 = vadd.f32 %v4789_v11, %v4733_v28  ;;  %v15084_v11 = vand.u32 4294901760, %v12617_v18  ;;  %v12635_v47 = vsub.f32 %v5317_v26, %v12624_v24  ;;  %6037 = vmatpush.msra.mxu3 %v6036_v30  ;;  %5916 = vmatpush.msra.mxu2 %v12624_v24 }
 0x420   :  { %15658 = vst [vmem:[#allocation86_spill] sm:$0xff] %v12607_v5  ;;  %v12620_v23 = vsub.f32 %v5265_v40, %v12607_v5  ;;  %5410 = vmatmul.f32.gmra.mxu0 %v12609_v21  ;;  %5555 = vmatmul.f32.gmra.mxu1 %v12607_v5  ;;  %v5315_v40 = vld [vmem:[#allocation7 + $0x160] sm:$0xff] }
 0x421   :  { %15659 = vst [vmem:[#allocation64_spill] sm:$0xff] %v12609_v21  ;;  %v4841_v27 = vadd.f32 %v4840_v42, %v4790_v31  ;;  %v6041_v22 = vsub.f32 %v12617_v18, %v15084_v11  ;;  %v12641_v42 = vand.u32 4294901760, %v5315_v40  ;;  %v15091_v60 = vand.u32 4294901760, %v12635_v47  ;;  %6231 = vmatpush.msrb.mxu1 %v12624_v24  ;;  %6151 = vmatpush.msrb.mxu0 %v12635_v47 }
 0x422   :  { %15660 = vst [vmem:[#allocation87_spill] sm:$0xff] %v12620_v23  ;;  %5632 = vmatmul.f32.gmra.mxu2 %v12511_v10  ;;  %5715 = vmatmul.f32.gmra.mxu3 %v12584_v7  ;;  %v12632_v6 = vand.u32 4294901760, %v12620_v23  ;;  %v4739_v11 = vadd.f32 %v12411_v53, %v4672_v12  ;;  %v12666_v12 = vand.u32 4294901760, %v5313_v3 }
 0x423   :  { %vm5235_vm7 = vcmp.gt.f32.partialorder %v4841_v27, 0.0  ;;  %v5251_v28 = vmul.f32 0.01, %v4841_v27  ;;  %v6042_v15 = vand.u32 4294901760, %v6041_v22  ;;  %5918 = vmatpush.msra.mxu2 %v12641_v42  ;;  %v6047_v49 = vsub.f32 %v12635_v47, %v15091_v60  ;;  %6233 = vmatpush.msrb.mxu1 %v12641_v42 }
 0x424   :  { %15661 = vst [vmem:[#allocation90_spill] sm:$0xff] %v12632_v6  ;;  %v5416_v52 = vsub.f32 %v12620_v23, %v12632_v6  ;;  %v12664_v53 = vsub.f32 %v5315_v40, %v12641_v42  ;;  %v5309_v40 = vld [vmem:[#allocation7 + $0x130] sm:$0xff] }
 0x425   :  { %v5267_v31 = vsel %vm5235_vm7, %v4841_v27, %v5251_v28  ;;  %v12648_v26 = vpop.f32.mrf.mxu2  ;;  %v12650_v30 = vpop.f32.mrf.mxu3  ;;  %6043 = vmatpush.msra.mxu3 %v6042_v15  ;;  %v5311_v28 = vld [vmem:[#allocation7 + $0x140] sm:$0xff]  ;;  %v6048_v60 = vand.u32 4294901760, %v6047_v49  ;;  %5920 = vmatpush.msra.mxu2 %v12666_v12 }
 0x426   :  { %15662 = vst [vmem:[#allocation89_spill] sm:$0xff] %v12650_v30  ;;  %v12654_v7 = vand.u32 4294901760, %v5267_v31  ;;  %v4793_v10 = vpop.f32.mrf.mxu0  ;;  %v12656_v14 = vand.u32 4294901760, %v5416_v52  ;;  %v12673_v52 = vpop.f32.mrf.mxu1  ;;  %v12675_v56 = vand.u32 4294901760, %v5311_v28  ;;  %v15098_v15 = vand.u32 4294901760, %v12664_v53  ;;  %6235 = vmatpush.msrb.mxu1 %v12666_v12  ;;  %6154 = vmatpush.msrb.mxu0 %v12664_v53 }
 0x427   :  { %v4794_v27 = vadd.f32 %v4793_v10, %v4739_v11  ;;  %v12680_v11 = vsub.f32 %v5313_v3, %v12666_v12  ;;  %6049 = vmatpush.msra.mxu3 %v6048_v60  ;;  %v15675_v30 = vand.u32 4294901760, %v12444_v61 }
 0x428   :  { %15663 = vst [vmem:[#allocation93_spill] sm:$0xff] %v12654_v7  ;;  %v12669_v22 = vsub.f32 %v5267_v31, %v12654_v7  ;;  %5418 = vmatmul.f32.gmra.mxu0 %v12656_v14  ;;  %5559 = vmatmul.f32.gmra.mxu1 %v12654_v7  ;;  %v12689_v49 = vsub.f32 %v5311_v28, %v12675_v56 }
 0x429   :  { %15664 = vst [vmem:[#allocation92_spill] sm:$0xff] %v12656_v14  ;;  %v4845_v10 = vadd.f32 %v4844_v38, %v4794_v27  ;;  %v12691_v38 = vand.u32 4294901760, %v5309_v40  ;;  %v6053_v3 = vsub.f32 %v12664_v53, %v15098_v15  ;;  %5922 = vmatpush.msra.mxu2 %v12675_v56  ;;  %6237 = vmatpush.msrb.mxu1 %v12675_v56  ;;  %v15668_v9 = vand.u32 4294901760, %v12680_v11 }
 0x42a   :  { %15665 = vst [vmem:[#allocation96_spill] sm:$0xff] %v12669_v22  ;;  %5637 = vmatmul.f32.gmra.mxu2 %v12573_v55  ;;  %5721 = vmatmul.f32.gmra.mxu3 %v12632_v6  ;;  %v12686_v31 = vand.u32 4294901760, %v12669_v22  ;;  %v5307_v6 = vld [vmem:[#allocation7 + $0x120] sm:$0xff]  ;;  %v15671_v44 = vand.u32 4294901760, %v12689_v49 }
 0x42b   :  { %vm5237_vm8 = vcmp.gt.f32.partialorder %v4845_v10, 0.0  ;;  %v5253_v27 = vmul.f32 0.01, %v4845_v10  ;;  %v12702_v63 = vsub.f32 %v5309_v40, %v12691_v38  ;;  %v12704_v21 = vand.u32 4294901760, %v5307_v6  ;;  %5924 = vmatpush.msra.mxu2 %v12691_v38  ;;  %v5305_v40 = vld [vmem:[#allocation7 + $0x110] sm:$0xff]  ;;  %6239 = vmatpush.msrb.mxu1 %v12691_v38 }
 0x42c   :  { %15666 = vst [vmem:[#allocation95_spill] sm:$0xff] %v12686_v31  ;;  %v5424_v55 = vsub.f32 %v12669_v22, %v12686_v31  ;;  %v6054_v48 = vand.u32 4294901760, %v6053_v3  ;;  %v6059_v37 = vsub.f32 %v12680_v11, %v15668_v9  ;;  %6157 = vmatpush.msrb.mxu0 %v12680_v11 }
 0x42d   :  { %v5269_v60 = vsel %vm5237_vm8, %v4845_v10, %v5253_v27  ;;  %v12708_v15 = vpop.f32.mrf.mxu2  ;;  %v12710_v14 = vpop.f32.mrf.mxu3  ;;  %v6065_v10 = vsub.f32 %v12689_v49, %v15671_v44  ;;  %v15106_v3 = vand.u32 4294901760, %v12702_v63  ;;  %v12727_v9 = vsub.f32 %v5307_v6, %v12704_v21  ;;  %5926 = vmatpush.msra.mxu2 %v12704_v21  ;;  %6241 = vmatpush.msrb.mxu1 %v12704_v21 }
 0x42e   :  { %15667 = vst [vmem:[#allocation100_spill] sm:$0xff] %v12710_v14  ;;  %v12716_v28 = vand.u32 4294901760, %v5269_v60  ;;  %v12718_v59 = vand.u32 4294901760, %v5424_v55  ;;  %6055 = vmatpush.msra.mxu3 %v6054_v48  ;;  %v6060_v27 = vand.u32 4294901760, %v6059_v37  ;;  %v12733_v4 = vpop.f32.mrf.mxu0  ;;  %v12737_v48 = vand.u32 4294901760, %v5305_v40  ;;  %6160 = vmatpush.msrb.mxu0 %v12689_v49 }
 0x42f   :  { %v6066_v44 = vand.u32 4294901760, %v6065_v10  ;;  %v6071_v37 = vsub.f32 %v12702_v63, %v15106_v3  ;;  %v15112_v6 = vand.u32 4294901760, %v12727_v9  ;;  %v12743_v14 = vand.u32 4294901760, %v5303_v41 }
 0x430   :  { %15669 = vst [vmem:[#allocation99_spill] sm:$0xff] %v12716_v28  ;;  %v12731_v55 = vsub.f32 %v5269_v60, %v12716_v28  ;;  %5426 = vmatmul.f32.gmra.mxu0 %v12718_v59  ;;  %5563 = vmatmul.f32.gmra.mxu1 %v12716_v28  ;;  %v12748_v60 = vpop.f32.mrf.mxu1 }
 0x431   :  { %15670 = vst [vmem:[#allocation104_spill] sm:$0xff] %v12718_v59  ;;  %6061 = vmatpush.msra.mxu3 %v6060_v27  ;;  %v12754_v27 = vsub.f32 %v5305_v40, %v12737_v48  ;;  %v6072_v3 = vand.u32 4294901760, %v6071_v37  ;;  %v6077_v59 = vsub.f32 %v12727_v9, %v15112_v6  ;;  %v12760_v28 = vsub.f32 %v5303_v41, %v12743_v14 }
 0x432   :  { %15672 = vst [vmem:[#allocation103_spill] sm:$0xff] %v12731_v55  ;;  %5642 = vmatmul.f32.gmra.mxu2 %v12620_v23  ;;  %5727 = vmatmul.f32.gmra.mxu3 %v12686_v31  ;;  %v12751_v10 = vand.u32 4294901760, %v12731_v55 }
 0x433   :  { %6067 = vmatpush.msra.mxu3 %v6066_v44  ;;  %5928 = vmatpush.msra.mxu2 %v12737_v48  ;;  %v15115_v23 = vand.u32 4294901760, %v12754_v27  ;;  %v6078_v37 = vand.u32 4294901760, %v6077_v59  ;;  %v15116_v41 = vand.u32 4294901760, %v12760_v28 }
 0x434   :  { %15673 = vst [vmem:[#allocation49_spill] sm:$0xff] %v12751_v10  ;;  %v5432_v31 = vsub.f32 %v12731_v55, %v12751_v10  ;;  %6243 = vmatpush.msrb.mxu1 %v12737_v48  ;;  %6163 = vmatpush.msrb.mxu0 %v12702_v63 }
 0x435   :  { %v12768_v40 = vpop.f32.mrf.mxu2  ;;  %v12770_v44 = vpop.f32.mrf.mxu3  ;;  %6073 = vmatpush.msra.mxu3 %v6072_v3  ;;  %5930 = vmatpush.msra.mxu2 %v12743_v14  ;;  %v6083_v7 = vsub.f32 %v12754_v27, %v15115_v23  ;;  %v6089_v59 = vsub.f32 %v12760_v28, %v15116_v41  ;;  %v15676_v23 = vand.u32 4294901760, %v12483_v19  ;;  %v15678_v19 = vand.u32 4294901760, %v12530_v20 }
 0x436   :  { %v12774_v6 = vand.u32 4294901760, %v5432_v31  ;;  %6245 = vmatpush.msrb.mxu1 %v12743_v14  ;;  %6166 = vmatpush.msrb.mxu0 %v12727_v9  ;;  %v5017_v61 = vpop.f32.mrf.mxu0 }
 0x437   :  { %6298 = vmatpush.msrb.mxu2 %v15675_v30  ;;  %6079 = vmatpush.msra.mxu3 %v6078_v37  ;;  %v6084_v31 = vand.u32 4294901760, %v6083_v7  ;;  %v6090_v3 = vand.u32 4294901760, %v6089_v59  ;;  %v15677_v30 = vand.u32 4294901760, %v12516_v29  ;;  %v15680_v29 = vand.u32 4294901760, %v12533_v62 }
 0x438   :  { %15674 = vst [vmem:[#allocation107_spill] sm:$0xff] %v12774_v6  ;;  %5434 = vmatmul.f32.gmra.mxu0 %v12774_v6  ;;  %5867 = vmatmul.f32.vlgmr.msra.gmra.mxu1 %v12383_v13  ;;  %v12795_v37 = vpop.f32.mrf.mxu1 }
 0x439   :  { %6302 = vmatpush.msrb.mxu2 %v15676_v23  ;;  %6085 = vmatpush.msra.mxu3 %v6084_v31  ;;  %v15679_v23 = vld [vmem:[#allocation79_spill] sm:$0xff]  ;;  %v15681_v31 = vand.u32 4294901760, %v12567_v2 }
 0x43a   :  { %5647 = vmatmul.f32.gmra.mxu2 %v12669_v22  ;;  %5733 = vmatmul.f32.gmra.mxu3 %v12751_v10  ;;  %v12805_v41 = vperm.slane %v15679_v23, 1  ;;  %v5282_v22 = vld [vmem:[#allocation7 + $0x58] sm:$0xff] }
 0x43b   :  { %6306 = vmatpush.msrb.mxu2 %v15677_v30  ;;  %6169 = vmatpush.msrb.mxu0 %v12754_v27 }
 0x43c   :  { %6091 = vmatpush.msra.mxu3 %v6090_v3  ;;  %v4872_v20 = vadd.f32 %v12491_v54, %v12805_v41 }
 0x43d   :  { %v12798_v7 = vpop.f32.mrf.mxu2  ;;  %v12800_v59 = vpop.f32.mrf.mxu3  ;;  %6310 = vmatpush.msrb.mxu2 %v15678_v19  ;;  %6172 = vmatpush.msrb.mxu0 %v12760_v28 }
 0x43e   :  { %6393 = vmatpush.msrb.mxu3 %v12432_v36  ;;  %v15682_v36 = vand.u32 4294901760, %v12587_v39  ;;  %v5022_v62 = vpop.f32.mrf.mxu0  ;;  %v4959_v2 = vadd.f32 %v12452_v0, %v4872_v20  ;;  %v4880_v0 = vadd.f32 %v12545_v32, %v12805_v41  ;;  %v15688_v32 = vand.u32 4294901760, %v12702_v63 }
 0x43f   :  { %6314 = vmatpush.msrb.mxu2 %v15680_v29  ;;  %v15690_v63 = vand.u32 4294901760, %v12754_v27 }
 0x440   :  { %5802 = vmatmul.f32.vlgmr.msra.gmra.mxu0 %v12383_v13  ;;  %5871 = vmatmul.f32.gmra.mxu1 %v12417_v58  ;;  %v12828_v19 = vpop.f32.mrf.mxu1  ;;  %v5013_v54 = vadd.f32 %v12733_v4, %v4959_v2 }
 0x441   :  { %6395 = vmatpush.msrb.mxu3 %v12471_v33  ;;  %6318 = vmatpush.msrb.mxu2 %v15681_v31  ;;  %v15683_v33 = vand.u32 4294901760, %v12617_v18 }
 0x442   :  { %5652 = vmatmul.f32.gmra.mxu2 %v12731_v55  ;;  %v5073_v39 = vadd.f32 %v12673_v52, %v5013_v54 }
 0x443   :  { %6397 = vmatpush.msrb.mxu3 %v12485_v51  ;;  %6322 = vmatpush.msrb.mxu2 %v15682_v36  ;;  %v15684_v51 = vand.u32 4294901760, %v12635_v47  ;;  %v15687_v47 = vand.u32 4294901760, %v12689_v49 }
 0x445   :  { %v12822_v3 = vpop.f32.mrf.mxu2  ;;  %v5192_v30 = vpop.f32.mrf.mxu3  ;;  %6399 = vmatpush.msrb.mxu3 %v12518_v50  ;;  %6326 = vmatpush.msrb.mxu2 %v15683_v33  ;;  %v15685_v50 = vand.u32 4294901760, %v12664_v53 }
 0x446   :  { %v5027_v53 = vpop.f32.mrf.mxu0 }
 0x447   :  { %6401 = vmatpush.msrb.mxu3 %v12520_v43  ;;  %6330 = vmatpush.msrb.mxu2 %v15684_v51  ;;  %v15686_v43 = vand.u32 4294901760, %v12680_v11 }
 0x448   :  { %5806 = vmatmul.f32.gmra.mxu0 %v12417_v58  ;;  %5875 = vmatmul.f32.gmra.mxu1 %v12457_v35  ;;  %v12852_v29 = vpop.f32.mrf.mxu1 }
 0x449   :  { %6403 = vmatpush.msrb.mxu3 %v12541_v1  ;;  %6334 = vmatpush.msrb.mxu2 %v15685_v50  ;;  %v4963_v1 = vadd.f32 %v12493_v25, %v4880_v0  ;;  %v4888_v25 = vadd.f32 %v12601_v46, %v12805_v41 }
 0x44b   :  { %6405 = vmatpush.msrb.mxu3 %v12577_v45  ;;  %6338 = vmatpush.msrb.mxu2 %v15686_v43  ;;  %v5018_v45 = vadd.f32 %v5017_v61, %v4963_v1  ;;  %v4967_v46 = vadd.f32 %v12547_v34, %v4888_v25  ;;  %v4896_v34 = vadd.f32 %v12648_v26, %v12805_v41 }
 0x44d   :  { %v5141_v4 = vpop.f32.mrf.mxu2  ;;  %v5196_v18 = vpop.f32.mrf.mxu3  ;;  %6407 = vmatpush.msrb.mxu3 %v12593_v17  ;;  %6342 = vmatpush.msrb.mxu2 %v15687_v47  ;;  %v15689_v17 = vand.u32 4294901760, %v12727_v9  ;;  %v5079_v52 = vadd.f32 %v12748_v60, %v5018_v45  ;;  %v15692_v9 = vand.u32 4294901760, %v12760_v28  ;;  %v5023_v27 = vadd.f32 %v5022_v62, %v4967_v46 }
 0x44e   :  { %v5142_v23 = vadd.f32 %v5141_v4, %v5073_v39  ;;  %v5032_v60 = vpop.f32.mrf.mxu0  ;;  %v4971_v26 = vadd.f32 %v12603_v57, %v4896_v34  ;;  %v4904_v57 = vadd.f32 %v12708_v15, %v12805_v41 }
 0x44f   :  { %6409 = vmatpush.msrb.mxu3 %v12624_v24  ;;  %6346 = vmatpush.msrb.mxu2 %v15688_v32  ;;  %v5085_v33 = vadd.f32 %v12795_v37, %v5023_v27 }
 0x450   :  { %v5193_v11 = vadd.f32 %v5192_v30, %v5142_v23  ;;  %5810 = vmatmul.f32.gmra.mxu0 %v12457_v35  ;;  %5879 = vmatmul.f32.gmra.mxu1 %v12499_v16  ;;  %v12883_v30 = vpop.f32.mrf.mxu1 }
 0x451   :  { %6411 = vmatpush.msrb.mxu3 %v12641_v42  ;;  %6350 = vmatpush.msrb.mxu2 %v15689_v17 }
 0x452   :  { %vm5224_vm9 = vcmp.gt.f32.partialorder %v5193_v11, 0.0  ;;  %v5240_v24 = vmul.f32 0.01, %v5193_v11 }
 0x453   :  { %6413 = vmatpush.msrb.mxu3 %v12666_v12  ;;  %6354 = vmatpush.msrb.mxu2 %v15690_v63  ;;  %v15702_v63 = vld [vmem:[#allocation93_spill] sm:$0xff] }
 0x454   :  { %v5256_v49 = vsel %vm5224_vm9, %v5193_v11, %v5240_v24 }
 0x455   :  { %v12865_v61 = vand.u32 4294901760, %v5256_v49  ;;  %v5145_v31 = vpop.f32.mrf.mxu2  ;;  %v5200_v42 = vpop.f32.mrf.mxu3  ;;  %6415 = vmatpush.msrb.mxu3 %v12675_v56  ;;  %6358 = vmatpush.msrb.mxu2 %v15692_v9 }
 0x456   :  { %v5146_v20 = vadd.f32 %v5145_v31, %v5079_v52 }
 0x457   :  { %15691 = vst [vmem:[#allocation52_spill] sm:$0xff] %v12865_v61  ;;  %v12872_v12 = vsub.f32 %v5256_v49, %v12865_v61  ;;  %6093 = vmatmul.f32.vlgmr.msra.gmra.mxu3 %v12865_v61  ;;  %v4912_v49 = vadd.f32 %v12768_v40, %v12805_v41 }
 0x458   :  { %v5197_v36 = vadd.f32 %v5196_v18, %v5146_v20  ;;  %5814 = vmatmul.f32.gmra.mxu0 %v12499_v16  ;;  %5883 = vmatmul.f32.gmra.mxu1 %v12553_v8  ;;  %v5276_v16 = vld [vmem:[#allocation7 + $0x28] sm:$0xff] }
 0x459   :  { %15693 = vst [vmem:[#allocation69_spill] sm:$0xff] %v12872_v12  ;;  %v12878_v56 = vand.u32 4294901760, %v12872_v12  ;;  %6417 = vmatpush.msrb.mxu3 %v12691_v38 }
 0x45a   :  { %vm5226_vm10 = vcmp.gt.f32.partialorder %v5197_v36, 0.0  ;;  %v5242_v28 = vmul.f32 0.01, %v5197_v36 }
 0x45b   :  { %15694 = vst [vmem:[#allocation54_spill] sm:$0xff] %v12878_v56  ;;  %v5934_v62 = vsub.f32 %v12872_v12, %v12878_v56  ;;  %6419 = vmatpush.msrb.mxu3 %v12704_v21  ;;  %v5028_v21 = vadd.f32 %v5027_v53, %v4971_v26  ;;  %v12911_v53 = vpop.f32.mrf.mxu1 }
 0x45c   :  { %v5258_v2 = vsel %vm5226_vm10, %v5197_v36, %v5242_v28  ;;  %v15706_v28 = vld [vmem:[#allocation100_spill] sm:$0xff] }
 0x45d   :  { %v12889_v51 = vand.u32 4294901760, %v5258_v2  ;;  %v5149_v54 = vpop.f32.mrf.mxu2  ;;  %v5204_v50 = vpop.f32.mrf.mxu3  ;;  %v12891_v38 = vand.u32 4294901760, %v5934_v62  ;;  %6421 = vmatpush.msrb.mxu3 %v12737_v48  ;;  %v5091_v47 = vadd.f32 %v12828_v19, %v5028_v21  ;;  %v4979_v62 = vadd.f32 %v15706_v28, %v4912_v49  ;;  %v5298_v49 = vld [vmem:[#allocation7 + $0xd8] sm:$0xff] }
 0x45e   :  { %v5150_v0 = vadd.f32 %v5149_v54, %v5085_v33  ;;  %v5037_v48 = vpop.f32.mrf.mxu0 }
 0x45f   :  { %15695 = vst [vmem:[#allocation53_spill] sm:$0xff] %v12891_v38  ;;  %v12896_v43 = vsub.f32 %v5258_v2, %v12889_v51  ;;  %5936 = vmatmul.f32.vlgmr.msra.gmra.mxu2 %v12891_v38  ;;  %6097 = vmatmul.f32.gmra.mxu3 %v12889_v51  ;;  %v5284_v38 = vld [vmem:[#allocation7 + $0x68] sm:$0xff] }
 0x460   :  { %v5201_v37 = vadd.f32 %v5200_v42, %v5150_v0  ;;  %5818 = vmatmul.f32.gmra.mxu0 %v12553_v8  ;;  %5887 = vmatmul.f32.gmra.mxu1 %v12607_v5  ;;  %v4920_v0 = vadd.f32 %v12798_v7, %v12805_v41 }
 0x461   :  { %15696 = vst [vmem:[#allocation108_spill] sm:$0xff] %v12896_v43  ;;  %v12903_v39 = vand.u32 4294901760, %v12896_v43  ;;  %6423 = vmatpush.msrb.mxu3 %v12743_v14  ;;  %v15700_v14 = vld [vmem:[#allocation89_spill] sm:$0xff] }
 0x462   :  { %vm5228_vm11 = vcmp.gt.f32.partialorder %v5201_v37, 0.0  ;;  %v5244_v4 = vmul.f32 0.01, %v5201_v37  ;;  %v4975_v17 = vadd.f32 %v15700_v14, %v4904_v57 }
 0x463   :  { %15697 = vst [vmem:[#allocation66_spill] sm:$0xff] %v12903_v39  ;;  %v5942_v18 = vsub.f32 %v12896_v43, %v12903_v39  ;;  %v12938_v33 = vpop.f32.mrf.mxu1 }
 0x464   :  { %v5260_v1 = vsel %vm5228_vm11, %v5201_v37, %v5244_v4  ;;  %v5033_v19 = vadd.f32 %v5032_v60, %v4975_v17  ;;  %v5302_v37 = vld [vmem:[#allocation7 + $0xf8] sm:$0xff]  ;;  %v4928_v17 = vadd.f32 %v12822_v3, %v12805_v41  ;;  %v12982_v41 = vand.u32 4294901760, %v5298_v49 }
 0x465   :  { %v12913_v23 = vand.u32 4294901760, %v5260_v1  ;;  %v5153_v32 = vpop.f32.mrf.mxu2  ;;  %v5208_v45 = vpop.f32.mrf.mxu3  ;;  %v12915_v11 = vand.u32 4294901760, %v5942_v18  ;;  %v12954_v4 = vand.u32 4294901760, %v5302_v37 }
 0x466   :  { %v5154_v15 = vadd.f32 %v5153_v32, %v5091_v47  ;;  %v5097_v9 = vadd.f32 %v12852_v29, %v5033_v19  ;;  %v5042_v46 = vpop.f32.mrf.mxu0  ;;  %v5038_v29 = vadd.f32 %v5037_v48, %v4979_v62  ;;  %v5300_v47 = vld [vmem:[#allocation7 + $0xe8] sm:$0xff] }
 0x467   :  { %15698 = vst [vmem:[#allocation106_spill] sm:$0xff] %v12913_v23  ;;  %v12919_v25 = vsub.f32 %v5260_v1, %v12913_v23  ;;  %5944 = vmatmul.f32.gmra.mxu2 %v12915_v11  ;;  %6101 = vmatmul.f32.gmra.mxu3 %v12913_v23  ;;  %v12962_v14 = vsub.f32 %v5302_v37, %v12954_v4  ;;  %v12964_v7 = vand.u32 4294901760, %v5300_v47 }
 0x468   :  { %15699 = vst [vmem:[#allocation56_spill] sm:$0xff] %v12915_v11  ;;  %v5205_v24 = vadd.f32 %v5204_v50, %v5154_v15  ;;  %5822 = vmatmul.f32.gmra.mxu0 %v12607_v5  ;;  %5891 = vmatmul.f32.gmra.mxu1 %v15702_v63  ;;  %v15708_v50 = vld [vmem:[#allocation99_spill] sm:$0xff]  ;;  %v5103_v48 = vadd.f32 %v12883_v30, %v5038_v29 }
 0x469   :  { %15701 = vst [vmem:[#allocation60_spill] sm:$0xff] %v12919_v25  ;;  %v12926_v52 = vand.u32 4294901760, %v12919_v25  ;;  %6458 = vmatpush.msra.mxu0 %v12954_v4  ;;  %6773 = vmatpush.msra.mxu3 %v12954_v4  ;;  %v4983_v30 = vadd.f32 %v12770_v44, %v4920_v0  ;;  %v12994_v29 = vsub.f32 %v5298_v49, %v12982_v41  ;;  %v5294_v0 = vld [vmem:[#allocation7 + $0xb8] sm:$0xff] }
 0x46a   :  { %vm5230_vm12 = vcmp.gt.f32.partialorder %v5205_v24, 0.0  ;;  %v5246_v31 = vmul.f32 0.01, %v5205_v24  ;;  %6685 = vmatpush.msra.mxu2 %v12962_v14 }
 0x46b   :  { %15703 = vst [vmem:[#allocation55_spill] sm:$0xff] %v12926_v52  ;;  %v5950_v42 = vsub.f32 %v12919_v25, %v12926_v52  ;;  %v5043_v44 = vadd.f32 %v5042_v46, %v4983_v30  ;;  %6460 = vmatpush.msra.mxu0 %v12964_v7  ;;  %v4987_v46 = vadd.f32 %v12800_v59, %v4928_v17  ;;  %v5292_v17 = vld [vmem:[#allocation7 + $0xa8] sm:$0xff] }
 0x46c   :  { %v5262_v20 = vsel %vm5230_vm12, %v5205_v24, %v5246_v31  ;;  %6775 = vmatpush.msra.mxu3 %v12964_v7 }
 0x46d   :  { %v12933_v27 = vand.u32 4294901760, %v5262_v20  ;;  %v5157_v60 = vpop.f32.mrf.mxu2  ;;  %v5212_v36 = vpop.f32.mrf.mxu3  ;;  %v12935_v34 = vand.u32 4294901760, %v5950_v42  ;;  %6462 = vmatpush.msra.mxu0 %v12982_v41  ;;  %v5109_v59 = vadd.f32 %v12911_v53, %v5043_v44 }
 0x46e   :  { %v5158_v40 = vadd.f32 %v5157_v60, %v5097_v9  ;;  %v5047_v15 = vpop.f32.mrf.mxu0  ;;  %v15119_v9 = vand.u32 4294901760, %v12962_v14  ;;  %v5296_v60 = vld [vmem:[#allocation7 + $0xc8] sm:$0xff]  ;;  %6777 = vmatpush.msra.mxu3 %v12982_v41 }
 0x46f   :  { %15704 = vst [vmem:[#allocation59_spill] sm:$0xff] %v12933_v27  ;;  %v12941_v2 = vsub.f32 %v5262_v20, %v12933_v27  ;;  %5952 = vmatmul.f32.gmra.mxu2 %v12935_v34  ;;  %6105 = vmatmul.f32.gmra.mxu3 %v12933_v27  ;;  %v12980_v20 = vsub.f32 %v5300_v47, %v12964_v7 }
 0x470   :  { %15705 = vst [vmem:[#allocation68_spill] sm:$0xff] %v12935_v34  ;;  %v5209_v54 = vadd.f32 %v5208_v45, %v5158_v40  ;;  %5826 = vmatmul.f32.gmra.mxu0 %v15702_v63  ;;  %5895 = vmatmul.f32.gmra.mxu1 %v15708_v50  ;;  %v6557_v62 = vsub.f32 %v12962_v14, %v15119_v9 }
 0x471   :  { %15707 = vst [vmem:[#allocation50_spill] sm:$0xff] %v12941_v2  ;;  %v12948_v26 = vand.u32 4294901760, %v12941_v2  ;;  %v15117_v40 = vand.u32 4294901760, %v12980_v20  ;;  %6688 = vmatpush.msra.mxu2 %v12980_v20 }
 0x472   :  { %vm5232_vm13 = vcmp.gt.f32.partialorder %v5209_v54, 0.0  ;;  %v5248_v21 = vmul.f32 0.01, %v5209_v54  ;;  %v6558_v37 = vand.u32 4294901760, %v6557_v62 }
 0x473   :  { %15709 = vst [vmem:[#allocation71_spill] sm:$0xff] %v12948_v26  ;;  %v5958_v57 = vsub.f32 %v12941_v2, %v12948_v26  ;;  %6691 = vmatpush.msra.mxu2 %v12994_v29 }
 0x474   :  { %v5264_v18 = vsel %vm5232_vm13, %v5209_v54, %v5248_v21  ;;  %v12999_v54 = vand.u32 4294901760, %v5296_v60  ;;  %6559 = vmatpush.msra.mxu1 %v6558_v37  ;;  %v5290_v37 = vld [vmem:[#allocation7 + $0x98] sm:$0xff] }
 0x475   :  { %v12957_v1 = vand.u32 4294901760, %v5264_v18  ;;  %v5161_v32 = vpop.f32.mrf.mxu2  ;;  %v12959_v45 = vand.u32 4294901760, %v5958_v57  ;;  %v12971_v24 = vpop.f32.mrf.mxu1  ;;  %v6563_v57 = vsub.f32 %v12980_v20, %v15117_v40 }
 0x476   :  { %v5162_v19 = vadd.f32 %v5161_v32, %v5103_v48  ;;  %v5216_v42 = vpop.f32.mrf.mxu3  ;;  %v15118_v48 = vand.u32 4294901760, %v12994_v29  ;;  %v13012_v47 = vsub.f32 %v5296_v60, %v12999_v54  ;;  %v13014_v32 = vand.u32 4294901760, %v5294_v0  ;;  %6464 = vmatpush.msra.mxu0 %v12999_v54  ;;  %6779 = vmatpush.msra.mxu3 %v12999_v54 }
 0x477   :  { %15710 = vst [vmem:[#allocation62_spill] sm:$0xff] %v12957_v1  ;;  %v12974_v31 = vsub.f32 %v5264_v18, %v12957_v1  ;;  %5960 = vmatmul.f32.gmra.mxu2 %v12959_v45  ;;  %6109 = vmatmul.f32.gmra.mxu3 %v12957_v1  ;;  %v6564_v62 = vand.u32 4294901760, %v6563_v57  ;;  %v5048_v57 = vadd.f32 %v5047_v15, %v4987_v46 }
 0x478   :  { %15711 = vst [vmem:[#allocation61_spill] sm:$0xff] %v12959_v45  ;;  %v5213_v3 = vadd.f32 %v5212_v36, %v5162_v19  ;;  %5830 = vmatmul.f32.gmra.mxu0 %v15708_v50  ;;  %6249 = vmatmul.f32.vlgmr.msrb.gmra.mxu1 %v12878_v56  ;;  %v6569_v53 = vsub.f32 %v12994_v29, %v15118_v48 }
 0x479   :  { %15712 = vst [vmem:[#allocation65_spill] sm:$0xff] %v12974_v31  ;;  %v12987_v28 = vand.u32 4294901760, %v12974_v31  ;;  %v13031_v40 = vsub.f32 %v5294_v0, %v13014_v32  ;;  %6565 = vmatpush.msra.mxu1 %v6564_v62  ;;  %6466 = vmatpush.msra.mxu0 %v13014_v32 }
 0x47a   :  { %vm5234_vm14 = vcmp.gt.f32.partialorder %v5213_v3, 0.0  ;;  %v5250_v36 = vmul.f32 0.01, %v5213_v3  ;;  %6694 = vmatpush.msra.mxu2 %v13012_v47  ;;  %6781 = vmatpush.msra.mxu3 %v13014_v32 }
 0x47b   :  { %15713 = vst [vmem:[#allocation48_spill] sm:$0xff] %v12987_v28  ;;  %v5966_v21 = vsub.f32 %v12974_v31, %v12987_v28  ;;  %v15126_v15 = vand.u32 4294901760, %v13031_v40 }
 0x47c   :  { %v5266_v18 = vsel %vm5234_vm14, %v5213_v3, %v5250_v36  ;;  %v15121_v36 = vand.u32 4294901760, %v13012_v47  ;;  %6697 = vmatpush.msra.mxu2 %v13031_v40 }
 0x47d   :  { %v13017_v30 = vand.u32 4294901760, %v5266_v18  ;;  %v5165_v19 = vpop.f32.mrf.mxu2  ;;  %v13019_v49 = vand.u32 4294901760, %v5966_v21  ;;  %v13025_v3 = vpop.f32.mrf.mxu0  ;;  %v13033_v21 = vand.u32 4294901760, %v5292_v17 }
 0x47e   :  { %v5166_v44 = vadd.f32 %v5165_v19, %v5109_v59  ;;  %v13027_v60 = vpop.f32.mrf.mxu1  ;;  %v6570_v59 = vand.u32 4294901760, %v6569_v53  ;;  %v13042_v19 = vand.u32 4294901760, %v5290_v37  ;;  %v6575_v9 = vsub.f32 %v13012_v47, %v15121_v36 }
 0x47f   :  { %15714 = vst [vmem:[#allocation73_spill] sm:$0xff] %v13017_v30  ;;  %v13038_v48 = vsub.f32 %v5266_v18, %v13017_v30  ;;  %5968 = vmatmul.f32.gmra.mxu2 %v13019_v49  ;;  %6113 = vmatmul.f32.gmra.mxu3 %v13017_v30  ;;  %v13051_v46 = vsub.f32 %v5292_v17, %v13033_v21  ;;  %v5288_v18 = vld [vmem:[#allocation7 + $0x88] sm:$0xff] }
 0x480   :  { %15715 = vst [vmem:[#allocation67_spill] sm:$0xff] %v13019_v49  ;;  %v5217_v0 = vadd.f32 %v5216_v42, %v5166_v44  ;;  %6175 = vmatmul.f32.vlgmr.msrb.gmra.mxu0 %v12872_v12  ;;  %6255 = vmatmul.f32.gmra.mxu1 %v12903_v39  ;;  %v5220_v49 = vpop.f32.mrf.mxu3  ;;  %v13057_v42 = vsub.f32 %v5290_v37, %v13042_v19  ;;  %v13059_v44 = vand.u32 4294901760, %v5288_v18  ;;  %v6576_v39 = vand.u32 4294901760, %v6575_v9  ;;  %v5286_v12 = vld [vmem:[#allocation7 + $0x78] sm:$0xff] }
 0x481   :  { %15716 = vst [vmem:[#allocation70_spill] sm:$0xff] %v13038_v48  ;;  %v13054_v53 = vand.u32 4294901760, %v13038_v48  ;;  %v6581_v17 = vsub.f32 %v13031_v40, %v15126_v15  ;;  %6571 = vmatpush.msra.mxu1 %v6570_v59  ;;  %6468 = vmatpush.msra.mxu0 %v13033_v21  ;;  %v5115_v9 = vadd.f32 %v12938_v33, %v5048_v57  ;;  %v13076_v11 = vand.u32 4294901760, %v5286_v12 }
 0x482   :  { %vm5236_vm15 = vcmp.gt.f32.partialorder %v5217_v0, 0.0  ;;  %v5252_v36 = vmul.f32 0.01, %v5217_v0  ;;  %v13072_v45 = vsub.f32 %v5288_v18, %v13059_v44  ;;  %6783 = vmatpush.msra.mxu3 %v13033_v21  ;;  %v15720_v18 = vand.u32 4294901760, %v13051_v46  ;;  %6700 = vmatpush.msra.mxu2 %v13051_v46 }
 0x483   :  { %15717 = vst [vmem:[#allocation47_spill] sm:$0xff] %v13054_v53  ;;  %v5974_v62 = vsub.f32 %v13038_v48, %v13054_v53  ;;  %v6582_v34 = vand.u32 4294901760, %v6581_v17  ;;  %6577 = vmatpush.msra.mxu1 %v6576_v39  ;;  %v15721_v33 = vand.u32 4294901760, %v13057_v42  ;;  %6470 = vmatpush.msra.mxu0 %v13042_v19  ;;  %v13099_v39 = vand.u32 4294901760, %v5284_v38 }
 0x484   :  { %v5268_v15 = vsel %vm5236_vm15, %v5217_v0, %v5252_v36  ;;  %v6587_v55 = vsub.f32 %v13051_v46, %v15720_v18  ;;  %v15136_v10 = vand.u32 4294901760, %v13072_v45  ;;  %6785 = vmatpush.msra.mxu3 %v13042_v19  ;;  %6703 = vmatpush.msra.mxu2 %v13057_v42 }
 0x485   :  { %v13080_v59 = vand.u32 4294901760, %v5268_v15  ;;  %v5169_v37 = vpop.f32.mrf.mxu2  ;;  %v13082_v56 = vand.u32 4294901760, %v5974_v62  ;;  %v6593_v36 = vsub.f32 %v13057_v42, %v15721_v33  ;;  %v13091_v0 = vpop.f32.mrf.mxu0  ;;  %v13097_v62 = vsub.f32 %v5286_v12, %v13076_v11  ;;  %6583 = vmatpush.msra.mxu1 %v6582_v34  ;;  %6472 = vmatpush.msra.mxu0 %v13059_v44 }
 0x486   :  { %v5170_v57 = vadd.f32 %v5169_v37, %v5115_v9  ;;  %v13093_v17 = vpop.f32.mrf.mxu1  ;;  %v6588_v37 = vand.u32 4294901760, %v6587_v55  ;;  %v6599_v12 = vsub.f32 %v13072_v45, %v15136_v10  ;;  %v13115_v6 = vsub.f32 %v5284_v38, %v13099_v39  ;;  %v5278_v38 = vld [vmem:[#allocation7 + $0x38] sm:$0xff]  ;;  %6787 = vmatpush.msra.mxu3 %v13059_v44  ;;  %6706 = vmatpush.msra.mxu2 %v13072_v45 }
 0x487   :  { %15718 = vst [vmem:[#allocation75_spill] sm:$0xff] %v13080_v59  ;;  %v13104_v18 = vsub.f32 %v5268_v15, %v13080_v59  ;;  %5976 = vmatmul.f32.gmra.mxu2 %v13082_v56  ;;  %6117 = vmatmul.f32.gmra.mxu3 %v13080_v59  ;;  %v15140_v33 = vand.u32 4294901760, %v13097_v62  ;;  %v5280_v15 = vld [vmem:[#allocation7 + $0x48] sm:$0xff]  ;;  %v6594_v55 = vand.u32 4294901760, %v6593_v36  ;;  %v13142_v8 = vand.u32 4294901760, %v5278_v38 }
 0x488   :  { %15719 = vst [vmem:[#allocation15_spill] sm:$0xff] %v13082_v56  ;;  %v5221_v9 = vadd.f32 %v5220_v49, %v5170_v57  ;;  %6180 = vmatmul.f32.gmra.mxu0 %v12896_v43  ;;  %6261 = vmatmul.f32.gmra.mxu1 %v12926_v52  ;;  %v13120_v49 = vand.u32 4294901760, %v5282_v22  ;;  %v13123_v57 = vand.u32 4294901760, %v5280_v15  ;;  %v13130_v43 = vpop.f32.mrf.mxu3  ;;  %v6600_v5 = vand.u32 4294901760, %v6599_v12 }
 0x489   :  { %15722 = vst [vmem:[#allocation22_spill] sm:$0xff] %v13093_v17  ;;  %v13118_v56 = vand.u32 4294901760, %v13104_v18  ;;  %v6605_v10 = vsub.f32 %v13097_v62, %v15140_v33  ;;  %6589 = vmatpush.msra.mxu1 %v6588_v37  ;;  %6474 = vmatpush.msra.mxu0 %v13076_v11  ;;  %v13160_v12 = vsub.f32 %v5278_v38, %v13142_v8  ;;  %v13162_v59 = vand.u32 4294901760, %v5276_v16 }
 0x48a   :  { %15723 = vst [vmem:[#allocation16_spill] sm:$0xff] %v13104_v18  ;;  %vm5238_vm0 = vcmp.gt.f32.partialorder %v5221_v9, 0.0  ;;  %v5254_v52 = vmul.f32 0.01, %v5221_v9  ;;  %v13136_v50 = vsub.f32 %v5282_v22, %v13120_v49  ;;  %v13139_v63 = vsub.f32 %v5280_v15, %v13123_v57  ;;  %6789 = vmatpush.msra.mxu3 %v13076_v11  ;;  %6709 = vmatpush.msra.mxu2 %v13097_v62 }
 0x48b   :  { %15724 = vst [vmem:[#allocation24_spill] sm:$0xff] %v13118_v56  ;;  %v5982_v34 = vsub.f32 %v13104_v18, %v13118_v56  ;;  %6595 = vmatpush.msra.mxu1 %v6594_v55  ;;  %v15728_v22 = vand.u32 4294901760, %v13115_v6  ;;  %6476 = vmatpush.msra.mxu0 %v13099_v39  ;;  %v13184_v35 = vsub.f32 %v5276_v16, %v13162_v59 }
 0x48c   :  { %15725 = vst [vmem:[#allocation21_spill] sm:$0xff] %v13120_v49  ;;  %v5270_v33 = vsel %vm5238_vm0, %v5221_v9, %v5254_v52  ;;  %6791 = vmatpush.msra.mxu3 %v13099_v39  ;;  %6712 = vmatpush.msra.mxu2 %v13115_v6 }
 0x48d   :  { %v13146_v37 = vand.u32 4294901760, %v5270_v33  ;;  %v13148_v36 = vand.u32 4294901760, %v5982_v34  ;;  %v6611_v15 = vsub.f32 %v13115_v6, %v15728_v22  ;;  %v13155_v52 = vpop.f32.mrf.mxu0  ;;  %v5274_v34 = vld [vmem:[#allocation7 + $0x18] sm:$0xff]  ;;  %v6606_v22 = vand.u32 4294901760, %v6605_v10  ;;  %6601 = vmatpush.msra.mxu1 %v6600_v5  ;;  %6478 = vmatpush.msra.mxu0 %v13120_v49 }
 0x48e   :  { %15729 = vst [vmem:[#allocation19_spill] sm:$0xff] %v13155_v52  ;;  %v13157_v9 = vpop.f32.mrf.mxu1  ;;  %v13177_v52 = vand.u32 4294901760, %v5274_v34  ;;  %6793 = vmatpush.msra.mxu3 %v13120_v49  ;;  %v15734_v5 = vand.u32 4294901760, %v13139_v63  ;;  %6715 = vmatpush.msra.mxu2 %v13136_v50 }
 0x48f   :  { %15726 = vst [vmem:[#allocation28_spill] sm:$0xff] %v13146_v37  ;;  %v13167_v55 = vsub.f32 %v5270_v33, %v13146_v37  ;;  %5984 = vmatmul.f32.gmra.mxu2 %v13148_v36  ;;  %6121 = vmatmul.f32.gmra.mxu3 %v13146_v37  ;;  %v6612_v38 = vand.u32 4294901760, %v6611_v15  ;;  %v5272_v33 = vld [vmem:[#allocation7 + $0x8] sm:$0xff]  ;;  %v13191_v15 = vpop.f32.mrf.mxu2 }
 0x490   :  { %15727 = vst [vmem:[#allocation26_spill] sm:$0xff] %v13148_v36  ;;  %6185 = vmatmul.f32.gmra.mxu0 %v12919_v25  ;;  %6267 = vmatmul.f32.gmra.mxu1 %v12948_v26  ;;  %v13187_v26 = vand.u32 4294901760, %v5272_v33  ;;  %v6623_v10 = vsub.f32 %v13139_v63, %v15734_v5  ;;  %v13199_v16 = vsub.f32 %v5274_v34, %v13177_v52  ;;  %v13204_v36 = vpop.f32.mrf.mxu3  ;;  %v15161_v5 = vand.u32 4294901760, %v13184_v35 }
 0x491   :  { %15730 = vst [vmem:[#allocation32_spill] sm:$0xff] %v13157_v9  ;;  %v15732_v9 = vand.u32 4294901760, %v13136_v50  ;;  %v13180_v58 = vand.u32 4294901760, %v13167_v55  ;;  %6607 = vmatpush.msra.mxu1 %v6606_v22  ;;  %6480 = vmatpush.msra.mxu0 %v13123_v57  ;;  %v15736_v22 = vand.u32 4294901760, %v13160_v12 }
 0x492   :  { %15731 = vst [vmem:[#allocation30_spill] sm:$0xff] %v13167_v55  ;;  %6795 = vmatpush.msra.mxu3 %v13123_v57  ;;  %v13213_v34 = vsub.f32 %v5272_v33, %v13187_v26  ;;  %6718 = vmatpush.msra.mxu2 %v13139_v63 }
 0x493   :  { %v6617_v17 = vsub.f32 %v13136_v50, %v15732_v9  ;;  %15733 = vst [vmem:[#allocation17_spill] sm:$0xff] %v13180_v58  ;;  %v5990_v9 = vsub.f32 %v13167_v55, %v13180_v58  ;;  %6613 = vmatpush.msra.mxu1 %v6612_v38  ;;  %v6629_v49 = vsub.f32 %v13160_v12, %v15736_v22  ;;  %v6624_v38 = vand.u32 4294901760, %v6623_v10 }
 0x494   :  { %6482 = vmatpush.msra.mxu0 %v13142_v8  ;;  %6797 = vmatpush.msra.mxu3 %v13142_v8  ;;  %v6635_v22 = vsub.f32 %v13184_v35, %v15161_v5 }
 0x495   :  { %v6618_v25 = vand.u32 4294901760, %v6617_v17  ;;  %v13206_v37 = vand.u32 4294901760, %v5990_v9  ;;  %v13216_v17 = vpop.f32.mrf.mxu0  ;;  %v15163_v9 = vand.u32 4294901760, %v13199_v16  ;;  %v6630_v33 = vand.u32 4294901760, %v6629_v49  ;;  %6721 = vmatpush.msra.mxu2 %v13160_v12 }
 0x496   :  { %v13218_v30 = vpop.f32.mrf.mxu1  ;;  %6484 = vmatpush.msra.mxu0 %v13162_v59  ;;  %6799 = vmatpush.msra.mxu3 %v13162_v59  ;;  %v6636_v49 = vand.u32 4294901760, %v6635_v22 }
 0x497   :  { %15735 = vst [vmem:[#allocation20_spill] sm:$0xff] %v13206_v37  ;;  %5992 = vmatmul.f32.gmra.mxu2 %v13206_v37  ;;  %6425 = vmatmul.f32.vlgmr.msrb.gmra.mxu3 %v12865_v61  ;;  %v6641_v10 = vsub.f32 %v13199_v16, %v15163_v9 }
 0x498   :  { %15737 = vst [vmem:[#allocation36_spill] sm:$0xff] %v13218_v30  ;;  %6190 = vmatmul.f32.gmra.mxu0 %v12941_v2  ;;  %6273 = vmatmul.f32.gmra.mxu1 %v12987_v28  ;;  %v15164_v30 = vand.u32 4294901760, %v13213_v34  ;;  %v13252_v9 = vpop.f32.mrf.mxu3  ;;  %v15739_v2 = vand.u32 4294901760, %v12980_v20  ;;  %v5335_v20 = vld [vmem:[%s14827_s10] sm:$0x3] }
 0x499   :  { %6619 = vmatpush.msra.mxu1 %v6618_v25  ;;  %6486 = vmatpush.msra.mxu0 %v13177_v52  ;;  %v13240_v25 = vpop.f32.mrf.mxu2 }
 0x49a   :  { %6724 = vmatpush.msra.mxu2 %v13184_v35  ;;  %6801 = vmatpush.msra.mxu3 %v13177_v52  ;;  %v6647_v5 = vsub.f32 %v13213_v34, %v15164_v30  ;;  %v15738_v30 = vand.u32 4294901760, %v12962_v14  ;;  %v15741_v14 = vand.u32 4294901760, %v13012_v47  ;;  %v13294_v47 = vperm.slane %v5335_v20, 0  ;;  %v15752_v20 = vld [vmem:[#allocation80_spill] sm:$0xff] }
 0x49b   :  { %6625 = vmatpush.msra.mxu1 %v6624_v38  ;;  %6488 = vmatpush.msra.mxu0 %v13187_v26 }
 0x49c   :  { %6803 = vmatpush.msra.mxu3 %v13187_v26  ;;  %6727 = vmatpush.msra.mxu2 %v13199_v16  ;;  %v6648_v22 = vand.u32 4294901760, %v6647_v5 }
 0x49d   :  { %6631 = vmatpush.msra.mxu1 %v6630_v33  ;;  %v13246_v38 = vpop.f32.mrf.mxu0  ;;  %v6642_v33 = vand.u32 4294901760, %v6641_v10  ;;  %6856 = vmatpush.msrb.mxu0 %v15738_v30  ;;  %v15740_v10 = vand.u32 4294901760, %v12994_v29  ;;  %v15743_v29 = vand.u32 4294901760, %v13051_v46 }
 0x49e   :  { %v13248_v28 = vpop.f32.mrf.mxu1  ;;  %6730 = vmatpush.msra.mxu2 %v13213_v34 }
 0x49f   :  { %6360 = vmatmul.f32.vlgmr.msrb.gmra.mxu2 %v12865_v61  ;;  %6429 = vmatmul.f32.gmra.mxu3 %v12889_v51 }
 0x4a0   :  { %6195 = vmatmul.f32.gmra.mxu0 %v12974_v31  ;;  %6279 = vmatmul.f32.gmra.mxu1 %v13054_v53  ;;  %v15777_v31 = vld [vmem:[#allocation92_spill] sm:$0xff] }
 0x4a1   :  { %6637 = vmatpush.msra.mxu1 %v6636_v49  ;;  %6860 = vmatpush.msrb.mxu0 %v15739_v2  ;;  %v13270_v5 = vpop.f32.mrf.mxu2  ;;  %v13276_v2 = vpop.f32.mrf.mxu3  ;;  %v15745_v49 = vand.u32 4294901760, %v13072_v45 }
 0x4a3   :  { %6643 = vmatpush.msra.mxu1 %v6642_v33  ;;  %6864 = vmatpush.msrb.mxu0 %v15740_v10  ;;  %v15746_v33 = vand.u32 4294901760, %v13097_v62 }
 0x4a5   :  { %6649 = vmatpush.msra.mxu1 %v6648_v22  ;;  %v13263_v37 = vpop.f32.mrf.mxu0  ;;  %6868 = vmatpush.msrb.mxu0 %v15741_v14 }
 0x4a6   :  { %v13265_v61 = vpop.f32.mrf.mxu1 }
 0x4a7   :  { %6951 = vmatpush.msrb.mxu1 %v12954_v4  ;;  %6364 = vmatmul.f32.gmra.mxu2 %v12889_v51  ;;  %v15742_v4 = vand.u32 4294901760, %v13031_v40  ;;  %v15744_v40 = vand.u32 4294901760, %v13057_v42 }
 0x4a8   :  { %6433 = vmatmul.f32.gmra.mxu3 %v12913_v23  ;;  %6200 = vmatmul.f32.gmra.mxu0 %v13038_v48 }
 0x4a9   :  { %6285 = vmatmul.f32.gmra.mxu1 %v13118_v56  ;;  %6872 = vmatpush.msrb.mxu0 %v15742_v4  ;;  %v13307_v46 = vpop.f32.mrf.mxu3  ;;  %v15751_v4 = vld [vmem:[#allocation83_spill] sm:$0xff]  ;;  %v15774_v56 = vld [vmem:[#allocation86_spill] sm:$0xff] }
 0x4aa   :  { %6953 = vmatpush.msrb.mxu1 %v12964_v7 }
 0x4ab   :  { %6876 = vmatpush.msrb.mxu0 %v15743_v29  ;;  %v15753_v29 = vld [vmem:[#allocation21_spill] sm:$0xff] }
 0x4ac   :  { %6955 = vmatpush.msrb.mxu1 %v12982_v41  ;;  %v13300_v41 = vpop.f32.mrf.mxu2 }
 0x4ad   :  { %v13290_v30 = vpop.f32.mrf.mxu0  ;;  %6880 = vmatpush.msrb.mxu0 %v15744_v40 }
 0x4ae   :  { %6957 = vmatpush.msrb.mxu1 %v12999_v54  ;;  %v13292_v7 = vpop.f32.mrf.mxu1  ;;  %v5380_v54 = vadd.f32 %v13025_v3, %v13294_v47  ;;  %v15747_v3 = vand.u32 4294901760, %v13115_v6 }
 0x4af   :  { %6368 = vmatmul.f32.gmra.mxu2 %v12913_v23  ;;  %6884 = vmatpush.msrb.mxu0 %v15745_v49 }
 0x4b0   :  { %6437 = vmatmul.f32.gmra.mxu3 %v12933_v27  ;;  %6205 = vmatmul.f32.gmra.mxu0 %v13104_v18  ;;  %v5537_v42 = vadd.f32 %v12971_v24, %v5380_v54  ;;  %v15748_v24 = vand.u32 4294901760, %v13136_v50  ;;  %v5334_v50 = vld [vmem:[#allocation7 + $0x1f8] sm:$0xff]  ;;  %v15755_v54 = vld [vmem:[#allocation19_spill] sm:$0xff]  ;;  %v15772_v18 = vld [vmem:[#allocation57_spill] sm:$0xff] }
 0x4b1   :  { %6291 = vmatmul.f32.gmra.mxu1 %v13180_v58  ;;  %6888 = vmatpush.msrb.mxu0 %v15746_v33  ;;  %v13333_v62 = vpop.f32.mrf.mxu3  ;;  %v5396_v49 = vadd.f32 %v15755_v54, %v13294_v47  ;;  %v5332_v33 = vld [vmem:[#allocation7 + $0x1e8] sm:$0xff]  ;;  %v15762_v54 = vand.u32 4294901760, %v13213_v34  ;;  %v15771_v58 = vld [vmem:[#allocation81_spill] sm:$0xff] }
 0x4b2   :  { %6959 = vmatpush.msrb.mxu1 %v13014_v32  ;;  %v5619_v45 = vadd.f32 %v13191_v15, %v5537_v42  ;;  %v13362_v42 = vand.u32 4294901760, %v5332_v33 }
 0x4b3   :  { %6892 = vmatpush.msrb.mxu0 %v15747_v3  ;;  %v15757_v3 = vand.u32 4294901760, %v13199_v16 }
 0x4b4   :  { %6961 = vmatpush.msrb.mxu1 %v13033_v21  ;;  %v5388_v21 = vadd.f32 %v13091_v0, %v13294_v47  ;;  %v5693_v10 = vadd.f32 %v13130_v43, %v5619_v45  ;;  %v13344_v43 = vand.u32 4294901760, %v5334_v50 }
 0x4b5   :  { %v13315_v22 = vpop.f32.mrf.mxu0  ;;  %6896 = vmatpush.msrb.mxu0 %v15748_v24 }
 0x4b6   :  { %6963 = vmatpush.msrb.mxu1 %v13042_v19  ;;  %v5868_v32 = vpop.f32.mrf.mxu1  ;;  %v13328_v19 = vpop.f32.mrf.mxu2  ;;  %v5541_v0 = vadd.f32 %v13027_v60, %v5388_v21  ;;  %v15754_v60 = vand.u32 4294901760, %v13160_v12  ;;  %7016 = vmatpush.msrb.mxu2 %v13344_v43  ;;  %v13354_v40 = vsub.f32 %v5334_v50, %v13344_v43 }
 0x4b7   :  { %6372 = vmatmul.f32.gmra.mxu2 %v12933_v27 }
 0x4b8   :  { %6441 = vmatmul.f32.gmra.mxu3 %v12957_v1  ;;  %6210 = vmatmul.f32.gmra.mxu0 %v13167_v55 }
 0x4b9   :  { %6651 = vmatmul.f32.vlgmr.msra.gmra.mxu1 %v12383_v13  ;;  %7018 = vmatpush.msrb.mxu2 %v13362_v42  ;;  %v13380_v16 = vpop.f32.mrf.mxu3 }
 0x4ba   :  { %6965 = vmatpush.msrb.mxu1 %v13059_v44  ;;  %v15749_v44 = vand.u32 4294901760, %v13139_v63 }
 0x4bc   :  { %6967 = vmatpush.msrb.mxu1 %v13076_v11  ;;  %6900 = vmatpush.msrb.mxu0 %v15749_v44  ;;  %v15750_v11 = vld [vmem:[#allocation73_spill] sm:$0xff] }
 0x4bd   :  { %v5803_v6 = vpop.f32.mrf.mxu0 }
 0x4be   :  { %6969 = vmatpush.msrb.mxu1 %v13099_v39  ;;  %v5872_v15 = vpop.f32.mrf.mxu1  ;;  %v5804_v14 = vadd.f32 %v5803_v6, %v5693_v10  ;;  %v5624_v39 = vadd.f32 %v13240_v25, %v5541_v0  ;;  %6904 = vmatpush.msrb.mxu0 %v15754_v60  ;;  %v15756_v25 = vand.u32 4294901760, %v13184_v35  ;;  %v13364_v12 = vpop.f32.mrf.mxu2  ;;  %v15759_v6 = vld [vmem:[#allocation75_spill] sm:$0xff]  ;;  %v15760_v0 = vld [vmem:[#allocation88_spill] sm:$0xff] }
 0x4bf   :  { %6376 = vmatmul.f32.gmra.mxu2 %v12957_v1 }
 0x4c0   :  { %6445 = vmatmul.f32.gmra.mxu3 %v15750_v11  ;;  %6494 = vmatmul.f32.vlgmr.msra.gmra.mxu0 %v15751_v4  ;;  %v13347_v63 = vadd.f32 %v5868_v32, %v5804_v14  ;;  %v15173_v32 = vand.u32 4294901760, %v13354_v40  ;;  %v5699_v45 = vadd.f32 %v13204_v36, %v5624_v39  ;;  %v5330_v36 = vld [vmem:[#allocation7 + $0x1d8] sm:$0xff]  ;;  %v15761_v14 = vld [vmem:[#allocation63_spill] sm:$0xff] }
 0x4c1   :  { %6655 = vmatmul.f32.gmra.mxu1 %v15752_v20  ;;  %6908 = vmatpush.msrb.mxu0 %v15756_v25  ;;  %v13384_v4 = vand.u32 4294901760, %v5330_v36 }
 0x4c2   :  { %6971 = vmatpush.msrb.mxu1 %v15753_v29  ;;  %v7115_v35 = vsub.f32 %v13354_v40, %v15173_v32 }
 0x4c3   :  { %6912 = vmatpush.msrb.mxu0 %v15757_v3  ;;  %7020 = vmatpush.msrb.mxu2 %v13384_v4 }
 0x4c4   :  { %6973 = vmatpush.msrb.mxu1 %v13123_v57  ;;  %v15758_v57 = vld [vmem:[#allocation22_spill] sm:$0xff]  ;;  %v7116_v50 = vand.u32 4294901760, %v7115_v35 }
 0x4c5   :  { %v5807_v21 = vpop.f32.mrf.mxu0  ;;  %v5545_v10 = vadd.f32 %v15758_v57, %v5396_v49  ;;  %6916 = vmatpush.msrb.mxu0 %v15762_v54  ;;  %v13395_v49 = vsub.f32 %v5330_v36, %v13384_v4  ;;  %v15765_v36 = vld [vmem:[#allocation97_spill] sm:$0xff] }
 0x4c6   :  { %6975 = vmatpush.msrb.mxu1 %v13142_v8  ;;  %v5876_v24 = vpop.f32.mrf.mxu1  ;;  %v5808_v44 = vadd.f32 %v5807_v21, %v5699_v45  ;;  %v13378_v8 = vsub.f32 %v5332_v33, %v13362_v42  ;;  %7117 = vmatpush.msrb.mxu3 %v7116_v50  ;;  %v5404_v33 = vadd.f32 %v13216_v17, %v13294_v47 }
 0x4c7   :  { %6380 = vmatmul.f32.gmra.mxu2 %v15750_v11  ;;  %v5629_v39 = vadd.f32 %v13270_v5, %v5545_v10  ;;  %7243 = vmatpush.msra.mxu0 %v13354_v40  ;;  %v5326_v10 = vld [vmem:[#allocation7 + $0x1b8] sm:$0xff] }
 0x4c8   :  { %6449 = vmatmul.f32.gmra.mxu3 %v15759_v6  ;;  %6502 = vmatmul.f32.gmra.mxu0 %v15760_v0  ;;  %v15171_v29 = vand.u32 4294901760, %v13378_v8  ;;  %v13388_v60 = vadd.f32 %v5872_v15, %v5808_v44  ;;  %v5328_v15 = vld [vmem:[#allocation7 + $0x1c8] sm:$0xff]  ;;  %v13421_v44 = vpop.f32.mrf.mxu2  ;;  %v15766_v0 = vld [vmem:[#allocation98_spill] sm:$0xff] }
 0x4c9   :  { %6659 = vmatmul.f32.gmra.mxu1 %v15761_v14  ;;  %v13405_v34 = vand.u32 4294901760, %v5328_v15  ;;  %v5705_v25 = vadd.f32 %v13252_v9, %v5629_v39  ;;  %7246 = vmatpush.msra.mxu0 %v13378_v8  ;;  %v15764_v9 = vld [vmem:[#allocation28_spill] sm:$0xff]  ;;  %v13425_v39 = vand.u32 4294901760, %v5326_v10 }
 0x4ca   :  { %6977 = vmatpush.msrb.mxu1 %v13162_v59  ;;  %v7121_v5 = vsub.f32 %v13378_v8, %v15171_v29  ;;  %v15170_v59 = vand.u32 4294901760, %v13395_v49  ;;  %v15770_v29 = vld [vmem:[#allocation51_spill] sm:$0xff] }
 0x4cb   :  { %7022 = vmatpush.msrb.mxu2 %v13405_v34  ;;  %7249 = vmatpush.msra.mxu0 %v13395_v49 }
 0x4cc   :  { %6979 = vmatpush.msrb.mxu1 %v13177_v52  ;;  %v7122_v45 = vand.u32 4294901760, %v7121_v5  ;;  %v7127_v21 = vsub.f32 %v13395_v49, %v15170_v59  ;;  %v15763_v52 = vld [vmem:[#allocation32_spill] sm:$0xff]  ;;  %v15768_v59 = vld [vmem:[#allocation82_spill] sm:$0xff] }
 0x4cd   :  { %v5811_v17 = vpop.f32.mrf.mxu0  ;;  %v5549_v35 = vadd.f32 %v15763_v52, %v5404_v33  ;;  %7024 = vmatpush.msrb.mxu2 %v13425_v39 }
 0x4ce   :  { %6981 = vmatpush.msrb.mxu1 %v13187_v26  ;;  %v5880_v3 = vpop.f32.mrf.mxu1  ;;  %v5812_v57 = vadd.f32 %v5811_v17, %v5705_v25  ;;  %v13419_v26 = vsub.f32 %v5328_v15, %v13405_v34  ;;  %v7128_v50 = vand.u32 4294901760, %v7127_v21  ;;  %7123 = vmatpush.msrb.mxu3 %v7122_v45  ;;  %v13432_v15 = vpop.f32.mrf.mxu3  ;;  %v13436_v25 = vsub.f32 %v5326_v10, %v13425_v39 }
 0x4cf   :  { %6384 = vmatmul.f32.gmra.mxu2 %v15759_v6  ;;  %v5634_v54 = vadd.f32 %v13300_v41, %v5549_v35  ;;  %v5412_v17 = vadd.f32 %v13246_v38, %v13294_v47 }
 0x4d0   :  { %7331 = vmatpush.msra.mxu1 %v13344_v43  ;;  %6453 = vmatmul.f32.gmra.mxu3 %v15764_v9  ;;  %v15169_v33 = vand.u32 4294901760, %v13419_v26  ;;  %v13429_v5 = vadd.f32 %v5876_v24, %v5812_v57  ;;  %v5324_v24 = vld [vmem:[#allocation7 + $0x1a8] sm:$0xff]  ;;  %v15172_v45 = vand.u32 4294901760, %v13436_v25 }
 0x4d1   :  { %6510 = vmatmul.f32.gmra.mxu0 %v15765_v36  ;;  %6663 = vmatmul.f32.gmra.mxu1 %v15766_v0  ;;  %v13446_v21 = vand.u32 4294901760, %v5324_v24  ;;  %v5711_v52 = vadd.f32 %v13276_v2, %v5634_v54  ;;  %v15767_v36 = vld [vmem:[#allocation36_spill] sm:$0xff]  ;;  %v5322_v54 = vld [vmem:[#allocation7 + $0x198] sm:$0xff] }
 0x4d2   :  { %7333 = vmatpush.msra.mxu1 %v13362_v42  ;;  %7129 = vmatpush.msrb.mxu3 %v7128_v50  ;;  %v7133_v41 = vsub.f32 %v13419_v26, %v15169_v33  ;;  %v7139_v10 = vsub.f32 %v13436_v25, %v15172_v45  ;;  %v5553_v50 = vadd.f32 %v15767_v36, %v5412_v17  ;;  %v13464_v32 = vand.u32 4294901760, %v5322_v54 }
 0x4d3   :  { %7252 = vmatpush.msra.mxu0 %v13419_v26  ;;  %7026 = vmatpush.msrb.mxu2 %v13446_v21  ;;  %v13460_v2 = vsub.f32 %v5324_v24, %v13446_v21 }
 0x4d4   :  { %7335 = vmatpush.msra.mxu1 %v13384_v4  ;;  %v7134_v35 = vand.u32 4294901760, %v7133_v41  ;;  %v15769_v41 = vld [vmem:[#allocation105_spill] sm:$0xff]  ;;  %v7140_v45 = vand.u32 4294901760, %v7139_v10  ;;  %v5639_v55 = vadd.f32 %v13328_v19, %v5553_v50  ;;  %v5420_v19 = vadd.f32 %v13263_v37, %v13294_v47 }
 0x4d5   :  { %v5815_v38 = vpop.f32.mrf.mxu0  ;;  %7255 = vmatpush.msra.mxu0 %v13436_v25  ;;  %v15175_v17 = vand.u32 4294901760, %v13460_v2  ;;  %7028 = vmatpush.msrb.mxu2 %v13464_v32 }
 0x4d6   :  { %7337 = vmatpush.msra.mxu1 %v13405_v34  ;;  %v5884_v57 = vpop.f32.mrf.mxu1  ;;  %v5816_v33 = vadd.f32 %v5815_v38, %v5711_v52  ;;  %7135 = vmatpush.msrb.mxu3 %v7134_v35  ;;  %v13475_v38 = vsub.f32 %v5322_v54, %v13464_v32  ;;  %v5717_v36 = vadd.f32 %v13307_v46, %v5639_v55  ;;  %v5318_v46 = vld [vmem:[#allocation7 + $0x178] sm:$0xff] }
 0x4d7   :  { %6388 = vmatmul.f32.gmra.mxu2 %v15764_v9  ;;  %7258 = vmatpush.msra.mxu0 %v13460_v2  ;;  %v13502_v53 = vand.u32 4294901760, %v5318_v46 }
 0x4d8   :  { %6807 = vmatmul.f32.vlgmr.msra.gmra.mxu3 %v15768_v59  ;;  %v13468_v52 = vadd.f32 %v5880_v3, %v5816_v33  ;;  %7339 = vmatpush.msra.mxu1 %v13425_v39  ;;  %v13471_v59 = vpop.f32.mrf.mxu2  ;;  %v7145_v3 = vsub.f32 %v13460_v2, %v15175_v17  ;;  %v5320_v33 = vld [vmem:[#allocation7 + $0x188] sm:$0xff]  ;;  %v15181_v35 = vand.u32 4294901760, %v13475_v38 }
 0x4d9   :  { %6518 = vmatmul.f32.gmra.mxu0 %v15769_v41  ;;  %6667 = vmatmul.f32.gmra.mxu1 %v15770_v29  ;;  %v13485_v10 = vand.u32 4294901760, %v5320_v33  ;;  %v5557_v41 = vadd.f32 %v13248_v28, %v5420_v19 }
 0x4da   :  { %v6094_v24 = vpop.f32.mrf.mxu3  ;;  %7141 = vmatpush.msrb.mxu3 %v7140_v45  ;;  %7341 = vmatpush.msra.mxu1 %v13446_v21  ;;  %v7146_v50 = vand.u32 4294901760, %v7145_v3  ;;  %v7151_v54 = vsub.f32 %v13475_v38, %v15181_v35  ;;  %v15773_v3 = vld [vmem:[#allocation64_spill] sm:$0xff] }
 0x4db   :  { %7261 = vmatpush.msra.mxu0 %v13475_v38  ;;  %7030 = vmatpush.msrb.mxu2 %v13485_v10  ;;  %v13498_v55 = vsub.f32 %v5320_v33, %v13485_v10  ;;  %v5644_v35 = vadd.f32 %v13364_v12, %v5557_v41  ;;  %v13511_v33 = vsub.f32 %v5318_v46, %v13502_v53 }
 0x4dc   :  { %7343 = vmatpush.msra.mxu1 %v13464_v32  ;;  %v7152_v48 = vand.u32 4294901760, %v7151_v54  ;;  %7147 = vmatpush.msrb.mxu3 %v7146_v50 }
 0x4dd   :  { %v5819_v37 = vpop.f32.mrf.mxu0  ;;  %v15182_v28 = vand.u32 4294901760, %v13498_v55  ;;  %7032 = vmatpush.msrb.mxu2 %v13502_v53  ;;  %7264 = vmatpush.msra.mxu0 %v13498_v55  ;;  %v15184_v50 = vand.u32 4294901760, %v13511_v33  ;;  %v5723_v54 = vadd.f32 %v13333_v62, %v5644_v35  ;;  %v15775_v35 = vld [vmem:[#allocation85_spill] sm:$0xff] }
 0x4de   :  { %v5888_v45 = vpop.f32.mrf.mxu1  ;;  %v5820_v17 = vadd.f32 %v5819_v37, %v5717_v36  ;;  %7345 = vmatpush.msra.mxu1 %v13485_v10  ;;  %v5428_v36 = vadd.f32 %v13290_v30, %v13294_v47  ;;  %7153 = vmatpush.msrb.mxu3 %v7152_v48 }
 0x4df   :  { %6733 = vmatmul.f32.vlgmr.msra.gmra.mxu2 %v15771_v58  ;;  %7267 = vmatpush.msra.mxu0 %v13511_v33 }
 0x4e0   :  { %6813 = vmatmul.f32.gmra.mxu3 %v15772_v18  ;;  %v13506_v19 = vadd.f32 %v5884_v57, %v5820_v17  ;;  %v7157_v57 = vsub.f32 %v13498_v55, %v15182_v28  ;;  %v5316_v17 = vld [vmem:[#allocation7 + $0x168] sm:$0xff]  ;;  %7347 = vmatpush.msra.mxu1 %v13502_v53  ;;  %v5561_v62 = vadd.f32 %v13265_v61, %v5428_v36 }
 0x4e1   :  { %6526 = vmatmul.f32.gmra.mxu0 %v15773_v3  ;;  %6671 = vmatmul.f32.gmra.mxu1 %v15774_v56  ;;  %v13522_v37 = vand.u32 4294901760, %v5316_v17  ;;  %v7163_v3 = vsub.f32 %v13511_v33, %v15184_v50  ;;  %v15778_v50 = vld [vmem:[#allocation93_spill] sm:$0xff] }
 0x4e2   :  { %v5937_v58 = vpop.f32.mrf.mxu2  ;;  %v6098_v18 = vpop.f32.mrf.mxu3  ;;  %v7158_v30 = vand.u32 4294901760, %v7157_v57  ;;  %v5312_v57 = vld [vmem:[#allocation7 + $0x148] sm:$0xff]  ;;  %v5649_v61 = vadd.f32 %v13421_v44, %v5561_v62  ;;  %v5436_v44 = vadd.f32 %v13315_v22, %v13294_v47 }
 0x4e3   :  { %v5938_v12 = vadd.f32 %v5937_v58, %v13347_v63  ;;  %v5314_v63 = vld [vmem:[#allocation7 + $0x158] sm:$0xff]  ;;  %7034 = vmatpush.msrb.mxu2 %v13522_v37  ;;  %v13535_v58 = vsub.f32 %v5316_v17, %v13522_v37  ;;  %7349 = vmatpush.msra.mxu1 %v13522_v37  ;;  %v7164_v9 = vand.u32 4294901760, %v7163_v3  ;;  %v13549_v11 = vand.u32 4294901760, %v5312_v57 }
 0x4e4   :  { %v13537_v28 = vand.u32 4294901760, %v5314_v63  ;;  %7159 = vmatpush.msrb.mxu3 %v7158_v30  ;;  %v5308_v30 = vld [vmem:[#allocation7 + $0x128] sm:$0xff]  ;;  %v5729_v47 = vadd.f32 %v13380_v16, %v5649_v61  ;;  %v5565_v16 = vadd.f32 %v13292_v7, %v5436_v44  ;;  %v15779_v61 = vld [vmem:[#allocation91_spill] sm:$0xff] }
 0x4e5   :  { %v13526_v41 = vadd.f32 %v6094_v24, %v5938_v12  ;;  %v5823_v48 = vpop.f32.mrf.mxu0  ;;  %v15776_v12 = vld [vmem:[#allocation94_spill] sm:$0xff]  ;;  %v15188_v17 = vand.u32 4294901760, %v13535_v58  ;;  %7270 = vmatpush.msra.mxu0 %v13535_v58 }
 0x4e6   :  { %v13528_v46 = vpop.f32.mrf.mxu1  ;;  %v5824_v24 = vadd.f32 %v5823_v48, %v5723_v54  ;;  %v13547_v6 = vsub.f32 %v5314_v63, %v13537_v28  ;;  %7036 = vmatpush.msrb.mxu2 %v13537_v28  ;;  %v5310_v54 = vld [vmem:[#allocation7 + $0x138] sm:$0xff]  ;;  %7351 = vmatpush.msra.mxu1 %v13537_v28 }
 0x4e7   :  { %6738 = vmatmul.f32.gmra.mxu2 %v15775_v35  ;;  %v7169_v3 = vsub.f32 %v13535_v58, %v15188_v17  ;;  %v13562_v35 = vsub.f32 %v5312_v57, %v13549_v11  ;;  %7165 = vmatpush.msrb.mxu3 %v7164_v9  ;;  %v5306_v9 = vld [vmem:[#allocation7 + $0x118] sm:$0xff] }
 0x4e8   :  { %6819 = vmatmul.f32.gmra.mxu3 %v15776_v12  ;;  %v13553_v36 = vadd.f32 %v5888_v45, %v5824_v24  ;;  %v15189_v63 = vand.u32 4294901760, %v13547_v6  ;;  %v13564_v12 = vand.u32 4294901760, %v5310_v54  ;;  %7038 = vmatpush.msrb.mxu2 %v13549_v11  ;;  %v13591_v27 = vand.u32 4294901760, %v5306_v9 }
 0x4e9   :  { %6534 = vmatmul.f32.gmra.mxu0 %v15777_v31  ;;  %6675 = vmatmul.f32.gmra.mxu1 %v15778_v50  ;;  %v7170_v62 = vand.u32 4294901760, %v7169_v3  ;;  %v15194_v57 = vand.u32 4294901760, %v13562_v35  ;;  %v15781_v50 = vld [vmem:[#allocation104_spill] sm:$0xff] }
 0x4ea   :  { %v5945_v48 = vpop.f32.mrf.mxu2  ;;  %v13555_v31 = vpop.f32.mrf.mxu3  ;;  %v7175_v24 = vsub.f32 %v13547_v6, %v15189_v63  ;;  %v13577_v17 = vsub.f32 %v5310_v54, %v13564_v12  ;;  %7353 = vmatpush.msra.mxu1 %v13549_v11  ;;  %7273 = vmatpush.msra.mxu0 %v13547_v6  ;;  %v13606_v7 = vsub.f32 %v5306_v9, %v13591_v27 }
 0x4eb   :  { %v5946_v45 = vadd.f32 %v5945_v48, %v13388_v60  ;;  %7040 = vmatpush.msrb.mxu2 %v13564_v12  ;;  %v13585_v60 = vand.u32 4294901760, %v5308_v30  ;;  %7171 = vmatpush.msrb.mxu3 %v7170_v62  ;;  %v7181_v54 = vsub.f32 %v13562_v35, %v15194_v57  ;;  %v15782_v57 = vld [vmem:[#allocation99_spill] sm:$0xff] }
 0x4ec   :  { %v7176_v63 = vand.u32 4294901760, %v7175_v24  ;;  %7355 = vmatpush.msra.mxu1 %v13564_v12  ;;  %v5304_v24 = vld [vmem:[#allocation7 + $0x108] sm:$0xff]  ;;  %v15783_v23 = vand.u32 4294901760, %v13577_v17  ;;  %7276 = vmatpush.msra.mxu0 %v13562_v35 }
 0x4ed   :  { %v13582_v22 = vadd.f32 %v6098_v18, %v5946_v45  ;;  %v5827_v48 = vpop.f32.mrf.mxu0  ;;  %v15780_v45 = vld [vmem:[#allocation101_spill] sm:$0xff]  ;;  %v13598_v62 = vsub.f32 %v5308_v30, %v13585_v60  ;;  %v7182_v1 = vand.u32 4294901760, %v7181_v54  ;;  %v13608_v44 = vand.u32 4294901760, %v5304_v24  ;;  %7042 = vmatpush.msrb.mxu2 %v13585_v60 }
 0x4ee   :  { %v5896_v3 = vpop.f32.mrf.mxu1  ;;  %v5828_v18 = vadd.f32 %v5827_v48, %v5729_v47  ;;  %v7187_v56 = vsub.f32 %v13577_v17, %v15783_v23  ;;  %v5654_v47 = vadd.f32 %v13471_v59, %v5565_v16  ;;  %7177 = vmatpush.msrb.mxu3 %v7176_v63  ;;  %v15197_v23 = vand.u32 4294901760, %v13606_v7  ;;  %7357 = vmatpush.msra.mxu1 %v13585_v60 }
 0x4ef   :  { %6743 = vmatmul.f32.gmra.mxu2 %v15779_v61  ;;  %v13618_v9 = vsub.f32 %v5304_v24, %v13608_v44  ;;  %7279 = vmatpush.msra.mxu0 %v13577_v17 }
 0x4f0   :  { %6825 = vmatmul.f32.gmra.mxu3 %v15780_v45  ;;  %v13612_v30 = vadd.f32 %v13528_v46, %v5828_v18  ;;  %v7188_v61 = vand.u32 4294901760, %v7187_v56  ;;  %7044 = vmatpush.msrb.mxu2 %v13591_v27  ;;  %v7199_v56 = vsub.f32 %v13606_v7, %v15197_v23  ;;  %v5735_v16 = vadd.f32 %v13432_v15, %v5654_v47  ;;  %v15785_v15 = vld [vmem:[#allocation102_spill] sm:$0xff] }
 0x4f1   :  { %6542 = vmatmul.f32.gmra.mxu0 %v15781_v50  ;;  %6679 = vmatmul.f32.gmra.mxu1 %v15782_v57  ;;  %v7192_v50 = vand.u32 4294901760, %v13598_v62  ;;  %v15198_v63 = vand.u32 4294901760, %v13618_v9 }
 0x4f2   :  { %v5953_v48 = vpop.f32.mrf.mxu2  ;;  %v6106_v54 = vpop.f32.mrf.mxu3  ;;  %7183 = vmatpush.msrb.mxu3 %v7182_v1  ;;  %7359 = vmatpush.msra.mxu1 %v13591_v27  ;;  %v7200_v47 = vand.u32 4294901760, %v7199_v56  ;;  %v15789_v56 = vand.u32 4294901760, %v13395_v49 }
 0x4f3   :  { %v5954_v59 = vadd.f32 %v5953_v48, %v13429_v5  ;;  %v7193_v46 = vsub.f32 %v13598_v62, %v7192_v50  ;;  %7046 = vmatpush.msrb.mxu2 %v13608_v44  ;;  %v7205_v24 = vsub.f32 %v13618_v9, %v15198_v63  ;;  %v15784_v48 = vand.u32 4294901760, %v13354_v40  ;;  %7282 = vmatpush.msra.mxu0 %v13598_v62  ;;  %v15810_v62 = vld [vmem:[#allocation53_spill] sm:$0xff] }
 0x4f4   :  { %7189 = vmatpush.msrb.mxu3 %v7188_v61  ;;  %7361 = vmatpush.msra.mxu1 %v13608_v44  ;;  %v15787_v61 = vld [vmem:[#allocation107_spill] sm:$0xff]  ;;  %v15788_v63 = vand.u32 4294901760, %v13378_v8 }
 0x4f5   :  { %v13635_v1 = vadd.f32 %v13555_v31, %v5954_v59  ;;  %v7194_v5 = vand.u32 4294901760, %v7193_v46  ;;  %v5831_v18 = vpop.f32.mrf.mxu0  ;;  %7414 = vmatpush.msra.mxu2 %v15784_v48  ;;  %v15786_v31 = vld [vmem:[#allocation58_spill] sm:$0xff]  ;;  %v7206_v59 = vand.u32 4294901760, %v7205_v24  ;;  %7285 = vmatpush.msra.mxu0 %v13606_v7 }
 0x4f6   :  { %v6250_v45 = vpop.f32.mrf.mxu1  ;;  %v5832_v23 = vadd.f32 %v5831_v18, %v5735_v16 }
 0x4f7   :  { %6748 = vmatmul.f32.gmra.mxu2 %v15785_v15  ;;  %7195 = vmatpush.msrb.mxu3 %v7194_v5  ;;  %v15792_v5 = vld [vmem:[#allocation90_spill] sm:$0xff] }
 0x4f8   :  { %6831 = vmatmul.f32.gmra.mxu3 %v15786_v31  ;;  %v13648_v46 = vadd.f32 %v5896_v3, %v5832_v23  ;;  %7418 = vmatpush.msra.mxu2 %v15788_v63  ;;  %v15790_v3 = vand.u32 4294901760, %v13419_v26  ;;  %v15793_v26 = vand.u32 4294901760, %v13436_v25  ;;  %v15796_v31 = vld [vmem:[#allocation87_spill] sm:$0xff] }
 0x4f9   :  { %6550 = vmatmul.f32.gmra.mxu0 %v15787_v61  ;;  %6983 = vmatmul.f32.vlgmr.msrb.gmra.mxu1 %v12383_v13 }
 0x4fa   :  { %v5961_v40 = vpop.f32.mrf.mxu2  ;;  %v6110_v48 = vpop.f32.mrf.mxu3  ;;  %7201 = vmatpush.msrb.mxu3 %v7200_v47  ;;  %7422 = vmatpush.msra.mxu2 %v15789_v56  ;;  %v15797_v47 = vld [vmem:[#allocation95_spill] sm:$0xff] }
 0x4fb   :  { %v5962_v16 = vadd.f32 %v5961_v40, %v13468_v52  ;;  %7288 = vmatpush.msra.mxu0 %v13618_v9  ;;  %v15791_v52 = vld [vmem:[#allocation84_spill] sm:$0xff] }
 0x4fc   :  { %7207 = vmatpush.msrb.mxu3 %v7206_v59  ;;  %7426 = vmatpush.msra.mxu2 %v15790_v3  ;;  %v15801_v40 = vld [vmem:[#allocation96_spill] sm:$0xff] }
 0x4fd   :  { %v6107_v18 = vadd.f32 %v6106_v54, %v5962_v16  ;;  %v6176_v23 = vpop.f32.mrf.mxu0 }
 0x4fe   :  { %v6256_v8 = vpop.f32.mrf.mxu1  ;;  %7509 = vmatpush.msra.mxu3 %v13344_v43  ;;  %v6177_v63 = vadd.f32 %v6176_v23, %v13526_v41  ;;  %7430 = vmatpush.msra.mxu2 %v15793_v26  ;;  %v15794_v41 = vand.u32 4294901760, %v13460_v2  ;;  %v15807_v23 = vld [vmem:[#allocation52_spill] sm:$0xff] }
 0x4ff   :  { %6753 = vmatmul.f32.gmra.mxu2 %v15791_v52 }
 0x500   :  { %6837 = vmatmul.f32.gmra.mxu3 %v15792_v5  ;;  %v13666_v49 = vadd.f32 %v6250_v45, %v6177_v63  ;;  %7434 = vmatpush.msra.mxu2 %v15794_v41 }
 0x501   :  { %6918 = vmatmul.f32.vlgmr.msrb.gmra.mxu0 %v12383_v13  ;;  %6987 = vmatmul.f32.gmra.mxu1 %v15752_v20  ;;  %v15795_v13 = vand.u32 4294901760, %v13475_v38 }
 0x502   :  { %7511 = vmatpush.msra.mxu3 %v13362_v42  ;;  %v5969_v43 = vpop.f32.mrf.mxu2  ;;  %v6114_v54 = vpop.f32.mrf.mxu3 }
 0x503   :  { %v5970_v24 = vadd.f32 %v5969_v43, %v13506_v19  ;;  %7438 = vmatpush.msra.mxu2 %v15795_v13  ;;  %v15813_v43 = vld [vmem:[#allocation106_spill] sm:$0xff] }
 0x504   :  { %7513 = vmatpush.msra.mxu3 %v13384_v4 }
 0x505   :  { %v6111_v15 = vadd.f32 %v6110_v48, %v5970_v24  ;;  %v6181_v45 = vpop.f32.mrf.mxu0  ;;  %v15802_v48 = vld [vmem:[#allocation49_spill] sm:$0xff] }
 0x506   :  { %7515 = vmatpush.msra.mxu3 %v13405_v34  ;;  %v6262_v42 = vpop.f32.mrf.mxu1  ;;  %v6182_v25 = vadd.f32 %v6181_v45, %v13582_v22  ;;  %v15798_v34 = vand.u32 4294901760, %v13498_v55  ;;  %v15799_v22 = vand.u32 4294901760, %v13511_v33  ;;  %v15815_v45 = vld [vmem:[#allocation68_spill] sm:$0xff] }
 0x507   :  { %6758 = vmatmul.f32.gmra.mxu2 %v15796_v31 }
 0x508   :  { %6843 = vmatmul.f32.gmra.mxu3 %v15797_v47  ;;  %v13683_v4 = vadd.f32 %v6256_v8, %v6182_v25  ;;  %7442 = vmatpush.msra.mxu2 %v15798_v34  ;;  %v7636_v34 = vld [vmem:[#allocation8 + $0x78] sm:$0xff] }
 0x509   :  { %6922 = vmatmul.f32.gmra.mxu0 %v15752_v20  ;;  %6991 = vmatmul.f32.gmra.mxu1 %v15761_v14  ;;  %v15800_v20 = vand.u32 4294901760, %v13535_v58 }
 0x50a   :  { %7517 = vmatpush.msra.mxu3 %v13425_v39  ;;  %v5977_v2 = vpop.f32.mrf.mxu2  ;;  %v6118_v38 = vpop.f32.mrf.mxu3  ;;  %7446 = vmatpush.msra.mxu2 %v15799_v22 }
 0x50b   :  { %v5978_v19 = vadd.f32 %v5977_v2, %v13553_v36  ;;  %v13756_v2 = vand.u32 4294901760, %v7636_v34 }
 0x50c   :  { %7519 = vmatpush.msra.mxu3 %v13446_v21  ;;  %7450 = vmatpush.msra.mxu2 %v15800_v20 }
 0x50d   :  { %v6115_v61 = vadd.f32 %v6114_v54, %v5978_v19  ;;  %v6186_v59 = vpop.f32.mrf.mxu0  ;;  %v13761_v22 = vsub.f32 %v7636_v34, %v13756_v2  ;;  %7658 = vmatpush.msrb.mxu0 %v13756_v2 }
 0x50e   :  { %7521 = vmatpush.msra.mxu3 %v13464_v32  ;;  %v6268_v39 = vpop.f32.mrf.mxu1  ;;  %v6187_v55 = vadd.f32 %v6186_v59, %v13635_v1  ;;  %v15803_v32 = vand.u32 4294901760, %v13547_v6  ;;  %v15804_v1 = vand.u32 4294901760, %v13562_v35  ;;  %v15806_v6 = vld [vmem:[#allocation103_spill] sm:$0xff] }
 0x50f   :  { %6763 = vmatmul.f32.gmra.mxu2 %v15801_v40  ;;  %v15817_v40 = vld [vmem:[#allocation61_spill] sm:$0xff] }
 0x510   :  { %6849 = vmatmul.f32.gmra.mxu3 %v15802_v48  ;;  %v13700_v21 = vadd.f32 %v6262_v42, %v6187_v55  ;;  %7454 = vmatpush.msra.mxu2 %v15803_v32  ;;  %v15816_v42 = vld [vmem:[#allocation59_spill] sm:$0xff]  ;;  %v15818_v48 = vld [vmem:[#allocation62_spill] sm:$0xff] }
 0x511   :  { %6926 = vmatmul.f32.gmra.mxu0 %v15761_v14  ;;  %6995 = vmatmul.f32.gmra.mxu1 %v15766_v0  ;;  %v15805_v14 = vand.u32 4294901760, %v13577_v17  ;;  %v15819_v32 = vld [vmem:[#allocation54_spill] sm:$0xff] }
 0x512   :  { %7523 = vmatpush.msra.mxu3 %v13485_v10  ;;  %v5985_v33 = vpop.f32.mrf.mxu2  ;;  %v6122_v58 = vpop.f32.mrf.mxu3  ;;  %7458 = vmatpush.msra.mxu2 %v15804_v1 }
 0x513   :  { %v5986_v36 = vadd.f32 %v5985_v33, %v13612_v30  ;;  %v15808_v30 = vand.u32 4294901760, %v13606_v7 }
 0x514   :  { %7525 = vmatpush.msra.mxu3 %v13502_v53  ;;  %7462 = vmatpush.msra.mxu2 %v15805_v14 }
 0x515   :  { %v6119_v16 = vadd.f32 %v6118_v38, %v5986_v36  ;;  %v6191_v56 = vpop.f32.mrf.mxu0  ;;  %v7635_v38 = vld [vmem:[#allocation8 + $0x70] sm:$0xff]  ;;  %v7633_v36 = vld [vmem:[#allocation8 + $0x60] sm:$0xff] }
 0x516   :  { %7527 = vmatpush.msra.mxu3 %v13522_v37  ;;  %v6274_v10 = vpop.f32.mrf.mxu1  ;;  %v6192_v3 = vadd.f32 %v6191_v56, %v6107_v18  ;;  %7466 = vmatpush.msra.mxu2 %v7192_v50  ;;  %v15811_v50 = vld [vmem:[#allocation86_spill] sm:$0xff]  ;;  %v13784_v14 = vand.u32 4294901760, %v7633_v36 }
 0x517   :  { %6768 = vmatmul.f32.gmra.mxu2 %v15806_v6  ;;  %v7632_v6 = vld [vmem:[#allocation8 + $0x58] sm:$0xff] }
 0x518   :  { %7209 = vmatmul.f32.vlgmr.msrb.gmra.mxu3 %v15807_v23  ;;  %v13716_v53 = vadd.f32 %v6268_v39, %v6192_v3  ;;  %7470 = vmatpush.msra.mxu2 %v15808_v30  ;;  %v7634_v39 = vld [vmem:[#allocation8 + $0x68] sm:$0xff]  ;;  %v13797_v30 = vand.u32 4294901760, %v7632_v6 }
 0x519   :  { %6930 = vmatmul.f32.gmra.mxu0 %v15766_v0  ;;  %6999 = vmatmul.f32.gmra.mxu1 %v15770_v29  ;;  %v15809_v0 = vand.u32 4294901760, %v13618_v9 }
 0x51a   :  { %7529 = vmatpush.msra.mxu3 %v13537_v28  ;;  %v5993_v37 = vpop.f32.mrf.mxu2  ;;  %v6426_v17 = vpop.f32.mrf.mxu3 }
 0x51b   :  { %v5994_v35 = vadd.f32 %v5993_v37, %v13648_v46  ;;  %7474 = vmatpush.msra.mxu2 %v15809_v0 }
 0x51c   :  { %7531 = vmatpush.msra.mxu3 %v13549_v11 }
 0x51d   :  { %v6123_v18 = vadd.f32 %v6122_v58, %v5994_v35  ;;  %v6196_v8 = vpop.f32.mrf.mxu0  ;;  %v13777_v58 = vand.u32 4294901760, %v7634_v39  ;;  %v13795_v35 = vsub.f32 %v7633_v36, %v13784_v14 }
 0x51e   :  { %7533 = vmatpush.msra.mxu3 %v13564_v12  ;;  %v6280_v28 = vpop.f32.mrf.mxu1  ;;  %v6197_v63 = vadd.f32 %v6196_v8, %v6111_v15  ;;  %v7631_v8 = vld [vmem:[#allocation8 + $0x50] sm:$0xff] }
 0x51f   :  { %7052 = vmatmul.f32.vlgmr.msrb.gmra.mxu2 %v15810_v62  ;;  %v13790_v3 = vsub.f32 %v7634_v39, %v13777_v58  ;;  %v13812_v62 = vand.u32 4294901760, %v7631_v8  ;;  %v7628_v39 = vld [vmem:[#allocation8 + $0x38] sm:$0xff] }
 0x520   :  { %7213 = vmatmul.f32.gmra.mxu3 %v12889_v51  ;;  %v13732_v11 = vadd.f32 %v6274_v10, %v6197_v63  ;;  %7885 = vmatpush.msrb.mxu2 %v13761_v22  ;;  %v13810_v63 = vsub.f32 %v7632_v6, %v13797_v30  ;;  %v7627_v6 = vld [vmem:[#allocation8 + $0x30] sm:$0xff] }
 0x521   :  { %6934 = vmatmul.f32.gmra.mxu0 %v15770_v29  ;;  %7003 = vmatmul.f32.gmra.mxu1 %v15811_v50  ;;  %v15812_v29 = vld [vmem:[#allocation56_spill] sm:$0xff]  ;;  %v15206_v0 = vand.u32 4294901760, %v13790_v3 }
 0x522   :  { %7535 = vmatpush.msra.mxu3 %v13585_v60  ;;  %v6361_v7 = vpop.f32.mrf.mxu2  ;;  %v6430_v12 = vpop.f32.mrf.mxu3  ;;  %v15814_v60 = vld [vmem:[#allocation93_spill] sm:$0xff] }
 0x523   :  { %v6362_v9 = vadd.f32 %v6361_v7, %v13666_v49 }
 0x524   :  { %7537 = vmatpush.msra.mxu3 %v13591_v27 }
 0x525   :  { %v13737_v46 = vadd.f32 %v6426_v17, %v6362_v9  ;;  %v6201_v52 = vpop.f32.mrf.mxu0  ;;  %v7769_v9 = vsub.f32 %v13790_v3, %v15206_v0  ;;  %v15834_v0 = vld [vmem:[#allocation71_spill] sm:$0xff] }
 0x526   :  { %7539 = vmatpush.msra.mxu3 %v13608_v44  ;;  %v6286_v5 = vpop.f32.mrf.mxu1  ;;  %v6202_v26 = vadd.f32 %v6201_v52, %v6115_v61  ;;  %v13763_v61 = vand.u32 4294901760, %v7635_v38  ;;  %v7630_v52 = vld [vmem:[#allocation8 + $0x48] sm:$0xff] }
 0x527   :  { %7060 = vmatmul.f32.gmra.mxu2 %v15812_v29  ;;  %vm7573_vm1 = vcmp.gt.f32.partialorder %v13737_v46, 0.0 }
 0x528   :  { %7217 = vmatmul.f32.gmra.mxu3 %v15813_v43  ;;  %v13744_v54 = vadd.f32 %v6280_v28, %v6202_v26  ;;  %v13775_v33 = vsub.f32 %v7635_v38, %v13763_v61  ;;  %7660 = vmatpush.msrb.mxu0 %v13763_v61  ;;  %v15204_v28 = vand.u32 4294901760, %v13795_v35  ;;  %v15821_v26 = vld [vmem:[#allocation73_spill] sm:$0xff] }
 0x529   :  { %6938 = vmatmul.f32.gmra.mxu0 %v15811_v50  ;;  %7007 = vmatmul.f32.gmra.mxu1 %v15814_v60 }
 0x52a   :  { %v6365_v49 = vpop.f32.mrf.mxu2  ;;  %7973 = vmatpush.msrb.mxu3 %v13756_v2  ;;  %v15207_v10 = vand.u32 4294901760, %v13775_v33  ;;  %7662 = vmatpush.msrb.mxu0 %v13777_v58  ;;  %v7775_v29 = vsub.f32 %v13795_v35, %v15204_v28  ;;  %v7622_v28 = vld [vmem:[#allocation8 + $0x8] sm:$0xff] }
 0x52b   :  { %v6434_v24 = vpop.f32.mrf.mxu3  ;;  %v6366_v27 = vadd.f32 %v6365_v49, %v13683_v4  ;;  %7888 = vmatpush.msrb.mxu2 %v13775_v33  ;;  %v15823_v49 = vld [vmem:[#allocation66_spill] sm:$0xff] }
 0x52c   :  { %7975 = vmatpush.msrb.mxu3 %v13763_v61  ;;  %7664 = vmatpush.msrb.mxu0 %v13784_v14 }
 0x52d   :  { %v13747_v41 = vadd.f32 %v6430_v12, %v6366_v27  ;;  %v6206_v44 = vpop.f32.mrf.mxu0  ;;  %7891 = vmatpush.msrb.mxu2 %v13790_v3  ;;  %v15202_v27 = vand.u32 4294901760, %v13810_v63 }
 0x52e   :  { %v6292_v15 = vpop.f32.mrf.mxu1  ;;  %v6207_v13 = vadd.f32 %v6206_v44, %v6119_v16  ;;  %7977 = vmatpush.msrb.mxu3 %v13777_v58  ;;  %v13833_v44 = vsub.f32 %v7631_v8, %v13812_v62  ;;  %7666 = vmatpush.msrb.mxu0 %v13797_v30 }
 0x52f   :  { %7068 = vmatmul.f32.gmra.mxu2 %v15815_v45  ;;  %v7776_v45 = vand.u32 4294901760, %v7775_v29  ;;  %vm7575_vm2 = vcmp.gt.f32.partialorder %v13747_v41, 0.0 }
 0x530   :  { %7221 = vmatmul.f32.gmra.mxu3 %v15816_v42  ;;  %v13753_v25 = vadd.f32 %v6286_v5, %v6207_v13  ;;  %v15820_v5 = vld [vmem:[#allocation67_spill] sm:$0xff]  ;;  %v15201_v38 = vand.u32 4294901760, %v13833_v44  ;;  %7894 = vmatpush.msrb.mxu2 %v13795_v35 }
 0x531   :  { %6942 = vmatmul.f32.gmra.mxu0 %v15814_v60  ;;  %7011 = vmatmul.f32.gmra.mxu1 %v15782_v57  ;;  %v15822_v60 = vld [vmem:[#allocation69_spill] sm:$0xff]  ;;  %v7629_v13 = vld [vmem:[#allocation8 + $0x40] sm:$0xff] }
 0x532   :  { %v6369_v31 = vpop.f32.mrf.mxu2  ;;  %7979 = vmatpush.msrb.mxu3 %v13784_v14  ;;  %7668 = vmatpush.msrb.mxu0 %v13812_v62 }
 0x533   :  { %v6438_v47 = vpop.f32.mrf.mxu3  ;;  %v6370_v4 = vadd.f32 %v6369_v31, %v13700_v21  ;;  %v15208_v21 = vand.u32 4294901760, %v13761_v22  ;;  %v13837_v31 = vand.u32 4294901760, %v7629_v13  ;;  %7897 = vmatpush.msrb.mxu2 %v13810_v63 }
 0x534   :  { %7981 = vmatpush.msrb.mxu3 %v13797_v30 }
 0x535   :  { %v13758_v19 = vadd.f32 %v6434_v24, %v6370_v4  ;;  %v6211_v20 = vpop.f32.mrf.mxu0  ;;  %v7757_v1 = vsub.f32 %v13761_v22, %v15208_v21  ;;  %v7770_v24 = vand.u32 4294901760, %v7769_v9  ;;  %v7781_v4 = vsub.f32 %v13810_v63, %v15202_v27  ;;  %7900 = vmatpush.msrb.mxu2 %v13833_v44  ;;  %v7623_v27 = vld [vmem:[#allocation8 + $0x10] sm:$0xff] }
 0x536   :  { %v13767_v59 = vpop.f32.mrf.mxu1  ;;  %v6212_v55 = vadd.f32 %v6211_v20, %v6123_v18  ;;  %v7763_v18 = vsub.f32 %v13775_v33, %v15207_v10  ;;  %7983 = vmatpush.msrb.mxu3 %v13812_v62  ;;  %v13940_v21 = vand.u32 4294901760, %v7622_v28 }
 0x537   :  { %7076 = vmatmul.f32.gmra.mxu2 %v15817_v40  ;;  %v7758_v17 = vand.u32 4294901760, %v7757_v1  ;;  %v13851_v40 = vsub.f32 %v7629_v13, %v13837_v31  ;;  %v7782_v36 = vand.u32 4294901760, %v7781_v4  ;;  %v7787_v1 = vsub.f32 %v13833_v44, %v15201_v38  ;;  %v7625_v4 = vld [vmem:[#allocation8 + $0x20] sm:$0xff] }
 0x538   :  { %7225 = vmatmul.f32.gmra.mxu3 %v15818_v48  ;;  %v13782_v16 = vadd.f32 %v6292_v15, %v6212_v55  ;;  %v7764_v12 = vand.u32 4294901760, %v7763_v18  ;;  %v13835_v15 = vand.u32 4294901760, %v7630_v52  ;;  %v13868_v18 = vand.u32 4294901760, %v7627_v6  ;;  %15835 = vst [vmem:[#allocation40_spill] sm:$0xff] %v13940_v21 }
 0x539   :  { %6946 = vmatmul.f32.gmra.mxu0 %v15782_v57  ;;  %7365 = vmatmul.f32.vlgmr.msra.gmra.mxu1 %v15819_v32  ;;  %v13853_v32 = vand.u32 4294901760, %v7628_v39  ;;  %v7788_v29 = vand.u32 4294901760, %v7787_v1  ;;  %vm7577_vm3 = vcmp.gt.f32.partialorder %v13758_v19, 0.0 }
 0x53a   :  { %v6373_v57 = vpop.f32.mrf.mxu2  ;;  %7759 = vmatpush.msrb.mxu1 %v7758_v17  ;;  %v13845_v20 = vsub.f32 %v7630_v52, %v13835_v15  ;;  %7670 = vmatpush.msrb.mxu0 %v13835_v15  ;;  %v15825_v52 = vld [vmem:[#allocation15_spill] sm:$0xff] }
 0x53b   :  { %v6442_v56 = vpop.f32.mrf.mxu3  ;;  %v6374_v37 = vadd.f32 %v6373_v57, %v13716_v53  ;;  %v13866_v17 = vsub.f32 %v7628_v39, %v13853_v32  ;;  %7985 = vmatpush.msrb.mxu3 %v13835_v15 }
 0x53c   :  { %7765 = vmatpush.msrb.mxu1 %v7764_v12  ;;  %v15200_v57 = vand.u32 4294901760, %v13845_v20  ;;  %7672 = vmatpush.msrb.mxu0 %v13837_v31 }
 0x53d   :  { %v13806_v53 = vadd.f32 %v6438_v47, %v6374_v37  ;;  %v13815_v50 = vpop.f32.mrf.mxu0  ;;  %v15199_v37 = vand.u32 4294901760, %v13851_v40  ;;  %v15203_v13 = vand.u32 4294901760, %v13866_v17  ;;  %7987 = vmatpush.msrb.mxu3 %v13837_v31  ;;  %7903 = vmatpush.msrb.mxu2 %v13845_v20 }
 0x53e   :  { %v13817_v7 = vpop.f32.mrf.mxu1  ;;  %7771 = vmatpush.msrb.mxu1 %v7770_v24  ;;  %v7793_v9 = vsub.f32 %v13845_v20, %v15200_v57  ;;  %7674 = vmatpush.msrb.mxu0 %v13853_v32 }
 0x53f   :  { %7084 = vmatmul.f32.gmra.mxu2 %v15820_v5  ;;  %v15826_v5 = vld [vmem:[#allocation75_spill] sm:$0xff]  ;;  %v7799_v24 = vsub.f32 %v13851_v40, %v15199_v37  ;;  %v7624_v37 = vld [vmem:[#allocation8 + $0x18] sm:$0xff]  ;;  %7989 = vmatpush.msrb.mxu3 %v13853_v32  ;;  %vm7579_vm4 = vcmp.gt.f32.partialorder %v13806_v53, 0.0 }
 0x540   :  { %7229 = vmatmul.f32.gmra.mxu3 %v15821_v26  ;;  %7777 = vmatpush.msrb.mxu1 %v7776_v45  ;;  %v13889_v45 = vsub.f32 %v7627_v6, %v13868_v18  ;;  %v7794_v39 = vand.u32 4294901760, %v7793_v9  ;;  %v13910_v57 = vand.u32 4294901760, %v7624_v37 }
 0x541   :  { %7291 = vmatmul.f32.vlgmr.msra.gmra.mxu0 %v15822_v60  ;;  %7371 = vmatmul.f32.gmra.mxu1 %v15823_v49  ;;  %v15827_v60 = vld [vmem:[#allocation108_spill] sm:$0xff]  ;;  %v15828_v49 = vld [vmem:[#allocation55_spill] sm:$0xff] }
 0x542   :  { %v6377_v47 = vpop.f32.mrf.mxu2  ;;  %7783 = vmatpush.msrb.mxu1 %v7782_v36  ;;  %v7805_v36 = vsub.f32 %v13866_v17, %v15203_v13  ;;  %15829 = vst [vmem:[#allocation18_spill] sm:$0xff] %v13910_v57  ;;  %7906 = vmatpush.msrb.mxu2 %v13851_v40 }
 0x543   :  { %v6446_v34 = vpop.f32.mrf.mxu3  ;;  %v6378_v55 = vadd.f32 %v6377_v47, %v13732_v11  ;;  %7676 = vmatpush.msrb.mxu0 %v13868_v18  ;;  %7991 = vmatpush.msrb.mxu3 %v13868_v18 }
 0x544   :  { %7789 = vmatpush.msrb.mxu1 %v7788_v29  ;;  %7909 = vmatpush.msrb.mxu2 %v13866_v17 }
 0x545   :  { %v13862_v11 = vadd.f32 %v6442_v56, %v6378_v55  ;;  %v13871_v8 = vpop.f32.mrf.mxu0  ;;  %v7626_v56 = vld [vmem:[#allocation8 + $0x28] sm:$0xff]  ;;  %v13894_v55 = vand.u32 4294901760, %v7625_v4 }
 0x546   :  { %v13873_v12 = vpop.f32.mrf.mxu1  ;;  %v13891_v47 = vand.u32 4294901760, %v7626_v56  ;;  %7795 = vmatpush.msrb.mxu1 %v7794_v39  ;;  %v15832_v39 = vld [vmem:[#allocation28_spill] sm:$0xff]  ;;  %7912 = vmatpush.msrb.mxu2 %v13889_v45 }
 0x547   :  { %15824 = vst [vmem:[#allocation34_spill] sm:$0xff] %v13862_v11  ;;  %7092 = vmatmul.f32.gmra.mxu2 %v15825_v52  ;;  %v13907_v9 = vsub.f32 %v7625_v4, %v13894_v55  ;;  %v13921_v4 = vsub.f32 %v7624_v37, %v13910_v57 }
 0x548   :  { %7233 = vmatmul.f32.gmra.mxu3 %v15826_v5  ;;  %7678 = vmatpush.msrb.mxu0 %v13891_v47 }
 0x549   :  { %7296 = vmatmul.f32.gmra.mxu0 %v15827_v60  ;;  %7377 = vmatmul.f32.gmra.mxu1 %v15828_v49  ;;  %v15205_v60 = vand.u32 4294901760, %v13889_v45  ;;  %v13898_v49 = vsub.f32 %v7626_v56, %v13891_v47  ;;  %v7800_v56 = vand.u32 4294901760, %v7799_v24  ;;  %v13924_v24 = vand.u32 4294901760, %v7623_v27 }
 0x54a   :  { %v6381_v1 = vpop.f32.mrf.mxu2  ;;  %v15211_v37 = vand.u32 4294901760, %v13907_v9  ;;  %7993 = vmatpush.msrb.mxu3 %v13891_v47  ;;  %7680 = vmatpush.msrb.mxu0 %v13894_v55 }
 0x54b   :  { %v6450_v52 = vpop.f32.mrf.mxu3  ;;  %v6382_v6 = vadd.f32 %v6381_v1, %v13744_v54  ;;  %v15210_v38 = vand.u32 4294901760, %v13898_v49  ;;  %v7811_v29 = vsub.f32 %v13889_v45, %v15205_v60  ;;  %v15833_v60 = vld [vmem:[#allocation60_spill] sm:$0xff]  ;;  %7801 = vmatpush.msrb.mxu1 %v7800_v56  ;;  %7915 = vmatpush.msrb.mxu2 %v13898_v49 }
 0x54c   :  { %v7823_v56 = vsub.f32 %v13907_v9, %v15211_v37  ;;  %7995 = vmatpush.msrb.mxu3 %v13894_v55  ;;  %7682 = vmatpush.msrb.mxu0 %v13910_v57 }
 0x54d   :  { %v13915_v54 = vadd.f32 %v6446_v34, %v6382_v6  ;;  %v15831_v34 = vld [vmem:[#allocation26_spill] sm:$0xff]  ;;  %v7806_v6 = vand.u32 4294901760, %v7805_v36  ;;  %v7817_v10 = vsub.f32 %v13898_v49, %v15210_v38  ;;  %v7812_v5 = vand.u32 4294901760, %v7811_v29  ;;  %7918 = vmatpush.msrb.mxu2 %v13907_v9 }
 0x54e   :  { %v13926_v1 = vpop.f32.mrf.mxu0  ;;  %v13928_v13 = vpop.f32.mrf.mxu1  ;;  %7997 = vmatpush.msrb.mxu3 %v13910_v57  ;;  %7684 = vmatpush.msrb.mxu0 %v13924_v24 }
 0x54f   :  { %15830 = vst [vmem:[#allocation25_spill] sm:$0xff] %v13915_v54  ;;  %7100 = vmatmul.f32.gmra.mxu2 %v15831_v34  ;;  %v7621_v54 = vld [vmem:[#allocation8] sm:$0xff]  ;;  %7807 = vmatpush.msrb.mxu1 %v7806_v6  ;;  %v7818_v29 = vand.u32 4294901760, %v7817_v10 }
 0x550   :  { %7237 = vmatmul.f32.gmra.mxu3 %v15832_v39  ;;  %v13944_v39 = vsub.f32 %v7623_v27, %v13924_v24  ;;  %v13947_v36 = vand.u32 4294901760, %v7621_v54  ;;  %v13956_v27 = vsub.f32 %v7622_v28, %v13940_v21  ;;  %7921 = vmatpush.msrb.mxu2 %v13921_v4 }
 0x551   :  { %7301 = vmatmul.f32.gmra.mxu0 %v15833_v60  ;;  %7383 = vmatmul.f32.gmra.mxu1 %v15834_v0 }
 0x552   :  { %15836 = vst [vmem:[#allocation38_spill] sm:$0xff] %v13947_v36  ;;  %v6385_v60 = vpop.f32.mrf.mxu2  ;;  %7813 = vmatpush.msrb.mxu1 %v7812_v5  ;;  %v13968_v37 = vsub.f32 %v7621_v54, %v13947_v36  ;;  %v7824_v5 = vand.u32 4294901760, %v7823_v56  ;;  %v15841_v54 = vld [vmem:[#allocation48_spill] sm:$0xff]  ;;  %v15842_v57 = vand.u32 4294901760, %v13944_v39  ;;  %7999 = vmatpush.msrb.mxu3 %v13924_v24 }
 0x553   :  { %v6454_v0 = vpop.f32.mrf.mxu3  ;;  %v6386_v38 = vadd.f32 %v6385_v60, %v13753_v25  ;;  %v15838_v25 = vand.u32 4294901760, %v13921_v4  ;;  %v8814_v60 = vld [vmem:[%s14827_s10] sm:$0x3]  ;;  %7686 = vmatpush.msrb.mxu0 %v13940_v21  ;;  %7924 = vmatpush.msrb.mxu2 %v13944_v39 }
 0x554   :  { %7819 = vmatpush.msrb.mxu1 %v7818_v29  ;;  %v15843_v29 = vand.u32 4294901760, %v13956_v27  ;;  %8001 = vmatpush.msrb.mxu3 %v13940_v21 }
 0x555   :  { %v13961_v34 = vadd.f32 %v6450_v52, %v6386_v38  ;;  %v7829_v6 = vsub.f32 %v13921_v4, %v15838_v25  ;;  %v15839_v38 = vld [vmem:[#allocation20_spill] sm:$0xff]  ;;  %v15840_v25 = vld [vmem:[#allocation50_spill] sm:$0xff]  ;;  %7688 = vmatpush.msrb.mxu0 %v13947_v36  ;;  %7927 = vmatpush.msrb.mxu2 %v13956_v27 }
 0x556   :  { %v13971_v28 = vpop.f32.mrf.mxu0  ;;  %v13973_v10 = vpop.f32.mrf.mxu1  ;;  %7825 = vmatpush.msrb.mxu1 %v7824_v5  ;;  %8003 = vmatpush.msrb.mxu3 %v13947_v36  ;;  %v15848_v36 = vand.u32 4294901760, %v13761_v22  ;;  %v15850_v22 = vand.u32 4294901760, %v13790_v3 }
 0x557   :  { %15837 = vst [vmem:[#allocation23_spill] sm:$0xff] %v13961_v34  ;;  %7108 = vmatmul.f32.gmra.mxu2 %v15839_v38  ;;  %v13985_v34 = vperm.slane %v8814_v60, 1  ;;  %v7830_v11 = vand.u32 4294901760, %v7829_v6  ;;  %v7835_v38 = vsub.f32 %v13944_v39, %v15842_v57  ;;  %v7841_v6 = vsub.f32 %v13956_v27, %v15843_v29 }
 0x558   :  { %7541 = vmatmul.f32.vlgmr.msra.gmra.mxu3 %v15807_v23  ;;  %7930 = vmatpush.msrb.mxu2 %v13968_v37 }
 0x559   :  { %7306 = vmatmul.f32.gmra.mxu0 %v15840_v25  ;;  %7389 = vmatmul.f32.gmra.mxu1 %v15841_v54  ;;  %v6496_v57 = vadd.f32 %v13815_v50, %v13985_v34  ;;  %v7836_v56 = vand.u32 4294901760, %v7835_v38  ;;  %v7842_v50 = vand.u32 4294901760, %v7841_v6  ;;  %v6504_v6 = vadd.f32 %v13871_v8, %v13985_v34 }
 0x55a   :  { %v6389_v52 = vpop.f32.mrf.mxu2  ;;  %7831 = vmatpush.msrb.mxu1 %v7830_v11  ;;  %v15846_v11 = vld [vmem:[#allocation65_spill] sm:$0xff]  ;;  %8056 = vmatpush.msra.mxu0 %v15848_v36  ;;  %v7589_v36 = vmul.f32 0.01, %v13737_v46 }
 0x55b   :  { %v6808_v25 = vpop.f32.mrf.mxu3  ;;  %v6390_v54 = vadd.f32 %v6389_v52, %v13782_v16  ;;  %v15845_v16 = vand.u32 4294901760, %v13968_v37  ;;  %v6653_v38 = vadd.f32 %v13767_v59, %v6496_v57  ;;  %v6657_v8 = vadd.f32 %v13817_v7, %v6504_v6 }
 0x55c   :  { %7837 = vmatpush.msrb.mxu1 %v7836_v56  ;;  %v7605_v57 = vsel %vm7573_vm1, %v13737_v46, %v7589_v36 }
 0x55d   :  { %v14003_v60 = vadd.f32 %v6454_v0, %v6390_v54  ;;  %v7847_v5 = vsub.f32 %v13968_v37, %v15845_v16  ;;  %v15847_v0 = vld [vmem:[#allocation47_spill] sm:$0xff] }
 0x55e   :  { %v14009_v52 = vpop.f32.mrf.mxu0  ;;  %v14011_v29 = vpop.f32.mrf.mxu1  ;;  %7843 = vmatpush.msrb.mxu1 %v7842_v50  ;;  %v6512_v50 = vadd.f32 %v13926_v1, %v13985_v34  ;;  %v15858_v1 = vand.u32 4294901760, %v13845_v20  ;;  %v15860_v20 = vand.u32 4294901760, %v13866_v17 }
 0x55f   :  { %15844 = vst [vmem:[#allocation29_spill] sm:$0xff] %v14003_v60  ;;  %7476 = vmatmul.f32.vlgmr.msra.gmra.mxu2 %v15807_v23  ;;  %v7848_v54 = vand.u32 4294901760, %v7847_v5  ;;  %v15849_v23 = vand.u32 4294901760, %v13775_v33  ;;  %v15851_v33 = vld [vmem:[#allocation70_spill] sm:$0xff]  ;;  %v15854_v5 = vand.u32 4294901760, %v13810_v63  ;;  %v15856_v63 = vld [vmem:[#allocation16_spill] sm:$0xff] }
 0x560   :  { %7545 = vmatmul.f32.gmra.mxu3 %v12889_v51 }
 0x561   :  { %7311 = vmatmul.f32.gmra.mxu0 %v15846_v11  ;;  %7395 = vmatmul.f32.gmra.mxu1 %v15847_v0 }
 0x562   :  { %v6734_v16 = vpop.f32.mrf.mxu2  ;;  %8060 = vmatpush.msra.mxu0 %v15849_v23  ;;  %7849 = vmatpush.msrb.mxu1 %v7848_v54  ;;  %v15859_v23 = vand.u32 4294901760, %v13851_v40  ;;  %v7593_v40 = vmul.f32 0.01, %v13758_v19 }
 0x563   :  { %v6814_v60 = vpop.f32.mrf.mxu3  ;;  %v6735_v21 = vadd.f32 %v6734_v16, %v6653_v38 }
 0x564   :  { %8151 = vmatpush.msra.mxu1 %v13756_v2  ;;  %8064 = vmatpush.msra.mxu0 %v15850_v22  ;;  %v15853_v2 = vand.u32 4294901760, %v13795_v35  ;;  %v14057_v35 = vand.u32 4294901760, %v7605_v57 }
 0x565   :  { %v14027_v11 = vadd.f32 %v6808_v25, %v6735_v21  ;;  %v15852_v21 = vld [vmem:[#allocation24_spill] sm:$0xff] }
 0x566   :  { %v14029_v59 = vpop.f32.mrf.mxu0  ;;  %v14031_v56 = vpop.f32.mrf.mxu1  ;;  %8153 = vmatpush.msra.mxu1 %v13763_v61  ;;  %8068 = vmatpush.msra.mxu0 %v15853_v2  ;;  %v15855_v61 = vand.u32 4294901760, %v13833_v44  ;;  %v6661_v44 = vadd.f32 %v13873_v12, %v6512_v50  ;;  %v6520_v12 = vadd.f32 %v13971_v28, %v13985_v34  ;;  %v15862_v28 = vand.u32 4294901760, %v13889_v45 }
 0x567   :  { %7480 = vmatmul.f32.gmra.mxu2 %v12889_v51 }
 0x568   :  { %7549 = vmatmul.f32.gmra.mxu3 %v15813_v43  ;;  %8155 = vmatpush.msra.mxu1 %v13777_v58  ;;  %v7591_v58 = vmul.f32 0.01, %v13747_v41  ;;  %v6665_v17 = vadd.f32 %v13928_v13, %v6520_v12  ;;  %v15863_v13 = vand.u32 4294901760, %v13898_v49  ;;  %v7595_v49 = vmul.f32 0.01, %v13806_v53 }
 0x569   :  { %7316 = vmatmul.f32.gmra.mxu0 %v15851_v33  ;;  %7401 = vmatmul.f32.gmra.mxu1 %v15852_v21 }
 0x56a   :  { %v6739_v3 = vpop.f32.mrf.mxu2  ;;  %8072 = vmatpush.msra.mxu0 %v15854_v5  ;;  %8157 = vmatpush.msra.mxu1 %v13784_v14  ;;  %v15857_v14 = vld [vmem:[#allocation17_spill] sm:$0xff]  ;;  %v7607_v54 = vsel %vm7575_vm2, %v13747_v41, %v7591_v58 }
 0x56b   :  { %v6820_v25 = vpop.f32.mrf.mxu3  ;;  %v6740_v51 = vadd.f32 %v6739_v3, %v6657_v8  ;;  %v7609_v8 = vsel %vm7577_vm3, %v13758_v19, %v7593_v40  ;;  %v15865_v3 = vand.u32 4294901760, %v13907_v9  ;;  %v15866_v9 = vand.u32 4294901760, %v13921_v4 }
 0x56c   :  { %8076 = vmatpush.msra.mxu0 %v15855_v61  ;;  %8159 = vmatpush.msra.mxu1 %v13797_v30  ;;  %v7611_v61 = vsel %vm7579_vm4, %v13806_v53, %v7595_v49 }
 0x56d   :  { %v14052_v0 = vadd.f32 %v6814_v60, %v6740_v51  ;;  %v14074_v60 = vsub.f32 %v7605_v57, %v14057_v35  ;;  %v14126_v51 = vand.u32 4294901760, %v7609_v8 }
 0x56e   :  { %v14059_v7 = vpop.f32.mrf.mxu0  ;;  %v14061_v46 = vpop.f32.mrf.mxu1  ;;  %8080 = vmatpush.msra.mxu0 %v15858_v1  ;;  %8161 = vmatpush.msra.mxu1 %v13812_v62  ;;  %v14092_v62 = vand.u32 4294901760, %v7607_v54 }
 0x56f   :  { %7484 = vmatmul.f32.gmra.mxu2 %v15813_v43  ;;  %v7691_v6 = vand.u32 4294901760, %v14074_v60  ;;  %v14141_v50 = vsub.f32 %v7609_v8, %v14126_v51  ;;  %v15878_v8 = vld [vmem:[#allocation25_spill] sm:$0xff] }
 0x570   :  { %7553 = vmatmul.f32.gmra.mxu3 %v15816_v42  ;;  %8084 = vmatpush.msra.mxu0 %v15859_v23  ;;  %v14108_v21 = vsub.f32 %v7607_v54, %v14092_v62  ;;  %v15873_v54 = vand.u32 4294901760, %v13968_v37  ;;  %v15876_v37 = vld [vmem:[#allocation38_spill] sm:$0xff]  ;;  %vm7583_vm6 = vcmp.gt.f32.partialorder %v15878_v8, 0.0 }
 0x571   :  { %7321 = vmatmul.f32.gmra.mxu0 %v15856_v63  ;;  %7407 = vmatmul.f32.gmra.mxu1 %v15857_v14  ;;  %v15869_v63 = vld [vmem:[#allocation18_spill] sm:$0xff]  ;;  %v15870_v14 = vand.u32 4294901760, %v13956_v27 }
 0x572   :  { %v6744_v38 = vpop.f32.mrf.mxu2  ;;  %8163 = vmatpush.msra.mxu1 %v13835_v15  ;;  %8088 = vmatpush.msra.mxu0 %v15860_v20  ;;  %v15861_v15 = vld [vmem:[#allocation30_spill] sm:$0xff] }
 0x573   :  { %v6826_v43 = vpop.f32.mrf.mxu3  ;;  %v6745_v16 = vadd.f32 %v6744_v38, %v6661_v44  ;;  %v14159_v38 = vand.u32 4294901760, %v7611_v61 }
 0x574   :  { %8165 = vmatpush.msra.mxu1 %v13837_v31  ;;  %8092 = vmatpush.msra.mxu0 %v15862_v28  ;;  %v6528_v31 = vadd.f32 %v14009_v52, %v13985_v34 }
 0x575   :  { %v14082_v30 = vadd.f32 %v6820_v25, %v6745_v16  ;;  %v14174_v12 = vsub.f32 %v7611_v61, %v14159_v38 }
 0x576   :  { %v14088_v22 = vpop.f32.mrf.mxu0  ;;  %v14090_v41 = vpop.f32.mrf.mxu1  ;;  %8167 = vmatpush.msra.mxu1 %v13853_v32  ;;  %8096 = vmatpush.msra.mxu0 %v15863_v13  ;;  %v7699_v32 = vand.u32 4294901760, %v14108_v21  ;;  %v15879_v13 = vld [vmem:[#allocation28_spill] sm:$0xff] }
 0x577   :  { %7488 = vmatmul.f32.gmra.mxu2 %v15816_v42  ;;  %v7692_v42 = vsub.f32 %v14074_v60, %v7691_v6 }
 0x578   :  { %7557 = vmatmul.f32.gmra.mxu3 %v15818_v48  ;;  %8169 = vmatpush.msra.mxu1 %v13868_v18  ;;  %v6669_v18 = vadd.f32 %v13973_v10, %v6528_v31  ;;  %v15867_v10 = vand.u32 4294901760, %v13944_v39  ;;  %v15871_v39 = vld [vmem:[#allocation34_spill] sm:$0xff] }
 0x579   :  { %7326 = vmatmul.f32.gmra.mxu0 %v15861_v15  ;;  %7851 = vmatmul.f32.vlgmr.msrb.gmra.mxu1 %v14057_v35  ;;  %v7693_v19 = vand.u32 4294901760, %v7692_v42  ;;  %vm7581_vm5 = vcmp.gt.f32.partialorder %v15871_v39, 0.0  ;;  %v15874_v15 = vld [vmem:[#allocation40_spill] sm:$0xff] }
 0x57a   :  { %v6749_v36 = vpop.f32.mrf.mxu2  ;;  %8100 = vmatpush.msra.mxu0 %v15865_v3  ;;  %8171 = vmatpush.msra.mxu1 %v13891_v47  ;;  %v6536_v47 = vadd.f32 %v14029_v59, %v13985_v34  ;;  %v15872_v59 = vld [vmem:[#allocation75_spill] sm:$0xff] }
 0x57b   :  { %v6832_v33 = vpop.f32.mrf.mxu3  ;;  %v6750_v2 = vadd.f32 %v6749_v36, %v6665_v17 }
 0x57c   :  { %8104 = vmatpush.msra.mxu0 %v15866_v9  ;;  %8173 = vmatpush.msra.mxu1 %v13894_v55  ;;  %v7707_v55 = vand.u32 4294901760, %v14141_v50  ;;  %v6673_v27 = vadd.f32 %v14011_v29, %v6536_v47 }
 0x57d   :  { %v14116_v45 = vadd.f32 %v6826_v43, %v6750_v2  ;;  %v7597_v43 = vmul.f32 0.01, %v15871_v39  ;;  %v7599_v2 = vmul.f32 0.01, %v15878_v8 }
 0x57e   :  { %v14121_v25 = vpop.f32.mrf.mxu0  ;;  %v14123_v57 = vpop.f32.mrf.mxu1  ;;  %8108 = vmatpush.msra.mxu0 %v15867_v10  ;;  %8175 = vmatpush.msra.mxu1 %v15869_v63 }
 0x57f   :  { %15864 = vst [vmem:[#allocation44_spill] sm:$0xff] %v14116_v45  ;;  %7492 = vmatmul.f32.gmra.mxu2 %v15818_v48  ;;  %v7700_v48 = vsub.f32 %v14108_v21, %v7699_v32  ;;  %v7613_v20 = vsel %vm7581_vm5, %v15871_v39, %v7597_v43  ;;  %v7651_v39 = vld [vmem:[#allocation8 + $0xf0] sm:$0xff] }
 0x580   :  { %7561 = vmatmul.f32.gmra.mxu3 %v15821_v26  ;;  %8112 = vmatpush.msra.mxu0 %v15870_v14  ;;  %v14188_v42 = vand.u32 4294901760, %v7613_v20 }
 0x581   :  { %7694 = vmatmul.f32.vlgmr.msrb.gmra.mxu0 %v7693_v19  ;;  %7855 = vmatmul.f32.gmra.mxu1 %v14092_v62  ;;  %v7701_v53 = vand.u32 4294901760, %v7700_v48  ;;  %v6552_v48 = vadd.f32 %v14088_v22, %v13985_v34 }
 0x582   :  { %v6754_v52 = vpop.f32.mrf.mxu2  ;;  %8177 = vmatpush.msra.mxu1 %v13924_v24  ;;  %8116 = vmatpush.msra.mxu0 %v15873_v54  ;;  %v6544_v24 = vadd.f32 %v14059_v7, %v13985_v34  ;;  %v14200_v49 = vsub.f32 %v7613_v20, %v14188_v42 }
 0x583   :  { %v6838_v5 = vpop.f32.mrf.mxu3  ;;  %v6755_v58 = vadd.f32 %v6754_v52, %v6669_v18  ;;  %v7615_v18 = vsel %vm7583_vm6, %v15878_v8, %v7599_v2  ;;  %v7652_v52 = vld [vmem:[#allocation8 + $0xf8] sm:$0xff]  ;;  %v6681_v43 = vadd.f32 %v14061_v46, %v6552_v48 }
 0x584   :  { %8179 = vmatpush.msra.mxu1 %v15874_v15  ;;  %v6677_v7 = vadd.f32 %v14031_v56, %v6544_v24  ;;  %v15225_v47 = vand.u32 4294901760, %v14200_v49  ;;  %v14214_v63 = vand.u32 4294901760, %v7615_v18 }
 0x585   :  { %v14149_v4 = vadd.f32 %v6832_v33, %v6755_v58  ;;  %v7715_v33 = vand.u32 4294901760, %v14174_v12 }
 0x586   :  { %v14154_v44 = vpop.f32.mrf.mxu0  ;;  %v14156_v1 = vpop.f32.mrf.mxu1  ;;  %8181 = vmatpush.msra.mxu1 %v15876_v37 }
 0x587   :  { %15868 = vst [vmem:[#allocation42_spill] sm:$0xff] %v14149_v4  ;;  %7496 = vmatmul.f32.gmra.mxu2 %v15821_v26  ;;  %v7708_v26 = vsub.f32 %v14141_v50, %v7707_v55  ;;  %v7716_v19 = vsub.f32 %v14174_v12, %v7715_v33 }
 0x588   :  { %7565 = vmatmul.f32.gmra.mxu3 %v15872_v59 }
 0x589   :  { %7702 = vmatmul.f32.gmra.mxu0 %v7701_v53  ;;  %7859 = vmatmul.f32.gmra.mxu1 %v14126_v51  ;;  %v7709_v36 = vand.u32 4294901760, %v7708_v26  ;;  %v7717_v10 = vand.u32 4294901760, %v7716_v19  ;;  %v15883_v53 = vld [vmem:[#allocation23_spill] sm:$0xff]  ;;  %v15887_v19 = vld [vmem:[#allocation29_spill] sm:$0xff] }
 0x58a   :  { %v6759_v16 = vpop.f32.mrf.mxu2  ;;  %v7601_v34 = vmul.f32 0.01, %v15883_v53  ;;  %vm7585_vm7 = vcmp.gt.f32.partialorder %v15883_v53, 0.0  ;;  %vm7587_vm8 = vcmp.gt.f32.partialorder %v15887_v19, 0.0 }
 0x58b   :  { %v6844_v23 = vpop.f32.mrf.mxu3  ;;  %v6760_v40 = vadd.f32 %v6759_v16, %v6673_v27  ;;  %v14238_v16 = vsub.f32 %v7615_v18, %v14214_v63  ;;  %v7603_v18 = vmul.f32 0.01, %v15887_v19 }
 0x58c   :  { %v7617_v46 = vsel %vm7585_vm7, %v15883_v53, %v7601_v34 }
 0x58d   :  { %v14180_v29 = vadd.f32 %v6838_v5, %v6760_v40  ;;  %v14203_v5 = vand.u32 4294901760, %v7652_v52  ;;  %v7650_v40 = vld [vmem:[#allocation8 + $0xe8] sm:$0xff] }
 0x58e   :  { %v14183_v17 = vpop.f32.mrf.mxu0  ;;  %v14185_v28 = vpop.f32.mrf.mxu1  ;;  %v14249_v24 = vand.u32 4294901760, %v7650_v40 }
 0x58f   :  { %15875 = vst [vmem:[#allocation46_spill] sm:$0xff] %v14180_v29  ;;  %7500 = vmatmul.f32.gmra.mxu2 %v15872_v59  ;;  %v14218_v14 = vsub.f32 %v7652_v52, %v14203_v5  ;;  %8531 = vmatpush.msrb.mxu1 %v14203_v5  ;;  %v14229_v59 = vand.u32 4294901760, %v7651_v39  ;;  %v7649_v52 = vld [vmem:[#allocation8 + $0xe0] sm:$0xff] }
 0x590   :  { %15877 = vst [vmem:[#allocation27_spill] sm:$0xff] %v14185_v28  ;;  %7569 = vmatmul.f32.gmra.mxu3 %v15879_v13  ;;  %8216 = vmatpush.msra.mxu2 %v14203_v5  ;;  %v7639_v28 = vld [vmem:[#allocation8 + $0x90] sm:$0xff] }
 0x591   :  { %7710 = vmatmul.f32.gmra.mxu0 %v7709_v36  ;;  %7863 = vmatmul.f32.gmra.mxu1 %v14159_v38  ;;  %v15221_v22 = vand.u32 4294901760, %v14218_v14  ;;  %v14246_v20 = vsub.f32 %v7651_v39, %v14229_v59 }
 0x592   :  { %v6764_v31 = vpop.f32.mrf.mxu2  ;;  %8443 = vmatpush.msrb.mxu0 %v14218_v14  ;;  %8218 = vmatpush.msra.mxu2 %v14229_v59 }
 0x593   :  { %v6850_v3 = vpop.f32.mrf.mxu3  ;;  %v6765_v9 = vadd.f32 %v6764_v31, %v6677_v7  ;;  %8533 = vmatpush.msrb.mxu1 %v14229_v59  ;;  %v15219_v36 = vand.u32 4294901760, %v14246_v20  ;;  %v15222_v7 = vand.u32 4294901760, %v14238_v16  ;;  %v14260_v31 = vand.u32 4294901760, %v7617_v46 }
 0x594   :  { %8446 = vmatpush.msrb.mxu0 %v14246_v20  ;;  %8220 = vmatpush.msra.mxu2 %v14249_v24 }
 0x595   :  { %v14207_v61 = vadd.f32 %v6844_v23, %v6765_v9  ;;  %v8315_v23 = vsub.f32 %v14218_v14, %v15221_v22  ;;  %v14271_v9 = vsub.f32 %v7650_v40, %v14249_v24  ;;  %8535 = vmatpush.msrb.mxu1 %v14249_v24  ;;  %v7732_v34 = vsub.f32 %v14238_v16, %v15222_v7 }
 0x596   :  { %v14209_v56 = vpop.f32.mrf.mxu0  ;;  %v14211_v58 = vpop.f32.mrf.mxu1  ;;  %v14288_v39 = vsub.f32 %v7617_v46, %v14260_v31 }
 0x597   :  { %15880 = vst [vmem:[#allocation33_spill] sm:$0xff] %v14207_v61  ;;  %7504 = vmatmul.f32.gmra.mxu2 %v15879_v13  ;;  %v8316_v15 = vand.u32 4294901760, %v8315_v23  ;;  %8449 = vmatpush.msrb.mxu0 %v14271_v9  ;;  %v7648_v23 = vld [vmem:[#allocation8 + $0xd8] sm:$0xff] }
 0x598   :  { %15881 = vst [vmem:[#allocation31_spill] sm:$0xff] %v14209_v56  ;;  %8007 = vmatmul.f32.vlgmr.msrb.gmra.mxu3 %v7691_v6  ;;  %v7724_v6 = vsub.f32 %v14200_v49, %v15225_v47 }
 0x599   :  { %15882 = vst [vmem:[#allocation37_spill] sm:$0xff] %v14211_v58  ;;  %7718 = vmatmul.f32.gmra.mxu0 %v7717_v10  ;;  %7867 = vmatmul.f32.gmra.mxu1 %v14188_v42  ;;  %v15218_v10 = vand.u32 4294901760, %v14271_v9 }
 0x59a   :  { %v6769_v27 = vpop.f32.mrf.mxu2  ;;  %v7725_v13 = vand.u32 4294901760, %v7724_v6  ;;  %8317 = vmatpush.msra.mxu3 %v8316_v15 }
 0x59b   :  { %v14232_v54 = vpop.f32.mrf.mxu3  ;;  %v6770_v26 = vadd.f32 %v6769_v27, %v6681_v43  ;;  %v7619_v43 = vsel %vm7587_vm8, %v15887_v19, %v7603_v18  ;;  %v8327_v27 = vsub.f32 %v14271_v9, %v15218_v10  ;;  %v7733_v19 = vand.u32 4294901760, %v7732_v34  ;;  %v7647_v34 = vld [vmem:[#allocation8 + $0xd0] sm:$0xff] }
 0x59c   :  { %v15223_v18 = vand.u32 4294901760, %v14288_v39 }
 0x59d   :  { %v14251_v37 = vadd.f32 %v6850_v3, %v6770_v26  ;;  %v8321_v3 = vsub.f32 %v14246_v20, %v15219_v36  ;;  %v14298_v26 = vand.u32 4294901760, %v7648_v23  ;;  %v8328_v40 = vand.u32 4294901760, %v8327_v27 }
 0x59e   :  { %v14255_v8 = vpop.f32.mrf.mxu0  ;;  %v14257_v2 = vpop.f32.mrf.mxu1  ;;  %v14323_v36 = vand.u32 4294901760, %v7647_v34 }
 0x59f   :  { %15884 = vst [vmem:[#allocation35_spill] sm:$0xff] %v14251_v37  ;;  %7933 = vmatmul.f32.vlgmr.msrb.gmra.mxu2 %v14074_v60  ;;  %v8322_v48 = vand.u32 4294901760, %v8321_v3  ;;  %v14276_v60 = vand.u32 4294901760, %v7649_v52  ;;  %v14308_v3 = vand.u32 4294901760, %v7619_v43 }
 0x5a0   :  { %15885 = vst [vmem:[#allocation41_spill] sm:$0xff] %v14255_v8  ;;  %8013 = vmatmul.f32.gmra.mxu3 %v7699_v32  ;;  %v7640_v8 = vld [vmem:[#allocation8 + $0x98] sm:$0xff] }
 0x5a1   :  { %15886 = vst [vmem:[#allocation39_spill] sm:$0xff] %v14257_v2  ;;  %7726 = vmatmul.f32.gmra.mxu0 %v7725_v13  ;;  %7871 = vmatmul.f32.gmra.mxu1 %v14214_v63  ;;  %v14296_v6 = vsub.f32 %v7649_v52, %v14276_v60 }
 0x5a2   :  { %v14280_v32 = vpop.f32.mrf.mxu2  ;;  %8323 = vmatpush.msra.mxu3 %v8322_v48  ;;  %8222 = vmatpush.msra.mxu2 %v14276_v60  ;;  %15890 = vst [vmem:[#allocation78_spill] sm:$0xff] %v14308_v3  ;;  %v14319_v48 = vsub.f32 %v7648_v23, %v14298_v26  ;;  %v7740_v23 = vsub.f32 %v14288_v39, %v15223_v18 }
 0x5a3   :  { %v14282_v53 = vpop.f32.mrf.mxu3  ;;  %8537 = vmatpush.msrb.mxu1 %v14276_v60  ;;  %v15220_v46 = vand.u32 4294901760, %v14296_v6  ;;  %8452 = vmatpush.msrb.mxu0 %v14296_v6 }
 0x5a4   :  { %8224 = vmatpush.msra.mxu2 %v14298_v26  ;;  %8329 = vmatpush.msra.mxu3 %v8328_v40  ;;  %v15224_v10 = vand.u32 4294901760, %v14319_v48 }
 0x5a5   :  { %8539 = vmatpush.msrb.mxu1 %v14298_v26  ;;  %v8333_v52 = vsub.f32 %v14296_v6, %v15220_v46  ;;  %8455 = vmatpush.msrb.mxu0 %v14319_v48  ;;  %v7646_v46 = vld [vmem:[#allocation8 + $0xc8] sm:$0xff] }
 0x5a6   :  { %v14303_v15 = vpop.f32.mrf.mxu0  ;;  %v14305_v13 = vpop.f32.mrf.mxu1  ;;  %v8339_v40 = vsub.f32 %v14319_v48, %v15224_v10  ;;  %8226 = vmatpush.msra.mxu2 %v14323_v36  ;;  %v14343_v22 = vand.u32 4294901760, %v7646_v46  ;;  %v7741_v10 = vand.u32 4294901760, %v7740_v23  ;;  %v7645_v23 = vld [vmem:[#allocation8 + $0xc0] sm:$0xff] }
 0x5a7   :  { %15888 = vst [vmem:[#allocation45_spill] sm:$0xff] %v14303_v15  ;;  %7938 = vmatmul.f32.gmra.mxu2 %v14108_v21  ;;  %v8334_v27 = vand.u32 4294901760, %v8333_v52  ;;  %v14341_v52 = vsub.f32 %v7647_v34, %v14323_v36  ;;  %8541 = vmatpush.msrb.mxu1 %v14323_v36  ;;  %v14366_v37 = vand.u32 4294901760, %v7645_v23 }
 0x5a8   :  { %15889 = vst [vmem:[#allocation43_spill] sm:$0xff] %v14305_v13  ;;  %8019 = vmatmul.f32.gmra.mxu3 %v7707_v55  ;;  %v8340_v7 = vand.u32 4294901760, %v8339_v40  ;;  %8228 = vmatpush.msra.mxu2 %v14343_v22  ;;  %v14362_v40 = vsub.f32 %v7646_v46, %v14343_v22 }
 0x5a9   :  { %7734 = vmatmul.f32.gmra.mxu0 %v7733_v19  ;;  %7875 = vmatmul.f32.gmra.mxu1 %v14260_v31  ;;  %v14334_v19 = vsub.f32 %v7619_v43, %v14308_v3  ;;  %v15226_v18 = vand.u32 4294901760, %v14341_v52 }
 0x5aa   :  { %v14326_v21 = vpop.f32.mrf.mxu2  ;;  %8335 = vmatpush.msra.mxu3 %v8334_v27  ;;  %8458 = vmatpush.msrb.mxu0 %v14341_v52 }
 0x5ab   :  { %v14328_v55 = vpop.f32.mrf.mxu3  ;;  %8543 = vmatpush.msrb.mxu1 %v14343_v22  ;;  %v8345_v34 = vsub.f32 %v14341_v52, %v15226_v18  ;;  %v15895_v18 = vand.u32 4294901760, %v14334_v19  ;;  %8230 = vmatpush.msra.mxu2 %v14366_v37 }
 0x5ac   :  { %15891 = vst [vmem:[#allocation72_spill] sm:$0xff] %v14328_v55  ;;  %8341 = vmatpush.msra.mxu3 %v8340_v7  ;;  %8461 = vmatpush.msrb.mxu0 %v14362_v40 }
 0x5ad   :  { %v8346_v47 = vand.u32 4294901760, %v8345_v34  ;;  %v7748_v46 = vsub.f32 %v14334_v19, %v15895_v18  ;;  %v7644_v34 = vld [vmem:[#allocation8 + $0xb8] sm:$0xff]  ;;  %8545 = vmatpush.msrb.mxu1 %v14366_v37 }
 0x5ae   :  { %v14348_v43 = vpop.f32.mrf.mxu0  ;;  %v14350_v27 = vpop.f32.mrf.mxu1  ;;  %v14383_v13 = vand.u32 4294901760, %v7644_v34 }
 0x5af   :  { %15892 = vst [vmem:[#allocation74_spill] sm:$0xff] %v14348_v43  ;;  %7943 = vmatmul.f32.gmra.mxu2 %v14141_v50  ;;  %8347 = vmatpush.msra.mxu3 %v8346_v47 }
 0x5b0   :  { %15893 = vst [vmem:[#allocation76_spill] sm:$0xff] %v14350_v27  ;;  %8025 = vmatmul.f32.gmra.mxu3 %v7715_v33  ;;  %v15227_v27 = vand.u32 4294901760, %v14362_v40  ;;  %8232 = vmatpush.msra.mxu2 %v14383_v13  ;;  %v14401_v2 = vsub.f32 %v7644_v34, %v14383_v13 }
 0x5b1   :  { %7742 = vmatmul.f32.gmra.mxu0 %v7741_v10  ;;  %7879 = vmatmul.f32.gmra.mxu1 %v14308_v3  ;;  %v14381_v10 = vsub.f32 %v7645_v23, %v14366_v37  ;;  %v15897_v23 = vand.u32 4294901760, %v14200_v49  ;;  %v14442_v3 = vand.u32 4294901760, %v7640_v8 }
 0x5b2   :  { %v14369_v50 = vpop.f32.mrf.mxu2  ;;  %v8351_v7 = vsub.f32 %v14362_v40, %v15227_v27  ;;  %v7749_v27 = vand.u32 4294901760, %v7748_v46  ;;  %8547 = vmatpush.msrb.mxu1 %v14383_v13  ;;  %v7643_v46 = vld [vmem:[#allocation8 + $0xb0] sm:$0xff]  ;;  %v15229_v15 = vand.u32 4294901760, %v14401_v2 }
 0x5b3   :  { %v14371_v33 = vpop.f32.mrf.mxu3  ;;  %v15228_v61 = vand.u32 4294901760, %v14381_v10  ;;  %8464 = vmatpush.msrb.mxu0 %v14381_v10  ;;  %v14405_v29 = vand.u32 4294901760, %v7643_v46  ;;  %15904 = vst [vmem:[#allocation19_spill] sm:$0xff] %v14442_v3 }
 0x5b4   :  { %15894 = vst [vmem:[#allocation77_spill] sm:$0xff] %v14371_v33  ;;  %v8352_v43 = vand.u32 4294901760, %v8351_v7 }
 0x5b5   :  { %v8357_v7 = vsub.f32 %v14381_v10, %v15228_v61  ;;  %8467 = vmatpush.msrb.mxu0 %v14401_v2  ;;  %v7642_v61 = vld [vmem:[#allocation8 + $0xa8] sm:$0xff]  ;;  %8234 = vmatpush.msra.mxu2 %v14405_v29 }
 0x5b6   :  { %v14388_v47 = vpop.f32.mrf.mxu0  ;;  %v14390_v18 = vpop.f32.mrf.mxu1  ;;  %8353 = vmatpush.msra.mxu3 %v8352_v43  ;;  %v14417_v43 = vsub.f32 %v7643_v46, %v14405_v29  ;;  %v14419_v34 = vand.u32 4294901760, %v7642_v61  ;;  %8549 = vmatpush.msrb.mxu1 %v14405_v29 }
 0x5b7   :  { %15896 = vst [vmem:[#allocation79_spill] sm:$0xff] %v14388_v47  ;;  %7948 = vmatmul.f32.gmra.mxu2 %v14174_v12  ;;  %v8358_v47 = vand.u32 4294901760, %v8357_v7  ;;  %v7641_v7 = vld [vmem:[#allocation8 + $0xa0] sm:$0xff] }
 0x5b8   :  { %8031 = vmatmul.f32.gmra.mxu3 %v15897_v23  ;;  %15900 = vst [vmem:[#allocation83_spill] sm:$0xff] %v14419_v34  ;;  %v15232_v33 = vand.u32 4294901760, %v14417_v43  ;;  %8236 = vmatpush.msra.mxu2 %v14419_v34  ;;  %v14432_v46 = vand.u32 4294901760, %v7641_v7 }
 0x5b9   :  { %7750 = vmatmul.f32.gmra.mxu0 %v7749_v27  ;;  %8183 = vmatmul.f32.vlgmr.msra.gmra.mxu1 %v14057_v35  ;;  %v8363_v27 = vsub.f32 %v14401_v2, %v15229_v15 }
 0x5ba   :  { %v14408_v12 = vpop.f32.mrf.mxu2  ;;  %8359 = vmatpush.msra.mxu3 %v8358_v47  ;;  %v14425_v47 = vsub.f32 %v7642_v61, %v14419_v34  ;;  %8470 = vmatpush.msrb.mxu0 %v14417_v43  ;;  %15902 = vst [vmem:[#allocation21_spill] sm:$0xff] %v14432_v46  ;;  %v8369_v61 = vsub.f32 %v14417_v43, %v15232_v33 }
 0x5bb   :  { %15898 = vst [vmem:[#allocation89_spill] sm:$0xff] %v14408_v12  ;;  %v14410_v23 = vpop.f32.mrf.mxu3  ;;  %v8364_v58 = vand.u32 4294901760, %v8363_v27  ;;  %8551 = vmatpush.msrb.mxu1 %v14419_v34  ;;  %v15903_v27 = vand.u32 4294901760, %v14238_v16  ;;  %v14447_v12 = vsub.f32 %v7641_v7, %v14432_v46  ;;  %8238 = vmatpush.msra.mxu2 %v14432_v46  ;;  %v14454_v33 = vsub.f32 %v7640_v8, %v14442_v3 }
 0x5bc   :  { %15899 = vst [vmem:[#allocation100_spill] sm:$0xff] %v14410_v23  ;;  %v15234_v4 = vand.u32 4294901760, %v14425_v47  ;;  %v14461_v7 = vand.u32 4294901760, %v7639_v28  ;;  %8473 = vmatpush.msrb.mxu0 %v14425_v47 }
 0x5bd   :  { %8365 = vmatpush.msra.mxu3 %v8364_v58  ;;  %v15236_v34 = vand.u32 4294901760, %v14447_v12  ;;  %8553 = vmatpush.msrb.mxu1 %v14432_v46  ;;  %v15238_v8 = vand.u32 4294901760, %v14454_v33 }
 0x5be   :  { %v14428_v15 = vpop.f32.mrf.mxu0  ;;  %v14430_v23 = vpop.f32.mrf.mxu1  ;;  %8240 = vmatpush.msra.mxu2 %v14442_v3  ;;  %8476 = vmatpush.msrb.mxu0 %v14447_v12 }
 0x5bf   :  { %15901 = vst [vmem:[#allocation80_spill] sm:$0xff] %v14430_v23  ;;  %7953 = vmatmul.f32.gmra.mxu2 %v14200_v49  ;;  %v8370_v49 = vand.u32 4294901760, %v8369_v61  ;;  %v7638_v23 = vld [vmem:[#allocation8 + $0x88] sm:$0xff]  ;;  %8555 = vmatpush.msrb.mxu1 %v14442_v3 }
 0x5c0   :  { %8037 = vmatmul.f32.gmra.mxu3 %v15903_v27  ;;  %v8375_v27 = vsub.f32 %v14425_v47, %v15234_v4  ;;  %v14467_v61 = vand.u32 4294901760, %v7638_v23  ;;  %v8381_v4 = vsub.f32 %v14447_v12, %v15236_v34  ;;  %8242 = vmatpush.msra.mxu2 %v14461_v7 }
 0x5c1   :  { %8118 = vmatmul.f32.vlgmr.msra.gmra.mxu0 %v14057_v35  ;;  %8187 = vmatmul.f32.gmra.mxu1 %v14092_v62 }
 0x5c2   :  { %v14456_v55 = vpop.f32.mrf.mxu2  ;;  %8371 = vmatpush.msra.mxu3 %v8370_v49  ;;  %v8376_v58 = vand.u32 4294901760, %v8375_v27  ;;  %v8387_v49 = vsub.f32 %v14454_v33, %v15238_v8  ;;  %v14482_v27 = vsub.f32 %v7638_v23, %v14467_v61  ;;  %v8382_v56 = vand.u32 4294901760, %v8381_v4  ;;  %8557 = vmatpush.msrb.mxu1 %v14461_v7 }
 0x5c3   :  { %15905 = vst [vmem:[#allocation22_spill] sm:$0xff] %v14456_v55  ;;  %v14458_v35 = vpop.f32.mrf.mxu3  ;;  %v7637_v55 = vld [vmem:[#allocation8 + $0x80] sm:$0xff]  ;;  %8479 = vmatpush.msrb.mxu0 %v14454_v33  ;;  %8244 = vmatpush.msra.mxu2 %v14467_v61 }
 0x5c4   :  { %15906 = vst [vmem:[#allocation88_spill] sm:$0xff] %v14458_v35  ;;  %v14473_v35 = vsub.f32 %v7639_v28, %v14461_v7  ;;  %8377 = vmatpush.msra.mxu3 %v8376_v58  ;;  %v14484_v46 = vand.u32 4294901760, %v7637_v55  ;;  %v15907_v58 = vand.u32 4294901760, %v14288_v39  ;;  %v8388_v23 = vand.u32 4294901760, %v8387_v49  ;;  %8559 = vmatpush.msrb.mxu1 %v14467_v61 }
 0x5c5   :  { %v15239_v8 = vand.u32 4294901760, %v14482_v27 }
 0x5c6   :  { %v14486_v34 = vpop.f32.mrf.mxu0  ;;  %v14488_v28 = vpop.f32.mrf.mxu1  ;;  %v15240_v3 = vand.u32 4294901760, %v14473_v35  ;;  %v14498_v45 = vsub.f32 %v7637_v55, %v14484_v46  ;;  %8383 = vmatpush.msra.mxu3 %v8382_v56  ;;  %8482 = vmatpush.msrb.mxu0 %v14473_v35 }
 0x5c7   :  { %7958 = vmatmul.f32.gmra.mxu2 %v14238_v16  ;;  %v8399_v16 = vsub.f32 %v14482_v27, %v15239_v8  ;;  %v15909_v8 = vand.u32 4294901760, %v14218_v14  ;;  %8561 = vmatpush.msrb.mxu1 %v14484_v46 }
 0x5c8   :  { %8043 = vmatmul.f32.gmra.mxu3 %v15907_v58  ;;  %v8393_v4 = vsub.f32 %v14473_v35, %v15240_v3  ;;  %v15241_v49 = vand.u32 4294901760, %v14498_v45  ;;  %8246 = vmatpush.msra.mxu2 %v14484_v46 }
 0x5c9   :  { %8122 = vmatmul.f32.gmra.mxu0 %v14092_v62  ;;  %8191 = vmatmul.f32.gmra.mxu1 %v14126_v51  ;;  %v8400_v3 = vand.u32 4294901760, %v8399_v16  ;;  %v15912_v16 = vand.u32 4294901760, %v14271_v9 }
 0x5ca   :  { %v14510_v58 = vpop.f32.mrf.mxu2  ;;  %v8394_v62 = vand.u32 4294901760, %v8393_v4  ;;  %8389 = vmatpush.msra.mxu3 %v8388_v23  ;;  %v8405_v56 = vsub.f32 %v14498_v45, %v15241_v49  ;;  %8614 = vmatpush.msrb.mxu2 %v15909_v8  ;;  %v15910_v23 = vand.u32 4294901760, %v14246_v20  ;;  %v15911_v49 = vand.u32 4294901760, %v14334_v19 }
 0x5cb   :  { %v14512_v55 = vpop.f32.mrf.mxu3  ;;  %8485 = vmatpush.msrb.mxu0 %v14482_v27  ;;  %v6920_v8 = vadd.f32 %v14121_v25, %v14027_v11  ;;  %v15914_v11 = vand.u32 4294901760, %v14319_v48 }
 0x5cc   :  { %15908 = vst [vmem:[#allocation63_spill] sm:$0xff] %v14512_v55  ;;  %8395 = vmatpush.msra.mxu3 %v8394_v62  ;;  %8618 = vmatpush.msrb.mxu2 %v15910_v23  ;;  %v8406_v14 = vand.u32 4294901760, %v8405_v56  ;;  %v15926_v56 = vld [vmem:[#allocation83_spill] sm:$0xff] }
 0x5cd   :  { %8488 = vmatpush.msrb.mxu0 %v14498_v45 }
 0x5ce   :  { %v14524_v4 = vpop.f32.mrf.mxu0  ;;  %v14526_v55 = vpop.f32.mrf.mxu1  ;;  %8401 = vmatpush.msra.mxu3 %v8400_v3  ;;  %8622 = vmatpush.msrb.mxu2 %v15912_v16  ;;  %v15929_v16 = vld [vmem:[#allocation21_spill] sm:$0xff] }
 0x5cf   :  { %7963 = vmatmul.f32.gmra.mxu2 %v14288_v39  ;;  %v15913_v39 = vand.u32 4294901760, %v14296_v6 }
 0x5d0   :  { %8049 = vmatmul.f32.gmra.mxu3 %v15911_v49 }
 0x5d1   :  { %8126 = vmatmul.f32.gmra.mxu0 %v14126_v51  ;;  %8195 = vmatmul.f32.gmra.mxu1 %v14159_v38  ;;  %v6985_v51 = vadd.f32 %v14090_v41, %v6920_v8  ;;  %v6924_v41 = vadd.f32 %v14154_v44, %v14052_v0  ;;  %v15917_v0 = vand.u32 4294901760, %v14381_v10 }
 0x5d2   :  { %v14539_v62 = vpop.f32.mrf.mxu2  ;;  %8407 = vmatpush.msra.mxu3 %v8406_v14  ;;  %8626 = vmatpush.msrb.mxu2 %v15913_v39  ;;  %v15928_v14 = vld [vmem:[#allocation72_spill] sm:$0xff]  ;;  %v15930_v39 = vand.u32 4294901760, %v14482_v27 }
 0x5d3   :  { %v14541_v20 = vpop.f32.mrf.mxu3  ;;  %v7054_v3 = vadd.f32 %v14280_v32, %v6985_v51  ;;  %v15916_v32 = vand.u32 4294901760, %v14362_v40 }
 0x5d4   :  { %8709 = vmatpush.msrb.mxu3 %v14203_v5  ;;  %8630 = vmatpush.msrb.mxu2 %v15914_v11  ;;  %v15915_v5 = vand.u32 4294901760, %v14341_v52  ;;  %v15931_v11 = vld [vmem:[#allocation27_spill] sm:$0xff] }
 0x5d6   :  { %v14550_v25 = vpop.f32.mrf.mxu0  ;;  %v14552_v9 = vpop.f32.mrf.mxu1  ;;  %8711 = vmatpush.msrb.mxu3 %v14229_v59  ;;  %8634 = vmatpush.msrb.mxu2 %v15915_v5  ;;  %v7211_v59 = vadd.f32 %v14232_v54, %v7054_v3  ;;  %v15932_v5 = vld [vmem:[#allocation19_spill] sm:$0xff] }
 0x5d7   :  { %7968 = vmatmul.f32.gmra.mxu2 %v14334_v19 }
 0x5d8   :  { %8713 = vmatpush.msrb.mxu3 %v14249_v24  ;;  %8638 = vmatpush.msrb.mxu2 %v15916_v32  ;;  %v7293_v19 = vadd.f32 %v14428_v15, %v7211_v59  ;;  %v15919_v15 = vand.u32 4294901760, %v14417_v43 }
 0x5d9   :  { %8130 = vmatmul.f32.gmra.mxu0 %v14159_v38  ;;  %8199 = vmatmul.f32.gmra.mxu1 %v14188_v42  ;;  %v6989_v38 = vadd.f32 %v14123_v57, %v6924_v41  ;;  %v6928_v57 = vadd.f32 %v14183_v17, %v14082_v30 }
 0x5da   :  { %v14564_v6 = vpop.f32.mrf.mxu2  ;;  %8715 = vmatpush.msrb.mxu3 %v14276_v60  ;;  %8642 = vmatpush.msrb.mxu2 %v15917_v0  ;;  %v15918_v60 = vand.u32 4294901760, %v14401_v2 }
 0x5db   :  { %v7542_v48 = vpop.f32.mrf.mxu3  ;;  %v7062_v54 = vadd.f32 %v14326_v21, %v6989_v38  ;;  %v6993_v40 = vadd.f32 %v14156_v1, %v6928_v57  ;;  %v15922_v1 = vand.u32 4294901760, %v14454_v33  ;;  %v15934_v38 = vld [vmem:[#allocation89_spill] sm:$0xff] }
 0x5dc   :  { %8717 = vmatpush.msrb.mxu3 %v14298_v26  ;;  %8646 = vmatpush.msrb.mxu2 %v15918_v60  ;;  %v7367_v26 = vadd.f32 %v14390_v18, %v7293_v19  ;;  %v15937_v60 = vld [vmem:[#allocation41_spill] sm:$0xff] }
 0x5de   :  { %v14575_v44 = vpop.f32.mrf.mxu0  ;;  %v14577_v24 = vpop.f32.mrf.mxu1  ;;  %8719 = vmatpush.msrb.mxu3 %v14323_v36  ;;  %8650 = vmatpush.msrb.mxu2 %v15919_v15  ;;  %v7215_v36 = vadd.f32 %v14282_v53, %v7062_v54  ;;  %v7070_v53 = vadd.f32 %v14369_v50, %v6993_v40  ;;  %v15927_v50 = vand.u32 4294901760, %v14473_v35 }
 0x5e0   :  { %8721 = vmatpush.msrb.mxu3 %v14343_v22  ;;  %v7298_v30 = vadd.f32 %v14486_v34, %v7215_v36  ;;  %v15921_v22 = vand.u32 4294901760, %v14447_v12  ;;  %v15924_v12 = vld [vmem:[#allocation31_spill] sm:$0xff]  ;;  %v7219_v8 = vadd.f32 %v15928_v14, %v7070_v53  ;;  %v15943_v14 = vld [vmem:[#allocation100_spill] sm:$0xff] }
 0x5e1   :  { %8134 = vmatmul.f32.gmra.mxu0 %v14188_v42  ;;  %8203 = vmatmul.f32.gmra.mxu1 %v14214_v63  ;;  %v15920_v42 = vand.u32 4294901760, %v14425_v47  ;;  %v15925_v47 = vld [vmem:[#allocation80_spill] sm:$0xff] }
 0x5e2   :  { %v7477_v21 = vpop.f32.mrf.mxu2  ;;  %8723 = vmatpush.msrb.mxu3 %v14366_v37  ;;  %v7373_v49 = vadd.f32 %v15925_v47, %v7298_v30  ;;  %v7303_v3 = vadd.f32 %v14524_v4, %v7219_v8  ;;  %v15935_v4 = vld [vmem:[#allocation78_spill] sm:$0xff]  ;;  %v15939_v30 = vld [vmem:[#allocation37_spill] sm:$0xff] }
 0x5e3   :  { %v7546_v52 = vpop.f32.mrf.mxu3  ;;  %v7478_v2 = vadd.f32 %v7477_v21, %v7367_v26  ;;  %8654 = vmatpush.msrb.mxu2 %v15920_v42 }
 0x5e4   :  { %8725 = vmatpush.msrb.mxu3 %v14383_v13  ;;  %v15923_v13 = vld [vmem:[#allocation44_spill] sm:$0xff]  ;;  %v7379_v15 = vadd.f32 %v14488_v28, %v7303_v3 }
 0x5e5   :  { %v7543_v17 = vadd.f32 %v7542_v48, %v7478_v2  ;;  %8658 = vmatpush.msrb.mxu2 %v15921_v22  ;;  %v6932_v43 = vadd.f32 %v15924_v12, %v15923_v13  ;;  %v15933_v48 = vand.u32 4294901760, %v14498_v45  ;;  %v15936_v45 = vld [vmem:[#allocation42_spill] sm:$0xff] }
 0x5e6   :  { %v14600_v10 = vpop.f32.mrf.mxu0  ;;  %v14602_v18 = vpop.f32.mrf.mxu1  ;;  %8727 = vmatpush.msrb.mxu3 %v14405_v29  ;;  %v6936_v57 = vadd.f32 %v15937_v60, %v15936_v45 }
 0x5e7   :  { %vm7574_vm9 = vcmp.gt.f32.partialorder %v7543_v17, 0.0  ;;  %v7590_v37 = vmul.f32 0.01, %v7543_v17  ;;  %8662 = vmatpush.msrb.mxu2 %v15922_v1  ;;  %v6997_v35 = vadd.f32 %v15931_v11, %v6932_v43  ;;  %v15940_v1 = vld [vmem:[#allocation22_spill] sm:$0xff]  ;;  %v15944_v11 = vld [vmem:[#allocation39_spill] sm:$0xff] }
 0x5e8   :  { %8729 = vmatpush.msrb.mxu3 %v15926_v56  ;;  %v15941_v43 = vld [vmem:[#allocation46_spill] sm:$0xff] }
 0x5e9   :  { %8138 = vmatmul.f32.gmra.mxu0 %v14214_v63  ;;  %8207 = vmatmul.f32.gmra.mxu1 %v14260_v31  ;;  %v7606_v34 = vsel %vm7574_vm9, %v7543_v17, %v7590_v37  ;;  %v7078_v19 = vadd.f32 %v15934_v38, %v6997_v35  ;;  %v7001_v17 = vadd.f32 %v15939_v30, %v6936_v57 }
 0x5ea   :  { %8666 = vmatpush.msrb.mxu2 %v15927_v50  ;;  %v14616_v23 = vand.u32 4294901760, %v7606_v34  ;;  %v7481_v29 = vpop.f32.mrf.mxu2  ;;  %8731 = vmatpush.msrb.mxu3 %v15929_v16  ;;  %v14666_v16 = vld [vmem:[%s14829_s12] ss:$0 sm:$0xff]  ;;  %s8951_s12 = smov [#allocation10]  }
 0x5eb   :  { %v7550_v33 = vpop.f32.mrf.mxu3  ;;  %v7482_v63 = vadd.f32 %v7481_v29, %v7373_v49  ;;  %v7086_v13 = vadd.f32 %v15940_v1, %v7001_v17  ;;  %s8785_s30 = sshll.u32 %s8951_s12, 4  ;;  %s8786_s30 = int_to_ptr.vmem [resolvable:$true] %s8785_s30 }
 0x5ec   :  { %8670 = vmatpush.msrb.mxu2 %v15930_v39  ;;  %v14623_v51 = vsub.f32 %v7606_v34, %v14616_v23  ;;  %8409 = vmatmul.f32.vlgmr.msra.gmra.mxu3 %v14616_v23  ;;  %v15942_v34 = vld [vmem:[#allocation45_spill] sm:$0xff] }
 0x5ed   :  { %v7547_v41 = vadd.f32 %v7546_v52, %v7482_v63  ;;  %8733 = vmatpush.msrb.mxu3 %v15932_v5  ;;  %v6940_v47 = vadd.f32 %v15942_v34, %v15941_v43  ;;  %v7227_v8 = vadd.f32 %v15943_v14, %v7086_v13 }
 0x5ee   :  { %8674 = vmatpush.msrb.mxu2 %v15933_v48  ;;  %v8249_v59 = vand.u32 4294901760, %v14623_v51  ;;  %v14632_v32 = vpop.f32.mrf.mxu0  ;;  %v14634_v27 = vpop.f32.mrf.mxu1 }
 0x5ef   :  { %vm7576_vm10 = vcmp.gt.f32.partialorder %v7547_v41, 0.0  ;;  %v7592_v0 = vmul.f32 0.01, %v7547_v41  ;;  %8735 = vmatpush.msrb.mxu3 %v14461_v7  ;;  %v15938_v7 = vld [vmem:[#allocation77_spill] sm:$0xff]  ;;  %v7313_v35 = vadd.f32 %v14575_v44, %v7227_v8  ;;  %v15952_v8 = vld [vmem:[#allocation76_spill] sm:$0xff] }
 0x5f0   :  { %v8250_v54 = vsub.f32 %v14623_v51, %v8249_v59  ;;  %v7223_v42 = vadd.f32 %v15938_v7, %v7078_v19 }
 0x5f1   :  { %8142 = vmatmul.f32.gmra.mxu0 %v14260_v31  ;;  %8211 = vmatmul.f32.gmra.mxu1 %v15935_v4  ;;  %v7608_v26 = vsel %vm7576_vm10, %v7547_v41, %v7592_v0  ;;  %v7391_v44 = vadd.f32 %v14552_v9, %v7313_v35 }
 0x5f2   :  { %8737 = vmatpush.msrb.mxu3 %v14467_v61  ;;  %v7485_v21 = vpop.f32.mrf.mxu2  ;;  %v8251_v36 = vand.u32 4294901760, %v8250_v54  ;;  %v14645_v2 = vand.u32 4294901760, %v7608_v26  ;;  %v7308_v28 = vadd.f32 %v14550_v25, %v7223_v42  ;;  %v15946_v54 = vld [vmem:[#allocation74_spill] sm:$0xff]  ;;  %v15948_v42 = vld [vmem:[#allocation43_spill] sm:$0xff] }
 0x5f3   :  { %v7554_v52 = vpop.f32.mrf.mxu3  ;;  %v7486_v31 = vadd.f32 %v7485_v21, %v7379_v15 }
 0x5f4   :  { %8739 = vmatpush.msrb.mxu3 %v14484_v46  ;;  %8252 = vmatmul.f32.vlgmr.msra.gmra.mxu2 %v8251_v36  ;;  %v8256_v40 = vsub.f32 %v7608_v26, %v14645_v2  ;;  %v7385_v56 = vadd.f32 %v14526_v55, %v7308_v28  ;;  %v7005_v55 = vadd.f32 %v15944_v11, %v6940_v47 }
 0x5f5   :  { %8413 = vmatmul.f32.gmra.mxu3 %v14645_v2  ;;  %v7551_v61 = vadd.f32 %v7550_v33, %v7486_v31 }
 0x5f6   :  { %v14653_v22 = vpop.f32.mrf.mxu0  ;;  %v7852_v53 = vpop.f32.mrf.mxu1  ;;  %v8257_v37 = vand.u32 4294901760, %v8256_v40 }
 0x5f7   :  { %vm7578_vm11 = vcmp.gt.f32.partialorder %v7551_v61, 0.0  ;;  %v7594_v12 = vmul.f32 0.01, %v7551_v61 }
 0x5f8   :  { %v8258_v46 = vsub.f32 %v8256_v40, %v8257_v37 }
 0x5f9   :  { %8146 = vmatmul.f32.gmra.mxu0 %v15935_v4  ;;  %8565 = vmatmul.f32.vlgmr.msrb.gmra.mxu1 %v8249_v59  ;;  %v7610_v49 = vsel %vm7578_vm11, %v7551_v61, %v7594_v12  ;;  %v7094_v59 = vadd.f32 %v14510_v58, %v7005_v55  ;;  %v15945_v4 = vld [vmem:[#allocation33_spill] sm:$0xff]  ;;  %v15949_v12 = vld [vmem:[#allocation35_spill] sm:$0xff] }
 0x5fa   :  { %v7489_v25 = vpop.f32.mrf.mxu2  ;;  %v8259_v29 = vand.u32 4294901760, %v8258_v46  ;;  %v14660_v33 = vand.u32 4294901760, %v7610_v49  ;;  %v6944_v45 = vadd.f32 %v15946_v54, %v15945_v4  ;;  %v15950_v46 = vld [vmem:[#allocation79_spill] sm:$0xff] }
 0x5fb   :  { %v7558_v50 = vpop.f32.mrf.mxu3  ;;  %v7490_v63 = vadd.f32 %v7489_v25, %v7385_v56  ;;  %v6948_v43 = vadd.f32 %v15950_v46, %v15949_v12 }
 0x5fc   :  { %8260 = vmatmul.f32.gmra.mxu2 %v8259_v29  ;;  %v8264_v39 = vsub.f32 %v7610_v49, %v14660_v33  ;;  %v7009_v31 = vadd.f32 %v15948_v42, %v6944_v45 }
 0x5fd   :  { %8417 = vmatmul.f32.gmra.mxu3 %v14660_v33  ;;  %v7555_v3 = vadd.f32 %v7554_v52, %v7490_v63  ;;  %v15947_v52 = vld [vmem:[#allocation88_spill] sm:$0xff]  ;;  %v7013_v63 = vadd.f32 %v15952_v8, %v6948_v43 }
 0x5fe   :  { %v7695_v41 = vpop.f32.mrf.mxu0  ;;  %v7856_v5 = vpop.f32.mrf.mxu1  ;;  %v8265_v48 = vand.u32 4294901760, %v8264_v39  ;;  %v7231_v36 = vadd.f32 %v15947_v52, %v7094_v59 }
 0x5ff   :  { %vm7580_vm12 = vcmp.gt.f32.partialorder %v7555_v3, 0.0  ;;  %v7596_v38 = vmul.f32 0.01, %v7555_v3  ;;  %v7696_v19 = vadd.f32 %v14666_v16, %v7695_v41 }
 0x600   :  { %v8266_v0 = vsub.f32 %v8264_v39, %v8265_v48  ;;  %v7318_v30 = vadd.f32 %v14600_v10, %v7231_v36 }
 0x601   :  { %8491 = vmatmul.f32.vlgmr.msrb.gmra.mxu0 %v14623_v51  ;;  %8571 = vmatmul.f32.gmra.mxu1 %v8257_v37  ;;  %v7612_v60 = vsel %vm7580_vm12, %v7555_v3, %v7596_v38  ;;  %v14678_v57 = vadd.f32 %v7852_v53, %v7696_v19  ;;  %v7102_v53 = vadd.f32 %v14539_v62, %v7009_v31  ;;  %v15951_v62 = vld [vmem:[#allocation63_spill] sm:$0xff] }
 0x602   :  { %v7493_v26 = vpop.f32.mrf.mxu2  ;;  %v8267_v21 = vand.u32 4294901760, %v8266_v0  ;;  %v14680_v58 = vand.u32 4294901760, %v7612_v60  ;;  %v7397_v47 = vadd.f32 %v14577_v24, %v7318_v30  ;;  %v7110_v3 = vadd.f32 %v14564_v6, %v7013_v63 }
 0x603   :  { %v7562_v15 = vpop.f32.mrf.mxu3  ;;  %v7494_v7 = vadd.f32 %v7493_v26, %v7391_v44  ;;  %v7235_v29 = vadd.f32 %v15951_v62, %v7102_v53 }
 0x604   :  { %8268 = vmatmul.f32.gmra.mxu2 %v8267_v21  ;;  %v8272_v51 = vsub.f32 %v7612_v60, %v14680_v58  ;;  %v7239_v6 = vadd.f32 %v14541_v20, %v7110_v3 }
 0x605   :  { %8421 = vmatmul.f32.gmra.mxu3 %v14680_v58  ;;  %v7559_v9 = vadd.f32 %v7558_v50, %v7494_v7  ;;  %v7323_v11 = vadd.f32 %v14632_v32, %v7235_v29 }
 0x606   :  { %v7703_v17 = vpop.f32.mrf.mxu0  ;;  %v7860_v28 = vpop.f32.mrf.mxu1  ;;  %v8273_v61 = vand.u32 4294901760, %v8272_v51  ;;  %v7328_v44 = vadd.f32 %v14653_v22, %v7239_v6 }
 0x607   :  { %vm7582_vm13 = vcmp.gt.f32.partialorder %v7559_v9, 0.0  ;;  %v7598_v37 = vmul.f32 0.01, %v7559_v9  ;;  %v7704_v1 = vadd.f32 %v14666_v16, %v7703_v17  ;;  %v7403_v19 = vadd.f32 %v14602_v18, %v7323_v11 }
 0x608   :  { %v8274_v13 = vsub.f32 %v8272_v51, %v8273_v61  ;;  %v7409_v42 = vadd.f32 %v14634_v27, %v7328_v44 }
 0x609   :  { %8496 = vmatmul.f32.gmra.mxu0 %v8256_v40  ;;  %8577 = vmatmul.f32.gmra.mxu1 %v8265_v48  ;;  %v7614_v34 = vsel %vm7582_vm13, %v7559_v9, %v7598_v37  ;;  %v14692_v10 = vadd.f32 %v7856_v5, %v7704_v1 }
 0x60a   :  { %v7497_v49 = vpop.f32.mrf.mxu2  ;;  %v8275_v25 = vand.u32 4294901760, %v8274_v13  ;;  %v14694_v50 = vand.u32 4294901760, %v7614_v34 }
 0x60b   :  { %v7566_v56 = vpop.f32.mrf.mxu3  ;;  %v7498_v14 = vadd.f32 %v7497_v49, %v7397_v47 }
 0x60c   :  { %8276 = vmatmul.f32.gmra.mxu2 %v8275_v25  ;;  %v8280_v40 = vsub.f32 %v7614_v34, %v14694_v50 }
 0x60d   :  { %8425 = vmatmul.f32.gmra.mxu3 %v14694_v50  ;;  %v7563_v24 = vadd.f32 %v7562_v15, %v7498_v14 }
 0x60e   :  { %v7711_v55 = vpop.f32.mrf.mxu0  ;;  %v8281_v35 = vand.u32 4294901760, %v8280_v40  ;;  %v7864_v48 = vpop.f32.mrf.mxu1 }
 0x60f   :  { %vm7584_vm14 = vcmp.gt.f32.partialorder %v7563_v24, 0.0  ;;  %v7600_v41 = vmul.f32 0.01, %v7563_v24  ;;  %v7712_v5 = vadd.f32 %v14666_v16, %v7711_v55 }
 0x610   :  { %v8282_v59 = vsub.f32 %v8280_v40, %v8281_v35 }
 0x611   :  { %8501 = vmatmul.f32.gmra.mxu0 %v8264_v39  ;;  %8583 = vmatmul.f32.gmra.mxu1 %v8273_v61  ;;  %v7616_v38 = vsel %vm7584_vm14, %v7563_v24, %v7600_v41  ;;  %v14704_v0 = vadd.f32 %v7860_v28, %v7712_v5 }
 0x612   :  { %v7501_v4 = vpop.f32.mrf.mxu2  ;;  %v8283_v54 = vand.u32 4294901760, %v8282_v59  ;;  %v14706_v45 = vand.u32 4294901760, %v7616_v38 }
 0x613   :  { %v7570_v32 = vpop.f32.mrf.mxu3  ;;  %v7502_v60 = vadd.f32 %v7501_v4, %v7403_v19 }
 0x614   :  { %8284 = vmatmul.f32.gmra.mxu2 %v8283_v54  ;;  %v8288_v39 = vsub.f32 %v7616_v38, %v14706_v45 }
 0x615   :  { %8429 = vmatmul.f32.gmra.mxu3 %v14706_v45  ;;  %v7567_v26 = vadd.f32 %v7566_v56, %v7502_v60 }
 0x616   :  { %v7719_v15 = vpop.f32.mrf.mxu0  ;;  %v8289_v18 = vand.u32 4294901760, %v8288_v39  ;;  %v7868_v20 = vpop.f32.mrf.mxu1 }
 0x617   :  { %vm7586_vm15 = vcmp.gt.f32.partialorder %v7567_v26, 0.0  ;;  %v7602_v21 = vmul.f32 0.01, %v7567_v26  ;;  %v7720_v52 = vadd.f32 %v14666_v16, %v7719_v15 }
 0x618   :  { %v8290_v36 = vsub.f32 %v8288_v39, %v8289_v18 }
 0x619   :  { %8506 = vmatmul.f32.gmra.mxu0 %v8272_v51  ;;  %8589 = vmatmul.f32.gmra.mxu1 %v8281_v35  ;;  %v7618_v7 = vsel %vm7586_vm15, %v7567_v26, %v7602_v21  ;;  %v7865_v31 = vadd.f32 %v7864_v48, %v7720_v52 }
 0x61a   :  { %v7505_v30 = vpop.f32.mrf.mxu2  ;;  %v8291_v17 = vand.u32 4294901760, %v8290_v36  ;;  %v14714_v28 = vand.u32 4294901760, %v7618_v7 }
 0x61b   :  { %v8008_v9 = vpop.f32.mrf.mxu3  ;;  %v7506_v22 = vadd.f32 %v7505_v30, %v7409_v42 }
 0x61c   :  { %8292 = vmatmul.f32.gmra.mxu2 %v8291_v17  ;;  %v8296_v61 = vsub.f32 %v7618_v7, %v14714_v28 }
 0x61d   :  { %8433 = vmatmul.f32.gmra.mxu3 %v14714_v28  ;;  %v7571_v53 = vadd.f32 %v7570_v32, %v7506_v22 }
 0x61e   :  { %v7727_v51 = vpop.f32.mrf.mxu0  ;;  %v8297_v37 = vand.u32 4294901760, %v8296_v61  ;;  %v7872_v25 = vpop.f32.mrf.mxu1 }
 0x61f   :  { %vm7588_vm0 = vcmp.gt.f32.partialorder %v7571_v53, 0.0  ;;  %v7604_v1 = vmul.f32 0.01, %v7571_v53  ;;  %v7728_v13 = vadd.f32 %v14666_v16, %v7727_v51 }
 0x620   :  { %v8298_v27 = vsub.f32 %v8296_v61, %v8297_v37 }
 0x621   :  { %8511 = vmatmul.f32.gmra.mxu0 %v8280_v40  ;;  %8595 = vmatmul.f32.gmra.mxu1 %v8289_v18  ;;  %v7620_v12 = vsel %vm7588_vm0, %v7571_v53, %v7604_v1  ;;  %v7869_v46 = vadd.f32 %v7868_v20, %v7728_v13 }
 0x622   :  { %v7934_v43 = vpop.f32.mrf.mxu2  ;;  %v8299_v47 = vand.u32 4294901760, %v8298_v27  ;;  %v14719_v49 = vand.u32 4294901760, %v7620_v12 }
 0x623   :  { %v8014_v34 = vpop.f32.mrf.mxu3  ;;  %v7935_v56 = vadd.f32 %v7934_v43, %v14678_v57 }
 0x624   :  { %8300 = vmatmul.f32.gmra.mxu2 %v8299_v47  ;;  %v8304_v62 = vsub.f32 %v7620_v12, %v14719_v49 }
 0x625   :  { %8437 = vmatmul.f32.gmra.mxu3 %v14719_v49  ;;  %v14724_v29 = vadd.f32 %v8008_v9, %v7935_v56 }
 0x626   :  { %v7735_v14 = vpop.f32.mrf.mxu0  ;;  %v8305_v40 = vand.u32 4294901760, %v8304_v62  ;;  %v7876_v41 = vpop.f32.mrf.mxu1 }
 0x627   :  { %v7736_v8 = vadd.f32 %v14666_v16, %v7735_v14 }
 0x628   :  { %v8306_v63 = vsub.f32 %v8304_v62, %v8305_v40 }
 0x629   :  { %8516 = vmatmul.f32.gmra.mxu0 %v8288_v39  ;;  %8601 = vmatmul.f32.gmra.mxu1 %v8297_v37  ;;  %v7873_v11 = vadd.f32 %v7872_v25, %v7736_v8 }
 0x62a   :  { %v7939_v24 = vpop.f32.mrf.mxu2  ;;  %v8307_v35 = vand.u32 4294901760, %v8306_v63 }
 0x62b   :  { %v8020_v55 = vpop.f32.mrf.mxu3  ;;  %v7940_v57 = vadd.f32 %v7939_v24, %v14692_v10 }
 0x62c   :  { %8308 = vmatmul.f32.gmra.mxu2 %v8307_v35 }
 0x62d   :  { %8741 = vmatmul.f32.vlgmr.msrb.gmra.mxu3 %v14616_v23  ;;  %v14729_v3 = vadd.f32 %v8014_v34, %v7940_v57 }
 0x62e   :  { %v7743_v5 = vpop.f32.mrf.mxu0  ;;  %v7880_v6 = vpop.f32.mrf.mxu1 }
 0x62f   :  { %v7744_v48 = vadd.f32 %v14666_v16, %v7743_v5 }
 0x631   :  { %8521 = vmatmul.f32.gmra.mxu0 %v8296_v61  ;;  %8607 = vmatmul.f32.gmra.mxu1 %v8305_v40  ;;  %v7877_v59 = vadd.f32 %v7876_v41, %v7744_v48 }
 0x632   :  { %v7944_v38 = vpop.f32.mrf.mxu2 }
 0x633   :  { %v7945_v19 = vadd.f32 %v7944_v38, %v14704_v0  ;;  %v8026_v4 = vpop.f32.mrf.mxu3 }
 0x634   :  { %8676 = vmatmul.f32.vlgmr.msrb.gmra.mxu2 %v14616_v23 }
 0x635   :  { %8745 = vmatmul.f32.gmra.mxu3 %v14645_v2  ;;  %v14735_v10 = vadd.f32 %v8020_v55, %v7945_v19 }
 0x636   :  { %v7751_v32 = vpop.f32.mrf.mxu0 }
 0x637   :  { %v7752_v54 = vadd.f32 %v14666_v16, %v7751_v32 }
 0x639   :  { %8526 = vmatmul.f32.gmra.mxu0 %v8304_v62  ;;  %v7881_v60 = vadd.f32 %v7880_v6, %v7752_v54 }
 0x63a   :  { %v7949_v39 = vpop.f32.mrf.mxu2 }
 0x63b   :  { %v7950_v44 = vadd.f32 %v7949_v39, %v7865_v31  ;;  %v8032_v26 = vpop.f32.mrf.mxu3  ;;  %v8184_v31 = vpop.f32.mrf.mxu1 }
 0x63c   :  { %8680 = vmatmul.f32.gmra.mxu2 %v14645_v2 }
 0x63d   :  { %8749 = vmatmul.f32.gmra.mxu3 %v14660_v33  ;;  %v14740_v0 = vadd.f32 %v8026_v4, %v7950_v44 }
 0x63e   :  { %v8119_v36 = vpop.f32.mrf.mxu0 }
 0x63f   :  { %v8120_v57 = vadd.f32 %v8119_v36, %v14724_v29 }
 0x642   :  { %v7954_v23 = vpop.f32.mrf.mxu2 }
 0x643   :  { %v7955_v15 = vadd.f32 %v7954_v23, %v7869_v46  ;;  %v8038_v16 = vpop.f32.mrf.mxu3  ;;  %v8188_v61 = vpop.f32.mrf.mxu1 }
 0x644   :  { %8684 = vmatmul.f32.gmra.mxu2 %v14660_v33 }
 0x645   :  { %8753 = vmatmul.f32.gmra.mxu3 %v14680_v58  ;;  %v14744_v18 = vadd.f32 %v8032_v26, %v7955_v15 }
 0x646   :  { %v8123_v30 = vpop.f32.mrf.mxu0 }
 0x647   :  { %v8124_v4 = vadd.f32 %v8123_v30, %v14729_v3 }
 0x649   :  { %v8189_v44 = vadd.f32 %v8188_v61, %v8124_v4 }
 0x64a   :  { %v7959_v21 = vpop.f32.mrf.mxu2 }
 0x64b   :  { %v7960_v52 = vadd.f32 %v7959_v21, %v7873_v11  ;;  %v8044_v7 = vpop.f32.mrf.mxu3 }
 0x64c   :  { %8688 = vmatmul.f32.gmra.mxu2 %v14680_v58 }
 0x64d   :  { %8757 = vmatmul.f32.gmra.mxu3 %v14694_v50  ;;  %v14748_v2 = vadd.f32 %v8038_v16, %v7960_v52 }
 0x64e   :  { %v8127_v53 = vpop.f32.mrf.mxu0 }
 0x64f   :  { %v8128_v29 = vadd.f32 %v8127_v53, %v14735_v10 }
 0x652   :  { %v7964_v20 = vpop.f32.mrf.mxu2 }
 0x653   :  { %v7965_v42 = vadd.f32 %v7964_v20, %v7877_v59  ;;  %v8050_v22 = vpop.f32.mrf.mxu3  ;;  %v8185_v59 = vadd.f32 %v8184_v31, %v8120_v57 }
 0x654   :  { %8692 = vmatmul.f32.gmra.mxu2 %v14694_v50  ;;  %v8192_v50 = vpop.f32.mrf.mxu1 }
 0x655   :  { %8761 = vmatmul.f32.gmra.mxu3 %v14706_v45  ;;  %v14752_v33 = vadd.f32 %v8044_v7, %v7965_v42  ;;  %v8193_v20 = vadd.f32 %v8192_v50, %v8128_v29 }
 0x656   :  { %v8131_v51 = vpop.f32.mrf.mxu0 }
 0x657   :  { %v8132_v30 = vadd.f32 %v8131_v51, %v14740_v0 }
 0x65a   :  { %v7969_v9 = vpop.f32.mrf.mxu2 }
 0x65b   :  { %v7970_v17 = vadd.f32 %v7969_v9, %v7881_v60 }
 0x65c   :  { %8696 = vmatmul.f32.gmra.mxu2 %v14706_v45  ;;  %v8196_v1 = vpop.f32.mrf.mxu1 }
 0x65d   :  { %8765 = vmatmul.f32.gmra.mxu3 %v14714_v28  ;;  %v14756_v58 = vadd.f32 %v8050_v22, %v7970_v17  ;;  %v8197_v53 = vadd.f32 %v8196_v1, %v8132_v30 }
 0x65e   :  { %v8135_v12 = vpop.f32.mrf.mxu0 }
 0x65f   :  { %v8136_v50 = vadd.f32 %v8135_v12, %v14744_v18 }
 0x664   :  { %8700 = vmatmul.f32.gmra.mxu2 %v14714_v28  ;;  %v14761_v45 = vpop.f32.mrf.mxu1 }
 0x665   :  { %8769 = vmatmul.f32.gmra.mxu3 %v14719_v49 }
 0x666   :  { %v14763_v34 = vpop.f32.mrf.mxu0 }
 0x667   :  { %v8140_v1 = vadd.f32 %v14763_v34, %v14748_v2 }
 0x66c   :  { %8704 = vmatmul.f32.gmra.mxu2 %v14719_v49  ;;  %v14765_v28 = vpop.f32.mrf.mxu1 }
 0x66e   :  { %v14767_v25 = vpop.f32.mrf.mxu0 }
 0x66f   :  { %v8410_v37 = vpop.f32.mrf.mxu3 }
 0x674   :  { %v14771_v14 = vpop.f32.mrf.mxu1 }
 0x676   :  { %v14773_v40 = vpop.f32.mrf.mxu0 }
 0x677   :  { %v8253_v13 = vpop.f32.mrf.mxu2 }
 0x678   :  { %v8414_v27 = vpop.f32.mrf.mxu3  ;;  %v8254_v19 = vadd.f32 %v8253_v13, %v8185_v59 }
 0x67a   :  { %v8411_v6 = vadd.f32 %v8410_v37, %v8254_v19  ;;  %v8201_v19 = vadd.f32 %v14761_v45, %v8136_v50 }
 0x67c   :  { %v14777_v11 = vpop.f32.mrf.mxu1 }
 0x67e   :  { %v8492_v35 = vpop.f32.mrf.mxu0 }
 0x67f   :  { %v8261_v46 = vpop.f32.mrf.mxu2  ;;  %v8493_v39 = vadd.f32 %v8492_v35, %v8411_v6 }
 0x680   :  { %v8418_v43 = vpop.f32.mrf.mxu3  ;;  %v8262_v26 = vadd.f32 %v8261_v46, %v8189_v44 }
 0x682   :  { %v8415_v52 = vadd.f32 %v8414_v27, %v8262_v26 }
 0x684   :  { %v8566_v41 = vpop.f32.mrf.mxu1 }
 0x685   :  { %v8567_v15 = vadd.f32 %v8566_v41, %v8493_v39 }
 0x686   :  { %v8497_v38 = vpop.f32.mrf.mxu0 }
 0x687   :  { %v8269_v47 = vpop.f32.mrf.mxu2  ;;  %v8498_v7 = vadd.f32 %v8497_v38, %v8415_v52 }
 0x688   :  { %v8422_v56 = vpop.f32.mrf.mxu3  ;;  %v8270_v31 = vadd.f32 %v8269_v47, %v8193_v20 }
 0x68a   :  { %v8419_v37 = vadd.f32 %v8418_v43, %v8270_v31 }
 0x68c   :  { %v8572_v60 = vpop.f32.mrf.mxu1 }
 0x68d   :  { %v8573_v17 = vadd.f32 %v8572_v60, %v8498_v7 }
 0x68e   :  { %v8502_v23 = vpop.f32.mrf.mxu0 }
 0x68f   :  { %v8277_v62 = vpop.f32.mrf.mxu2  ;;  %v8503_v10 = vadd.f32 %v8502_v23, %v8419_v37 }
 0x690   :  { %v14769_v49 = vpop.f32.mrf.mxu3  ;;  %v8278_v35 = vadd.f32 %v8277_v62, %v8197_v53 }
 0x692   :  { %v8423_v47 = vadd.f32 %v8422_v56, %v8278_v35  ;;  %v8205_v56 = vadd.f32 %v14765_v28, %v8140_v1 }
 0x694   :  { %v8578_v3 = vpop.f32.mrf.mxu1 }
 0x695   :  { %v8579_v57 = vadd.f32 %v8578_v3, %v8503_v10 }
 0x696   :  { %v8507_v9 = vpop.f32.mrf.mxu0 }
 0x697   :  { %v8285_v8 = vpop.f32.mrf.mxu2  ;;  %v8508_v51 = vadd.f32 %v8507_v9, %v8423_v47 }
 0x698   :  { %v14775_v63 = vpop.f32.mrf.mxu3  ;;  %v8286_v43 = vadd.f32 %v8285_v8, %v8201_v19  ;;  %v8144_v8 = vadd.f32 %v14767_v25, %v14752_v33 }
 0x69a   :  { %v8427_v18 = vadd.f32 %v14769_v49, %v8286_v43 }
 0x69c   :  { %v8584_v27 = vpop.f32.mrf.mxu1 }
 0x69d   :  { %v8585_v62 = vadd.f32 %v8584_v27, %v8508_v51 }
 0x69e   :  { %v8512_v59 = vpop.f32.mrf.mxu0 }
 0x69f   :  { %v14779_v24 = vpop.f32.mrf.mxu2  ;;  %v8513_v60 = vadd.f32 %v8512_v59, %v8427_v18 }
 0x6a0   :  { %v14781_v55 = vpop.f32.mrf.mxu3  ;;  %v8294_v45 = vadd.f32 %v14779_v24, %v8205_v56  ;;  %v8148_v24 = vadd.f32 %v14773_v40, %v14756_v58 }
 0x6a2   :  { %v8431_v34 = vadd.f32 %v14775_v63, %v8294_v45 }
 0x6a6   :  { %v8517_v39 = vpop.f32.mrf.mxu0 }
 0x6a7   :  { %v14784_v5 = vpop.f32.mrf.mxu2  ;;  %v8518_v49 = vadd.f32 %v8517_v39, %v8431_v34 }
 0x6a8   :  { %v14786_v48 = vpop.f32.mrf.mxu3 }
 0x6ae   :  { %v8522_v52 = vpop.f32.mrf.mxu0 }
 0x6af   :  { %v14789_v32 = vpop.f32.mrf.mxu2 }
 0x6b0   :  { %v8742_v54 = vpop.f32.mrf.mxu3 }
 0x6b7   :  { %v8677_v16 = vpop.f32.mrf.mxu2 }
 0x6b8   :  { %v8746_v21 = vpop.f32.mrf.mxu3  ;;  %v8678_v36 = vadd.f32 %v8677_v16, %v8567_v15  ;;  %v8209_v16 = vadd.f32 %v14771_v14, %v8144_v8 }
 0x6ba   :  { %v8743_v42 = vadd.f32 %v8742_v54, %v8678_v36  ;;  %v8590_v54 = vpop.f32.mrf.mxu1  ;;  %v8302_v28 = vadd.f32 %v14784_v5, %v8209_v16  ;;  %v8527_v5 = vpop.f32.mrf.mxu0 }
 0x6bb   :  { %v8591_v23 = vadd.f32 %v8590_v54, %v8513_v60 }
 0x6bc   :  { %8773 = vst [vmem:[#allocation10 + $0x8] sm:$0xff] %v8743_v42  ;;  %v8435_v25 = vadd.f32 %v14781_v55, %v8302_v28  ;;  %v8213_v42 = vadd.f32 %v14777_v11, %v8148_v24 }
 0x6be   :  { %v8523_v63 = vadd.f32 %v8522_v52, %v8435_v25  ;;  %v8310_v14 = vadd.f32 %v14789_v32, %v8213_v42 }
 0x6bf   :  { %v8681_v22 = vpop.f32.mrf.mxu2 }
 0x6c0   :  { %v8750_v61 = vpop.f32.mrf.mxu3  ;;  %v8682_v13 = vadd.f32 %v8681_v22, %v8573_v17  ;;  %v8439_v22 = vadd.f32 %v14786_v48, %v8310_v14 }
 0x6c2   :  { %v8747_v46 = vadd.f32 %v8746_v21, %v8682_v13  ;;  %v8596_v15 = vpop.f32.mrf.mxu1  ;;  %v8528_v40 = vadd.f32 %v8527_v5, %v8439_v22 }
 0x6c3   :  { %v8597_v7 = vadd.f32 %v8596_v15, %v8518_v49 }
 0x6c4   :  { %8774 = vst [vmem:[#allocation10 + $0x18] sm:$0xff] %v8747_v46 }
 0x6c7   :  { %v8685_v41 = vpop.f32.mrf.mxu2 }
 0x6c8   :  { %v8686_v38 = vadd.f32 %v8685_v41, %v8579_v57  ;;  %v8754_v0 = vpop.f32.mrf.mxu3 }
 0x6ca   :  { %v8751_v4 = vadd.f32 %v8750_v61, %v8686_v38  ;;  %v8602_v31 = vpop.f32.mrf.mxu1 }
 0x6cb   :  { %v8603_v30 = vadd.f32 %v8602_v31, %v8523_v63 }
 0x6cc   :  { %8775 = vst [vmem:[#allocation10 + $0x28] sm:$0xff] %v8751_v4 }
 0x6cf   :  { %v8689_v6 = vpop.f32.mrf.mxu2 }
 0x6d0   :  { %v8690_v12 = vadd.f32 %v8689_v6, %v8585_v62  ;;  %v8758_v26 = vpop.f32.mrf.mxu3 }
 0x6d2   :  { %v8755_v44 = vadd.f32 %v8754_v0, %v8690_v12  ;;  %v8608_v55 = vpop.f32.mrf.mxu1 }
 0x6d3   :  { %v8609_v37 = vadd.f32 %v8608_v55, %v8528_v40 }
 0x6d4   :  { %8776 = vst [vmem:[#allocation10 + $0x38] sm:$0xff] %v8755_v44 }
 0x6d7   :  { %v8693_v2 = vpop.f32.mrf.mxu2 }
 0x6d8   :  { %v8694_v29 = vadd.f32 %v8693_v2, %v8591_v23  ;;  %v8762_v36 = vpop.f32.mrf.mxu3 }
 0x6da   :  { %v8759_v21 = vadd.f32 %v8758_v26, %v8694_v29 }
 0x6dc   :  { %8777 = vst [vmem:[#allocation10 + $0x48] sm:$0xff] %v8759_v21 }
 0x6df   :  { %v8697_v33 = vpop.f32.mrf.mxu2 }
 0x6e0   :  { %v8698_v20 = vadd.f32 %v8697_v33, %v8597_v7  ;;  %v8766_v9 = vpop.f32.mrf.mxu3 }
 0x6e2   :  { %v8763_v3 = vadd.f32 %v8762_v36, %v8698_v20 }
 0x6e4   :  { %8778 = vst [vmem:[#allocation10 + $0x58] sm:$0xff] %v8763_v3 }
 0x6e7   :  { %v8701_v17 = vpop.f32.mrf.mxu2 }
 0x6e8   :  { %v8702_v58 = vadd.f32 %v8701_v17, %v8603_v30  ;;  %v8770_v32 = vpop.f32.mrf.mxu3 }
 0x6ea   :  { %v8767_v61 = vadd.f32 %v8766_v9, %v8702_v58 }
 0x6ec   :  { %8779 = vst [vmem:[#allocation10 + $0x68] sm:$0xff] %v8767_v61 }
 0x6ef   :  { %v8705_v13 = vpop.f32.mrf.mxu2 }
 0x6f0   :  { %v8706_v11 = vadd.f32 %v8705_v13, %v8609_v37 }
 0x6f2   :  { %v8771_v10 = vadd.f32 %v8770_v32, %v8706_v11 }
 0x6f4   :  { %8780 = vst [vmem:[#allocation10 + $0x78] sm:$0xff] %v8771_v10 }
 0x6f5   :  { %8793 = dma.vmem_to_hbm [thread:$0]  %s8786_s30, 2048, %s8788_s0, [#allocation4], %s8947_s20, %s8947_s20, %s8948_s21  }
 0x6f6   :  { %8941 = dma.done.wait [#allocation4], 2048  }
 0x6f7   :  { %8942 = vsyncadd [#allocation4], 4294965248 }
 0x6f8   :  { %8798 = vsyncpa [#allocation3], 1 }
 0x6f9   :  { %8799 = vsyncpa [#allocation6], 1 }
 0x6fa   :  { %8800 = vsyncpa [#allocation9], 1 }
 0x6fb   :  { %8801 = vsyncpa [#allocation4], 1 }

</bundles_post_ra>
